<compile_context>
chip_gen: v7x
topology: tpu7x:2x2x1
jax: 0.10.0
libtpu: 0.0.40
codegen_flags: <defaults>
</compile_context>

<pallas_src>
import jax
import jax.numpy as jnp
import numpy as np
from jax.experimental import pallas as pl
from jax.experimental.pallas import tpu as pltpu

BF16 = jnp.bfloat16


# ----------------------------------------------------------------------------
# Fully fused CifarNet kernel: conv tower + MLP + log_softmax, one grid step
# per block of `bt` images.  All weights are VMEM-resident for the whole call.
# ----------------------------------------------------------------------------
def cifarnet_kernel(x_ref, w1_ref, sb1_ref, w2_ref, sb2_ref, w3_ref, sb3_ref,
                    fw1_ref, fb1_ref, fw2_ref, fb2_ref, fw3_ref, fb3_ref,
                    o_ref,
                    hbuf1, pin2, hbuf2, pin3, hbuf3, f3buf):
    bt = x_ref.shape[0]

    # --- zero ONLY the 1-pixel borders of the im2col'ed padded scratches -----
    # (done every grid step so a megacore "parallel" batch split stays
    #  correct; the interiors are fully overwritten below).
    pin2[:, 0:1, :, :] = jnp.zeros((bt, 1, 16, 96), BF16)
    pin2[:, 17:18, :, :] = jnp.zeros((bt, 1, 16, 96), BF16)
    pin2[:, :, 0:1, 0:32] = jnp.zeros((bt, 18, 1, 32), BF16)
    pin2[:, :, 15:16, 64:96] = jnp.zeros((bt, 18, 1, 32), BF16)
    pin3[:, 0:1, :, :] = jnp.zeros((bt, 1, 8, 192), BF16)
    pin3[:, 9:10, :, :] = jnp.zeros((bt, 1, 8, 192), BF16)
    pin3[:, :, 0:1, 0:64] = jnp.zeros((bt, 10, 1, 64), BF16)
    pin3[:, :, 7:8, 128:192] = jnp.zeros((bt, 10, 1, 64), BF16)

    # ---------------- conv1 (BN folded) + ReLU + 2x2 max-pool ----------------
    # x_ref holds the wrapper-side im2col: last dim = 9 taps * 3 ch -> 32.
    # One K=32 bf16 MXU dot per row strip; fori_loop bounds live f32 values.
    def conv1_chunk(i, carry):
        r0 = pl.multiple_of(i * 8, 8)
        xc = x_ref[:, pl.ds(r0, 8), :, :]                        # (bt,8,32,32)
        acc = jnp.dot(xc.reshape(bt * 8 * 32, 32), w1_ref[...],
                      preferred_element_type=jnp.float32)        # (bt*256,32)
        z = jnp.maximum(acc + sb1_ref[...], 0.0).reshape(bt, 8, 32, 32)
        zh = jnp.max(z.reshape(bt, 4, 2, 32, 32), axis=2)        # row pool
        hbuf1[:, pl.ds(pl.multiple_of(i * 4, 4), 4), :, :] = zh
        return carry

    jax.lax.fori_loop(0, 4, conv1_chunk, 0)

    lo = hbuf1[:, :, pl.ds(0, 16, stride=2), :]                  # column pool
    hi = hbuf1[:, :, pl.ds(1, 16, stride=2), :]
    p1 = jnp.maximum(lo, hi).astype(BF16)                        # (bt,16,16,32)

    # Write p1 into the conv2 im2col scratch: 3 dj-shifted lane-offset stores
    # build the (dj, cin)-merged contraction dim once (K = 96).
    pin2[:, 1:17, 1:16, 0:32] = p1[:, :, 0:15, :]
    pin2[:, 1:17, 0:16, 32:64] = p1
    pin2[:, 1:17, 0:15, 64:96] = p1[:, :, 1:16, :]

    # ---------------- conv2 + ReLU + pool (3 dots, K = 96) -------------------
    acc2 = jnp.zeros((bt * 16 * 16, 64), jnp.float32)
    for di in range(3):
        patch = pin2[:, di:di + 16, :, :].reshape(bt * 16 * 16, 96)
        acc2 = acc2 + jnp.dot(patch, w2_ref[di],
                              preferred_element_type=jnp.float32)
    z2 = jnp.maximum(acc2 + sb2_ref[...], 0.0).reshape(bt, 16, 16, 64)
    hbuf2[...] = jnp.max(z2.reshape(bt, 8, 2, 16, 64), axis=2)   # row pool
    lo = hbuf2[:, :, pl.ds(0, 8, stride=2), :]
    hi = hbuf2[:, :, pl.ds(1, 8, stride=2), :]
    p2 = jnp.maximum(lo, hi).astype(BF16)                        # (bt,8,8,64)

    pin3[:, 1:9, 1:8, 0:64] = p2[:, :, 0:7, :]
    pin3[:, 1:9, 0:8, 64:128] = p2
    pin3[:, 1:9, 0:7, 128:192] = p2[:, :, 1:8, :]

    # ---------------- conv3 + ReLU + pool (3 dots, K = 192) ------------------
    acc3 = jnp.zeros((bt * 8 * 8, 64), jnp.float32)
    for di in range(3):
        patch = pin3[:, di:di + 8, :, :].reshape(bt * 8 * 8, 192)
        acc3 = acc3 + jnp.dot(patch, w3_ref[di],
                              preferred_element_type=jnp.float32)
    z3 = jnp.maximum(acc3 + sb3_ref[...], 0.0).reshape(bt, 8, 8, 64)
    hbuf3[...] = jnp.max(z3.reshape(bt, 4, 2, 8, 64), axis=2)    # row pool
    lo = hbuf3[:, :, pl.ds(0, 4, stride=2), :]
    hi = hbuf3[:, :, pl.ds(1, 4, stride=2), :]
    p3 = jnp.maximum(lo, hi)                                     # (bt,4,4,64) f32

    # ---------------- MLP head -----------------------------------------------
    # fc1 weights were pre-permuted (NCHW->NHWC flatten) and regrouped so the
    # 16 spatial slots pack into 4 lane-chunks of K = 256 (4 dots, not 16).
    f = p3.reshape(bt, 16, 64).astype(BF16)
    for k in range(4):
        f3buf[:, :, k * 64:(k + 1) * 64] = f[:, 4 * k:4 * (k + 1), :]
    h1 = jnp.zeros((bt, 512), jnp.float32)
    for g in range(4):
        h1 = h1 + jnp.dot(f3buf[:, g, :], fw1_ref[g],
                          preferred_element_type=jnp.float32)
    h1 = jnp.maximum(h1 + fb1_ref[...], 0.0)
    # TODO(synk): nn.Dropout(p=0.5) after fc1 / fc2 is identity (eval forward).
    h2 = jnp.maximum(
        jnp.dot(h1.astype(BF16), fw2_ref[...],
                preferred_element_type=jnp.float32) + fb2_ref[...], 0.0)
    logits = jnp.dot(h2.astype(BF16), fw3_ref[...],
                     preferred_element_type=jnp.float32) + fb3_ref[...]

    m = jnp.max(logits, axis=1, keepdims=True)
    u = logits - m
    o_ref[...] = u - jnp.log(jnp.sum(jnp.exp(u), axis=1, keepdims=True))


# ----------------------------------------------------------------------------
# Generation-aware batch-block / VMEM-limit choice (trace time).
# ----------------------------------------------------------------------------
def _pick_bt_and_vmem(batch):
    try:
        cap = int(pltpu.get_tpu_info().vmem_capacity_bytes)
    except Exception:
        cap = 64 * 1024 * 1024                       # be v7x-safe if unknown
    if cap >= 100 * 1024 * 1024:                     # v5e / v6e: 128 MiB VMEM
        bt_target, vmem = 32, 96 * 1024 * 1024
    else:                                            # v7x: 64 MiB per TC
        bt_target, vmem = 16, 48 * 1024 * 1024
    bt = int(min(bt_target, max(1, pl.next_power_of_2(int(batch)))))
    return bt, vmem


# ----------------------------------------------------------------------------
# Wrapper: fold BN, permute/cast weights, im2col conv1 input, launch kernel.
# ----------------------------------------------------------------------------
@jax.jit
def cifarnet_forward(x_nchw, params):
    (w1, b1, g1, be1, rm1, rv1,
     w2, b2, g2, be2, rm2, rv2,
     w3, b3, g3, be3, rm3, rv3,
     fc1w, fc1b, fc2w, fc2b, fc3w, fc3b) = params
    B = x_nchw.shape[0]
    eps = 1e-5

    def fold(w_oihw, b, g, be, rm, rv):
        s = g / jnp.sqrt(rv + eps)
        w_hwio = jnp.transpose(w_oihw, (2, 3, 1, 0)) * s          # per-Cout scale
        sb = (b - rm) * s + be
        return w_hwio.astype(jnp.float32), sb.reshape(1, -1).astype(jnp.float32)

    w1f, sb1 = fold(w1, b1, g1, be1, rm1, rv1)                    # (3,3,3,32)
    w2f, sb2 = fold(w2, b2, g2, be2, rm2, rv2)                    # (3,3,32,64)
    w3f, sb3 = fold(w3, b3, g3, be3, rm3, rv3)                    # (3,3,64,64)

    # conv1 as one K-matmul: rows ordered (di, dj, cin), zero-padded 27 -> 32.
    w1r = jnp.pad(w1f.reshape(27, 32), ((0, 5), (0, 0))).astype(BF16)
    # conv2/conv3: merge the 3 dj taps into the contraction dim (dj*Cin + cin).
    w2r = w2f.reshape(3, 96, 64).astype(BF16)
    w3r = w3f.reshape(3, 192, 64).astype(BF16)

    # fc1: permute rows from torch NCHW-flatten (c*16 + h*4 + w) to NHWC order,
    # then regroup the 16 spatial slots into 4 lane-chunks of 4 slots (K=256):
    # fw1g[g, k*64 + c, :] == fc1w.T[c*16 + (k*4+g), :].
    fw1 = fc1w.T.reshape(64, 4, 4, 512).transpose(1, 2, 0, 3)     # [h,w,c,:]
    fw1 = fw1.reshape(16, 64, 512)                                # [s=h*4+w,c,:]
    fw1 = fw1.reshape(4, 4, 64, 512).transpose(1, 0, 2, 3)        # [g,k,c,:]
    fw1g = fw1.reshape(4, 256, 512).astype(BF16)
    fw2r = fc2w.T.astype(BF16)                                    # (512,64)
    fw3r = fc3w.T.astype(BF16)                                    # (64,10)
    fb1r = fc1b.reshape(1, 512).astype(jnp.float32)
    fb2r = fc2b.reshape(1, 64).astype(jnp.float32)
    fb3r = fc3b.reshape(1, 10).astype(jnp.float32)

    # conv1 im2col in XLA: (B,3,32,32) -> (B,32,32,27->32) bf16 so the in-kernel
    # conv1 is a lane-dense K=32 MXU matmul (fixes the old 8/128-lane loads).
    xh = jnp.transpose(x_nchw, (0, 2, 3, 1))                      # NCHW -> NHWC
    xp = jnp.pad(xh, ((0, 0), (1, 1), (1, 1), (0, 0)))
    taps = [xp[:, di:di + 32, dj:dj + 32, :]
            for di in range(3) for dj in range(3)]
    xcol = jnp.concatenate(taps, axis=-1)                         # (B,32,32,27)
    xcol = jnp.pad(xcol, ((0, 0), (0, 0), (0, 0), (0, 5))).astype(BF16)

    bt, vmem_bytes = _pick_bt_and_vmem(B)
    Bp = ((B + bt - 1) // bt) * bt
    if Bp != B:
        xcol = jnp.pad(xcol, ((0, Bp - B), (0, 0), (0, 0), (0, 0)))
    grid = (Bp // bt,)

    out = pl.pallas_call(
        cifarnet_kernel,
        out_shape=jax.ShapeDtypeStruct((Bp, 10), jnp.float32),
        grid_spec=pltpu.PrefetchScalarGridSpec(
            num_scalar_prefetch=0,
            grid=grid,
            in_specs=[
                pl.BlockSpec((bt, 32, 32, 32), lambda i: (i, 0, 0, 0)),
                pl.BlockSpec((32, 32), lambda i: (0, 0)),
                pl.BlockSpec((1, 32), lambda i: (0, 0)),
                pl.BlockSpec((3, 96, 64), lambda i: (0, 0, 0)),
                pl.BlockSpec((1, 64), lambda i: (0, 0)),
                pl.BlockSpec((3, 192, 64), lambda i: (0, 0, 0)),
                pl.BlockSpec((1, 64), lambda i: (0, 0)),
                pl.BlockSpec((4, 256, 512), lambda i: (0, 0, 0)),
                pl.BlockSpec((1, 512), lambda i: (0, 0)),
                pl.BlockSpec((512, 64), lambda i: (0, 0)),
                pl.BlockSpec((1, 64), lambda i: (0, 0)),
                pl.BlockSpec((64, 10), lambda i: (0, 0)),
                pl.BlockSpec((1, 10), lambda i: (0, 0)),
            ],
            out_specs=pl.BlockSpec((bt, 10), lambda i: (i, 0)),
            scratch_shapes=[
                pltpu.VMEM((bt, 16, 32, 32), jnp.float32),        # hbuf1
                pltpu.VMEM((bt, 18, 16, 96), BF16),               # pin2 (im2col)
                pltpu.VMEM((bt, 8, 16, 64), jnp.float32),         # hbuf2
                pltpu.VMEM((bt, 10, 8, 192), BF16),               # pin3 (im2col)
                pltpu.VMEM((bt, 4, 8, 64), jnp.float32),          # hbuf3
                pltpu.VMEM((bt, 4, 256), BF16),                   # f3buf (fc1 K)
            ],
        ),
        compiler_params=pltpu.CompilerParams(
            dimension_semantics=("parallel",),
            vmem_limit_bytes=vmem_bytes,
        ),
    )(xcol, w1r, sb1, w2r, sb2, w3r, sb3, fw1g, fb1r, fw2r, fb2r, fw3r, fb3r)
    return out[:B]


# ----------------------------------------------------------------------------
# Reference 1: unfused XLA with the SAME BN folding + bf16 quantization points
# as the kernel (tight check of the im2col / permutation / pooling logic).
# ----------------------------------------------------------------------------
def cifarnet_forward_ref_mixed(x, params):
    (w1, b1, g1, be1, rm1, rv1,
     w2, b2, g2, be2, rm2, rv2,
     w3, b3, g3, be3, rm3, rv3,
     fc1w, fc1b, fc2w, fc2b, fc3w, fc3b) = params
    eps = 1e-5

    def fold(w_oihw, b, g, be, rm, rv):
        s = g / jnp.sqrt(rv + eps)
        return ((jnp.transpose(w_oihw, (2, 3, 1, 0)) * s).astype(BF16),
                (b - rm) * s + be)

    def block(xb, wf, sb):
        y = jax.lax.conv_general_dilated(
            xb.astype(BF16), wf, window_strides=(1, 1),
            padding=((1, 1), (1, 1)),
            dimension_numbers=("NHWC", "HWIO", "NHWC"),
            preferred_element_type=jnp.float32)
        y = jnp.maximum(y + sb.reshape(1, 1, 1, -1), 0.0)
        return jax.lax.reduce_window(y, -jnp.inf, jax.lax.max,
                                     (1, 2, 2, 1), (1, 2, 2, 1), "VALID")

    y = jnp.transpose(x, (0, 2, 3, 1))
    y = block(y, *fold(w1, b1, g1, be1, rm1, rv1))
    y = block(y, *fold(w2, b2, g2, be2, rm2, rv2))
    y = block(y, *fold(w3, b3, g3, be3, rm3, rv3))
    flat = jnp.transpose(y, (0, 3, 1, 2)).reshape(y.shape[0], -1)  # NCHW flatten
    h = jnp.maximum(jnp.dot(flat.astype(BF16), fc1w.T.astype(BF16),
                            preferred_element_type=jnp.float32) + fc1b, 0.0)
    h = jnp.maximum(jnp.dot(h.astype(BF16), fc2w.T.astype(BF16),
                            preferred_element_type=jnp.float32) + fc2b, 0.0)
    logits = jnp.dot(h.astype(BF16), fc3w.T.astype(BF16),
                     preferred_element_type=jnp.float32) + fc3b
    return jax.nn.log_softmax(logits, axis=1)


# ----------------------------------------------------------------------------
# Reference 2: faithful full-f32 forward (BN unfolded, running stats) -- used
# with a looser tolerance to bound the bf16 mixed-precision drift.
# ----------------------------------------------------------------------------
def cifarnet_forward_ref_f32(x, params):
    (w1, b1, g1, be1, rm1, rv1,
     w2, b2, g2, be2, rm2, rv2,
     w3, b3, g3, be3, rm3, rv3,
     fc1w, fc1b, fc2w, fc2b, fc3w, fc3b) = params
    eps = 1e-5
    hi = jax.lax.Precision.HIGHEST

    def block(x, w, b, g, be, rm, rv):
        y = jax.lax.conv_general_dilated(
            x, w, window_strides=(1, 1), padding=((1, 1), (1, 1)),
            dimension_numbers=("NCHW", "OIHW", "NCHW"), precision=hi)
        y = y + b[None, :, None, None]
        y = (y - rm[None, :, None, None]) / jnp.sqrt(rv[None, :, None, None] + eps)
        y = y * g[None, :, None, None] + be[None, :, None, None]
        y = jnp.maximum(y, 0.0)
        return jax.lax.reduce_window(y, -jnp.inf, jax.lax.max,
                                     (1, 1, 2, 2), (1, 1, 2, 2), "VALID")

    y = block(x, w1, b1, g1, be1, rm1, rv1)
    y = block(y, w2, b2, g2, be2, rm2, rv2)
    y = block(y, w3, b3, g3, be3, rm3, rv3)
    flat = y.reshape(y.shape[0], -1)                              # NCHW flatten
    h = jnp.maximum(jnp.dot(flat, fc1w.T, precision=hi) + fc1b, 0.0)
    h = jnp.maximum(jnp.dot(h, fc2w.T, precision=hi) + fc2b, 0.0)
    logits = jnp.dot(h, fc3w.T, precision=hi) + fc3b
    return jax.nn.log_softmax(logits, axis=1)


if __name__ == "__main__":
    key = jax.random.PRNGKey(0)
    ks = jax.random.split(key, 32)
    n = jax.random.normal
    u = jax.random.uniform

    # Deterministic synthetic parameters (torch shapes from CifarNet.__init__).
    w1 = n(ks[0], (32, 3, 3, 3), jnp.float32) * 0.15
    b1 = n(ks[1], (32,), jnp.float32) * 0.05
    g1 = 1.0 + 0.1 * n(ks[2], (32,), jnp.float32)
    be1 = 0.1 * n(ks[3], (32,), jnp.float32)
    rm1 = 0.1 * n(ks[4], (32,), jnp.float32)
    rv1 = u(ks[5], (32,), jnp.float32, 0.5, 1.5)

    w2 = n(ks[6], (64, 32, 3, 3), jnp.float32) * 0.05
    b2 = n(ks[7], (64,), jnp.float32) * 0.05
    g2 = 1.0 + 0.1 * n(ks[8], (64,), jnp.float32)
    be2 = 0.1 * n(ks[9], (64,), jnp.float32)
    rm2 = 0.1 * n(ks[10], (64,), jnp.float32)
    rv2 = u(ks[11], (64,), jnp.float32, 0.5, 1.5)

    w3 = n(ks[12], (64, 64, 3, 3), jnp.float32) * 0.05
    b3 = n(ks[13], (64,), jnp.float32) * 0.05
    g3 = 1.0 + 0.1 * n(ks[14], (64,), jnp.float32)
    be3 = 0.1 * n(ks[15], (64,), jnp.float32)
    rm3 = 0.1 * n(ks[16], (64,), jnp.float32)
    rv3 = u(ks[17], (64,), jnp.float32, 0.5, 1.5)

    fc1w = n(ks[18], (512, 1024), jnp.float32) * 0.03
    fc1b = n(ks[19], (512,), jnp.float32) * 0.05
    fc2w = n(ks[20], (64, 512), jnp.float32) * 0.05
    fc2b = n(ks[21], (64,), jnp.float32) * 0.05
    fc3w = n(ks[22], (10, 64), jnp.float32) * 0.1
    fc3b = n(ks[23], (10,), jnp.float32) * 0.05

    params = (w1, b1, g1, be1, rm1, rv1,
              w2, b2, g2, be2, rm2, rv2,
              w3, b3, g3, be3, rm3, rv3,
              fc1w, fc1b, fc2w, fc2b, fc3w, fc3b)

    # Input shape implied by fc1 = Linear(4*4*64, 512): (B, 3, 32, 32) NCHW.
    x = n(ks[24], (4, 3, 32, 32), jnp.float32)

    out = jax.block_until_ready(cifarnet_forward(x, params))
    ref_mix = jax.block_until_ready(cifarnet_forward_ref_mixed(x, params))
    ref_f32 = jax.block_until_ready(cifarnet_forward_ref_f32(x, params))

    # Tight check vs. a reference using the same bf16 quantization points.
    np.testing.assert_allclose(np.asarray(out), np.asarray(ref_mix),
                               rtol=2e-3, atol=2e-3)
    # Loose check vs. the faithful f32 module (bounds mixed-precision drift).
    np.testing.assert_allclose(np.asarray(out), np.asarray(ref_f32),
                               rtol=3e-2, atol=3e-2)
    assert out.shape == (4, 10)

    print("KERNEL_OK")
</pallas_src>

<mosaic_0001>
module attributes {stable_mosaic.version = 11 : i64} {
  func.func @cifarnet_kernel(%arg0: i32, %arg1: memref<4x32x32x32xbf16, #tpu.memory_space<vmem>>, %arg2: memref<32x32xbf16, #tpu.memory_space<vmem>>, %arg3: memref<1x32xf32, #tpu.memory_space<vmem>>, %arg4: memref<3x96x64xbf16, #tpu.memory_space<vmem>>, %arg5: memref<1x64xf32, #tpu.memory_space<vmem>>, %arg6: memref<3x192x64xbf16, #tpu.memory_space<vmem>>, %arg7: memref<1x64xf32, #tpu.memory_space<vmem>>, %arg8: memref<4x256x512xbf16, #tpu.memory_space<vmem>>, %arg9: memref<1x512xf32, #tpu.memory_space<vmem>>, %arg10: memref<512x64xbf16, #tpu.memory_space<vmem>>, %arg11: memref<1x64xf32, #tpu.memory_space<vmem>>, %arg12: memref<64x10xbf16, #tpu.memory_space<vmem>>, %arg13: memref<1x10xf32, #tpu.memory_space<vmem>>, %arg14: memref<4x10xf32, #tpu.memory_space<vmem>>, %arg15: memref<4x16x32x32xf32, #tpu.memory_space<vmem>>, %arg16: memref<4x18x16x96xbf16, #tpu.memory_space<vmem>>, %arg17: memref<4x8x16x64xf32, #tpu.memory_space<vmem>>, %arg18: memref<4x10x8x192xbf16, #tpu.memory_space<vmem>>, %arg19: memref<4x4x8x64xf32, #tpu.memory_space<vmem>>, %arg20: memref<4x4x256xbf16, #tpu.memory_space<vmem>>) attributes {dimension_semantics = [#tpu.dimension_semantics<parallel>], iteration_bounds = array<i64: 1>, scalar_prefetch = 0 : i64, scratch_operands = 6 : i64, tpu.core_type = #tpu.core_type<tc>, window_params = [{transform_indices = @transform_0, window_bounds = array<i64: 4, 32, 32, 32>}, {pipeline_mode = #tpu.pipeline_mode<synchronous>, transform_indices = @transform_1, window_bounds = array<i64: 32, 32>}, {pipeline_mode = #tpu.pipeline_mode<synchronous>, transform_indices = @transform_2, window_bounds = array<i64: 1, 32>}, {pipeline_mode = #tpu.pipeline_mode<synchronous>, transform_indices = @transform_3, window_bounds = array<i64: 3, 96, 64>}, {pipeline_mode = #tpu.pipeline_mode<synchronous>, transform_indices = @transform_4, window_bounds = array<i64: 1, 64>}, {pipeline_mode = #tpu.pipeline_mode<synchronous>, transform_indices = @transform_5, window_bounds = array<i64: 3, 192, 64>}, {pipeline_mode = #tpu.pipeline_mode<synchronous>, transform_indices = @transform_6, window_bounds = array<i64: 1, 64>}, {pipeline_mode = #tpu.pipeline_mode<synchronous>, transform_indices = @transform_7, window_bounds = array<i64: 4, 256, 512>}, {pipeline_mode = #tpu.pipeline_mode<synchronous>, transform_indices = @transform_8, window_bounds = array<i64: 1, 512>}, {pipeline_mode = #tpu.pipeline_mode<synchronous>, transform_indices = @transform_9, window_bounds = array<i64: 512, 64>}, {pipeline_mode = #tpu.pipeline_mode<synchronous>, transform_indices = @transform_10, window_bounds = array<i64: 1, 64>}, {pipeline_mode = #tpu.pipeline_mode<synchronous>, transform_indices = @transform_11, window_bounds = array<i64: 64, 10>}, {pipeline_mode = #tpu.pipeline_mode<synchronous>, transform_indices = @transform_12, window_bounds = array<i64: 1, 10>}, {transform_indices = @transform_13, window_bounds = array<i64: 4, 10>}]} {
    %cst = arith.constant 0.000000e+00 : bf16
    %0 = vector.broadcast %cst : bf16 to vector<4x1x16x96xbf16>
    %c0 = arith.constant 0 : index
    %c0_0 = arith.constant 0 : index
    %c0_1 = arith.constant 0 : index
    %c0_2 = arith.constant 0 : index
    %1 = vector.load %arg16[%c0, %c0_0, %c0_1, %c0_2] : memref<4x18x16x96xbf16, #tpu.memory_space<vmem>>, vector<4x1x16x96xbf16>
    tpu.vector_store %arg16[%c0, %c0_0, %c0_1, %c0_2], %0 {strides = array<i32>} : memref<4x18x16x96xbf16, #tpu.memory_space<vmem>>, vector<4x1x16x96xbf16>,
    %cst_3 = arith.constant 0.000000e+00 : bf16
    %2 = vector.broadcast %cst_3 : bf16 to vector<4x1x16x96xbf16>
    %c0_4 = arith.constant 0 : index
    %c17 = arith.constant 17 : index
    %c0_5 = arith.constant 0 : index
    %c0_6 = arith.constant 0 : index
    %3 = vector.load %arg16[%c0_4, %c17, %c0_5, %c0_6] : memref<4x18x16x96xbf16, #tpu.memory_space<vmem>>, vector<4x1x16x96xbf16>
    tpu.vector_store %arg16[%c0_4, %c17, %c0_5, %c0_6], %2 {strides = array<i32>} : memref<4x18x16x96xbf16, #tpu.memory_space<vmem>>, vector<4x1x16x96xbf16>,
    %cst_7 = arith.constant 0.000000e+00 : bf16
    %4 = vector.broadcast %cst_7 : bf16 to vector<4x18x1x32xbf16>
    %c0_8 = arith.constant 0 : index
    %c0_9 = arith.constant 0 : index
    %c0_10 = arith.constant 0 : index
    %c0_11 = arith.constant 0 : index
    %5 = vector.load %arg16[%c0_8, %c0_9, %c0_10, %c0_11] : memref<4x18x16x96xbf16, #tpu.memory_space<vmem>>, vector<4x18x1x32xbf16>
    tpu.vector_store %arg16[%c0_8, %c0_9, %c0_10, %c0_11], %4 {strides = array<i32>} : memref<4x18x16x96xbf16, #tpu.memory_space<vmem>>, vector<4x18x1x32xbf16>,
    %cst_12 = arith.constant 0.000000e+00 : bf16
    %6 = vector.broadcast %cst_12 : bf16 to vector<4x18x1x32xbf16>
    %c0_13 = arith.constant 0 : index
    %c0_14 = arith.constant 0 : index
    %c15 = arith.constant 15 : index
    %c64 = arith.constant 64 : index
    %7 = vector.load %arg16[%c0_13, %c0_14, %c15, %c64] : memref<4x18x16x96xbf16, #tpu.memory_space<vmem>>, vector<4x18x1x32xbf16>
    tpu.vector_store %arg16[%c0_13, %c0_14, %c15, %c64], %6 {strides = array<i32>} : memref<4x18x16x96xbf16, #tpu.memory_space<vmem>>, vector<4x18x1x32xbf16>,
    %cst_15 = arith.constant 0.000000e+00 : bf16
    %8 = vector.broadcast %cst_15 : bf16 to vector<4x1x8x192xbf16>
    %c0_16 = arith.constant 0 : index
    %c0_17 = arith.constant 0 : index
    %c0_18 = arith.constant 0 : index
    %c0_19 = arith.constant 0 : index
    %9 = vector.load %arg18[%c0_16, %c0_17, %c0_18, %c0_19] : memref<4x10x8x192xbf16, #tpu.memory_space<vmem>>, vector<4x1x8x192xbf16>
    tpu.vector_store %arg18[%c0_16, %c0_17, %c0_18, %c0_19], %8 {strides = array<i32>} : memref<4x10x8x192xbf16, #tpu.memory_space<vmem>>, vector<4x1x8x192xbf16>,
    %cst_20 = arith.constant 0.000000e+00 : bf16
    %10 = vector.broadcast %cst_20 : bf16 to vector<4x1x8x192xbf16>
    %c0_21 = arith.constant 0 : index
    %c9 = arith.constant 9 : index
    %c0_22 = arith.constant 0 : index
    %c0_23 = arith.constant 0 : index
    %11 = vector.load %arg18[%c0_21, %c9, %c0_22, %c0_23] : memref<4x10x8x192xbf16, #tpu.memory_space<vmem>>, vector<4x1x8x192xbf16>
    tpu.vector_store %arg18[%c0_21, %c9, %c0_22, %c0_23], %10 {strides = array<i32>} : memref<4x10x8x192xbf16, #tpu.memory_space<vmem>>, vector<4x1x8x192xbf16>,
    %cst_24 = arith.constant 0.000000e+00 : bf16
    %12 = vector.broadcast %cst_24 : bf16 to vector<4x10x1x64xbf16>
    %c0_25 = arith.constant 0 : index
    %c0_26 = arith.constant 0 : index
    %c0_27 = arith.constant 0 : index
    %c0_28 = arith.constant 0 : index
    %13 = vector.load %arg18[%c0_25, %c0_26, %c0_27, %c0_28] : memref<4x10x8x192xbf16, #tpu.memory_space<vmem>>, vector<4x10x1x64xbf16>
    tpu.vector_store %arg18[%c0_25, %c0_26, %c0_27, %c0_28], %12 {strides = array<i32>} : memref<4x10x8x192xbf16, #tpu.memory_space<vmem>>, vector<4x10x1x64xbf16>,
    %cst_29 = arith.constant 0.000000e+00 : bf16
    %14 = vector.broadcast %cst_29 : bf16 to vector<4x10x1x64xbf16>
    %c0_30 = arith.constant 0 : index
    %c0_31 = arith.constant 0 : index
    %c7 = arith.constant 7 : index
    %c128 = arith.constant 128 : index
    %15 = vector.load %arg18[%c0_30, %c0_31, %c7, %c128] : memref<4x10x8x192xbf16, #tpu.memory_space<vmem>>, vector<4x10x1x64xbf16>
    tpu.vector_store %arg18[%c0_30, %c0_31, %c7, %c128], %14 {strides = array<i32>} : memref<4x10x8x192xbf16, #tpu.memory_space<vmem>>, vector<4x10x1x64xbf16>,
    %c0_i32 = arith.constant 0 : i32
    %c4_i32 = arith.constant 4 : i32
    %16 = arith.addi %c0_i32, %c4_i32 : i32
    %c1_i32 = arith.constant 1 : i32
    scf.for %arg21 = %c0_i32 to %16 step %c1_i32  : i32 {
      %c8_i32 = arith.constant 8 : i32
      %159 = arith.muli %arg21, %c8_i32 : i32
      %160 = tpu.assume_multiple %159, 8 : i32
      %c0_201 = arith.constant 0 : index
      %161 = arith.index_cast %160 : i32 to index
      %c0_202 = arith.constant 0 : index
      %c0_203 = arith.constant 0 : index
      %162 = vector.load %arg1[%c0_201, %161, %c0_202, %c0_203] : memref<4x32x32x32xbf16, #tpu.memory_space<vmem>>, vector<4x8x32x32xbf16>
      %163 = vector.shape_cast %162 : vector<4x8x32x32xbf16> to vector<1024x32xbf16>
      %c0_204 = arith.constant 0 : index
      %c0_205 = arith.constant 0 : index
      %164 = vector.load %arg2[%c0_204, %c0_205] : memref<32x32xbf16, #tpu.memory_space<vmem>>, vector<32x32xbf16>
      %cst_206 = arith.constant dense<0.000000e+00> : vector<1024x32xf32>
      %165 = tpu.matmul %163, %164, %cst_206 {dimension_numbers = #tpu.dot_dimension_numbers<[1], [0], [0], [1], [0, 0, 1, 1], [], []>} : vector<1024x32xbf16>, vector<32x32xbf16>, vector<1024x32xf32> -> vector<1024x32xf32>
      %c0_207 = arith.constant 0 : index
      %c0_208 = arith.constant 0 : index
      %166 = vector.load %arg3[%c0_207, %c0_208] : memref<1x32xf32, #tpu.memory_space<vmem>>, vector<1x32xf32>
      %167 = vector.broadcast %166 : vector<1x32xf32> to vector<1024x32xf32>
      %168 = arith.addf %165, %167 : vector<1024x32xf32>
      %cst_209 = arith.constant 0.000000e+00 : f32
      %169 = vector.broadcast %cst_209 : f32 to vector<1024x32xf32>
      %170 = arith.maximumf %168, %169 : vector<1024x32xf32>
      %171 = vector.shape_cast %170 : vector<1024x32xf32> to vector<4x8x32x32xf32>
      %172 = vector.shape_cast %171 : vector<4x8x32x32xf32> to vector<4x4x2x32x32xf32>
      %cst_210 = arith.constant dense<0xFF800000> : vector<4x4x32x32xf32>
      %173 = vector.multi_reduction <maximumf>, %172, %cst_210 [2] : vector<4x4x2x32x32xf32> to vector<4x4x32x32xf32>
      %c4_i32_211 = arith.constant 4 : i32
      %174 = arith.muli %arg21, %c4_i32_211 : i32
      %175 = tpu.assume_multiple %174, 4 : i32
      %c0_212 = arith.constant 0 : index
      %176 = arith.index_cast %175 : i32 to index
      %c0_213 = arith.constant 0 : index
      %c0_214 = arith.constant 0 : index
      %177 = vector.load %arg15[%c0_212, %176, %c0_213, %c0_214] : memref<4x16x32x32xf32, #tpu.memory_space<vmem>>, vector<4x4x32x32xf32>
      tpu.vector_store %arg15[%c0_212, %176, %c0_213, %c0_214], %173 {strides = array<i32>} : memref<4x16x32x32xf32, #tpu.memory_space<vmem>>, vector<4x4x32x32xf32>,
    }
    %c4_i32_32 = arith.constant 4 : i32
    %c0_33 = arith.constant 0 : index
    %c0_34 = arith.constant 0 : index
    %c0_35 = arith.constant 0 : index
    %c0_36 = arith.constant 0 : index
    %17 = tpu.strided_load %arg15[%c0_33, %c0_34, %c0_35, %c0_36] {strides = array<i32: 1, 1, 2, 1>} : memref<4x16x32x32xf32, #tpu.memory_space<vmem>>, vector<4x16x16x32xf32>
    %c0_37 = arith.constant 0 : index
    %c0_38 = arith.constant 0 : index
    %c1 = arith.constant 1 : index
    %c0_39 = arith.constant 0 : index
    %18 = tpu.strided_load %arg15[%c0_37, %c0_38, %c1, %c0_39] {strides = array<i32: 1, 1, 2, 1>} : memref<4x16x32x32xf32, #tpu.memory_space<vmem>>, vector<4x16x16x32xf32>
    %19 = arith.maximumf %17, %18 : vector<4x16x16x32xf32>
    %20 = arith.truncf %19 : vector<4x16x16x32xf32> to vector<4x16x16x32xbf16>
    %21 = vector.extract_strided_slice %20 {offsets = [0, 0, 0, 0], sizes = [4, 16, 15, 32], strides = [1, 1, 1, 1]} : vector<4x16x16x32xbf16> to vector<4x16x15x32xbf16>
    %c0_40 = arith.constant 0 : index
    %c1_41 = arith.constant 1 : index
    %c1_42 = arith.constant 1 : index
    %c0_43 = arith.constant 0 : index
    %22 = vector.load %arg16[%c0_40, %c1_41, %c1_42, %c0_43] : memref<4x18x16x96xbf16, #tpu.memory_space<vmem>>, vector<4x16x15x32xbf16>
    tpu.vector_store %arg16[%c0_40, %c1_41, %c1_42, %c0_43], %21 {strides = array<i32>} : memref<4x18x16x96xbf16, #tpu.memory_space<vmem>>, vector<4x16x15x32xbf16>,
    %c0_44 = arith.constant 0 : index
    %c1_45 = arith.constant 1 : index
    %c0_46 = arith.constant 0 : index
    %c32 = arith.constant 32 : index
    %23 = vector.load %arg16[%c0_44, %c1_45, %c0_46, %c32] : memref<4x18x16x96xbf16, #tpu.memory_space<vmem>>, vector<4x16x16x32xbf16>
    tpu.vector_store %arg16[%c0_44, %c1_45, %c0_46, %c32], %20 {strides = array<i32>} : memref<4x18x16x96xbf16, #tpu.memory_space<vmem>>, vector<4x16x16x32xbf16>,
    %24 = vector.extract_strided_slice %20 {offsets = [0, 0, 1, 0], sizes = [4, 16, 15, 32], strides = [1, 1, 1, 1]} : vector<4x16x16x32xbf16> to vector<4x16x15x32xbf16>
    %c0_47 = arith.constant 0 : index
    %c1_48 = arith.constant 1 : index
    %c0_49 = arith.constant 0 : index
    %c64_50 = arith.constant 64 : index
    %25 = vector.load %arg16[%c0_47, %c1_48, %c0_49, %c64_50] : memref<4x18x16x96xbf16, #tpu.memory_space<vmem>>, vector<4x16x15x32xbf16>
    tpu.vector_store %arg16[%c0_47, %c1_48, %c0_49, %c64_50], %24 {strides = array<i32>} : memref<4x18x16x96xbf16, #tpu.memory_space<vmem>>, vector<4x16x15x32xbf16>,
    %cst_51 = arith.constant 0.000000e+00 : f32
    %26 = vector.broadcast %cst_51 : f32 to vector<1024x64xf32>
    %c0_52 = arith.constant 0 : index
    %c0_53 = arith.constant 0 : index
    %c0_54 = arith.constant 0 : index
    %c0_55 = arith.constant 0 : index
    %27 = vector.load %arg16[%c0_52, %c0_53, %c0_54, %c0_55] : memref<4x18x16x96xbf16, #tpu.memory_space<vmem>>, vector<4x16x16x96xbf16>
    %28 = vector.shape_cast %27 : vector<4x16x16x96xbf16> to vector<1024x96xbf16>
    %c0_56 = arith.constant 0 : index
    %c0_57 = arith.constant 0 : index
    %c0_58 = arith.constant 0 : index
    %29 = vector.load %arg4[%c0_56, %c0_57, %c0_58] : memref<3x96x64xbf16, #tpu.memory_space<vmem>>, vector<1x96x64xbf16>
    %30 = vector.shape_cast %29 : vector<1x96x64xbf16> to vector<96x64xbf16>
    %cst_59 = arith.constant dense<0.000000e+00> : vector<1024x64xf32>
    %31 = tpu.matmul %28, %30, %cst_59 {dimension_numbers = #tpu.dot_dimension_numbers<[1], [0], [0], [1], [0, 0, 1, 1], [], []>} : vector<1024x96xbf16>, vector<96x64xbf16>, vector<1024x64xf32> -> vector<1024x64xf32>
    %32 = arith.addf %26, %31 : vector<1024x64xf32>
    %c0_60 = arith.constant 0 : index
    %c1_61 = arith.constant 1 : index
    %c0_62 = arith.constant 0 : index
    %c0_63 = arith.constant 0 : index
    %33 = vector.load %arg16[%c0_60, %c1_61, %c0_62, %c0_63] : memref<4x18x16x96xbf16, #tpu.memory_space<vmem>>, vector<4x16x16x96xbf16>
    %34 = vector.shape_cast %33 : vector<4x16x16x96xbf16> to vector<1024x96xbf16>
    %c1_64 = arith.constant 1 : index
    %c0_65 = arith.constant 0 : index
    %c0_66 = arith.constant 0 : index
    %35 = vector.load %arg4[%c1_64, %c0_65, %c0_66] : memref<3x96x64xbf16, #tpu.memory_space<vmem>>, vector<1x96x64xbf16>
    %36 = vector.shape_cast %35 : vector<1x96x64xbf16> to vector<96x64xbf16>
    %cst_67 = arith.constant dense<0.000000e+00> : vector<1024x64xf32>
    %37 = tpu.matmul %34, %36, %cst_67 {dimension_numbers = #tpu.dot_dimension_numbers<[1], [0], [0], [1], [0, 0, 1, 1], [], []>} : vector<1024x96xbf16>, vector<96x64xbf16>, vector<1024x64xf32> -> vector<1024x64xf32>
    %38 = arith.addf %32, %37 : vector<1024x64xf32>
    %c0_68 = arith.constant 0 : index
    %c2 = arith.constant 2 : index
    %c0_69 = arith.constant 0 : index
    %c0_70 = arith.constant 0 : index
    %39 = vector.load %arg16[%c0_68, %c2, %c0_69, %c0_70] : memref<4x18x16x96xbf16, #tpu.memory_space<vmem>>, vector<4x16x16x96xbf16>
    %40 = vector.shape_cast %39 : vector<4x16x16x96xbf16> to vector<1024x96xbf16>
    %c2_71 = arith.constant 2 : index
    %c0_72 = arith.constant 0 : index
    %c0_73 = arith.constant 0 : index
    %41 = vector.load %arg4[%c2_71, %c0_72, %c0_73] : memref<3x96x64xbf16, #tpu.memory_space<vmem>>, vector<1x96x64xbf16>
    %42 = vector.shape_cast %41 : vector<1x96x64xbf16> to vector<96x64xbf16>
    %cst_74 = arith.constant dense<0.000000e+00> : vector<1024x64xf32>
    %43 = tpu.matmul %40, %42, %cst_74 {dimension_numbers = #tpu.dot_dimension_numbers<[1], [0], [0], [1], [0, 0, 1, 1], [], []>} : vector<1024x96xbf16>, vector<96x64xbf16>, vector<1024x64xf32> -> vector<1024x64xf32>
    %44 = arith.addf %38, %43 : vector<1024x64xf32>
    %c0_75 = arith.constant 0 : index
    %c0_76 = arith.constant 0 : index
    %45 = vector.load %arg5[%c0_75, %c0_76] : memref<1x64xf32, #tpu.memory_space<vmem>>, vector<1x64xf32>
    %46 = vector.broadcast %45 : vector<1x64xf32> to vector<1024x64xf32>
    %47 = arith.addf %44, %46 : vector<1024x64xf32>
    %cst_77 = arith.constant 0.000000e+00 : f32
    %48 = vector.broadcast %cst_77 : f32 to vector<1024x64xf32>
    %49 = arith.maximumf %47, %48 : vector<1024x64xf32>
    %50 = vector.shape_cast %49 : vector<1024x64xf32> to vector<4x16x16x64xf32>
    %51 = vector.shape_cast %50 : vector<4x16x16x64xf32> to vector<4x8x2x16x64xf32>
    %cst_78 = arith.constant dense<0xFF800000> : vector<4x8x16x64xf32>
    %52 = vector.multi_reduction <maximumf>, %51, %cst_78 [2] : vector<4x8x2x16x64xf32> to vector<4x8x16x64xf32>
    %c0_79 = arith.constant 0 : index
    %c0_80 = arith.constant 0 : index
    %c0_81 = arith.constant 0 : index
    %c0_82 = arith.constant 0 : index
    %53 = vector.load %arg17[%c0_79, %c0_80, %c0_81, %c0_82] : memref<4x8x16x64xf32, #tpu.memory_space<vmem>>, vector<4x8x16x64xf32>
    tpu.vector_store %arg17[%c0_79, %c0_80, %c0_81, %c0_82], %52 {strides = array<i32>} : memref<4x8x16x64xf32, #tpu.memory_space<vmem>>, vector<4x8x16x64xf32>,
    %c0_83 = arith.constant 0 : index
    %c0_84 = arith.constant 0 : index
    %c0_85 = arith.constant 0 : index
    %c0_86 = arith.constant 0 : index
    %54 = tpu.strided_load %arg17[%c0_83, %c0_84, %c0_85, %c0_86] {strides = array<i32: 1, 1, 2, 1>} : memref<4x8x16x64xf32, #tpu.memory_space<vmem>>, vector<4x8x8x64xf32>
    %c0_87 = arith.constant 0 : index
    %c0_88 = arith.constant 0 : index
    %c1_89 = arith.constant 1 : index
    %c0_90 = arith.constant 0 : index
    %55 = tpu.strided_load %arg17[%c0_87, %c0_88, %c1_89, %c0_90] {strides = array<i32: 1, 1, 2, 1>} : memref<4x8x16x64xf32, #tpu.memory_space<vmem>>, vector<4x8x8x64xf32>
    %56 = arith.maximumf %54, %55 : vector<4x8x8x64xf32>
    %57 = arith.truncf %56 : vector<4x8x8x64xf32> to vector<4x8x8x64xbf16>
    %58 = vector.extract_strided_slice %57 {offsets = [0, 0, 0, 0], sizes = [4, 8, 7, 64], strides = [1, 1, 1, 1]} : vector<4x8x8x64xbf16> to vector<4x8x7x64xbf16>
    %c0_91 = arith.constant 0 : index
    %c1_92 = arith.constant 1 : index
    %c1_93 = arith.constant 1 : index
    %c0_94 = arith.constant 0 : index
    %59 = vector.load %arg18[%c0_91, %c1_92, %c1_93, %c0_94] : memref<4x10x8x192xbf16, #tpu.memory_space<vmem>>, vector<4x8x7x64xbf16>
    tpu.vector_store %arg18[%c0_91, %c1_92, %c1_93, %c0_94], %58 {strides = array<i32>} : memref<4x10x8x192xbf16, #tpu.memory_space<vmem>>, vector<4x8x7x64xbf16>,
    %c0_95 = arith.constant 0 : index
    %c1_96 = arith.constant 1 : index
    %c0_97 = arith.constant 0 : index
    %c64_98 = arith.constant 64 : index
    %60 = vector.load %arg18[%c0_95, %c1_96, %c0_97, %c64_98] : memref<4x10x8x192xbf16, #tpu.memory_space<vmem>>, vector<4x8x8x64xbf16>
    tpu.vector_store %arg18[%c0_95, %c1_96, %c0_97, %c64_98], %57 {strides = array<i32>} : memref<4x10x8x192xbf16, #tpu.memory_space<vmem>>, vector<4x8x8x64xbf16>,
    %61 = vector.extract_strided_slice %57 {offsets = [0, 0, 1, 0], sizes = [4, 8, 7, 64], strides = [1, 1, 1, 1]} : vector<4x8x8x64xbf16> to vector<4x8x7x64xbf16>
    %c0_99 = arith.constant 0 : index
    %c1_100 = arith.constant 1 : index
    %c0_101 = arith.constant 0 : index
    %c128_102 = arith.constant 128 : index
    %62 = vector.load %arg18[%c0_99, %c1_100, %c0_101, %c128_102] : memref<4x10x8x192xbf16, #tpu.memory_space<vmem>>, vector<4x8x7x64xbf16>
    tpu.vector_store %arg18[%c0_99, %c1_100, %c0_101, %c128_102], %61 {strides = array<i32>} : memref<4x10x8x192xbf16, #tpu.memory_space<vmem>>, vector<4x8x7x64xbf16>,
    %cst_103 = arith.constant 0.000000e+00 : f32
    %63 = vector.broadcast %cst_103 : f32 to vector<256x64xf32>
    %c0_104 = arith.constant 0 : index
    %c0_105 = arith.constant 0 : index
    %c0_106 = arith.constant 0 : index
    %c0_107 = arith.constant 0 : index
    %64 = vector.load %arg18[%c0_104, %c0_105, %c0_106, %c0_107] : memref<4x10x8x192xbf16, #tpu.memory_space<vmem>>, vector<4x8x8x192xbf16>
    %65 = vector.shape_cast %64 : vector<4x8x8x192xbf16> to vector<256x192xbf16>
    %c0_108 = arith.constant 0 : index
    %c0_109 = arith.constant 0 : index
    %c0_110 = arith.constant 0 : index
    %66 = vector.load %arg6[%c0_108, %c0_109, %c0_110] : memref<3x192x64xbf16, #tpu.memory_space<vmem>>, vector<1x192x64xbf16>
    %67 = vector.shape_cast %66 : vector<1x192x64xbf16> to vector<192x64xbf16>
    %cst_111 = arith.constant dense<0.000000e+00> : vector<256x64xf32>
    %68 = tpu.matmul %65, %67, %cst_111 {dimension_numbers = #tpu.dot_dimension_numbers<[1], [0], [0], [1], [0, 0, 1, 1], [], []>} : vector<256x192xbf16>, vector<192x64xbf16>, vector<256x64xf32> -> vector<256x64xf32>
    %69 = arith.addf %63, %68 : vector<256x64xf32>
    %c0_112 = arith.constant 0 : index
    %c1_113 = arith.constant 1 : index
    %c0_114 = arith.constant 0 : index
    %c0_115 = arith.constant 0 : index
    %70 = vector.load %arg18[%c0_112, %c1_113, %c0_114, %c0_115] : memref<4x10x8x192xbf16, #tpu.memory_space<vmem>>, vector<4x8x8x192xbf16>
    %71 = vector.shape_cast %70 : vector<4x8x8x192xbf16> to vector<256x192xbf16>
    %c1_116 = arith.constant 1 : index
    %c0_117 = arith.constant 0 : index
    %c0_118 = arith.constant 0 : index
    %72 = vector.load %arg6[%c1_116, %c0_117, %c0_118] : memref<3x192x64xbf16, #tpu.memory_space<vmem>>, vector<1x192x64xbf16>
    %73 = vector.shape_cast %72 : vector<1x192x64xbf16> to vector<192x64xbf16>
    %cst_119 = arith.constant dense<0.000000e+00> : vector<256x64xf32>
    %74 = tpu.matmul %71, %73, %cst_119 {dimension_numbers = #tpu.dot_dimension_numbers<[1], [0], [0], [1], [0, 0, 1, 1], [], []>} : vector<256x192xbf16>, vector<192x64xbf16>, vector<256x64xf32> -> vector<256x64xf32>
    %75 = arith.addf %69, %74 : vector<256x64xf32>
    %c0_120 = arith.constant 0 : index
    %c2_121 = arith.constant 2 : index
    %c0_122 = arith.constant 0 : index
    %c0_123 = arith.constant 0 : index
    %76 = vector.load %arg18[%c0_120, %c2_121, %c0_122, %c0_123] : memref<4x10x8x192xbf16, #tpu.memory_space<vmem>>, vector<4x8x8x192xbf16>
    %77 = vector.shape_cast %76 : vector<4x8x8x192xbf16> to vector<256x192xbf16>
    %c2_124 = arith.constant 2 : index
    %c0_125 = arith.constant 0 : index
    %c0_126 = arith.constant 0 : index
    %78 = vector.load %arg6[%c2_124, %c0_125, %c0_126] : memref<3x192x64xbf16, #tpu.memory_space<vmem>>, vector<1x192x64xbf16>
    %79 = vector.shape_cast %78 : vector<1x192x64xbf16> to vector<192x64xbf16>
    %cst_127 = arith.constant dense<0.000000e+00> : vector<256x64xf32>
    %80 = tpu.matmul %77, %79, %cst_127 {dimension_numbers = #tpu.dot_dimension_numbers<[1], [0], [0], [1], [0, 0, 1, 1], [], []>} : vector<256x192xbf16>, vector<192x64xbf16>, vector<256x64xf32> -> vector<256x64xf32>
    %81 = arith.addf %75, %80 : vector<256x64xf32>
    %c0_128 = arith.constant 0 : index
    %c0_129 = arith.constant 0 : index
    %82 = vector.load %arg7[%c0_128, %c0_129] : memref<1x64xf32, #tpu.memory_space<vmem>>, vector<1x64xf32>
    %83 = vector.broadcast %82 : vector<1x64xf32> to vector<256x64xf32>
    %84 = arith.addf %81, %83 : vector<256x64xf32>
    %cst_130 = arith.constant 0.000000e+00 : f32
    %85 = vector.broadcast %cst_130 : f32 to vector<256x64xf32>
    %86 = arith.maximumf %84, %85 : vector<256x64xf32>
    %87 = vector.shape_cast %86 : vector<256x64xf32> to vector<4x8x8x64xf32>
    %88 = vector.shape_cast %87 : vector<4x8x8x64xf32> to vector<4x4x2x8x64xf32>
    %cst_131 = arith.constant dense<0xFF800000> : vector<4x4x8x64xf32>
    %89 = vector.multi_reduction <maximumf>, %88, %cst_131 [2] : vector<4x4x2x8x64xf32> to vector<4x4x8x64xf32>
    %c0_132 = arith.constant 0 : index
    %c0_133 = arith.constant 0 : index
    %c0_134 = arith.constant 0 : index
    %c0_135 = arith.constant 0 : index
    %90 = vector.load %arg19[%c0_132, %c0_133, %c0_134, %c0_135] : memref<4x4x8x64xf32, #tpu.memory_space<vmem>>, vector<4x4x8x64xf32>
    tpu.vector_store %arg19[%c0_132, %c0_133, %c0_134, %c0_135], %89 {strides = array<i32>} : memref<4x4x8x64xf32, #tpu.memory_space<vmem>>, vector<4x4x8x64xf32>,
    %c0_136 = arith.constant 0 : index
    %c0_137 = arith.constant 0 : index
    %c0_138 = arith.constant 0 : index
    %c0_139 = arith.constant 0 : index
    %91 = tpu.strided_load %arg19[%c0_136, %c0_137, %c0_138, %c0_139] {strides = array<i32: 1, 1, 2, 1>} : memref<4x4x8x64xf32, #tpu.memory_space<vmem>>, vector<4x4x4x64xf32>
    %c0_140 = arith.constant 0 : index
    %c0_141 = arith.constant 0 : index
    %c1_142 = arith.constant 1 : index
    %c0_143 = arith.constant 0 : index
    %92 = tpu.strided_load %arg19[%c0_140, %c0_141, %c1_142, %c0_143] {strides = array<i32: 1, 1, 2, 1>} : memref<4x4x8x64xf32, #tpu.memory_space<vmem>>, vector<4x4x4x64xf32>
    %93 = arith.maximumf %91, %92 : vector<4x4x4x64xf32>
    %94 = vector.shape_cast %93 : vector<4x4x4x64xf32> to vector<4x16x64xf32>
    %95 = arith.truncf %94 : vector<4x16x64xf32> to vector<4x16x64xbf16>
    %96 = vector.extract_strided_slice %95 {offsets = [0, 0, 0], sizes = [4, 4, 64], strides = [1, 1, 1]} : vector<4x16x64xbf16> to vector<4x4x64xbf16>
    %c0_144 = arith.constant 0 : index
    %c0_145 = arith.constant 0 : index
    %c0_146 = arith.constant 0 : index
    %97 = vector.load %arg20[%c0_144, %c0_145, %c0_146] : memref<4x4x256xbf16, #tpu.memory_space<vmem>>, vector<4x4x64xbf16>
    tpu.vector_store %arg20[%c0_144, %c0_145, %c0_146], %96 {strides = array<i32>} : memref<4x4x256xbf16, #tpu.memory_space<vmem>>, vector<4x4x64xbf16>,
    %98 = vector.extract_strided_slice %95 {offsets = [0, 4, 0], sizes = [4, 4, 64], strides = [1, 1, 1]} : vector<4x16x64xbf16> to vector<4x4x64xbf16>
    %c0_147 = arith.constant 0 : index
    %c0_148 = arith.constant 0 : index
    %c64_149 = arith.constant 64 : index
    %99 = vector.load %arg20[%c0_147, %c0_148, %c64_149] : memref<4x4x256xbf16, #tpu.memory_space<vmem>>, vector<4x4x64xbf16>
    tpu.vector_store %arg20[%c0_147, %c0_148, %c64_149], %98 {strides = array<i32>} : memref<4x4x256xbf16, #tpu.memory_space<vmem>>, vector<4x4x64xbf16>,
    %100 = vector.extract_strided_slice %95 {offsets = [0, 8, 0], sizes = [4, 4, 64], strides = [1, 1, 1]} : vector<4x16x64xbf16> to vector<4x4x64xbf16>
    %c0_150 = arith.constant 0 : index
    %c0_151 = arith.constant 0 : index
    %c128_152 = arith.constant 128 : index
    %101 = vector.load %arg20[%c0_150, %c0_151, %c128_152] : memref<4x4x256xbf16, #tpu.memory_space<vmem>>, vector<4x4x64xbf16>
    tpu.vector_store %arg20[%c0_150, %c0_151, %c128_152], %100 {strides = array<i32>} : memref<4x4x256xbf16, #tpu.memory_space<vmem>>, vector<4x4x64xbf16>,
    %102 = vector.extract_strided_slice %95 {offsets = [0, 12, 0], sizes = [4, 4, 64], strides = [1, 1, 1]} : vector<4x16x64xbf16> to vector<4x4x64xbf16>
    %c0_153 = arith.constant 0 : index
    %c0_154 = arith.constant 0 : index
    %c192 = arith.constant 192 : index
    %103 = vector.load %arg20[%c0_153, %c0_154, %c192] : memref<4x4x256xbf16, #tpu.memory_space<vmem>>, vector<4x4x64xbf16>
    tpu.vector_store %arg20[%c0_153, %c0_154, %c192], %102 {strides = array<i32>} : memref<4x4x256xbf16, #tpu.memory_space<vmem>>, vector<4x4x64xbf16>,
    %cst_155 = arith.constant 0.000000e+00 : f32
    %104 = vector.broadcast %cst_155 : f32 to vector<4x512xf32>
    %c0_156 = arith.constant 0 : index
    %c0_157 = arith.constant 0 : index
    %c0_158 = arith.constant 0 : index
    %105 = vector.load %arg20[%c0_156, %c0_157, %c0_158] : memref<4x4x256xbf16, #tpu.memory_space<vmem>>, vector<4x1x256xbf16>
    %106 = vector.shape_cast %105 : vector<4x1x256xbf16> to vector<4x256xbf16>
    %c0_159 = arith.constant 0 : index
    %c0_160 = arith.constant 0 : index
    %c0_161 = arith.constant 0 : index
    %107 = vector.load %arg8[%c0_159, %c0_160, %c0_161] : memref<4x256x512xbf16, #tpu.memory_space<vmem>>, vector<1x256x512xbf16>
    %108 = vector.shape_cast %107 : vector<1x256x512xbf16> to vector<256x512xbf16>
    %cst_162 = arith.constant dense<0.000000e+00> : vector<4x512xf32>
    %109 = tpu.matmul %106, %108, %cst_162 {dimension_numbers = #tpu.dot_dimension_numbers<[1], [0], [0], [1], [0, 0, 1, 1], [], []>} : vector<4x256xbf16>, vector<256x512xbf16>, vector<4x512xf32> -> vector<4x512xf32>
    %110 = arith.addf %104, %109 : vector<4x512xf32>
    %c0_163 = arith.constant 0 : index
    %c1_164 = arith.constant 1 : index
    %c0_165 = arith.constant 0 : index
    %111 = vector.load %arg20[%c0_163, %c1_164, %c0_165] : memref<4x4x256xbf16, #tpu.memory_space<vmem>>, vector<4x1x256xbf16>
    %112 = vector.shape_cast %111 : vector<4x1x256xbf16> to vector<4x256xbf16>
    %c1_166 = arith.constant 1 : index
    %c0_167 = arith.constant 0 : index
    %c0_168 = arith.constant 0 : index
    %113 = vector.load %arg8[%c1_166, %c0_167, %c0_168] : memref<4x256x512xbf16, #tpu.memory_space<vmem>>, vector<1x256x512xbf16>
    %114 = vector.shape_cast %113 : vector<1x256x512xbf16> to vector<256x512xbf16>
    %cst_169 = arith.constant dense<0.000000e+00> : vector<4x512xf32>
    %115 = tpu.matmul %112, %114, %cst_169 {dimension_numbers = #tpu.dot_dimension_numbers<[1], [0], [0], [1], [0, 0, 1, 1], [], []>} : vector<4x256xbf16>, vector<256x512xbf16>, vector<4x512xf32> -> vector<4x512xf32>
    %116 = arith.addf %110, %115 : vector<4x512xf32>
    %c0_170 = arith.constant 0 : index
    %c2_171 = arith.constant 2 : index
    %c0_172 = arith.constant 0 : index
    %117 = vector.load %arg20[%c0_170, %c2_171, %c0_172] : memref<4x4x256xbf16, #tpu.memory_space<vmem>>, vector<4x1x256xbf16>
    %118 = vector.shape_cast %117 : vector<4x1x256xbf16> to vector<4x256xbf16>
    %c2_173 = arith.constant 2 : index
    %c0_174 = arith.constant 0 : index
    %c0_175 = arith.constant 0 : index
    %119 = vector.load %arg8[%c2_173, %c0_174, %c0_175] : memref<4x256x512xbf16, #tpu.memory_space<vmem>>, vector<1x256x512xbf16>
    %120 = vector.shape_cast %119 : vector<1x256x512xbf16> to vector<256x512xbf16>
    %cst_176 = arith.constant dense<0.000000e+00> : vector<4x512xf32>
    %121 = tpu.matmul %118, %120, %cst_176 {dimension_numbers = #tpu.dot_dimension_numbers<[1], [0], [0], [1], [0, 0, 1, 1], [], []>} : vector<4x256xbf16>, vector<256x512xbf16>, vector<4x512xf32> -> vector<4x512xf32>
    %122 = arith.addf %116, %121 : vector<4x512xf32>
    %c0_177 = arith.constant 0 : index
    %c3 = arith.constant 3 : index
    %c0_178 = arith.constant 0 : index
    %123 = vector.load %arg20[%c0_177, %c3, %c0_178] : memref<4x4x256xbf16, #tpu.memory_space<vmem>>, vector<4x1x256xbf16>
    %124 = vector.shape_cast %123 : vector<4x1x256xbf16> to vector<4x256xbf16>
    %c3_179 = arith.constant 3 : index
    %c0_180 = arith.constant 0 : index
    %c0_181 = arith.constant 0 : index
    %125 = vector.load %arg8[%c3_179, %c0_180, %c0_181] : memref<4x256x512xbf16, #tpu.memory_space<vmem>>, vector<1x256x512xbf16>
    %126 = vector.shape_cast %125 : vector<1x256x512xbf16> to vector<256x512xbf16>
    %cst_182 = arith.constant dense<0.000000e+00> : vector<4x512xf32>
    %127 = tpu.matmul %124, %126, %cst_182 {dimension_numbers = #tpu.dot_dimension_numbers<[1], [0], [0], [1], [0, 0, 1, 1], [], []>} : vector<4x256xbf16>, vector<256x512xbf16>, vector<4x512xf32> -> vector<4x512xf32>
    %128 = arith.addf %122, %127 : vector<4x512xf32>
    %c0_183 = arith.constant 0 : index
    %c0_184 = arith.constant 0 : index
    %129 = vector.load %arg9[%c0_183, %c0_184] : memref<1x512xf32, #tpu.memory_space<vmem>>, vector<1x512xf32>
    %130 = vector.broadcast %129 : vector<1x512xf32> to vector<4x512xf32>
    %131 = arith.addf %128, %130 : vector<4x512xf32>
    %cst_185 = arith.constant 0.000000e+00 : f32
    %132 = vector.broadcast %cst_185 : f32 to vector<4x512xf32>
    %133 = arith.maximumf %131, %132 : vector<4x512xf32>
    %134 = arith.truncf %133 : vector<4x512xf32> to vector<4x512xbf16>
    %c0_186 = arith.constant 0 : index
    %c0_187 = arith.constant 0 : index
    %135 = vector.load %arg10[%c0_186, %c0_187] : memref<512x64xbf16, #tpu.memory_space<vmem>>, vector<512x64xbf16>
    %cst_188 = arith.constant dense<0.000000e+00> : vector<4x64xf32>
    %136 = tpu.matmul %134, %135, %cst_188 {dimension_numbers = #tpu.dot_dimension_numbers<[1], [0], [0], [1], [0, 0, 1, 1], [], []>} : vector<4x512xbf16>, vector<512x64xbf16>, vector<4x64xf32> -> vector<4x64xf32>
    %c0_189 = arith.constant 0 : index
    %c0_190 = arith.constant 0 : index
    %137 = vector.load %arg11[%c0_189, %c0_190] : memref<1x64xf32, #tpu.memory_space<vmem>>, vector<1x64xf32>
    %138 = vector.broadcast %137 : vector<1x64xf32> to vector<4x64xf32>
    %139 = arith.addf %136, %138 : vector<4x64xf32>
    %cst_191 = arith.constant 0.000000e+00 : f32
    %140 = vector.broadcast %cst_191 : f32 to vector<4x64xf32>
    %141 = arith.maximumf %139, %140 : vector<4x64xf32>
    %142 = arith.truncf %141 : vector<4x64xf32> to vector<4x64xbf16>
    %c0_192 = arith.constant 0 : index
    %c0_193 = arith.constant 0 : index
    %143 = vector.load %arg12[%c0_192, %c0_193] : memref<64x10xbf16, #tpu.memory_space<vmem>>, vector<64x10xbf16>
    %cst_194 = arith.constant dense<0.000000e+00> : vector<4x10xf32>
    %144 = tpu.matmul %142, %143, %cst_194 {dimension_numbers = #tpu.dot_dimension_numbers<[1], [0], [0], [1], [0, 0, 1, 1], [], []>} : vector<4x64xbf16>, vector<64x10xbf16>, vector<4x10xf32> -> vector<4x10xf32>
    %c0_195 = arith.constant 0 : index
    %c0_196 = arith.constant 0 : index
    %145 = vector.load %arg13[%c0_195, %c0_196] : memref<1x10xf32, #tpu.memory_space<vmem>>, vector<1x10xf32>
    %146 = vector.broadcast %145 : vector<1x10xf32> to vector<4x10xf32>
    %147 = arith.addf %144, %146 : vector<4x10xf32>
    %cst_197 = arith.constant dense<0xFF800000> : vector<4xf32>
    %148 = vector.multi_reduction <maximumf>, %147, %cst_197 [1] : vector<4x10xf32> to vector<4xf32>
    %149 = vector.shape_cast %148 : vector<4xf32> to vector<4x1xf32>
    %150 = vector.broadcast %149 : vector<4x1xf32> to vector<4x10xf32>
    %151 = arith.subf %147, %150 : vector<4x10xf32>
    %152 = math.exp %151 : vector<4x10xf32>
    %cst_198 = arith.constant dense<0.000000e+00> : vector<4xf32>
    %153 = vector.multi_reduction <add>, %152, %cst_198 [1] : vector<4x10xf32> to vector<4xf32>
    %154 = vector.shape_cast %153 : vector<4xf32> to vector<4x1xf32>
    %155 = math.log %154 : vector<4x1xf32>
    %156 = vector.broadcast %155 : vector<4x1xf32> to vector<4x10xf32>
    %157 = arith.subf %151, %156 : vector<4x10xf32>
    %c0_199 = arith.constant 0 : index
    %c0_200 = arith.constant 0 : index
    %158 = vector.load %arg14[%c0_199, %c0_200] : memref<4x10xf32, #tpu.memory_space<vmem>>, vector<4x10xf32>
    tpu.vector_store %arg14[%c0_199, %c0_200], %157 {strides = array<i32>} : memref<4x10xf32, #tpu.memory_space<vmem>>, vector<4x10xf32>,
    return
  }
  func.func @transform_0(%arg0: i32) -> (i32, i32, i32, i32) {
    %c0_i32 = arith.constant 0 : i32
    %c0_i32_0 = arith.constant 0 : i32
    %c0_i32_1 = arith.constant 0 : i32
    %c0_i32_2 = arith.constant 0 : i32
    return %arg0, %c0_i32, %c0_i32_0, %c0_i32_1 : i32, i32, i32, i32
  }
  func.func @transform_1(%arg0: i32) -> (i32, i32) {
    %c0_i32 = arith.constant 0 : i32
    %c0_i32_0 = arith.constant 0 : i32
    %c0_i32_1 = arith.constant 0 : i32
    return %c0_i32, %c0_i32_0 : i32, i32
  }
  func.func @transform_2(%arg0: i32) -> (i32, i32) {
    %c0_i32 = arith.constant 0 : i32
    %c0_i32_0 = arith.constant 0 : i32
    %c0_i32_1 = arith.constant 0 : i32
    return %c0_i32, %c0_i32_0 : i32, i32
  }
  func.func @transform_3(%arg0: i32) -> (i32, i32, i32) {
    %c0_i32 = arith.constant 0 : i32
    %c0_i32_0 = arith.constant 0 : i32
    %c0_i32_1 = arith.constant 0 : i32
    %c0_i32_2 = arith.constant 0 : i32
    return %c0_i32, %c0_i32_0, %c0_i32_1 : i32, i32, i32
  }
  func.func @transform_4(%arg0: i32) -> (i32, i32) {
    %c0_i32 = arith.constant 0 : i32
    %c0_i32_0 = arith.constant 0 : i32
    %c0_i32_1 = arith.constant 0 : i32
    return %c0_i32, %c0_i32_0 : i32, i32
  }
  func.func @transform_5(%arg0: i32) -> (i32, i32, i32) {
    %c0_i32 = arith.constant 0 : i32
    %c0_i32_0 = arith.constant 0 : i32
    %c0_i32_1 = arith.constant 0 : i32
    %c0_i32_2 = arith.constant 0 : i32
    return %c0_i32, %c0_i32_0, %c0_i32_1 : i32, i32, i32
  }
  func.func @transform_6(%arg0: i32) -> (i32, i32) {
    %c0_i32 = arith.constant 0 : i32
    %c0_i32_0 = arith.constant 0 : i32
    %c0_i32_1 = arith.constant 0 : i32
    return %c0_i32, %c0_i32_0 : i32, i32
  }
  func.func @transform_7(%arg0: i32) -> (i32, i32, i32) {
    %c0_i32 = arith.constant 0 : i32
    %c0_i32_0 = arith.constant 0 : i32
    %c0_i32_1 = arith.constant 0 : i32
    %c0_i32_2 = arith.constant 0 : i32
    return %c0_i32, %c0_i32_0, %c0_i32_1 : i32, i32, i32
  }
  func.func @transform_8(%arg0: i32) -> (i32, i32) {
    %c0_i32 = arith.constant 0 : i32
    %c0_i32_0 = arith.constant 0 : i32
    %c0_i32_1 = arith.constant 0 : i32
    return %c0_i32, %c0_i32_0 : i32, i32
  }
  func.func @transform_9(%arg0: i32) -> (i32, i32) {
    %c0_i32 = arith.constant 0 : i32
    %c0_i32_0 = arith.constant 0 : i32
    %c0_i32_1 = arith.constant 0 : i32
    return %c0_i32, %c0_i32_0 : i32, i32
  }
  func.func @transform_10(%arg0: i32) -> (i32, i32) {
    %c0_i32 = arith.constant 0 : i32
    %c0_i32_0 = arith.constant 0 : i32
    %c0_i32_1 = arith.constant 0 : i32
    return %c0_i32, %c0_i32_0 : i32, i32
  }
  func.func @transform_11(%arg0: i32) -> (i32, i32) {
    %c0_i32 = arith.constant 0 : i32
    %c0_i32_0 = arith.constant 0 : i32
    %c0_i32_1 = arith.constant 0 : i32
    return %c0_i32, %c0_i32_0 : i32, i32
  }
  func.func @transform_12(%arg0: i32) -> (i32, i32) {
    %c0_i32 = arith.constant 0 : i32
    %c0_i32_0 = arith.constant 0 : i32
    %c0_i32_1 = arith.constant 0 : i32
    return %c0_i32, %c0_i32_0 : i32, i32
  }
  func.func @transform_13(%arg0: i32) -> (i32, i32) {
    %c0_i32 = arith.constant 0 : i32
    %c0_i32_0 = arith.constant 0 : i32
    return %arg0, %c0_i32 : i32, i32
  }
}

</mosaic_0001>

<bundles_post_ra>
// kernel: cifarnet_forward.1
= control target key start
LH: loop header
LB: loop body
LE: loop exit
PB: predicated region body
PF: predicated region fallthrough
CT: control target
= control target key end

     0   :  { %18 = vsyncpa [#allocation9], 0  ;;  %vm46_vm0 = vcmask 785408   ;;  %vm494_vm1 = vcmask 1043456   ;;  %vm495_vm2 = vcmask 523268   ;;  %v21524_v0 = vmov 0   ;;  %s21510_s0 = inlined_call_operand.vmem [shape: bf16[4,32,32,32], index: 0, kind: input, shape index: {}]   ;;  %s21511_s1 = inlined_call_operand.vmem [shape: bf16[32,32], index: 1, kind: input, shape index: {}]   ;;  %s21512_s2 = inlined_call_operand.vmem [shape: f32[1,32], index: 2, kind: input, shape index: {}]   ;;  %s21513_s3 = inlined_call_operand.vmem [shape: bf16[3,96,64], index: 3, kind: input, shape index: {}]   ;;  %s21514_s4 = inlined_call_operand.vmem [shape: f32[1,64], index: 4, kind: input, shape index: {}]   ;;  %s21515_s5 = inlined_call_operand.vmem [shape: bf16[3,192,64], index: 5, kind: input, shape index: {}]   ;;  %s21516_s6 = inlined_call_operand.vmem [shape: f32[1,64], index: 6, kind: input, shape index: {}]   ;;  %s21517_s7 = inlined_call_operand.vmem [shape: bf16[4,256,512], index: 7, kind: input, shape index: {}]   ;;  %s21518_s8 = inlined_call_operand.vmem [shape: f32[1,512], index: 8, kind: input, shape index: {}]   ;;  %s21519_s9 = inlined_call_operand.vmem [shape: bf16[512,64], index: 9, kind: input, shape index: {}]   ;;  %s21520_s10 = inlined_call_operand.vmem [shape: f32[1,64], index: 10, kind: input, shape index: {}]   ;;  %s21521_s11 = inlined_call_operand.vmem [shape: bf16[64,10], index: 11, kind: input, shape index: {}]   ;;  %s21522_s12 = inlined_call_operand.vmem [shape: f32[1,10], index: 12, kind: input, shape index: {}]   ;;  %s21523_s13 = inlined_call_operand.hbm [shape: f32[4,10], index: 13, kind: output, shape index: {}]  }
   0x1   :  { %47 = vst.msk [vmem:[#allocation3] sm:$0xff] %vm46_vm0, %v21524_v0  ;;  %48 = vst.msk [vmem:[#allocation3 + $0x90] sm:$0xff] %vm46_vm0, %v21524_v0  ;;  %vm56_vm4 = vcmask 253952   ;;  %vm57_vm5 = vsmask.f32 256  ;;  %vm275_vm7 = vcmask 785927  }
   0x2   :  { %49 = vst.msk [vmem:[#allocation3 + $0x120] sm:$0xff] %vm46_vm0, %v21524_v0  ;;  %50 = vst.msk [vmem:[#allocation3 + $0x1b0] sm:$0xff] %vm46_vm0, %v21524_v0  ;;  %v62_v1 = vld [vmem:[#allocation3 + $0x8] sm:$0x1]  ;;  %v65_v3 = vld [vmem:[#allocation3 + $0x10] sm:$0x1] }
   0x3   :  { %52 = vst.msk [vmem:[#allocation3 + $0x88] sm:$0xff] %vm46_vm0, %v21524_v0  ;;  %53 = vst.msk [vmem:[#allocation3 + $0x118] sm:$0xff] %vm46_vm0, %v21524_v0  ;;  %v68_v4 = vld [vmem:[#allocation3 + $0x18] sm:$0x1]  ;;  %v71_v8 = vld [vmem:[#allocation3 + $0x20] sm:$0x1] }
   0x4   :  { %54 = vst.msk [vmem:[#allocation3 + $0x1a8] sm:$0xff] %vm46_vm0, %v21524_v0  ;;  %55 = vst.msk [vmem:[#allocation3 + $0x238] sm:$0xff] %vm46_vm0, %v21524_v0  ;;  %v74_v10 = vld [vmem:[#allocation3 + $0x28] sm:$0x1]  ;;  %v77_v11 = vld [vmem:[#allocation3 + $0x30] sm:$0x1] }
   0x5   :  { %vm496_vm3 = vmor %vm495_vm2, %vm494_vm1  ;;  %v80_v14 = vld [vmem:[#allocation3 + $0x38] sm:$0x1]  ;;  %v83_v15 = vld [vmem:[#allocation3 + $0x40] sm:$0x1]  ;;  %vm276_vm8 = vsmask.f32 7966 }
   0x6   :  { %497 = vst.msk [vmem:[#allocation5] sm:$0xff] %vm496_vm3, %v21524_v0  ;;  %498 = vst.msk [vmem:[#allocation5 + $0x50] sm:$0xff] %vm496_vm3, %v21524_v0  ;;  %v86_v18 = vld [vmem:[#allocation3 + $0x48] sm:$0x1]  ;;  %v89_v19 = vld [vmem:[#allocation3 + $0x50] sm:$0x1] }
   0x7   :  { %499 = vst.msk [vmem:[#allocation5 + $0xa0] sm:$0xff] %vm496_vm3, %v21524_v0  ;;  %500 = vst.msk [vmem:[#allocation5 + $0xf0] sm:$0xff] %vm496_vm3, %v21524_v0  ;;  %v92_v22 = vld [vmem:[#allocation3 + $0x58] sm:$0x1]  ;;  %v95_v23 = vld [vmem:[#allocation3 + $0x60] sm:$0x1] }
   0x8   :  { %502 = vst.msk [vmem:[#allocation5 + $0x48] sm:$0xff] %vm496_vm3, %v21524_v0  ;;  %503 = vst.msk [vmem:[#allocation5 + $0x98] sm:$0xff] %vm496_vm3, %v21524_v0  ;;  %v59_v24 = vld [vmem:[#allocation3] sm:$0x1]  ;;  %v98_v27 = vld [vmem:[#allocation3 + $0x68] sm:$0x1] }
   0x9   :  { %504 = vst.msk [vmem:[#allocation5 + $0xe8] sm:$0xff] %vm496_vm3, %v21524_v0  ;;  %505 = vst.msk [vmem:[#allocation5 + $0x138] sm:$0xff] %vm496_vm3, %v21524_v0  ;;  %v101_v30 = vld [vmem:[#allocation3 + $0x70] sm:$0x1]  ;;  %v104_v31 = vld [vmem:[#allocation3 + $0x78] sm:$0x1] }
   0xa   :  { %vm16333_vm6 = vmand %vm56_vm4, %vm57_vm5  ;;  %v107_v34 = vld [vmem:[#allocation3 + $0x80] sm:$0x1]  ;;  %v110_v35 = vld [vmem:[#allocation3 + $0x88] sm:$0x1]  ;;  %vm506_vm10 = vcmask 516096   ;;  %vm628_vm12 = vcmask 519171  }
   0xb   :  { %v63_v5 = vsel %vm16333_vm6, 0, %v62_v1  ;;  %v66_v6 = vsel %vm16333_vm6, 0, %v65_v3  ;;  %v69_v7 = vsel %vm16333_vm6, 0, %v68_v4  ;;  %v72_v9 = vsel %vm16333_vm6, 0, %v71_v8  ;;  %v113_v38 = vld [vmem:[#allocation3 + $0x90] sm:$0x1]  ;;  %vm16475_vm9 = vmand %vm275_vm7, %vm276_vm8 }
   0xc   :  { %64 = vst [vmem:[#allocation3 + $0x8] sm:$0x1] %v63_v5  ;;  %67 = vst [vmem:[#allocation3 + $0x10] sm:$0x1] %v66_v6  ;;  %v75_v12 = vsel %vm16333_vm6, 0, %v74_v10  ;;  %v78_v13 = vsel %vm16333_vm6, 0, %v77_v11 }
   0xd   :  { %70 = vst [vmem:[#allocation3 + $0x18] sm:$0x1] %v69_v7  ;;  %73 = vst [vmem:[#allocation3 + $0x20] sm:$0x1] %v72_v9  ;;  %v81_v16 = vsel %vm16333_vm6, 0, %v80_v14  ;;  %v84_v17 = vsel %vm16333_vm6, 0, %v83_v15 }
   0xe   :  { %76 = vst [vmem:[#allocation3 + $0x28] sm:$0x1] %v75_v12  ;;  %79 = vst [vmem:[#allocation3 + $0x30] sm:$0x1] %v78_v13  ;;  %v87_v20 = vsel %vm16333_vm6, 0, %v86_v18  ;;  %v90_v21 = vsel %vm16333_vm6, 0, %v89_v19 }
   0xf   :  { %82 = vst [vmem:[#allocation3 + $0x38] sm:$0x1] %v81_v16  ;;  %85 = vst [vmem:[#allocation3 + $0x40] sm:$0x1] %v84_v17  ;;  %v93_v25 = vsel %vm16333_vm6, 0, %v92_v22  ;;  %v96_v26 = vsel %vm16333_vm6, 0, %v95_v23 }
  0x10   :  { %88 = vst [vmem:[#allocation3 + $0x48] sm:$0x1] %v87_v20  ;;  %91 = vst [vmem:[#allocation3 + $0x50] sm:$0x1] %v90_v21  ;;  %v60_v28 = vsel %vm16333_vm6, 0, %v59_v24  ;;  %v99_v29 = vsel %vm16333_vm6, 0, %v98_v27 }
  0x11   :  { %94 = vst [vmem:[#allocation3 + $0x58] sm:$0x1] %v93_v25  ;;  %97 = vst [vmem:[#allocation3 + $0x60] sm:$0x1] %v96_v26  ;;  %v102_v32 = vsel %vm16333_vm6, 0, %v101_v30  ;;  %v105_v33 = vsel %vm16333_vm6, 0, %v104_v31 }
  0x12   :  { %61 = vst [vmem:[#allocation3] sm:$0x1] %v60_v28  ;;  %100 = vst [vmem:[#allocation3 + $0x68] sm:$0x1] %v99_v29  ;;  %v108_v36 = vsel %vm16333_vm6, 0, %v107_v34  ;;  %v111_v37 = vsel %vm16333_vm6, 0, %v110_v35 }
  0x13   :  { %103 = vst [vmem:[#allocation3 + $0x70] sm:$0x1] %v102_v32  ;;  %106 = vst [vmem:[#allocation3 + $0x78] sm:$0x1] %v105_v33  ;;  %v116_v39 = vld [vmem:[#allocation3 + $0x98] sm:$0x1] }
  0x14   :  { %109 = vst [vmem:[#allocation3 + $0x80] sm:$0x1] %v108_v36  ;;  %112 = vst [vmem:[#allocation3 + $0x88] sm:$0x1] %v111_v37  ;;  %v114_v40 = vsel %vm16333_vm6, 0, %v113_v38  ;;  %v117_v41 = vsel %vm16333_vm6, 0, %v116_v39 }
  0x15   :  { %v119_v42 = vld [vmem:[#allocation3 + $0xa0] sm:$0x1]  ;;  %v122_v43 = vld [vmem:[#allocation3 + $0xa8] sm:$0x1]  ;;  %115 = vst [vmem:[#allocation3 + $0x90] sm:$0x1] %v114_v40  ;;  %vm16625_vm11 = vmand %vm506_vm10, %vm57_vm5 }
  0x16   :  { %118 = vst [vmem:[#allocation3 + $0x98] sm:$0x1] %v117_v41  ;;  %v120_v44 = vsel %vm16333_vm6, 0, %v119_v42  ;;  %v123_v45 = vsel %vm16333_vm6, 0, %v122_v43  ;;  %v125_v46 = vld [vmem:[#allocation3 + $0xb0] sm:$0x1] }
  0x17   :  { %v128_v47 = vld [vmem:[#allocation3 + $0xb8] sm:$0x1]  ;;  %121 = vst [vmem:[#allocation3 + $0xa0] sm:$0x1] %v120_v44  ;;  %124 = vst [vmem:[#allocation3 + $0xa8] sm:$0x1] %v123_v45 }
  0x18   :  { %v126_v48 = vsel %vm16333_vm6, 0, %v125_v46  ;;  %v129_v49 = vsel %vm16333_vm6, 0, %v128_v47  ;;  %v131_v50 = vld [vmem:[#allocation3 + $0xc0] sm:$0x1]  ;;  %v134_v51 = vld [vmem:[#allocation3 + $0xc8] sm:$0x1] }
  0x19   :  { %127 = vst [vmem:[#allocation3 + $0xb0] sm:$0x1] %v126_v48  ;;  %130 = vst [vmem:[#allocation3 + $0xb8] sm:$0x1] %v129_v49  ;;  %v132_v52 = vsel %vm16333_vm6, 0, %v131_v50  ;;  %v135_v53 = vsel %vm16333_vm6, 0, %v134_v51 }
  0x1a   :  { %v137_v54 = vld [vmem:[#allocation3 + $0xd0] sm:$0x1]  ;;  %v140_v55 = vld [vmem:[#allocation3 + $0xd8] sm:$0x1]  ;;  %133 = vst [vmem:[#allocation3 + $0xc0] sm:$0x1] %v132_v52 }
  0x1b   :  { %136 = vst [vmem:[#allocation3 + $0xc8] sm:$0x1] %v135_v53  ;;  %v138_v56 = vsel %vm16333_vm6, 0, %v137_v54  ;;  %v141_v57 = vsel %vm16333_vm6, 0, %v140_v55  ;;  %v143_v58 = vld [vmem:[#allocation3 + $0xe0] sm:$0x1] }
  0x1c   :  { %v146_v59 = vld [vmem:[#allocation3 + $0xe8] sm:$0x1]  ;;  %139 = vst [vmem:[#allocation3 + $0xd0] sm:$0x1] %v138_v56  ;;  %142 = vst [vmem:[#allocation3 + $0xd8] sm:$0x1] %v141_v57 }
  0x1d   :  { %v144_v60 = vsel %vm16333_vm6, 0, %v143_v58  ;;  %v147_v61 = vsel %vm16333_vm6, 0, %v146_v59  ;;  %v149_v62 = vld [vmem:[#allocation3 + $0xf0] sm:$0x1]  ;;  %v152_v63 = vld [vmem:[#allocation3 + $0xf8] sm:$0x1] }
  0x1e   :  { %145 = vst [vmem:[#allocation3 + $0xe0] sm:$0x1] %v144_v60  ;;  %148 = vst [vmem:[#allocation3 + $0xe8] sm:$0x1] %v147_v61  ;;  %v150_v1 = vsel %vm16333_vm6, 0, %v149_v62  ;;  %v153_v3 = vsel %vm16333_vm6, 0, %v152_v63 }
  0x1f   :  { %v155_v4 = vld [vmem:[#allocation3 + $0x100] sm:$0x1]  ;;  %v158_v5 = vld [vmem:[#allocation3 + $0x108] sm:$0x1]  ;;  %151 = vst [vmem:[#allocation3 + $0xf0] sm:$0x1] %v150_v1 }
  0x20   :  { %154 = vst [vmem:[#allocation3 + $0xf8] sm:$0x1] %v153_v3  ;;  %v156_v6 = vsel %vm16333_vm6, 0, %v155_v4  ;;  %v159_v7 = vsel %vm16333_vm6, 0, %v158_v5  ;;  %v161_v8 = vld [vmem:[#allocation3 + $0x110] sm:$0x1] }
  0x21   :  { %v164_v9 = vld [vmem:[#allocation3 + $0x118] sm:$0x1]  ;;  %157 = vst [vmem:[#allocation3 + $0x100] sm:$0x1] %v156_v6  ;;  %160 = vst [vmem:[#allocation3 + $0x108] sm:$0x1] %v159_v7 }
  0x22   :  { %v162_v10 = vsel %vm16333_vm6, 0, %v161_v8  ;;  %v165_v11 = vsel %vm16333_vm6, 0, %v164_v9  ;;  %v167_v12 = vld [vmem:[#allocation3 + $0x120] sm:$0x1]  ;;  %v170_v13 = vld [vmem:[#allocation3 + $0x128] sm:$0x1] }
  0x23   :  { %163 = vst [vmem:[#allocation3 + $0x110] sm:$0x1] %v162_v10  ;;  %166 = vst [vmem:[#allocation3 + $0x118] sm:$0x1] %v165_v11  ;;  %v168_v14 = vsel %vm16333_vm6, 0, %v167_v12  ;;  %v171_v15 = vsel %vm16333_vm6, 0, %v170_v13 }
  0x24   :  { %v173_v16 = vld [vmem:[#allocation3 + $0x130] sm:$0x1]  ;;  %v176_v17 = vld [vmem:[#allocation3 + $0x138] sm:$0x1]  ;;  %169 = vst [vmem:[#allocation3 + $0x120] sm:$0x1] %v168_v14 }
  0x25   :  { %172 = vst [vmem:[#allocation3 + $0x128] sm:$0x1] %v171_v15  ;;  %v174_v18 = vsel %vm16333_vm6, 0, %v173_v16  ;;  %v177_v19 = vsel %vm16333_vm6, 0, %v176_v17  ;;  %v179_v20 = vld [vmem:[#allocation3 + $0x140] sm:$0x1] }
  0x26   :  { %v182_v21 = vld [vmem:[#allocation3 + $0x148] sm:$0x1]  ;;  %175 = vst [vmem:[#allocation3 + $0x130] sm:$0x1] %v174_v18  ;;  %178 = vst [vmem:[#allocation3 + $0x138] sm:$0x1] %v177_v19 }
  0x27   :  { %v180_v22 = vsel %vm16333_vm6, 0, %v179_v20  ;;  %v183_v23 = vsel %vm16333_vm6, 0, %v182_v21  ;;  %v185_v24 = vld [vmem:[#allocation3 + $0x150] sm:$0x1]  ;;  %v188_v25 = vld [vmem:[#allocation3 + $0x158] sm:$0x1] }
  0x28   :  { %181 = vst [vmem:[#allocation3 + $0x140] sm:$0x1] %v180_v22  ;;  %184 = vst [vmem:[#allocation3 + $0x148] sm:$0x1] %v183_v23  ;;  %v186_v26 = vsel %vm16333_vm6, 0, %v185_v24  ;;  %v189_v27 = vsel %vm16333_vm6, 0, %v188_v25 }
  0x29   :  { %v191_v28 = vld [vmem:[#allocation3 + $0x160] sm:$0x1]  ;;  %v194_v29 = vld [vmem:[#allocation3 + $0x168] sm:$0x1]  ;;  %187 = vst [vmem:[#allocation3 + $0x150] sm:$0x1] %v186_v26 }
  0x2a   :  { %190 = vst [vmem:[#allocation3 + $0x158] sm:$0x1] %v189_v27  ;;  %v192_v30 = vsel %vm16333_vm6, 0, %v191_v28  ;;  %v195_v31 = vsel %vm16333_vm6, 0, %v194_v29  ;;  %v197_v32 = vld [vmem:[#allocation3 + $0x170] sm:$0x1] }
  0x2b   :  { %v200_v33 = vld [vmem:[#allocation3 + $0x178] sm:$0x1]  ;;  %193 = vst [vmem:[#allocation3 + $0x160] sm:$0x1] %v192_v30  ;;  %196 = vst [vmem:[#allocation3 + $0x168] sm:$0x1] %v195_v31 }
  0x2c   :  { %v198_v34 = vsel %vm16333_vm6, 0, %v197_v32  ;;  %v201_v35 = vsel %vm16333_vm6, 0, %v200_v33  ;;  %v203_v36 = vld [vmem:[#allocation3 + $0x180] sm:$0x1]  ;;  %v206_v37 = vld [vmem:[#allocation3 + $0x188] sm:$0x1] }
  0x2d   :  { %199 = vst [vmem:[#allocation3 + $0x170] sm:$0x1] %v198_v34  ;;  %202 = vst [vmem:[#allocation3 + $0x178] sm:$0x1] %v201_v35  ;;  %v204_v38 = vsel %vm16333_vm6, 0, %v203_v36  ;;  %v207_v39 = vsel %vm16333_vm6, 0, %v206_v37 }
  0x2e   :  { %v209_v40 = vld [vmem:[#allocation3 + $0x190] sm:$0x1]  ;;  %v212_v41 = vld [vmem:[#allocation3 + $0x198] sm:$0x1]  ;;  %205 = vst [vmem:[#allocation3 + $0x180] sm:$0x1] %v204_v38 }
  0x2f   :  { %208 = vst [vmem:[#allocation3 + $0x188] sm:$0x1] %v207_v39  ;;  %v210_v42 = vsel %vm16333_vm6, 0, %v209_v40  ;;  %v213_v43 = vsel %vm16333_vm6, 0, %v212_v41  ;;  %v215_v44 = vld [vmem:[#allocation3 + $0x1a0] sm:$0x1] }
  0x30   :  { %v218_v45 = vld [vmem:[#allocation3 + $0x1a8] sm:$0x1]  ;;  %211 = vst [vmem:[#allocation3 + $0x190] sm:$0x1] %v210_v42  ;;  %214 = vst [vmem:[#allocation3 + $0x198] sm:$0x1] %v213_v43 }
  0x31   :  { %v216_v46 = vsel %vm16333_vm6, 0, %v215_v44  ;;  %v219_v47 = vsel %vm16333_vm6, 0, %v218_v45  ;;  %v221_v48 = vld [vmem:[#allocation3 + $0x1b0] sm:$0x1]  ;;  %v224_v49 = vld [vmem:[#allocation3 + $0x1b8] sm:$0x1] }
  0x32   :  { %217 = vst [vmem:[#allocation3 + $0x1a0] sm:$0x1] %v216_v46  ;;  %220 = vst [vmem:[#allocation3 + $0x1a8] sm:$0x1] %v219_v47  ;;  %v222_v50 = vsel %vm16333_vm6, 0, %v221_v48  ;;  %v225_v51 = vsel %vm16333_vm6, 0, %v224_v49 }
  0x33   :  { %v227_v52 = vld [vmem:[#allocation3 + $0x1c0] sm:$0x1]  ;;  %v230_v53 = vld [vmem:[#allocation3 + $0x1c8] sm:$0x1]  ;;  %223 = vst [vmem:[#allocation3 + $0x1b0] sm:$0x1] %v222_v50 }
  0x34   :  { %226 = vst [vmem:[#allocation3 + $0x1b8] sm:$0x1] %v225_v51  ;;  %v228_v54 = vsel %vm16333_vm6, 0, %v227_v52  ;;  %v231_v55 = vsel %vm16333_vm6, 0, %v230_v53  ;;  %v233_v56 = vld [vmem:[#allocation3 + $0x1d0] sm:$0x1] }
  0x35   :  { %v236_v57 = vld [vmem:[#allocation3 + $0x1d8] sm:$0x1]  ;;  %229 = vst [vmem:[#allocation3 + $0x1c0] sm:$0x1] %v228_v54  ;;  %232 = vst [vmem:[#allocation3 + $0x1c8] sm:$0x1] %v231_v55 }
  0x36   :  { %v234_v58 = vsel %vm16333_vm6, 0, %v233_v56  ;;  %v237_v59 = vsel %vm16333_vm6, 0, %v236_v57  ;;  %v239_v60 = vld [vmem:[#allocation3 + $0x1e0] sm:$0x1]  ;;  %v242_v61 = vld [vmem:[#allocation3 + $0x1e8] sm:$0x1] }
  0x37   :  { %235 = vst [vmem:[#allocation3 + $0x1d0] sm:$0x1] %v234_v58  ;;  %238 = vst [vmem:[#allocation3 + $0x1d8] sm:$0x1] %v237_v59  ;;  %v240_v62 = vsel %vm16333_vm6, 0, %v239_v60  ;;  %v243_v63 = vsel %vm16333_vm6, 0, %v242_v61 }
  0x38   :  { %v245_v1 = vld [vmem:[#allocation3 + $0x1f0] sm:$0x1]  ;;  %v248_v3 = vld [vmem:[#allocation3 + $0x1f8] sm:$0x1]  ;;  %241 = vst [vmem:[#allocation3 + $0x1e0] sm:$0x1] %v240_v62 }
  0x39   :  { %244 = vst [vmem:[#allocation3 + $0x1e8] sm:$0x1] %v243_v63  ;;  %v246_v4 = vsel %vm16333_vm6, 0, %v245_v1  ;;  %v249_v5 = vsel %vm16333_vm6, 0, %v248_v3  ;;  %v251_v6 = vld [vmem:[#allocation3 + $0x200] sm:$0x1] }
  0x3a   :  { %v254_v7 = vld [vmem:[#allocation3 + $0x208] sm:$0x1]  ;;  %247 = vst [vmem:[#allocation3 + $0x1f0] sm:$0x1] %v246_v4  ;;  %250 = vst [vmem:[#allocation3 + $0x1f8] sm:$0x1] %v249_v5 }
  0x3b   :  { %v252_v8 = vsel %vm16333_vm6, 0, %v251_v6  ;;  %v255_v9 = vsel %vm16333_vm6, 0, %v254_v7  ;;  %v257_v10 = vld [vmem:[#allocation3 + $0x210] sm:$0x1]  ;;  %v260_v11 = vld [vmem:[#allocation3 + $0x218] sm:$0x1] }
  0x3c   :  { %253 = vst [vmem:[#allocation3 + $0x200] sm:$0x1] %v252_v8  ;;  %256 = vst [vmem:[#allocation3 + $0x208] sm:$0x1] %v255_v9  ;;  %v258_v12 = vsel %vm16333_vm6, 0, %v257_v10  ;;  %v261_v13 = vsel %vm16333_vm6, 0, %v260_v11 }
  0x3d   :  { %v263_v14 = vld [vmem:[#allocation3 + $0x220] sm:$0x1]  ;;  %v266_v15 = vld [vmem:[#allocation3 + $0x228] sm:$0x1]  ;;  %259 = vst [vmem:[#allocation3 + $0x210] sm:$0x1] %v258_v12 }
  0x3e   :  { %262 = vst [vmem:[#allocation3 + $0x218] sm:$0x1] %v261_v13  ;;  %v264_v17 = vsel %vm16333_vm6, 0, %v263_v14  ;;  %v267_v18 = vsel %vm16333_vm6, 0, %v266_v15  ;;  %v269_v19 = vld [vmem:[#allocation3 + $0x230] sm:$0x1] }
  0x3f   :  { %v272_v20 = vld [vmem:[#allocation3 + $0x238] sm:$0x1]  ;;  %265 = vst [vmem:[#allocation3 + $0x220] sm:$0x1] %v264_v17  ;;  %268 = vst [vmem:[#allocation3 + $0x228] sm:$0x1] %v267_v18 }
  0x40   :  { %v270_v21 = vsel %vm16333_vm6, 0, %v269_v19  ;;  %v273_v22 = vsel %vm16333_vm6, 0, %v272_v20  ;;  %v278_v23 = vld [vmem:[#allocation3] sm:$0x80]  ;;  %v281_v24 = vld [vmem:[#allocation3 + $0x8] sm:$0x80] }
  0x41   :  { %271 = vst [vmem:[#allocation3 + $0x230] sm:$0x1] %v270_v21  ;;  %274 = vst [vmem:[#allocation3 + $0x238] sm:$0x1] %v273_v22  ;;  %v279_v25 = vsel %vm16475_vm9, 0, %v278_v23  ;;  %v282_v26 = vsel %vm16475_vm9, 0, %v281_v24 }
  0x42   :  { %v284_v27 = vld [vmem:[#allocation3 + $0x10] sm:$0x80]  ;;  %v287_v28 = vld [vmem:[#allocation3 + $0x18] sm:$0x80]  ;;  %280 = vst [vmem:[#allocation3] sm:$0x80] %v279_v25 }
  0x43   :  { %283 = vst [vmem:[#allocation3 + $0x8] sm:$0x80] %v282_v26  ;;  %v285_v29 = vsel %vm16475_vm9, 0, %v284_v27  ;;  %v288_v2 = vsel %vm16475_vm9, 0, %v287_v28  ;;  %v290_v30 = vld [vmem:[#allocation3 + $0x20] sm:$0x80] }
  0x44   :  { %v293_v31 = vld [vmem:[#allocation3 + $0x28] sm:$0x80]  ;;  %286 = vst [vmem:[#allocation3 + $0x10] sm:$0x80] %v285_v29  ;;  %289 = vst [vmem:[#allocation3 + $0x18] sm:$0x80] %v288_v2 }
  0x45   :  { %v291_v32 = vsel %vm16475_vm9, 0, %v290_v30  ;;  %v294_v33 = vsel %vm16475_vm9, 0, %v293_v31  ;;  %v296_v34 = vld [vmem:[#allocation3 + $0x30] sm:$0x80]  ;;  %v299_v35 = vld [vmem:[#allocation3 + $0x38] sm:$0x80] }
  0x46   :  { %292 = vst [vmem:[#allocation3 + $0x20] sm:$0x80] %v291_v32  ;;  %295 = vst [vmem:[#allocation3 + $0x28] sm:$0x80] %v294_v33  ;;  %v297_v36 = vsel %vm16475_vm9, 0, %v296_v34  ;;  %v300_v37 = vsel %vm16475_vm9, 0, %v299_v35 }
  0x47   :  { %v302_v38 = vld [vmem:[#allocation3 + $0x40] sm:$0x80]  ;;  %v305_v39 = vld [vmem:[#allocation3 + $0x48] sm:$0x80]  ;;  %298 = vst [vmem:[#allocation3 + $0x30] sm:$0x80] %v297_v36 }
  0x48   :  { %301 = vst [vmem:[#allocation3 + $0x38] sm:$0x80] %v300_v37  ;;  %v303_v40 = vsel %vm16475_vm9, 0, %v302_v38  ;;  %v306_v41 = vsel %vm16475_vm9, 0, %v305_v39  ;;  %v308_v42 = vld [vmem:[#allocation3 + $0x50] sm:$0x80] }
  0x49   :  { %v311_v43 = vld [vmem:[#allocation3 + $0x58] sm:$0x80]  ;;  %304 = vst [vmem:[#allocation3 + $0x40] sm:$0x80] %v303_v40  ;;  %307 = vst [vmem:[#allocation3 + $0x48] sm:$0x80] %v306_v41 }
  0x4a   :  { %v309_v44 = vsel %vm16475_vm9, 0, %v308_v42  ;;  %v312_v45 = vsel %vm16475_vm9, 0, %v311_v43  ;;  %v314_v46 = vld [vmem:[#allocation3 + $0x60] sm:$0x80]  ;;  %v317_v47 = vld [vmem:[#allocation3 + $0x68] sm:$0x80] }
  0x4b   :  { %310 = vst [vmem:[#allocation3 + $0x50] sm:$0x80] %v309_v44  ;;  %313 = vst [vmem:[#allocation3 + $0x58] sm:$0x80] %v312_v45  ;;  %v315_v48 = vsel %vm16475_vm9, 0, %v314_v46  ;;  %v318_v49 = vsel %vm16475_vm9, 0, %v317_v47 }
  0x4c   :  { %v320_v50 = vld [vmem:[#allocation3 + $0x70] sm:$0x80]  ;;  %v323_v51 = vld [vmem:[#allocation3 + $0x78] sm:$0x80]  ;;  %316 = vst [vmem:[#allocation3 + $0x60] sm:$0x80] %v315_v48 }
  0x4d   :  { %319 = vst [vmem:[#allocation3 + $0x68] sm:$0x80] %v318_v49  ;;  %v321_v52 = vsel %vm16475_vm9, 0, %v320_v50  ;;  %v324_v53 = vsel %vm16475_vm9, 0, %v323_v51  ;;  %v326_v54 = vld [vmem:[#allocation3 + $0x80] sm:$0x80] }
  0x4e   :  { %v329_v55 = vld [vmem:[#allocation3 + $0x88] sm:$0x80]  ;;  %322 = vst [vmem:[#allocation3 + $0x70] sm:$0x80] %v321_v52  ;;  %325 = vst [vmem:[#allocation3 + $0x78] sm:$0x80] %v324_v53 }
  0x4f   :  { %v327_v56 = vsel %vm16475_vm9, 0, %v326_v54  ;;  %v330_v57 = vsel %vm16475_vm9, 0, %v329_v55  ;;  %v332_v58 = vld [vmem:[#allocation3 + $0x90] sm:$0x80]  ;;  %v335_v59 = vld [vmem:[#allocation3 + $0x98] sm:$0x80] }
  0x50   :  { %328 = vst [vmem:[#allocation3 + $0x80] sm:$0x80] %v327_v56  ;;  %331 = vst [vmem:[#allocation3 + $0x88] sm:$0x80] %v330_v57  ;;  %v333_v60 = vsel %vm16475_vm9, 0, %v332_v58  ;;  %v336_v61 = vsel %vm16475_vm9, 0, %v335_v59 }
  0x51   :  { %v338_v62 = vld [vmem:[#allocation3 + $0xa0] sm:$0x80]  ;;  %v341_v63 = vld [vmem:[#allocation3 + $0xa8] sm:$0x80]  ;;  %334 = vst [vmem:[#allocation3 + $0x90] sm:$0x80] %v333_v60 }
  0x52   :  { %337 = vst [vmem:[#allocation3 + $0x98] sm:$0x80] %v336_v61  ;;  %v339_v1 = vsel %vm16475_vm9, 0, %v338_v62  ;;  %v342_v3 = vsel %vm16475_vm9, 0, %v341_v63  ;;  %v344_v4 = vld [vmem:[#allocation3 + $0xb0] sm:$0x80] }
  0x53   :  { %v347_v5 = vld [vmem:[#allocation3 + $0xb8] sm:$0x80]  ;;  %340 = vst [vmem:[#allocation3 + $0xa0] sm:$0x80] %v339_v1  ;;  %343 = vst [vmem:[#allocation3 + $0xa8] sm:$0x80] %v342_v3 }
  0x54   :  { %v345_v6 = vsel %vm16475_vm9, 0, %v344_v4  ;;  %v348_v7 = vsel %vm16475_vm9, 0, %v347_v5  ;;  %v350_v8 = vld [vmem:[#allocation3 + $0xc0] sm:$0x80]  ;;  %v353_v9 = vld [vmem:[#allocation3 + $0xc8] sm:$0x80] }
  0x55   :  { %346 = vst [vmem:[#allocation3 + $0xb0] sm:$0x80] %v345_v6  ;;  %349 = vst [vmem:[#allocation3 + $0xb8] sm:$0x80] %v348_v7  ;;  %v351_v10 = vsel %vm16475_vm9, 0, %v350_v8  ;;  %v354_v11 = vsel %vm16475_vm9, 0, %v353_v9 }
  0x56   :  { %v356_v12 = vld [vmem:[#allocation3 + $0xd0] sm:$0x80]  ;;  %v359_v13 = vld [vmem:[#allocation3 + $0xd8] sm:$0x80]  ;;  %352 = vst [vmem:[#allocation3 + $0xc0] sm:$0x80] %v351_v10 }
  0x57   :  { %355 = vst [vmem:[#allocation3 + $0xc8] sm:$0x80] %v354_v11  ;;  %v357_v14 = vsel %vm16475_vm9, 0, %v356_v12  ;;  %v360_v15 = vsel %vm16475_vm9, 0, %v359_v13  ;;  %v362_v17 = vld [vmem:[#allocation3 + $0xe0] sm:$0x80] }
  0x58   :  { %v365_v18 = vld [vmem:[#allocation3 + $0xe8] sm:$0x80]  ;;  %358 = vst [vmem:[#allocation3 + $0xd0] sm:$0x80] %v357_v14  ;;  %361 = vst [vmem:[#allocation3 + $0xd8] sm:$0x80] %v360_v15 }
  0x59   :  { %v363_v19 = vsel %vm16475_vm9, 0, %v362_v17  ;;  %v366_v20 = vsel %vm16475_vm9, 0, %v365_v18  ;;  %v368_v21 = vld [vmem:[#allocation3 + $0xf0] sm:$0x80]  ;;  %v371_v22 = vld [vmem:[#allocation3 + $0xf8] sm:$0x80] }
  0x5a   :  { %364 = vst [vmem:[#allocation3 + $0xe0] sm:$0x80] %v363_v19  ;;  %367 = vst [vmem:[#allocation3 + $0xe8] sm:$0x80] %v366_v20  ;;  %v369_v23 = vsel %vm16475_vm9, 0, %v368_v21  ;;  %v372_v24 = vsel %vm16475_vm9, 0, %v371_v22 }
  0x5b   :  { %v374_v25 = vld [vmem:[#allocation3 + $0x100] sm:$0x80]  ;;  %v377_v26 = vld [vmem:[#allocation3 + $0x108] sm:$0x80]  ;;  %370 = vst [vmem:[#allocation3 + $0xf0] sm:$0x80] %v369_v23 }
  0x5c   :  { %373 = vst [vmem:[#allocation3 + $0xf8] sm:$0x80] %v372_v24  ;;  %v375_v27 = vsel %vm16475_vm9, 0, %v374_v25  ;;  %v378_v28 = vsel %vm16475_vm9, 0, %v377_v26  ;;  %v380_v29 = vld [vmem:[#allocation3 + $0x110] sm:$0x80] }
  0x5d   :  { %v383_v2 = vld [vmem:[#allocation3 + $0x118] sm:$0x80]  ;;  %376 = vst [vmem:[#allocation3 + $0x100] sm:$0x80] %v375_v27  ;;  %379 = vst [vmem:[#allocation3 + $0x108] sm:$0x80] %v378_v28 }
  0x5e   :  { %v381_v30 = vsel %vm16475_vm9, 0, %v380_v29  ;;  %v384_v31 = vsel %vm16475_vm9, 0, %v383_v2  ;;  %v386_v32 = vld [vmem:[#allocation3 + $0x120] sm:$0x80]  ;;  %v389_v33 = vld [vmem:[#allocation3 + $0x128] sm:$0x80] }
  0x5f   :  { %382 = vst [vmem:[#allocation3 + $0x110] sm:$0x80] %v381_v30  ;;  %385 = vst [vmem:[#allocation3 + $0x118] sm:$0x80] %v384_v31  ;;  %v387_v34 = vsel %vm16475_vm9, 0, %v386_v32  ;;  %v390_v35 = vsel %vm16475_vm9, 0, %v389_v33 }
  0x60   :  { %v392_v36 = vld [vmem:[#allocation3 + $0x130] sm:$0x80]  ;;  %v395_v37 = vld [vmem:[#allocation3 + $0x138] sm:$0x80]  ;;  %388 = vst [vmem:[#allocation3 + $0x120] sm:$0x80] %v387_v34 }
  0x61   :  { %391 = vst [vmem:[#allocation3 + $0x128] sm:$0x80] %v390_v35  ;;  %v393_v38 = vsel %vm16475_vm9, 0, %v392_v36  ;;  %v396_v39 = vsel %vm16475_vm9, 0, %v395_v37  ;;  %v398_v40 = vld [vmem:[#allocation3 + $0x140] sm:$0x80] }
  0x62   :  { %v401_v41 = vld [vmem:[#allocation3 + $0x148] sm:$0x80]  ;;  %394 = vst [vmem:[#allocation3 + $0x130] sm:$0x80] %v393_v38  ;;  %397 = vst [vmem:[#allocation3 + $0x138] sm:$0x80] %v396_v39 }
  0x63   :  { %v399_v42 = vsel %vm16475_vm9, 0, %v398_v40  ;;  %v402_v43 = vsel %vm16475_vm9, 0, %v401_v41  ;;  %v404_v44 = vld [vmem:[#allocation3 + $0x150] sm:$0x80]  ;;  %v407_v45 = vld [vmem:[#allocation3 + $0x158] sm:$0x80] }
  0x64   :  { %400 = vst [vmem:[#allocation3 + $0x140] sm:$0x80] %v399_v42  ;;  %403 = vst [vmem:[#allocation3 + $0x148] sm:$0x80] %v402_v43  ;;  %v405_v46 = vsel %vm16475_vm9, 0, %v404_v44  ;;  %v408_v47 = vsel %vm16475_vm9, 0, %v407_v45 }
  0x65   :  { %v410_v48 = vld [vmem:[#allocation3 + $0x160] sm:$0x80]  ;;  %v413_v49 = vld [vmem:[#allocation3 + $0x168] sm:$0x80]  ;;  %406 = vst [vmem:[#allocation3 + $0x150] sm:$0x80] %v405_v46 }
  0x66   :  { %409 = vst [vmem:[#allocation3 + $0x158] sm:$0x80] %v408_v47  ;;  %v411_v50 = vsel %vm16475_vm9, 0, %v410_v48  ;;  %v414_v51 = vsel %vm16475_vm9, 0, %v413_v49  ;;  %v416_v52 = vld [vmem:[#allocation3 + $0x170] sm:$0x80] }
  0x67   :  { %v419_v53 = vld [vmem:[#allocation3 + $0x178] sm:$0x80]  ;;  %412 = vst [vmem:[#allocation3 + $0x160] sm:$0x80] %v411_v50  ;;  %415 = vst [vmem:[#allocation3 + $0x168] sm:$0x80] %v414_v51 }
  0x68   :  { %v417_v54 = vsel %vm16475_vm9, 0, %v416_v52  ;;  %v420_v55 = vsel %vm16475_vm9, 0, %v419_v53  ;;  %v422_v56 = vld [vmem:[#allocation3 + $0x180] sm:$0x80]  ;;  %v425_v57 = vld [vmem:[#allocation3 + $0x188] sm:$0x80] }
  0x69   :  { %418 = vst [vmem:[#allocation3 + $0x170] sm:$0x80] %v417_v54  ;;  %421 = vst [vmem:[#allocation3 + $0x178] sm:$0x80] %v420_v55  ;;  %v423_v58 = vsel %vm16475_vm9, 0, %v422_v56  ;;  %v426_v59 = vsel %vm16475_vm9, 0, %v425_v57 }
  0x6a   :  { %v428_v60 = vld [vmem:[#allocation3 + $0x190] sm:$0x80]  ;;  %v431_v61 = vld [vmem:[#allocation3 + $0x198] sm:$0x80]  ;;  %424 = vst [vmem:[#allocation3 + $0x180] sm:$0x80] %v423_v58 }
  0x6b   :  { %427 = vst [vmem:[#allocation3 + $0x188] sm:$0x80] %v426_v59  ;;  %v429_v62 = vsel %vm16475_vm9, 0, %v428_v60  ;;  %v432_v63 = vsel %vm16475_vm9, 0, %v431_v61  ;;  %v434_v1 = vld [vmem:[#allocation3 + $0x1a0] sm:$0x80] }
  0x6c   :  { %v437_v3 = vld [vmem:[#allocation3 + $0x1a8] sm:$0x80]  ;;  %430 = vst [vmem:[#allocation3 + $0x190] sm:$0x80] %v429_v62  ;;  %433 = vst [vmem:[#allocation3 + $0x198] sm:$0x80] %v432_v63 }
  0x6d   :  { %v435_v4 = vsel %vm16475_vm9, 0, %v434_v1  ;;  %v438_v5 = vsel %vm16475_vm9, 0, %v437_v3  ;;  %v440_v6 = vld [vmem:[#allocation3 + $0x1b0] sm:$0x80]  ;;  %v443_v7 = vld [vmem:[#allocation3 + $0x1b8] sm:$0x80] }
  0x6e   :  { %436 = vst [vmem:[#allocation3 + $0x1a0] sm:$0x80] %v435_v4  ;;  %439 = vst [vmem:[#allocation3 + $0x1a8] sm:$0x80] %v438_v5  ;;  %v441_v8 = vsel %vm16475_vm9, 0, %v440_v6  ;;  %v444_v9 = vsel %vm16475_vm9, 0, %v443_v7 }
  0x6f   :  { %v446_v10 = vld [vmem:[#allocation3 + $0x1c0] sm:$0x80]  ;;  %v449_v11 = vld [vmem:[#allocation3 + $0x1c8] sm:$0x80]  ;;  %442 = vst [vmem:[#allocation3 + $0x1b0] sm:$0x80] %v441_v8 }
  0x70   :  { %445 = vst [vmem:[#allocation3 + $0x1b8] sm:$0x80] %v444_v9  ;;  %v447_v12 = vsel %vm16475_vm9, 0, %v446_v10  ;;  %v450_v13 = vsel %vm16475_vm9, 0, %v449_v11  ;;  %v452_v14 = vld [vmem:[#allocation3 + $0x1d0] sm:$0x80] }
  0x71   :  { %v455_v15 = vld [vmem:[#allocation3 + $0x1d8] sm:$0x80]  ;;  %448 = vst [vmem:[#allocation3 + $0x1c0] sm:$0x80] %v447_v12  ;;  %451 = vst [vmem:[#allocation3 + $0x1c8] sm:$0x80] %v450_v13 }
  0x72   :  { %v453_v17 = vsel %vm16475_vm9, 0, %v452_v14  ;;  %v456_v18 = vsel %vm16475_vm9, 0, %v455_v15  ;;  %v458_v19 = vld [vmem:[#allocation3 + $0x1e0] sm:$0x80]  ;;  %v461_v20 = vld [vmem:[#allocation3 + $0x1e8] sm:$0x80] }
  0x73   :  { %454 = vst [vmem:[#allocation3 + $0x1d0] sm:$0x80] %v453_v17  ;;  %457 = vst [vmem:[#allocation3 + $0x1d8] sm:$0x80] %v456_v18  ;;  %v459_v21 = vsel %vm16475_vm9, 0, %v458_v19  ;;  %v462_v22 = vsel %vm16475_vm9, 0, %v461_v20 }
  0x74   :  { %v464_v23 = vld [vmem:[#allocation3 + $0x1f0] sm:$0x80]  ;;  %v467_v24 = vld [vmem:[#allocation3 + $0x1f8] sm:$0x80]  ;;  %460 = vst [vmem:[#allocation3 + $0x1e0] sm:$0x80] %v459_v21 }
  0x75   :  { %463 = vst [vmem:[#allocation3 + $0x1e8] sm:$0x80] %v462_v22  ;;  %v465_v25 = vsel %vm16475_vm9, 0, %v464_v23  ;;  %v468_v26 = vsel %vm16475_vm9, 0, %v467_v24  ;;  %v470_v27 = vld [vmem:[#allocation3 + $0x200] sm:$0x80] }
  0x76   :  { %v473_v28 = vld [vmem:[#allocation3 + $0x208] sm:$0x80]  ;;  %466 = vst [vmem:[#allocation3 + $0x1f0] sm:$0x80] %v465_v25  ;;  %469 = vst [vmem:[#allocation3 + $0x1f8] sm:$0x80] %v468_v26 }
  0x77   :  { %v471_v29 = vsel %vm16475_vm9, 0, %v470_v27  ;;  %v474_v2 = vsel %vm16475_vm9, 0, %v473_v28  ;;  %v476_v30 = vld [vmem:[#allocation3 + $0x210] sm:$0x80]  ;;  %v479_v31 = vld [vmem:[#allocation3 + $0x218] sm:$0x80] }
  0x78   :  { %472 = vst [vmem:[#allocation3 + $0x200] sm:$0x80] %v471_v29  ;;  %475 = vst [vmem:[#allocation3 + $0x208] sm:$0x80] %v474_v2  ;;  %v477_v32 = vsel %vm16475_vm9, 0, %v476_v30  ;;  %v480_v33 = vsel %vm16475_vm9, 0, %v479_v31 }
  0x79   :  { %v482_v34 = vld [vmem:[#allocation3 + $0x220] sm:$0x80]  ;;  %v485_v35 = vld [vmem:[#allocation3 + $0x228] sm:$0x80]  ;;  %478 = vst [vmem:[#allocation3 + $0x210] sm:$0x80] %v477_v32 }
  0x7a   :  { %481 = vst [vmem:[#allocation3 + $0x218] sm:$0x80] %v480_v33  ;;  %v483_v37 = vsel %vm16475_vm9, 0, %v482_v34  ;;  %v486_v38 = vsel %vm16475_vm9, 0, %v485_v35  ;;  %v488_v39 = vld [vmem:[#allocation3 + $0x230] sm:$0x80] }
  0x7b   :  { %v491_v40 = vld [vmem:[#allocation3 + $0x238] sm:$0x80]  ;;  %484 = vst [vmem:[#allocation3 + $0x220] sm:$0x80] %v483_v37  ;;  %487 = vst [vmem:[#allocation3 + $0x228] sm:$0x80] %v486_v38 }
  0x7c   :  { %v489_v41 = vsel %vm16475_vm9, 0, %v488_v39  ;;  %v492_v42 = vsel %vm16475_vm9, 0, %v491_v40  ;;  %v508_v43 = vld [vmem:[#allocation5] sm:$0x1]  ;;  %v511_v44 = vld [vmem:[#allocation5 + $0x8] sm:$0x1] }
  0x7d   :  { %490 = vst [vmem:[#allocation3 + $0x230] sm:$0x80] %v489_v41  ;;  %493 = vst [vmem:[#allocation3 + $0x238] sm:$0x80] %v492_v42  ;;  %v509_v45 = vsel %vm16625_vm11, 0, %v508_v43  ;;  %v512_v46 = vsel %vm16625_vm11, 0, %v511_v44 }
  0x7e   :  { %v514_v47 = vld [vmem:[#allocation5 + $0x10] sm:$0x1]  ;;  %v517_v48 = vld [vmem:[#allocation5 + $0x18] sm:$0x1]  ;;  %510 = vst [vmem:[#allocation5] sm:$0x1] %v509_v45 }
  0x7f   :  { %513 = vst [vmem:[#allocation5 + $0x8] sm:$0x1] %v512_v46  ;;  %v515_v49 = vsel %vm16625_vm11, 0, %v514_v47  ;;  %v518_v16 = vsel %vm16625_vm11, 0, %v517_v48  ;;  %v520_v50 = vld [vmem:[#allocation5 + $0x20] sm:$0x1] }
  0x80   :  { %v523_v51 = vld [vmem:[#allocation5 + $0x28] sm:$0x1]  ;;  %516 = vst [vmem:[#allocation5 + $0x10] sm:$0x1] %v515_v49  ;;  %519 = vst [vmem:[#allocation5 + $0x18] sm:$0x1] %v518_v16 }
  0x81   :  { %v521_v52 = vsel %vm16625_vm11, 0, %v520_v50  ;;  %v524_v53 = vsel %vm16625_vm11, 0, %v523_v51  ;;  %v526_v54 = vld [vmem:[#allocation5 + $0x30] sm:$0x1]  ;;  %v529_v55 = vld [vmem:[#allocation5 + $0x38] sm:$0x1] }
  0x82   :  { %522 = vst [vmem:[#allocation5 + $0x20] sm:$0x1] %v521_v52  ;;  %525 = vst [vmem:[#allocation5 + $0x28] sm:$0x1] %v524_v53  ;;  %v527_v56 = vsel %vm16625_vm11, 0, %v526_v54  ;;  %v530_v57 = vsel %vm16625_vm11, 0, %v529_v55 }
  0x83   :  { %v532_v58 = vld [vmem:[#allocation5 + $0x40] sm:$0x1]  ;;  %v535_v59 = vld [vmem:[#allocation5 + $0x48] sm:$0x1]  ;;  %528 = vst [vmem:[#allocation5 + $0x30] sm:$0x1] %v527_v56 }
  0x84   :  { %531 = vst [vmem:[#allocation5 + $0x38] sm:$0x1] %v530_v57  ;;  %v533_v60 = vsel %vm16625_vm11, 0, %v532_v58  ;;  %v536_v61 = vsel %vm16625_vm11, 0, %v535_v59  ;;  %v538_v62 = vld [vmem:[#allocation5 + $0x50] sm:$0x1] }
  0x85   :  { %v541_v63 = vld [vmem:[#allocation5 + $0x58] sm:$0x1]  ;;  %534 = vst [vmem:[#allocation5 + $0x40] sm:$0x1] %v533_v60  ;;  %537 = vst [vmem:[#allocation5 + $0x48] sm:$0x1] %v536_v61 }
  0x86   :  { %v539_v1 = vsel %vm16625_vm11, 0, %v538_v62  ;;  %v542_v3 = vsel %vm16625_vm11, 0, %v541_v63  ;;  %v544_v4 = vld [vmem:[#allocation5 + $0x60] sm:$0x1]  ;;  %v547_v5 = vld [vmem:[#allocation5 + $0x68] sm:$0x1] }
  0x87   :  { %540 = vst [vmem:[#allocation5 + $0x50] sm:$0x1] %v539_v1  ;;  %543 = vst [vmem:[#allocation5 + $0x58] sm:$0x1] %v542_v3  ;;  %v545_v6 = vsel %vm16625_vm11, 0, %v544_v4  ;;  %v548_v7 = vsel %vm16625_vm11, 0, %v547_v5 }
  0x88   :  { %v550_v8 = vld [vmem:[#allocation5 + $0x70] sm:$0x1]  ;;  %v553_v9 = vld [vmem:[#allocation5 + $0x78] sm:$0x1]  ;;  %546 = vst [vmem:[#allocation5 + $0x60] sm:$0x1] %v545_v6 }
  0x89   :  { %549 = vst [vmem:[#allocation5 + $0x68] sm:$0x1] %v548_v7  ;;  %v551_v10 = vsel %vm16625_vm11, 0, %v550_v8  ;;  %v554_v11 = vsel %vm16625_vm11, 0, %v553_v9  ;;  %v556_v12 = vld [vmem:[#allocation5 + $0x80] sm:$0x1] }
  0x8a   :  { %v559_v13 = vld [vmem:[#allocation5 + $0x88] sm:$0x1]  ;;  %552 = vst [vmem:[#allocation5 + $0x70] sm:$0x1] %v551_v10  ;;  %555 = vst [vmem:[#allocation5 + $0x78] sm:$0x1] %v554_v11 }
  0x8b   :  { %v557_v14 = vsel %vm16625_vm11, 0, %v556_v12  ;;  %v560_v15 = vsel %vm16625_vm11, 0, %v559_v13  ;;  %v562_v17 = vld [vmem:[#allocation5 + $0x90] sm:$0x1]  ;;  %v565_v18 = vld [vmem:[#allocation5 + $0x98] sm:$0x1] }
  0x8c   :  { %558 = vst [vmem:[#allocation5 + $0x80] sm:$0x1] %v557_v14  ;;  %561 = vst [vmem:[#allocation5 + $0x88] sm:$0x1] %v560_v15  ;;  %v563_v19 = vsel %vm16625_vm11, 0, %v562_v17  ;;  %v566_v20 = vsel %vm16625_vm11, 0, %v565_v18 }
  0x8d   :  { %v568_v21 = vld [vmem:[#allocation5 + $0xa0] sm:$0x1]  ;;  %v571_v22 = vld [vmem:[#allocation5 + $0xa8] sm:$0x1]  ;;  %564 = vst [vmem:[#allocation5 + $0x90] sm:$0x1] %v563_v19 }
  0x8e   :  { %567 = vst [vmem:[#allocation5 + $0x98] sm:$0x1] %v566_v20  ;;  %v569_v23 = vsel %vm16625_vm11, 0, %v568_v21  ;;  %v572_v24 = vsel %vm16625_vm11, 0, %v571_v22  ;;  %v574_v25 = vld [vmem:[#allocation5 + $0xb0] sm:$0x1] }
  0x8f   :  { %v577_v26 = vld [vmem:[#allocation5 + $0xb8] sm:$0x1]  ;;  %570 = vst [vmem:[#allocation5 + $0xa0] sm:$0x1] %v569_v23  ;;  %573 = vst [vmem:[#allocation5 + $0xa8] sm:$0x1] %v572_v24 }
  0x90   :  { %v575_v27 = vsel %vm16625_vm11, 0, %v574_v25  ;;  %v578_v28 = vsel %vm16625_vm11, 0, %v577_v26  ;;  %v580_v29 = vld [vmem:[#allocation5 + $0xc0] sm:$0x1]  ;;  %v583_v2 = vld [vmem:[#allocation5 + $0xc8] sm:$0x1] }
  0x91   :  { %576 = vst [vmem:[#allocation5 + $0xb0] sm:$0x1] %v575_v27  ;;  %579 = vst [vmem:[#allocation5 + $0xb8] sm:$0x1] %v578_v28  ;;  %v581_v30 = vsel %vm16625_vm11, 0, %v580_v29  ;;  %v584_v31 = vsel %vm16625_vm11, 0, %v583_v2 }
  0x92   :  { %v586_v32 = vld [vmem:[#allocation5 + $0xd0] sm:$0x1]  ;;  %v589_v33 = vld [vmem:[#allocation5 + $0xd8] sm:$0x1]  ;;  %582 = vst [vmem:[#allocation5 + $0xc0] sm:$0x1] %v581_v30 }
  0x93   :  { %585 = vst [vmem:[#allocation5 + $0xc8] sm:$0x1] %v584_v31  ;;  %v587_v34 = vsel %vm16625_vm11, 0, %v586_v32  ;;  %v590_v35 = vsel %vm16625_vm11, 0, %v589_v33  ;;  %v592_v37 = vld [vmem:[#allocation5 + $0xe0] sm:$0x1] }
  0x94   :  { %v595_v38 = vld [vmem:[#allocation5 + $0xe8] sm:$0x1]  ;;  %588 = vst [vmem:[#allocation5 + $0xd0] sm:$0x1] %v587_v34  ;;  %591 = vst [vmem:[#allocation5 + $0xd8] sm:$0x1] %v590_v35 }
  0x95   :  { %v593_v39 = vsel %vm16625_vm11, 0, %v592_v37  ;;  %v596_v40 = vsel %vm16625_vm11, 0, %v595_v38  ;;  %v598_v41 = vld [vmem:[#allocation5 + $0xf0] sm:$0x1]  ;;  %v601_v42 = vld [vmem:[#allocation5 + $0xf8] sm:$0x1] }
  0x96   :  { %594 = vst [vmem:[#allocation5 + $0xe0] sm:$0x1] %v593_v39  ;;  %597 = vst [vmem:[#allocation5 + $0xe8] sm:$0x1] %v596_v40  ;;  %v599_v43 = vsel %vm16625_vm11, 0, %v598_v41  ;;  %v602_v44 = vsel %vm16625_vm11, 0, %v601_v42 }
  0x97   :  { %v604_v45 = vld [vmem:[#allocation5 + $0x100] sm:$0x1]  ;;  %v607_v46 = vld [vmem:[#allocation5 + $0x108] sm:$0x1]  ;;  %600 = vst [vmem:[#allocation5 + $0xf0] sm:$0x1] %v599_v43 }
  0x98   :  { %603 = vst [vmem:[#allocation5 + $0xf8] sm:$0x1] %v602_v44  ;;  %v605_v47 = vsel %vm16625_vm11, 0, %v604_v45  ;;  %v608_v48 = vsel %vm16625_vm11, 0, %v607_v46  ;;  %v610_v49 = vld [vmem:[#allocation5 + $0x110] sm:$0x1] }
  0x99   :  { %v613_v16 = vld [vmem:[#allocation5 + $0x118] sm:$0x1]  ;;  %606 = vst [vmem:[#allocation5 + $0x100] sm:$0x1] %v605_v47  ;;  %609 = vst [vmem:[#allocation5 + $0x108] sm:$0x1] %v608_v48 }
  0x9a   :  { %v611_v50 = vsel %vm16625_vm11, 0, %v610_v49  ;;  %v614_v51 = vsel %vm16625_vm11, 0, %v613_v16  ;;  %v616_v52 = vld [vmem:[#allocation5 + $0x120] sm:$0x1]  ;;  %v619_v53 = vld [vmem:[#allocation5 + $0x128] sm:$0x1] }
  0x9b   :  { %612 = vst [vmem:[#allocation5 + $0x110] sm:$0x1] %v611_v50  ;;  %615 = vst [vmem:[#allocation5 + $0x118] sm:$0x1] %v614_v51  ;;  %v617_v54 = vsel %vm16625_vm11, 0, %v616_v52  ;;  %v620_v55 = vsel %vm16625_vm11, 0, %v619_v53 }
  0x9c   :  { %v622_v56 = vld [vmem:[#allocation5 + $0x130] sm:$0x1]  ;;  %v625_v57 = vld [vmem:[#allocation5 + $0x138] sm:$0x1]  ;;  %618 = vst [vmem:[#allocation5 + $0x120] sm:$0x1] %v617_v54 }
  0x9d   :  { %621 = vst [vmem:[#allocation5 + $0x128] sm:$0x1] %v620_v55  ;;  %v623_v58 = vsel %vm16625_vm11, 0, %v622_v56  ;;  %v626_v59 = vsel %vm16625_vm11, 0, %v625_v57  ;;  %vm629_vm13 = vsmask.f32 7950 }
  0x9e   :  { %v631_v60 = vld [vmem:[#allocation5 + $0x4] sm:$0x8]  ;;  %624 = vst [vmem:[#allocation5 + $0x130] sm:$0x1] %v623_v58  ;;  %627 = vst [vmem:[#allocation5 + $0x138] sm:$0x1] %v626_v59 }
  0x9f   :  { %vm16718_vm14 = vmand %vm628_vm12, %vm629_vm13  ;;  %v634_v62 = vld [vmem:[#allocation5 + $0xc] sm:$0x8]  ;;  %v637_v63 = vld [vmem:[#allocation5 + $0x14] sm:$0x8]  ;;  %s16802_s25 = smov 0  }
  0xa0   :  { %v632_v1 = vsel %vm16718_vm14, 0, %v631_v60  ;;  %v635_v3 = vsel %vm16718_vm14, 0, %v634_v62  ;;  %v638_v36 = vsel %vm16718_vm14, 0, %v637_v63  ;;  %v640_v4 = vld [vmem:[#allocation5 + $0x1c] sm:$0x8] }
  0xa1   :  { %633 = vst [vmem:[#allocation5 + $0x4] sm:$0x8] %v632_v1  ;;  %636 = vst [vmem:[#allocation5 + $0xc] sm:$0x8] %v635_v3  ;;  %v641_v5 = vsel %vm16718_vm14, 0, %v640_v4 }
  0xa2   :  { %639 = vst [vmem:[#allocation5 + $0x14] sm:$0x8] %v638_v36  ;;  %v643_v6 = vld [vmem:[#allocation5 + $0x24] sm:$0x8]  ;;  %v646_v7 = vld [vmem:[#allocation5 + $0x2c] sm:$0x8] }
  0xa3   :  { %642 = vst [vmem:[#allocation5 + $0x1c] sm:$0x8] %v641_v5  ;;  %v644_v8 = vsel %vm16718_vm14, 0, %v643_v6  ;;  %v647_v9 = vsel %vm16718_vm14, 0, %v646_v7  ;;  %v649_v10 = vld [vmem:[#allocation5 + $0x34] sm:$0x8] }
  0xa4   :  { %v652_v11 = vld [vmem:[#allocation5 + $0x3c] sm:$0x8]  ;;  %645 = vst [vmem:[#allocation5 + $0x24] sm:$0x8] %v644_v8  ;;  %648 = vst [vmem:[#allocation5 + $0x2c] sm:$0x8] %v647_v9 }
  0xa5   :  { %v650_v12 = vsel %vm16718_vm14, 0, %v649_v10  ;;  %v653_v13 = vsel %vm16718_vm14, 0, %v652_v11  ;;  %v655_v14 = vld [vmem:[#allocation5 + $0x44] sm:$0x8]  ;;  %v658_v15 = vld [vmem:[#allocation5 + $0x4c] sm:$0x8] }
  0xa6   :  { %651 = vst [vmem:[#allocation5 + $0x34] sm:$0x8] %v650_v12  ;;  %654 = vst [vmem:[#allocation5 + $0x3c] sm:$0x8] %v653_v13  ;;  %v656_v17 = vsel %vm16718_vm14, 0, %v655_v14  ;;  %v659_v18 = vsel %vm16718_vm14, 0, %v658_v15 }
  0xa7   :  { %v661_v19 = vld [vmem:[#allocation5 + $0x54] sm:$0x8]  ;;  %v664_v20 = vld [vmem:[#allocation5 + $0x5c] sm:$0x8]  ;;  %657 = vst [vmem:[#allocation5 + $0x44] sm:$0x8] %v656_v17 }
  0xa8   :  { %660 = vst [vmem:[#allocation5 + $0x4c] sm:$0x8] %v659_v18  ;;  %v662_v21 = vsel %vm16718_vm14, 0, %v661_v19  ;;  %v665_v22 = vsel %vm16718_vm14, 0, %v664_v20  ;;  %v667_v23 = vld [vmem:[#allocation5 + $0x64] sm:$0x8] }
  0xa9   :  { %v670_v24 = vld [vmem:[#allocation5 + $0x6c] sm:$0x8]  ;;  %663 = vst [vmem:[#allocation5 + $0x54] sm:$0x8] %v662_v21  ;;  %666 = vst [vmem:[#allocation5 + $0x5c] sm:$0x8] %v665_v22 }
  0xaa   :  { %v668_v25 = vsel %vm16718_vm14, 0, %v667_v23  ;;  %v671_v26 = vsel %vm16718_vm14, 0, %v670_v24  ;;  %v673_v27 = vld [vmem:[#allocation5 + $0x74] sm:$0x8]  ;;  %v676_v28 = vld [vmem:[#allocation5 + $0x7c] sm:$0x8] }
  0xab   :  { %669 = vst [vmem:[#allocation5 + $0x64] sm:$0x8] %v668_v25  ;;  %672 = vst [vmem:[#allocation5 + $0x6c] sm:$0x8] %v671_v26  ;;  %v674_v29 = vsel %vm16718_vm14, 0, %v673_v27  ;;  %v677_v2 = vsel %vm16718_vm14, 0, %v676_v28 }
  0xac   :  { %v679_v30 = vld [vmem:[#allocation5 + $0x84] sm:$0x8]  ;;  %v682_v31 = vld [vmem:[#allocation5 + $0x8c] sm:$0x8]  ;;  %675 = vst [vmem:[#allocation5 + $0x74] sm:$0x8] %v674_v29 }
  0xad   :  { %678 = vst [vmem:[#allocation5 + $0x7c] sm:$0x8] %v677_v2  ;;  %v680_v32 = vsel %vm16718_vm14, 0, %v679_v30  ;;  %v683_v33 = vsel %vm16718_vm14, 0, %v682_v31  ;;  %v685_v34 = vld [vmem:[#allocation5 + $0x94] sm:$0x8] }
  0xae   :  { %v688_v35 = vld [vmem:[#allocation5 + $0x9c] sm:$0x8]  ;;  %681 = vst [vmem:[#allocation5 + $0x84] sm:$0x8] %v680_v32  ;;  %684 = vst [vmem:[#allocation5 + $0x8c] sm:$0x8] %v683_v33 }
  0xaf   :  { %v686_v37 = vsel %vm16718_vm14, 0, %v685_v34  ;;  %v689_v38 = vsel %vm16718_vm14, 0, %v688_v35  ;;  %v691_v39 = vld [vmem:[#allocation5 + $0xa4] sm:$0x8]  ;;  %v694_v40 = vld [vmem:[#allocation5 + $0xac] sm:$0x8] }
  0xb0   :  { %687 = vst [vmem:[#allocation5 + $0x94] sm:$0x8] %v686_v37  ;;  %690 = vst [vmem:[#allocation5 + $0x9c] sm:$0x8] %v689_v38  ;;  %v692_v41 = vsel %vm16718_vm14, 0, %v691_v39  ;;  %v695_v42 = vsel %vm16718_vm14, 0, %v694_v40 }
  0xb1   :  { %v697_v43 = vld [vmem:[#allocation5 + $0xb4] sm:$0x8]  ;;  %v700_v44 = vld [vmem:[#allocation5 + $0xbc] sm:$0x8]  ;;  %693 = vst [vmem:[#allocation5 + $0xa4] sm:$0x8] %v692_v41 }
  0xb2   :  { %696 = vst [vmem:[#allocation5 + $0xac] sm:$0x8] %v695_v42  ;;  %v698_v45 = vsel %vm16718_vm14, 0, %v697_v43  ;;  %v701_v46 = vsel %vm16718_vm14, 0, %v700_v44  ;;  %v703_v47 = vld [vmem:[#allocation5 + $0xc4] sm:$0x8] }
  0xb3   :  { %v706_v48 = vld [vmem:[#allocation5 + $0xcc] sm:$0x8]  ;;  %699 = vst [vmem:[#allocation5 + $0xb4] sm:$0x8] %v698_v45  ;;  %702 = vst [vmem:[#allocation5 + $0xbc] sm:$0x8] %v701_v46 }
  0xb4   :  { %v704_v49 = vsel %vm16718_vm14, 0, %v703_v47  ;;  %v707_v16 = vsel %vm16718_vm14, 0, %v706_v48  ;;  %v709_v50 = vld [vmem:[#allocation5 + $0xd4] sm:$0x8]  ;;  %v712_v51 = vld [vmem:[#allocation5 + $0xdc] sm:$0x8] }
  0xb5   :  { %705 = vst [vmem:[#allocation5 + $0xc4] sm:$0x8] %v704_v49  ;;  %708 = vst [vmem:[#allocation5 + $0xcc] sm:$0x8] %v707_v16  ;;  %v710_v52 = vsel %vm16718_vm14, 0, %v709_v50  ;;  %v713_v53 = vsel %vm16718_vm14, 0, %v712_v51 }
  0xb6   :  { %v715_v54 = vld [vmem:[#allocation5 + $0xe4] sm:$0x8]  ;;  %v718_v55 = vld [vmem:[#allocation5 + $0xec] sm:$0x8]  ;;  %711 = vst [vmem:[#allocation5 + $0xd4] sm:$0x8] %v710_v52 }
  0xb7   :  { %714 = vst [vmem:[#allocation5 + $0xdc] sm:$0x8] %v713_v53  ;;  %v716_v56 = vsel %vm16718_vm14, 0, %v715_v54  ;;  %v719_v57 = vsel %vm16718_vm14, 0, %v718_v55  ;;  %v721_v58 = vld [vmem:[#allocation5 + $0xf4] sm:$0x8] }
  0xb8   :  { %v724_v59 = vld [vmem:[#allocation5 + $0xfc] sm:$0x8]  ;;  %717 = vst [vmem:[#allocation5 + $0xe4] sm:$0x8] %v716_v56  ;;  %720 = vst [vmem:[#allocation5 + $0xec] sm:$0x8] %v719_v57 }
  0xb9   :  { %v722_v60 = vsel %vm16718_vm14, 0, %v721_v58  ;;  %v725_v62 = vsel %vm16718_vm14, 0, %v724_v59  ;;  %v727_v63 = vld [vmem:[#allocation5 + $0x104] sm:$0x8]  ;;  %v730_v1 = vld [vmem:[#allocation5 + $0x10c] sm:$0x8] }
  0xba   :  { %723 = vst [vmem:[#allocation5 + $0xf4] sm:$0x8] %v722_v60  ;;  %726 = vst [vmem:[#allocation5 + $0xfc] sm:$0x8] %v725_v62  ;;  %v728_v3 = vsel %vm16718_vm14, 0, %v727_v63  ;;  %v731_v36 = vsel %vm16718_vm14, 0, %v730_v1 }
  0xbb   :  { %v733_v4 = vld [vmem:[#allocation5 + $0x114] sm:$0x8]  ;;  %v736_v5 = vld [vmem:[#allocation5 + $0x11c] sm:$0x8]  ;;  %729 = vst [vmem:[#allocation5 + $0x104] sm:$0x8] %v728_v3 }
  0xbc   :  { %732 = vst [vmem:[#allocation5 + $0x10c] sm:$0x8] %v731_v36  ;;  %v734_v6 = vsel %vm16718_vm14, 0, %v733_v4  ;;  %v737_v7 = vsel %vm16718_vm14, 0, %v736_v5  ;;  %v739_v8 = vld [vmem:[#allocation5 + $0x124] sm:$0x8] }
  0xbd   :  { %v742_v9 = vld [vmem:[#allocation5 + $0x12c] sm:$0x8]  ;;  %735 = vst [vmem:[#allocation5 + $0x114] sm:$0x8] %v734_v6  ;;  %738 = vst [vmem:[#allocation5 + $0x11c] sm:$0x8] %v737_v7 }
  0xbe   :  { %v740_v10 = vsel %vm16718_vm14, 0, %v739_v8  ;;  %v743_v11 = vsel %vm16718_vm14, 0, %v742_v9  ;;  %v745_v12 = vld [vmem:[#allocation5 + $0x134] sm:$0x8]  ;;  %v748_v13 = vld [vmem:[#allocation5 + $0x13c] sm:$0x8] }
  0xbf   :  { %741 = vst [vmem:[#allocation5 + $0x124] sm:$0x8] %v740_v10  ;;  %744 = vst [vmem:[#allocation5 + $0x12c] sm:$0x8] %v743_v11  ;;  %v746_v14 = vsel %vm16718_vm14, 0, %v745_v12  ;;  %v749_v15 = vsel %vm16718_vm14, 0, %v748_v13 }
  0xc0   :  { %747 = vst [vmem:[#allocation5 + $0x134] sm:$0x8] %v746_v14  ;;  %750 = vst [vmem:[#allocation5 + $0x13c] sm:$0x8] %v749_v15 }
  0xc1 LB: > { %v15595_v17 = vld [vmem:[%s21511_s1] sm:$0xff]   ;;  %v15596_v61 = vld [vmem:[%s21511_s1 + $0x8] sm:$0xff]   ;;  %s14397_s30 = sshll.u32 %s16229_s25, 7  ;;  %vm1232_vm15 = vcmask 261120   ;;  %s756_s25 = sadd.s32 1, %s16229_s25   ;;  %s16229_s25 = sphi %s16802_s25, %s756_s25  }
  0xc2   : > { %14756 = vmatprep.subr.bf16.mxu0 %v15595_v17  ;;  %15320 = vmatprep.subr.bf16.mxu1 %v15595_v17  ;;  %s16819_s16 = scalar_lea.vmem %s21510_s0, %s14397_s30  ;;  %s16984_s19 = scalar_lea.vmem [#allocation2], %s14397_s30 }
  0xc3   : > { %14757 = vmatpush3.bf16.msra.mxu0 %v15595_v17  ;;  %15322 = vmatpush3.bf16.msra.mxu1 %v15595_v17  ;;  %v15597_v18 = vld [vmem:[%s16819_s16] sm:$0xff]   ;;  %v15599_v20 = vld [vmem:[%s16819_s16 + $0x8] sm:$0xff]   ;;  %v15601_v22 = vld [vmem:[%s16819_s16 + $0x10] sm:$0xff]   ;;  %p753_p0 = scmp.ge.s32.totalorder %s756_s25, 4  }
  0xc4   : > { %14758 = vmatprep.subr.bf16.mxu0 %v15596_v61  ;;  %15321 = vmatprep.subr.bf16.mxu1 %v15596_v61  ;;  %v15598_v19 = vld [vmem:[%s16819_s16 + $0x400] sm:$0xff]   ;;  %v15600_v21 = vld [vmem:[%s16819_s16 + $0x408] sm:$0xff]   ;;  %v15602_v23 = vld [vmem:[%s16819_s16 + $0x410] sm:$0xff]   ;;  %s16232_s0 = smov (%p753_p0), 32   ;;  %s16233_s22 = smov (%p753_p0), 64   ;;  %vm4024_vm3 = vcmask (%p753_p0), 523520  }
  0xc5   : > { %14760 = vmatprep.mubr.msk.bf16.mxu0 %vm1232_vm15, %v15597_v18  ;;  %14824 = vmatprep.mubr.msk.bf16.mxu1 %vm1232_vm15, %v15598_v19  ;;  %v15603_v24 = vld [vmem:[%s16819_s16 + $0x18] sm:$0xff]   ;;  %v15605_v26 = vld [vmem:[%s16819_s16 + $0x20] sm:$0xff]   ;;  %v15607_v28 = vld [vmem:[%s16819_s16 + $0x28] sm:$0xff]   ;;  %vm3574_vm1 = vsmask.f32 (%p753_p0), 7938  ;;  %vm4409_vm4 = vcmask (%p753_p0), 785920  }
  0xc6   : > { %v15604_v25 = vld [vmem:[%s16819_s16 + $0x418] sm:$0xff]   ;;  %v15606_v27 = vld [vmem:[%s16819_s16 + $0x420] sm:$0xff]   ;;  %v15608_v29 = vld [vmem:[%s16819_s16 + $0x428] sm:$0xff]   ;;  %vm4410_vm5 = vsmask.f32 (%p753_p0), 7424  ;;  %vm7545_vm7 = vcmask (%p753_p0), 523264  }
  0xc7   : > { %14759 = vmatpush3.bf16.msra.mxu0 %v15596_v61  ;;  %15323 = vmatpush3.bf16.msra.mxu1 %v15596_v61  ;;  %v15609_v2 = vld [vmem:[%s16819_s16 + $0x30] sm:$0xff]   ;;  %v15611_v31 = vld [vmem:[%s16819_s16 + $0x38] sm:$0xff]   ;;  %v15613_v33 = vld [vmem:[%s16819_s16 + $0x40] sm:$0xff]   ;;  %vm8346_vm8 = vcmask (%p753_p0), 519168   ;;  %vm8733_vm9 = vsmask.f32 (%p753_p0), 3328 }
  0xc8   : > { %v15610_v30 = vld [vmem:[%s16819_s16 + $0x430] sm:$0xff]   ;;  %v15612_v32 = vld [vmem:[%s16819_s16 + $0x438] sm:$0xff]   ;;  %v15614_v34 = vld [vmem:[%s16819_s16 + $0x440] sm:$0xff]   ;;  %9208 = vmatprep.subr.bf16.mxu1 (%p753_p0), %v21524_v0  ;;  %vm10559_vm12 = vcmask (%p753_p0), 517120   ;;  %vm10612_vm13 = vcmask (%p753_p0), 1041920   ;;  %vm10855_vm14 = vcmask (%p753_p0), 1041409  }
  0xc9   : > { %v15615_v35 = vld [vmem:[%s16819_s16 + $0x48] sm:$0xff]   ;;  %v15617_v38 = vld [vmem:[%s16819_s16 + $0x50] sm:$0xff]   ;;  %v15619_v40 = vld [vmem:[%s16819_s16 + $0x58] sm:$0xff]  }
  0xca   : > { %14761 = vmatmul.mubr.msk.bf16.vlgmr.msra.gmra.mrb[0].mxu0 %vm1232_vm15, %v15599_v20  ;;  %14825 = vmatmul.mubr.msk.bf16.vlgmr.msra.gmra.mrb[0].mxu1 %vm1232_vm15, %v15600_v21  ;;  %v15616_v37 = vld [vmem:[%s16819_s16 + $0x448] sm:$0xff]   ;;  %v15618_v39 = vld [vmem:[%s16819_s16 + $0x450] sm:$0xff]   ;;  %v15620_v41 = vld [vmem:[%s16819_s16 + $0x458] sm:$0xff]  }
  0xcb   : > { %14764 = vmatprep.mubr.msk.bf16.mxu0 %vm1232_vm15, %v15601_v22  ;;  %14828 = vmatprep.mubr.msk.bf16.mxu1 %vm1232_vm15, %v15602_v23  ;;  %v15621_v42 = vld [vmem:[%s16819_s16 + $0x60] sm:$0xff]   ;;  %v15623_v44 = vld [vmem:[%s16819_s16 + $0x68] sm:$0xff]   ;;  %v15625_v46 = vld [vmem:[%s16819_s16 + $0x70] sm:$0xff]  }
  0xcc   : > { %v15622_v43 = vld [vmem:[%s16819_s16 + $0x460] sm:$0xff]   ;;  %v15624_v45 = vld [vmem:[%s16819_s16 + $0x468] sm:$0xff]   ;;  %v15626_v47 = vld [vmem:[%s16819_s16 + $0x470] sm:$0xff]  }
  0xcd   : > { %v15627_v48 = vld [vmem:[%s16819_s16 + $0x78] sm:$0xff]   ;;  %v15629_v16 = vld [vmem:[%s16819_s16 + $0x200] sm:$0xff]   ;;  %v15631_v51 = vld [vmem:[%s16819_s16 + $0x208] sm:$0xff]  }
  0xce   : > { %v15628_v49 = vld [vmem:[%s16819_s16 + $0x478] sm:$0xff]   ;;  %v15630_v50 = vld [vmem:[%s16819_s16 + $0x600] sm:$0xff]   ;;  %v15632_v52 = vld [vmem:[%s16819_s16 + $0x608] sm:$0xff]  }
  0xcf   : > { %v15633_v53 = vld [vmem:[%s16819_s16 + $0x210] sm:$0xff]   ;;  %v15635_v55 = vld [vmem:[%s16819_s16 + $0x218] sm:$0xff]   ;;  %v15637_v57 = vld [vmem:[%s16819_s16 + $0x220] sm:$0xff]  }
  0xd0   : > { %v15634_v54 = vld [vmem:[%s16819_s16 + $0x610] sm:$0xff]   ;;  %v15636_v56 = vld [vmem:[%s16819_s16 + $0x618] sm:$0xff]   ;;  %v15638_v58 = vld [vmem:[%s16819_s16 + $0x620] sm:$0xff]  }
  0xd1   : > { %v15639_v59 = vld [vmem:[%s16819_s16 + $0x228] sm:$0xff]   ;;  %v15641_v62 = vld [vmem:[%s16819_s16 + $0x230] sm:$0xff]   ;;  %v15643_v1 = vld [vmem:[%s16819_s16 + $0x238] sm:$0xff]  }
  0xd2   : > { %14765 = vmatmul.mubr.msk.bf16.gmra.mrb[4].mxu0 %vm1232_vm15, %v15603_v24  ;;  %14829 = vmatmul.mubr.msk.bf16.gmra.mrb[4].mxu1 %vm1232_vm15, %v15604_v25  ;;  %v15640_v60 = vld [vmem:[%s16819_s16 + $0x628] sm:$0xff]   ;;  %v15642_v63 = vld [vmem:[%s16819_s16 + $0x630] sm:$0xff]   ;;  %v15644_v3 = vld [vmem:[%s16819_s16 + $0x638] sm:$0xff]  }
  0xd3   : > { %14768 = vmatprep.mubr.msk.bf16.mxu0 %vm1232_vm15, %v15605_v26  ;;  %14832 = vmatprep.mubr.msk.bf16.mxu1 %vm1232_vm15, %v15606_v27  ;;  %v15645_v36 = vld [vmem:[%s16819_s16 + $0x240] sm:$0xff]   ;;  %v15647_v5 = vld [vmem:[%s16819_s16 + $0x248] sm:$0xff]   ;;  %v15649_v7 = vld [vmem:[%s16819_s16 + $0x250] sm:$0xff]  }
  0xd4   : > { %v15646_v4 = vld [vmem:[%s16819_s16 + $0x640] sm:$0xff]   ;;  %v15648_v6 = vld [vmem:[%s16819_s16 + $0x648] sm:$0xff]   ;;  %v15650_v8 = vld [vmem:[%s16819_s16 + $0x650] sm:$0xff]  }
  0xd5   : > { %v15651_v9 = vld [vmem:[%s16819_s16 + $0x258] sm:$0xff]   ;;  %v15653_v11 = vld [vmem:[%s16819_s16 + $0x260] sm:$0xff]   ;;  %v15655_v13 = vld [vmem:[%s16819_s16 + $0x268] sm:$0xff]  }
  0xd6   : > { %v15652_v10 = vld [vmem:[%s16819_s16 + $0x658] sm:$0xff]   ;;  %v15654_v12 = vld [vmem:[%s16819_s16 + $0x660] sm:$0xff]   ;;  %v15656_v14 = vld [vmem:[%s16819_s16 + $0x668] sm:$0xff]  }
  0xd7   : > { %v15657_v15 = vld [vmem:[%s16819_s16 + $0x270] sm:$0xff]   ;;  %v15659_v61 = vld [vmem:[%s16819_s16 + $0x278] sm:$0xff]   ;;  %v16952_v19 = vld [vmem:[%s21512_s2] ss:$0 sm:$0xff] }
  0xd8   : > { %v15658_v17 = vld [vmem:[%s16819_s16 + $0x670] sm:$0xff]   ;;  %v15660_v18 = vld [vmem:[%s16819_s16 + $0x678] sm:$0xff]   ;;  %vm17581_vm2 = vmand (%p753_p0), %vm1232_vm15, %vm3574_vm1 }
  0xd9   :  { %vm17938_vm6 = vmand (%p753_p0), %vm4409_vm4, %vm4410_vm5 }
  0xda   : > { %14769 = vmatmul.mubr.msk.bf16.gmra.mrb[8].mxu0 %vm1232_vm15, %v15607_v28  ;;  %14833 = vmatmul.mubr.msk.bf16.gmra.mrb[8].mxu1 %vm1232_vm15, %v15608_v29  ;;  %vm19387_vm10 = vmand (%p753_p0), %vm8346_vm8, %vm3574_vm1  ;;  %vm10861_vm1 = vcmask (%p753_p0), 1043459  }
  0xdb   : > { %14772 = vmatprep.mubr.msk.bf16.mxu0 %vm1232_vm15, %v15609_v2  ;;  %14836 = vmatprep.mubr.msk.bf16.mxu1 %vm1232_vm15, %v15610_v30  ;;  %vm19399_vm11 = vmand (%p753_p0), %vm8346_vm8, %vm8733_vm9 }
  0xe2   : > { %14773 = vmatmul.mubr.msk.bf16.gmra.mrb[12].mxu0 %vm1232_vm15, %v15611_v31  ;;  %14837 = vmatmul.mubr.msk.bf16.gmra.mrb[12].mxu1 %vm1232_vm15, %v15612_v32 }
  0xe3   : > { %14776 = vmatprep.mubr.msk.bf16.mxu0 %vm1232_vm15, %v15613_v33  ;;  %14840 = vmatprep.mubr.msk.bf16.mxu1 %vm1232_vm15, %v15614_v34 }
  0xea   : > { %14777 = vmatmul.mubr.msk.bf16.gmra.mrb[16].mxu0 %vm1232_vm15, %v15615_v35  ;;  %14841 = vmatmul.mubr.msk.bf16.gmra.mrb[16].mxu1 %vm1232_vm15, %v15616_v37 }
  0xeb   : > { %14780 = vmatprep.mubr.msk.bf16.mxu0 %vm1232_vm15, %v15617_v38  ;;  %14844 = vmatprep.mubr.msk.bf16.mxu1 %vm1232_vm15, %v15618_v39 }
  0xf2   : > { %14781 = vmatmul.mubr.msk.bf16.gmra.mrb[20].mxu0 %vm1232_vm15, %v15619_v40  ;;  %14845 = vmatmul.mubr.msk.bf16.gmra.mrb[20].mxu1 %vm1232_vm15, %v15620_v41 }
  0xf3   : > { %14784 = vmatprep.mubr.msk.bf16.mxu0 %vm1232_vm15, %v15621_v42  ;;  %14848 = vmatprep.mubr.msk.bf16.mxu1 %vm1232_vm15, %v15622_v43 }
  0xfa   : > { %14785 = vmatmul.mubr.msk.bf16.gmra.mrb[24].mxu0 %vm1232_vm15, %v15623_v44  ;;  %14849 = vmatmul.mubr.msk.bf16.gmra.mrb[24].mxu1 %vm1232_vm15, %v15624_v45 }
  0xfb   : > { %14788 = vmatprep.mubr.msk.bf16.mxu0 %vm1232_vm15, %v15625_v46  ;;  %14852 = vmatprep.mubr.msk.bf16.mxu1 %vm1232_vm15, %v15626_v47 }
 0x102   : > { %14789 = vmatmul.mubr.msk.bf16.gmra.mrb[28].mxu0 %vm1232_vm15, %v15627_v48  ;;  %14853 = vmatmul.mubr.msk.bf16.gmra.mrb[28].mxu1 %vm1232_vm15, %v15628_v49 }
 0x103   : > { %14792 = vmatprep.mubr.msk.bf16.mxu0 %vm1232_vm15, %v15629_v16  ;;  %14856 = vmatprep.mubr.msk.bf16.mxu1 %vm1232_vm15, %v15630_v50 }
 0x10a   : > { %14793 = vmatmul.mubr.msk.bf16.gmra.mrb[32].mxu0 %vm1232_vm15, %v15631_v51  ;;  %14857 = vmatmul.mubr.msk.bf16.gmra.mrb[32].mxu1 %vm1232_vm15, %v15632_v52 }
 0x10b   : > { %14796 = vmatprep.mubr.msk.bf16.mxu0 %vm1232_vm15, %v15633_v53  ;;  %14860 = vmatprep.mubr.msk.bf16.mxu1 %vm1232_vm15, %v15634_v54 }
 0x112   : > { %14797 = vmatmul.mubr.msk.bf16.gmra.mrb[36].mxu0 %vm1232_vm15, %v15635_v55  ;;  %14861 = vmatmul.mubr.msk.bf16.gmra.mrb[36].mxu1 %vm1232_vm15, %v15636_v56 }
 0x113   : > { %14800 = vmatprep.mubr.msk.bf16.mxu0 %vm1232_vm15, %v15637_v57  ;;  %14864 = vmatprep.mubr.msk.bf16.mxu1 %vm1232_vm15, %v15638_v58 }
 0x11a   : > { %14801 = vmatmul.mubr.msk.bf16.gmra.mrb[40].mxu0 %vm1232_vm15, %v15639_v59  ;;  %14865 = vmatmul.mubr.msk.bf16.gmra.mrb[40].mxu1 %vm1232_vm15, %v15640_v60 }
 0x11b   : > { %14804 = vmatprep.mubr.msk.bf16.mxu0 %vm1232_vm15, %v15641_v62  ;;  %14868 = vmatprep.mubr.msk.bf16.mxu1 %vm1232_vm15, %v15642_v63 }
 0x122   : > { %14805 = vmatmul.mubr.msk.bf16.gmra.mrb[44].mxu0 %vm1232_vm15, %v15643_v1  ;;  %14869 = vmatmul.mubr.msk.bf16.gmra.mrb[44].mxu1 %vm1232_vm15, %v15644_v3 }
 0x123   : > { %14808 = vmatprep.mubr.msk.bf16.mxu0 %vm1232_vm15, %v15645_v36  ;;  %14872 = vmatprep.mubr.msk.bf16.mxu1 %vm1232_vm15, %v15646_v4 }
 0x12a   : > { %14809 = vmatmul.mubr.msk.bf16.gmra.mrb[48].mxu0 %vm1232_vm15, %v15647_v5  ;;  %14873 = vmatmul.mubr.msk.bf16.gmra.mrb[48].mxu1 %vm1232_vm15, %v15648_v6 }
 0x12b   : > { %14812 = vmatprep.mubr.msk.bf16.mxu0 %vm1232_vm15, %v15649_v7  ;;  %14876 = vmatprep.mubr.msk.bf16.mxu1 %vm1232_vm15, %v15650_v8 }
 0x132   : > { %14813 = vmatmul.mubr.msk.bf16.gmra.mrb[52].mxu0 %vm1232_vm15, %v15651_v9  ;;  %14877 = vmatmul.mubr.msk.bf16.gmra.mrb[52].mxu1 %vm1232_vm15, %v15652_v10 }
 0x133   : > { %14816 = vmatprep.mubr.msk.bf16.mxu0 %vm1232_vm15, %v15653_v11  ;;  %14880 = vmatprep.mubr.msk.bf16.mxu1 %vm1232_vm15, %v15654_v12 }
 0x13a   : > { %14817 = vmatmul.mubr.msk.bf16.gmra.mrb[56].mxu0 %vm1232_vm15, %v15655_v13  ;;  %14881 = vmatmul.mubr.msk.bf16.gmra.mrb[56].mxu1 %vm1232_vm15, %v15656_v14 }
 0x13b   : > { %14820 = vmatprep.mubr.msk.bf16.mxu0 %vm1232_vm15, %v15657_v15  ;;  %14884 = vmatprep.mubr.msk.bf16.mxu1 %vm1232_vm15, %v15658_v17 }
 0x142   : > { %14821 = vmatmul.mubr.msk.bf16.gmra.mrb[60].mxu0 %vm1232_vm15, %v15659_v61  ;;  %14885 = vmatmul.mubr.msk.bf16.gmra.mrb[60].mxu1 %vm1232_vm15, %v15660_v18 }
 0x19d   : > { %v14762_v20 = vpop.f32.mrb[0].mxu0  ;;  %v14826_v21 = vpop.f32.mrb[0].mxu1 }
 0x19e   : > { %v1468_v22 = vadd.f32 %v14762_v20, %v16952_v19  ;;  %v1724_v23 = vadd.f32 %v14826_v21, %v16952_v19  ;;  %v1459_v24 = vpop.f32.mrb[1].mxu0  ;;  %v1715_v25 = vpop.f32.mrb[1].mxu1 }
 0x19f   : > { %v1460_v26 = vadd.f32 %v16952_v19, %v1459_v24  ;;  %v1716_v27 = vadd.f32 %v16952_v19, %v1715_v25  ;;  %v14763_v28 = vpop.f32.mrb[2].mxu0  ;;  %v14827_v29 = vpop.f32.mrb[2].mxu1 }
 0x1a0   : > { %v1471_v2 = vadd.f32 %v14763_v28, %v16952_v19  ;;  %v1727_v30 = vadd.f32 %v14827_v29, %v16952_v19  ;;  %v1462_v31 = vpop.f32.mrb[3].mxu0  ;;  %v1718_v32 = vpop.f32.mrb[3].mxu1  ;;  %v1972_v33 = vmax.f32 %v1468_v22, 0.0  ;;  %v2036_v34 = vmax.f32 %v1724_v23, 0.0 }
 0x1a1   : > { %v1970_v35 = vmax.f32 %v1460_v26, 0.0  ;;  %v2034_v37 = vmax.f32 %v1716_v27, 0.0  ;;  %v1463_v38 = vadd.f32 %v16952_v19, %v1462_v31  ;;  %v1719_v39 = vadd.f32 %v16952_v19, %v1718_v32 }
 0x1a2   : > { %v1973_v40 = vmax.f32 %v1471_v2, 0.0  ;;  %v2037_v41 = vmax.f32 %v1727_v30, 0.0  ;;  %v2104_v42 = vsel %vm1232_vm15, %v1972_v33, -inf  ;;  %v2200_v43 = vsel %vm1232_vm15, %v2036_v34, -inf }
 0x1a3   : > { %v2098_v44 = vsel %vm1232_vm15, %v1970_v35, -inf  ;;  %v2194_v45 = vsel %vm1232_vm15, %v2034_v37, -inf  ;;  %v1971_v48 = vmax.f32 %v1463_v38, 0.0  ;;  %v2035_v49 = vmax.f32 %v1719_v39, 0.0 }
 0x1a4   : > { %v2107_v53 = vsel %vm1232_vm15, %v1973_v40, -inf  ;;  %v2203_v54 = vsel %vm1232_vm15, %v2037_v41, -inf }
 0x1a5   : > { %v14766_v46 = vpop.f32.mrb[4].mxu0  ;;  %v14830_v47 = vpop.f32.mrb[4].mxu1  ;;  %v2101_v26 = vsel %vm1232_vm15, %v1971_v48, -inf  ;;  %v2197_v27 = vsel %vm1232_vm15, %v2035_v49, -inf }
 0x1a6   : > { %v1484_v16 = vadd.f32 %v14766_v46, %v16952_v19  ;;  %v1740_v50 = vadd.f32 %v14830_v47, %v16952_v19  ;;  %v1475_v51 = vpop.f32.mrb[5].mxu0  ;;  %v1731_v52 = vpop.f32.mrb[5].mxu1 }
 0x1a7   : > { %v1476_v55 = vadd.f32 %v16952_v19, %v1475_v51  ;;  %v1732_v56 = vadd.f32 %v16952_v19, %v1731_v52  ;;  %v14767_v57 = vpop.f32.mrb[6].mxu0  ;;  %v14831_v58 = vpop.f32.mrb[6].mxu1 }
 0x1a8   : > { %v1976_v59 = vmax.f32 %v1484_v16, 0.0  ;;  %v2040_v60 = vmax.f32 %v1740_v50, 0.0  ;;  %v1487_v62 = vadd.f32 %v14767_v57, %v16952_v19  ;;  %v1743_v63 = vadd.f32 %v14831_v58, %v16952_v19  ;;  %v1478_v1 = vpop.f32.mrb[7].mxu0  ;;  %v1734_v3 = vpop.f32.mrb[7].mxu1 }
 0x1a9   : > { %v1974_v36 = vmax.f32 %v1476_v55, 0.0  ;;  %v2038_v4 = vmax.f32 %v1732_v56, 0.0  ;;  %v1479_v5 = vadd.f32 %v16952_v19, %v1478_v1  ;;  %v1735_v6 = vadd.f32 %v16952_v19, %v1734_v3 }
 0x1aa   : > { %v2105_v7 = vsel %vm1232_vm15, %v1976_v59, -inf  ;;  %v2201_v8 = vsel %vm1232_vm15, %v2040_v60, -inf  ;;  %v1977_v9 = vmax.f32 %v1487_v62, 0.0  ;;  %v2041_v10 = vmax.f32 %v1743_v63, 0.0 }
 0x1ab   : > { %v2106_v11 = vmax.f32 %v2104_v42, %v2105_v7  ;;  %v2202_v12 = vmax.f32 %v2200_v43, %v2201_v8  ;;  %v2099_v13 = vsel %vm1232_vm15, %v1974_v36, -inf  ;;  %v2195_v14 = vsel %vm1232_vm15, %v2038_v4, -inf }
 0x1ac   : > { %v2100_v15 = vmax.f32 %v2098_v44, %v2099_v13  ;;  %v2196_v17 = vmax.f32 %v2194_v45, %v2195_v14  ;;  %v2108_v61 = vsel %vm1232_vm15, %v1977_v9, -inf  ;;  %v2204_v18 = vsel %vm1232_vm15, %v2041_v10, -inf }
 0x1ad   : > { %2295 = vst.msk [vmem:[%s16984_s19 + $0x10] sm:$0xff] %vm1232_vm15, %v2106_v11  ;;  %2327 = vst.msk [vmem:[%s16984_s19 + $0x410] sm:$0xff] %vm1232_vm15, %v2202_v12  ;;  %v2109_v20 = vmax.f32 %v2107_v53, %v2108_v61  ;;  %v2205_v21 = vmax.f32 %v2203_v54, %v2204_v18  ;;  %v1975_v22 = vmax.f32 %v1479_v5, 0.0  ;;  %v2039_v23 = vmax.f32 %v1735_v6, 0.0  ;;  %v14770_v24 = vpop.f32.mrb[8].mxu0  ;;  %v14834_v25 = vpop.f32.mrb[8].mxu1 }
 0x1ae   : > { %2293 = vst.msk [vmem:[%s16984_s19] sm:$0xff] %vm1232_vm15, %v2100_v15  ;;  %2325 = vst.msk [vmem:[%s16984_s19 + $0x400] sm:$0xff] %vm1232_vm15, %v2196_v17  ;;  %v1500_v28 = vadd.f32 %v14770_v24, %v16952_v19  ;;  %v1756_v29 = vadd.f32 %v14834_v25, %v16952_v19  ;;  %v1491_v2 = vpop.f32.mrb[9].mxu0  ;;  %v1747_v30 = vpop.f32.mrb[9].mxu1 }
 0x1af   : > { %2296 = vst.msk [vmem:[%s16984_s19 + $0x18] sm:$0xff] %vm1232_vm15, %v2109_v20  ;;  %2328 = vst.msk [vmem:[%s16984_s19 + $0x418] sm:$0xff] %vm1232_vm15, %v2205_v21  ;;  %v2102_v31 = vsel %vm1232_vm15, %v1975_v22, -inf  ;;  %v2198_v32 = vsel %vm1232_vm15, %v2039_v23, -inf  ;;  %v1492_v33 = vadd.f32 %v16952_v19, %v1491_v2  ;;  %v1748_v34 = vadd.f32 %v16952_v19, %v1747_v30  ;;  %v14771_v35 = vpop.f32.mrb[10].mxu0  ;;  %v14835_v37 = vpop.f32.mrb[10].mxu1 }
 0x1b0   : > { %v2103_v38 = vmax.f32 %v2101_v26, %v2102_v31  ;;  %v2199_v39 = vmax.f32 %v2197_v27, %v2198_v32  ;;  %v1980_v40 = vmax.f32 %v1500_v28, 0.0  ;;  %v2044_v41 = vmax.f32 %v1756_v29, 0.0  ;;  %v1494_v42 = vpop.f32.mrb[11].mxu0  ;;  %v1750_v43 = vpop.f32.mrb[11].mxu1 }
 0x1b1   : > { %v1978_v44 = vmax.f32 %v1492_v33, 0.0  ;;  %v2042_v45 = vmax.f32 %v1748_v34, 0.0  ;;  %v1503_v46 = vadd.f32 %v14771_v35, %v16952_v19  ;;  %v1759_v47 = vadd.f32 %v14835_v37, %v16952_v19 }
 0x1b2   : > { %2294 = vst.msk [vmem:[%s16984_s19 + $0x8] sm:$0xff] %vm1232_vm15, %v2103_v38  ;;  %2326 = vst.msk [vmem:[%s16984_s19 + $0x408] sm:$0xff] %vm1232_vm15, %v2199_v39  ;;  %v1495_v48 = vadd.f32 %v16952_v19, %v1494_v42  ;;  %v1751_v49 = vadd.f32 %v16952_v19, %v1750_v43  ;;  %v2116_v51 = vsel %vm1232_vm15, %v1980_v40, -inf  ;;  %v2212_v52 = vsel %vm1232_vm15, %v2044_v41, -inf }
 0x1b3   : > { %v1981_v16 = vmax.f32 %v1503_v46, 0.0  ;;  %v2045_v50 = vmax.f32 %v1759_v47, 0.0  ;;  %v2110_v53 = vsel %vm1232_vm15, %v1978_v44, -inf  ;;  %v2206_v54 = vsel %vm1232_vm15, %v2042_v45, -inf }
 0x1b4   : > { %v1979_v57 = vmax.f32 %v1495_v48, 0.0  ;;  %v2043_v58 = vmax.f32 %v1751_v49, 0.0 }
 0x1b5   : > { %v14774_v55 = vpop.f32.mrb[12].mxu0  ;;  %v14838_v56 = vpop.f32.mrb[12].mxu1  ;;  %v2119_v1 = vsel %vm1232_vm15, %v1981_v16, -inf  ;;  %v2215_v3 = vsel %vm1232_vm15, %v2045_v50, -inf }
 0x1b6   : > { %v1516_v59 = vadd.f32 %v14774_v55, %v16952_v19  ;;  %v1772_v60 = vadd.f32 %v14838_v56, %v16952_v19  ;;  %v1507_v62 = vpop.f32.mrb[13].mxu0  ;;  %v1763_v63 = vpop.f32.mrb[13].mxu1  ;;  %v2113_v35 = vsel %vm1232_vm15, %v1979_v57, -inf  ;;  %v2209_v37 = vsel %vm1232_vm15, %v2043_v58, -inf }
 0x1b7   : > { %v1508_v36 = vadd.f32 %v16952_v19, %v1507_v62  ;;  %v1764_v4 = vadd.f32 %v16952_v19, %v1763_v63  ;;  %v14775_v5 = vpop.f32.mrb[14].mxu0  ;;  %v14839_v6 = vpop.f32.mrb[14].mxu1 }
 0x1b8   : > { %v1984_v7 = vmax.f32 %v1516_v59, 0.0  ;;  %v2048_v8 = vmax.f32 %v1772_v60, 0.0  ;;  %v1519_v9 = vadd.f32 %v14775_v5, %v16952_v19  ;;  %v1775_v10 = vadd.f32 %v14839_v6, %v16952_v19  ;;  %v1510_v11 = vpop.f32.mrb[15].mxu0  ;;  %v1766_v12 = vpop.f32.mrb[15].mxu1 }
 0x1b9   : > { %v1982_v13 = vmax.f32 %v1508_v36, 0.0  ;;  %v2046_v14 = vmax.f32 %v1764_v4, 0.0  ;;  %v1511_v15 = vadd.f32 %v16952_v19, %v1510_v11  ;;  %v1767_v17 = vadd.f32 %v16952_v19, %v1766_v12 }
 0x1ba   : > { %v2117_v61 = vsel %vm1232_vm15, %v1984_v7, -inf  ;;  %v2213_v18 = vsel %vm1232_vm15, %v2048_v8, -inf  ;;  %v1985_v20 = vmax.f32 %v1519_v9, 0.0  ;;  %v2049_v21 = vmax.f32 %v1775_v10, 0.0 }
 0x1bb   : > { %v2118_v22 = vmax.f32 %v2116_v51, %v2117_v61  ;;  %v2214_v23 = vmax.f32 %v2212_v52, %v2213_v18  ;;  %v2111_v24 = vsel %vm1232_vm15, %v1982_v13, -inf  ;;  %v2207_v25 = vsel %vm1232_vm15, %v2046_v14, -inf }
 0x1bc   : > { %v2112_v26 = vmax.f32 %v2110_v53, %v2111_v24  ;;  %v2208_v27 = vmax.f32 %v2206_v54, %v2207_v25  ;;  %v2120_v28 = vsel %vm1232_vm15, %v1985_v20, -inf  ;;  %v2216_v29 = vsel %vm1232_vm15, %v2049_v21, -inf }
 0x1bd   : > { %2299 = vst.msk [vmem:[%s16984_s19 + $0x30] sm:$0xff] %vm1232_vm15, %v2118_v22  ;;  %2331 = vst.msk [vmem:[%s16984_s19 + $0x430] sm:$0xff] %vm1232_vm15, %v2214_v23  ;;  %v2121_v2 = vmax.f32 %v2119_v1, %v2120_v28  ;;  %v2217_v30 = vmax.f32 %v2215_v3, %v2216_v29  ;;  %v1983_v31 = vmax.f32 %v1511_v15, 0.0  ;;  %v2047_v32 = vmax.f32 %v1767_v17, 0.0  ;;  %v14778_v33 = vpop.f32.mrb[16].mxu0  ;;  %v14842_v34 = vpop.f32.mrb[16].mxu1 }
 0x1be   : > { %2297 = vst.msk [vmem:[%s16984_s19 + $0x20] sm:$0xff] %vm1232_vm15, %v2112_v26  ;;  %2329 = vst.msk [vmem:[%s16984_s19 + $0x420] sm:$0xff] %vm1232_vm15, %v2208_v27  ;;  %v1532_v38 = vadd.f32 %v14778_v33, %v16952_v19  ;;  %v1788_v39 = vadd.f32 %v14842_v34, %v16952_v19  ;;  %v1523_v40 = vpop.f32.mrb[17].mxu0  ;;  %v1779_v41 = vpop.f32.mrb[17].mxu1 }
 0x1bf   : > { %2300 = vst.msk [vmem:[%s16984_s19 + $0x38] sm:$0xff] %vm1232_vm15, %v2121_v2  ;;  %2332 = vst.msk [vmem:[%s16984_s19 + $0x438] sm:$0xff] %vm1232_vm15, %v2217_v30  ;;  %v2114_v42 = vsel %vm1232_vm15, %v1983_v31, -inf  ;;  %v2210_v43 = vsel %vm1232_vm15, %v2047_v32, -inf  ;;  %v1524_v44 = vadd.f32 %v16952_v19, %v1523_v40  ;;  %v1780_v45 = vadd.f32 %v16952_v19, %v1779_v41  ;;  %v14779_v46 = vpop.f32.mrb[18].mxu0  ;;  %v14843_v47 = vpop.f32.mrb[18].mxu1 }
 0x1c0   : > { %v2115_v48 = vmax.f32 %v2113_v35, %v2114_v42  ;;  %v2211_v49 = vmax.f32 %v2209_v37, %v2210_v43  ;;  %v1988_v16 = vmax.f32 %v1532_v38, 0.0  ;;  %v2052_v50 = vmax.f32 %v1788_v39, 0.0  ;;  %v1526_v51 = vpop.f32.mrb[19].mxu0  ;;  %v1782_v52 = vpop.f32.mrb[19].mxu1 }
 0x1c1   : > { %v1986_v53 = vmax.f32 %v1524_v44, 0.0  ;;  %v2050_v54 = vmax.f32 %v1780_v45, 0.0  ;;  %v1535_v55 = vadd.f32 %v14779_v46, %v16952_v19  ;;  %v1791_v56 = vadd.f32 %v14843_v47, %v16952_v19 }
 0x1c2   : > { %2298 = vst.msk [vmem:[%s16984_s19 + $0x28] sm:$0xff] %vm1232_vm15, %v2115_v48  ;;  %2330 = vst.msk [vmem:[%s16984_s19 + $0x428] sm:$0xff] %vm1232_vm15, %v2211_v49  ;;  %v1527_v57 = vadd.f32 %v16952_v19, %v1526_v51  ;;  %v1783_v58 = vadd.f32 %v16952_v19, %v1782_v52  ;;  %v2128_v62 = vsel %vm1232_vm15, %v1988_v16, -inf  ;;  %v2224_v63 = vsel %vm1232_vm15, %v2052_v50, -inf }
 0x1c3   : > { %v1989_v59 = vmax.f32 %v1535_v55, 0.0  ;;  %v2053_v60 = vmax.f32 %v1791_v56, 0.0  ;;  %v2122_v1 = vsel %vm1232_vm15, %v1986_v53, -inf  ;;  %v2218_v3 = vsel %vm1232_vm15, %v2050_v54, -inf }
 0x1c4   : > { %v1987_v5 = vmax.f32 %v1527_v57, 0.0  ;;  %v2051_v6 = vmax.f32 %v1783_v58, 0.0 }
 0x1c5   : > { %v14782_v36 = vpop.f32.mrb[20].mxu0  ;;  %v14846_v4 = vpop.f32.mrb[20].mxu1  ;;  %v2131_v11 = vsel %vm1232_vm15, %v1989_v59, -inf  ;;  %v2227_v12 = vsel %vm1232_vm15, %v2053_v60, -inf }
 0x1c6   : > { %v1548_v7 = vadd.f32 %v14782_v36, %v16952_v19  ;;  %v1804_v8 = vadd.f32 %v14846_v4, %v16952_v19  ;;  %v1539_v9 = vpop.f32.mrb[21].mxu0  ;;  %v1795_v10 = vpop.f32.mrb[21].mxu1  ;;  %v2125_v46 = vsel %vm1232_vm15, %v1987_v5, -inf  ;;  %v2221_v47 = vsel %vm1232_vm15, %v2051_v6, -inf }
 0x1c7   : > { %v1540_v13 = vadd.f32 %v16952_v19, %v1539_v9  ;;  %v1796_v14 = vadd.f32 %v16952_v19, %v1795_v10  ;;  %v14783_v15 = vpop.f32.mrb[22].mxu0  ;;  %v14847_v17 = vpop.f32.mrb[22].mxu1 }
 0x1c8   : > { %v1992_v61 = vmax.f32 %v1548_v7, 0.0  ;;  %v2056_v18 = vmax.f32 %v1804_v8, 0.0  ;;  %v1551_v20 = vadd.f32 %v14783_v15, %v16952_v19  ;;  %v1807_v21 = vadd.f32 %v14847_v17, %v16952_v19  ;;  %v1542_v22 = vpop.f32.mrb[23].mxu0  ;;  %v1798_v23 = vpop.f32.mrb[23].mxu1 }
 0x1c9   : > { %v1990_v24 = vmax.f32 %v1540_v13, 0.0  ;;  %v2054_v25 = vmax.f32 %v1796_v14, 0.0  ;;  %v1543_v26 = vadd.f32 %v16952_v19, %v1542_v22  ;;  %v1799_v27 = vadd.f32 %v16952_v19, %v1798_v23 }
 0x1ca   : > { %v2129_v28 = vsel %vm1232_vm15, %v1992_v61, -inf  ;;  %v2225_v29 = vsel %vm1232_vm15, %v2056_v18, -inf  ;;  %v1993_v2 = vmax.f32 %v1551_v20, 0.0  ;;  %v2057_v30 = vmax.f32 %v1807_v21, 0.0 }
 0x1cb   : > { %v2130_v31 = vmax.f32 %v2128_v62, %v2129_v28  ;;  %v2226_v32 = vmax.f32 %v2224_v63, %v2225_v29  ;;  %v2123_v33 = vsel %vm1232_vm15, %v1990_v24, -inf  ;;  %v2219_v34 = vsel %vm1232_vm15, %v2054_v25, -inf }
 0x1cc   : > { %v2124_v35 = vmax.f32 %v2122_v1, %v2123_v33  ;;  %v2220_v37 = vmax.f32 %v2218_v3, %v2219_v34  ;;  %v2132_v38 = vsel %vm1232_vm15, %v1993_v2, -inf  ;;  %v2228_v39 = vsel %vm1232_vm15, %v2057_v30, -inf }
 0x1cd   : > { %2303 = vst.msk [vmem:[%s16984_s19 + $0x50] sm:$0xff] %vm1232_vm15, %v2130_v31  ;;  %2335 = vst.msk [vmem:[%s16984_s19 + $0x450] sm:$0xff] %vm1232_vm15, %v2226_v32  ;;  %v2133_v40 = vmax.f32 %v2131_v11, %v2132_v38  ;;  %v2229_v41 = vmax.f32 %v2227_v12, %v2228_v39  ;;  %v1991_v42 = vmax.f32 %v1543_v26, 0.0  ;;  %v2055_v43 = vmax.f32 %v1799_v27, 0.0  ;;  %v14786_v44 = vpop.f32.mrb[24].mxu0  ;;  %v14850_v45 = vpop.f32.mrb[24].mxu1 }
 0x1ce   : > { %2301 = vst.msk [vmem:[%s16984_s19 + $0x40] sm:$0xff] %vm1232_vm15, %v2124_v35  ;;  %2333 = vst.msk [vmem:[%s16984_s19 + $0x440] sm:$0xff] %vm1232_vm15, %v2220_v37  ;;  %v1564_v48 = vadd.f32 %v14786_v44, %v16952_v19  ;;  %v1820_v49 = vadd.f32 %v14850_v45, %v16952_v19  ;;  %v1555_v16 = vpop.f32.mrb[25].mxu0  ;;  %v1811_v50 = vpop.f32.mrb[25].mxu1 }
 0x1cf   : > { %2304 = vst.msk [vmem:[%s16984_s19 + $0x58] sm:$0xff] %vm1232_vm15, %v2133_v40  ;;  %2336 = vst.msk [vmem:[%s16984_s19 + $0x458] sm:$0xff] %vm1232_vm15, %v2229_v41  ;;  %v2126_v51 = vsel %vm1232_vm15, %v1991_v42, -inf  ;;  %v2222_v52 = vsel %vm1232_vm15, %v2055_v43, -inf  ;;  %v1556_v53 = vadd.f32 %v16952_v19, %v1555_v16  ;;  %v1812_v54 = vadd.f32 %v16952_v19, %v1811_v50  ;;  %v14787_v55 = vpop.f32.mrb[26].mxu0  ;;  %v14851_v56 = vpop.f32.mrb[26].mxu1 }
 0x1d0   : > { %v2127_v57 = vmax.f32 %v2125_v46, %v2126_v51  ;;  %v2223_v58 = vmax.f32 %v2221_v47, %v2222_v52  ;;  %v1996_v59 = vmax.f32 %v1564_v48, 0.0  ;;  %v2060_v60 = vmax.f32 %v1820_v49, 0.0  ;;  %v1558_v62 = vpop.f32.mrb[27].mxu0  ;;  %v1814_v63 = vpop.f32.mrb[27].mxu1 }
 0x1d1   : > { %v1994_v1 = vmax.f32 %v1556_v53, 0.0  ;;  %v2058_v3 = vmax.f32 %v1812_v54, 0.0  ;;  %v1567_v36 = vadd.f32 %v14787_v55, %v16952_v19  ;;  %v1823_v4 = vadd.f32 %v14851_v56, %v16952_v19 }
 0x1d2   : > { %2302 = vst.msk [vmem:[%s16984_s19 + $0x48] sm:$0xff] %vm1232_vm15, %v2127_v57  ;;  %2334 = vst.msk [vmem:[%s16984_s19 + $0x448] sm:$0xff] %vm1232_vm15, %v2223_v58  ;;  %v1559_v5 = vadd.f32 %v16952_v19, %v1558_v62  ;;  %v1815_v6 = vadd.f32 %v16952_v19, %v1814_v63  ;;  %v2140_v9 = vsel %vm1232_vm15, %v1996_v59, -inf  ;;  %v2236_v10 = vsel %vm1232_vm15, %v2060_v60, -inf }
 0x1d3   : > { %v1997_v7 = vmax.f32 %v1567_v36, 0.0  ;;  %v2061_v8 = vmax.f32 %v1823_v4, 0.0  ;;  %v2134_v11 = vsel %vm1232_vm15, %v1994_v1, -inf  ;;  %v2230_v12 = vsel %vm1232_vm15, %v2058_v3, -inf }
 0x1d4   : > { %v1995_v15 = vmax.f32 %v1559_v5, 0.0  ;;  %v2059_v17 = vmax.f32 %v1815_v6, 0.0 }
 0x1d5   : > { %v14790_v13 = vpop.f32.mrb[28].mxu0  ;;  %v14854_v14 = vpop.f32.mrb[28].mxu1  ;;  %v2143_v22 = vsel %vm1232_vm15, %v1997_v7, -inf  ;;  %v2239_v23 = vsel %vm1232_vm15, %v2061_v8, -inf }
 0x1d6   : > { %v1580_v61 = vadd.f32 %v14790_v13, %v16952_v19  ;;  %v1836_v18 = vadd.f32 %v14854_v14, %v16952_v19  ;;  %v1571_v20 = vpop.f32.mrb[29].mxu0  ;;  %v1827_v21 = vpop.f32.mrb[29].mxu1  ;;  %v2137_v55 = vsel %vm1232_vm15, %v1995_v15, -inf  ;;  %v2233_v56 = vsel %vm1232_vm15, %v2059_v17, -inf }
 0x1d7   : > { %v1572_v24 = vadd.f32 %v16952_v19, %v1571_v20  ;;  %v1828_v25 = vadd.f32 %v16952_v19, %v1827_v21  ;;  %v14791_v26 = vpop.f32.mrb[30].mxu0  ;;  %v14855_v27 = vpop.f32.mrb[30].mxu1 }
 0x1d8   : > { %v2000_v28 = vmax.f32 %v1580_v61, 0.0  ;;  %v2064_v29 = vmax.f32 %v1836_v18, 0.0  ;;  %v1583_v2 = vadd.f32 %v14791_v26, %v16952_v19  ;;  %v1839_v30 = vadd.f32 %v14855_v27, %v16952_v19  ;;  %v1574_v31 = vpop.f32.mrb[31].mxu0  ;;  %v1830_v32 = vpop.f32.mrb[31].mxu1 }
 0x1d9   : > { %v1998_v33 = vmax.f32 %v1572_v24, 0.0  ;;  %v2062_v34 = vmax.f32 %v1828_v25, 0.0  ;;  %v1575_v35 = vadd.f32 %v16952_v19, %v1574_v31  ;;  %v1831_v37 = vadd.f32 %v16952_v19, %v1830_v32 }
 0x1da   : > { %v2141_v38 = vsel %vm1232_vm15, %v2000_v28, -inf  ;;  %v2237_v39 = vsel %vm1232_vm15, %v2064_v29, -inf  ;;  %v2001_v40 = vmax.f32 %v1583_v2, 0.0  ;;  %v2065_v41 = vmax.f32 %v1839_v30, 0.0 }
 0x1db   : > { %v2142_v42 = vmax.f32 %v2140_v9, %v2141_v38  ;;  %v2238_v43 = vmax.f32 %v2236_v10, %v2237_v39  ;;  %v2135_v44 = vsel %vm1232_vm15, %v1998_v33, -inf  ;;  %v2231_v45 = vsel %vm1232_vm15, %v2062_v34, -inf }
 0x1dc   : > { %v2136_v46 = vmax.f32 %v2134_v11, %v2135_v44  ;;  %v2232_v47 = vmax.f32 %v2230_v12, %v2231_v45  ;;  %v2144_v48 = vsel %vm1232_vm15, %v2001_v40, -inf  ;;  %v2240_v49 = vsel %vm1232_vm15, %v2065_v41, -inf }
 0x1dd   : > { %2307 = vst.msk [vmem:[%s16984_s19 + $0x70] sm:$0xff] %vm1232_vm15, %v2142_v42  ;;  %2339 = vst.msk [vmem:[%s16984_s19 + $0x470] sm:$0xff] %vm1232_vm15, %v2238_v43  ;;  %v2145_v16 = vmax.f32 %v2143_v22, %v2144_v48  ;;  %v2241_v50 = vmax.f32 %v2239_v23, %v2240_v49  ;;  %v1999_v51 = vmax.f32 %v1575_v35, 0.0  ;;  %v2063_v52 = vmax.f32 %v1831_v37, 0.0  ;;  %v14794_v53 = vpop.f32.mrb[32].mxu0  ;;  %v14858_v54 = vpop.f32.mrb[32].mxu1 }
 0x1de   : > { %2305 = vst.msk [vmem:[%s16984_s19 + $0x60] sm:$0xff] %vm1232_vm15, %v2136_v46  ;;  %2337 = vst.msk [vmem:[%s16984_s19 + $0x460] sm:$0xff] %vm1232_vm15, %v2232_v47  ;;  %v1596_v57 = vadd.f32 %v14794_v53, %v16952_v19  ;;  %v1852_v58 = vadd.f32 %v14858_v54, %v16952_v19  ;;  %v1587_v59 = vpop.f32.mrb[33].mxu0  ;;  %v1843_v60 = vpop.f32.mrb[33].mxu1 }
 0x1df   : > { %2308 = vst.msk [vmem:[%s16984_s19 + $0x78] sm:$0xff] %vm1232_vm15, %v2145_v16  ;;  %2340 = vst.msk [vmem:[%s16984_s19 + $0x478] sm:$0xff] %vm1232_vm15, %v2241_v50  ;;  %v2138_v62 = vsel %vm1232_vm15, %v1999_v51, -inf  ;;  %v2234_v63 = vsel %vm1232_vm15, %v2063_v52, -inf  ;;  %v1588_v1 = vadd.f32 %v16952_v19, %v1587_v59  ;;  %v1844_v3 = vadd.f32 %v16952_v19, %v1843_v60  ;;  %v14795_v36 = vpop.f32.mrb[34].mxu0  ;;  %v14859_v4 = vpop.f32.mrb[34].mxu1 }
 0x1e0   : > { %v2139_v5 = vmax.f32 %v2137_v55, %v2138_v62  ;;  %v2235_v6 = vmax.f32 %v2233_v56, %v2234_v63  ;;  %v2004_v7 = vmax.f32 %v1596_v57, 0.0  ;;  %v2068_v8 = vmax.f32 %v1852_v58, 0.0  ;;  %v1590_v9 = vpop.f32.mrb[35].mxu0  ;;  %v1846_v10 = vpop.f32.mrb[35].mxu1 }
 0x1e1   : > { %v2002_v11 = vmax.f32 %v1588_v1, 0.0  ;;  %v2066_v12 = vmax.f32 %v1844_v3, 0.0  ;;  %v1599_v13 = vadd.f32 %v14795_v36, %v16952_v19  ;;  %v1855_v14 = vadd.f32 %v14859_v4, %v16952_v19 }
 0x1e2   : > { %2306 = vst.msk [vmem:[%s16984_s19 + $0x68] sm:$0xff] %vm1232_vm15, %v2139_v5  ;;  %2338 = vst.msk [vmem:[%s16984_s19 + $0x468] sm:$0xff] %vm1232_vm15, %v2235_v6  ;;  %v1591_v15 = vadd.f32 %v16952_v19, %v1590_v9  ;;  %v1847_v17 = vadd.f32 %v16952_v19, %v1846_v10  ;;  %v2152_v20 = vsel %vm1232_vm15, %v2004_v7, -inf  ;;  %v2248_v21 = vsel %vm1232_vm15, %v2068_v8, -inf }
 0x1e3   : > { %v2005_v61 = vmax.f32 %v1599_v13, 0.0  ;;  %v2069_v18 = vmax.f32 %v1855_v14, 0.0  ;;  %v2146_v22 = vsel %vm1232_vm15, %v2002_v11, -inf  ;;  %v2242_v23 = vsel %vm1232_vm15, %v2066_v12, -inf }
 0x1e4   : > { %v2003_v26 = vmax.f32 %v1591_v15, 0.0  ;;  %v2067_v27 = vmax.f32 %v1847_v17, 0.0 }
 0x1e5   : > { %v14798_v24 = vpop.f32.mrb[36].mxu0  ;;  %v14862_v25 = vpop.f32.mrb[36].mxu1  ;;  %v2155_v31 = vsel %vm1232_vm15, %v2005_v61, -inf  ;;  %v2251_v32 = vsel %vm1232_vm15, %v2069_v18, -inf }
 0x1e6   : > { %v1612_v28 = vadd.f32 %v14798_v24, %v16952_v19  ;;  %v1868_v29 = vadd.f32 %v14862_v25, %v16952_v19  ;;  %v1603_v2 = vpop.f32.mrb[37].mxu0  ;;  %v1859_v30 = vpop.f32.mrb[37].mxu1  ;;  %v2149_v36 = vsel %vm1232_vm15, %v2003_v26, -inf  ;;  %v2245_v4 = vsel %vm1232_vm15, %v2067_v27, -inf }
 0x1e7   : > { %v1604_v33 = vadd.f32 %v16952_v19, %v1603_v2  ;;  %v1860_v34 = vadd.f32 %v16952_v19, %v1859_v30  ;;  %v14799_v35 = vpop.f32.mrb[38].mxu0  ;;  %v14863_v37 = vpop.f32.mrb[38].mxu1 }
 0x1e8   : > { %v2008_v38 = vmax.f32 %v1612_v28, 0.0  ;;  %v2072_v39 = vmax.f32 %v1868_v29, 0.0  ;;  %v1615_v40 = vadd.f32 %v14799_v35, %v16952_v19  ;;  %v1871_v41 = vadd.f32 %v14863_v37, %v16952_v19  ;;  %v1606_v42 = vpop.f32.mrb[39].mxu0  ;;  %v1862_v43 = vpop.f32.mrb[39].mxu1 }
 0x1e9   : > { %v2006_v44 = vmax.f32 %v1604_v33, 0.0  ;;  %v2070_v45 = vmax.f32 %v1860_v34, 0.0  ;;  %v1607_v46 = vadd.f32 %v16952_v19, %v1606_v42  ;;  %v1863_v47 = vadd.f32 %v16952_v19, %v1862_v43 }
 0x1ea   : > { %v2153_v48 = vsel %vm1232_vm15, %v2008_v38, -inf  ;;  %v2249_v49 = vsel %vm1232_vm15, %v2072_v39, -inf  ;;  %v2009_v16 = vmax.f32 %v1615_v40, 0.0  ;;  %v2073_v50 = vmax.f32 %v1871_v41, 0.0 }
 0x1eb   : > { %v2154_v51 = vmax.f32 %v2152_v20, %v2153_v48  ;;  %v2250_v52 = vmax.f32 %v2248_v21, %v2249_v49  ;;  %v2147_v53 = vsel %vm1232_vm15, %v2006_v44, -inf  ;;  %v2243_v54 = vsel %vm1232_vm15, %v2070_v45, -inf }
 0x1ec   : > { %v2148_v55 = vmax.f32 %v2146_v22, %v2147_v53  ;;  %v2244_v56 = vmax.f32 %v2242_v23, %v2243_v54  ;;  %v2156_v57 = vsel %vm1232_vm15, %v2009_v16, -inf  ;;  %v2252_v58 = vsel %vm1232_vm15, %v2073_v50, -inf }
 0x1ed   : > { %2311 = vst.msk [vmem:[%s16984_s19 + $0x210] sm:$0xff] %vm1232_vm15, %v2154_v51  ;;  %2343 = vst.msk [vmem:[%s16984_s19 + $0x610] sm:$0xff] %vm1232_vm15, %v2250_v52  ;;  %v2157_v59 = vmax.f32 %v2155_v31, %v2156_v57  ;;  %v2253_v60 = vmax.f32 %v2251_v32, %v2252_v58  ;;  %v2007_v62 = vmax.f32 %v1607_v46, 0.0  ;;  %v2071_v63 = vmax.f32 %v1863_v47, 0.0  ;;  %v14802_v1 = vpop.f32.mrb[40].mxu0  ;;  %v14866_v3 = vpop.f32.mrb[40].mxu1 }
 0x1ee   : > { %2309 = vst.msk [vmem:[%s16984_s19 + $0x200] sm:$0xff] %vm1232_vm15, %v2148_v55  ;;  %2341 = vst.msk [vmem:[%s16984_s19 + $0x600] sm:$0xff] %vm1232_vm15, %v2244_v56  ;;  %v1628_v5 = vadd.f32 %v14802_v1, %v16952_v19  ;;  %v1884_v6 = vadd.f32 %v14866_v3, %v16952_v19  ;;  %v1619_v7 = vpop.f32.mrb[41].mxu0  ;;  %v1875_v8 = vpop.f32.mrb[41].mxu1 }
 0x1ef   : > { %2312 = vst.msk [vmem:[%s16984_s19 + $0x218] sm:$0xff] %vm1232_vm15, %v2157_v59  ;;  %2344 = vst.msk [vmem:[%s16984_s19 + $0x618] sm:$0xff] %vm1232_vm15, %v2253_v60  ;;  %v2150_v9 = vsel %vm1232_vm15, %v2007_v62, -inf  ;;  %v2246_v10 = vsel %vm1232_vm15, %v2071_v63, -inf  ;;  %v1620_v11 = vadd.f32 %v16952_v19, %v1619_v7  ;;  %v1876_v12 = vadd.f32 %v16952_v19, %v1875_v8  ;;  %v14803_v13 = vpop.f32.mrb[42].mxu0  ;;  %v14867_v14 = vpop.f32.mrb[42].mxu1 }
 0x1f0   : > { %v2151_v15 = vmax.f32 %v2149_v36, %v2150_v9  ;;  %v2247_v17 = vmax.f32 %v2245_v4, %v2246_v10  ;;  %v2012_v61 = vmax.f32 %v1628_v5, 0.0  ;;  %v2076_v18 = vmax.f32 %v1884_v6, 0.0  ;;  %v1622_v20 = vpop.f32.mrb[43].mxu0  ;;  %v1878_v21 = vpop.f32.mrb[43].mxu1 }
 0x1f1   : > { %v2010_v22 = vmax.f32 %v1620_v11, 0.0  ;;  %v2074_v23 = vmax.f32 %v1876_v12, 0.0  ;;  %v1631_v24 = vadd.f32 %v14803_v13, %v16952_v19  ;;  %v1887_v25 = vadd.f32 %v14867_v14, %v16952_v19 }
 0x1f2   : > { %2310 = vst.msk [vmem:[%s16984_s19 + $0x208] sm:$0xff] %vm1232_vm15, %v2151_v15  ;;  %2342 = vst.msk [vmem:[%s16984_s19 + $0x608] sm:$0xff] %vm1232_vm15, %v2247_v17  ;;  %v1623_v26 = vadd.f32 %v16952_v19, %v1622_v20  ;;  %v1879_v27 = vadd.f32 %v16952_v19, %v1878_v21  ;;  %v2164_v2 = vsel %vm1232_vm15, %v2012_v61, -inf  ;;  %v2260_v30 = vsel %vm1232_vm15, %v2076_v18, -inf }
 0x1f3   : > { %v2013_v28 = vmax.f32 %v1631_v24, 0.0  ;;  %v2077_v29 = vmax.f32 %v1887_v25, 0.0  ;;  %v2158_v31 = vsel %vm1232_vm15, %v2010_v22, -inf  ;;  %v2254_v32 = vsel %vm1232_vm15, %v2074_v23, -inf }
 0x1f4   : > { %v2011_v35 = vmax.f32 %v1623_v26, 0.0  ;;  %v2075_v37 = vmax.f32 %v1879_v27, 0.0 }
 0x1f5   : > { %v14806_v33 = vpop.f32.mrb[44].mxu0  ;;  %v14870_v34 = vpop.f32.mrb[44].mxu1  ;;  %v2167_v42 = vsel %vm1232_vm15, %v2013_v28, -inf  ;;  %v2263_v43 = vsel %vm1232_vm15, %v2077_v29, -inf }
 0x1f6   : > { %v1644_v38 = vadd.f32 %v14806_v33, %v16952_v19  ;;  %v1900_v39 = vadd.f32 %v14870_v34, %v16952_v19  ;;  %v1635_v40 = vpop.f32.mrb[45].mxu0  ;;  %v1891_v41 = vpop.f32.mrb[45].mxu1  ;;  %v2161_v13 = vsel %vm1232_vm15, %v2011_v35, -inf  ;;  %v2257_v14 = vsel %vm1232_vm15, %v2075_v37, -inf }
 0x1f7   : > { %v1636_v44 = vadd.f32 %v16952_v19, %v1635_v40  ;;  %v1892_v45 = vadd.f32 %v16952_v19, %v1891_v41  ;;  %v14807_v46 = vpop.f32.mrb[46].mxu0  ;;  %v14871_v47 = vpop.f32.mrb[46].mxu1 }
 0x1f8   : > { %v2016_v48 = vmax.f32 %v1644_v38, 0.0  ;;  %v2080_v49 = vmax.f32 %v1900_v39, 0.0  ;;  %v1647_v16 = vadd.f32 %v14807_v46, %v16952_v19  ;;  %v1903_v50 = vadd.f32 %v14871_v47, %v16952_v19  ;;  %v1638_v51 = vpop.f32.mrb[47].mxu0  ;;  %v1894_v52 = vpop.f32.mrb[47].mxu1 }
 0x1f9   : > { %v2014_v53 = vmax.f32 %v1636_v44, 0.0  ;;  %v2078_v54 = vmax.f32 %v1892_v45, 0.0  ;;  %v1639_v55 = vadd.f32 %v16952_v19, %v1638_v51  ;;  %v1895_v56 = vadd.f32 %v16952_v19, %v1894_v52 }
 0x1fa   : > { %v2165_v57 = vsel %vm1232_vm15, %v2016_v48, -inf  ;;  %v2261_v58 = vsel %vm1232_vm15, %v2080_v49, -inf  ;;  %v2017_v59 = vmax.f32 %v1647_v16, 0.0  ;;  %v2081_v60 = vmax.f32 %v1903_v50, 0.0  ;;  %v17261_v48 = vld [vmem:[%s21512_s2] ss:$0 sm:$0xff] }
 0x1fb   : > { %v2166_v62 = vmax.f32 %v2164_v2, %v2165_v57  ;;  %v2262_v63 = vmax.f32 %v2260_v30, %v2261_v58  ;;  %v2159_v1 = vsel %vm1232_vm15, %v2014_v53, -inf  ;;  %v2255_v3 = vsel %vm1232_vm15, %v2078_v54, -inf }
 0x1fc   : > { %v2160_v36 = vmax.f32 %v2158_v31, %v2159_v1  ;;  %v2256_v4 = vmax.f32 %v2254_v32, %v2255_v3  ;;  %v2168_v5 = vsel %vm1232_vm15, %v2017_v59, -inf  ;;  %v2264_v6 = vsel %vm1232_vm15, %v2081_v60, -inf }
 0x1fd   : > { %2315 = vst.msk [vmem:[%s16984_s19 + $0x230] sm:$0xff] %vm1232_vm15, %v2166_v62  ;;  %2347 = vst.msk [vmem:[%s16984_s19 + $0x630] sm:$0xff] %vm1232_vm15, %v2262_v63  ;;  %v2169_v7 = vmax.f32 %v2167_v42, %v2168_v5  ;;  %v2265_v8 = vmax.f32 %v2263_v43, %v2264_v6  ;;  %v2015_v9 = vmax.f32 %v1639_v55, 0.0  ;;  %v2079_v10 = vmax.f32 %v1895_v56, 0.0  ;;  %v14810_v11 = vpop.f32.mrb[48].mxu0  ;;  %v14874_v12 = vpop.f32.mrb[48].mxu1 }
 0x1fe   : > { %2313 = vst.msk [vmem:[%s16984_s19 + $0x220] sm:$0xff] %vm1232_vm15, %v2160_v36  ;;  %2345 = vst.msk [vmem:[%s16984_s19 + $0x620] sm:$0xff] %vm1232_vm15, %v2256_v4  ;;  %v1660_v15 = vadd.f32 %v14810_v11, %v16952_v19  ;;  %v1916_v17 = vadd.f32 %v14874_v12, %v16952_v19  ;;  %v1651_v61 = vpop.f32.mrb[49].mxu0  ;;  %v1907_v18 = vpop.f32.mrb[49].mxu1 }
 0x1ff   : > { %2316 = vst.msk [vmem:[%s16984_s19 + $0x238] sm:$0xff] %vm1232_vm15, %v2169_v7  ;;  %2348 = vst.msk [vmem:[%s16984_s19 + $0x638] sm:$0xff] %vm1232_vm15, %v2265_v8  ;;  %v2162_v20 = vsel %vm1232_vm15, %v2015_v9, -inf  ;;  %v2258_v21 = vsel %vm1232_vm15, %v2079_v10, -inf  ;;  %v1652_v22 = vadd.f32 %v16952_v19, %v1651_v61  ;;  %v1908_v23 = vadd.f32 %v16952_v19, %v1907_v18  ;;  %v14811_v24 = vpop.f32.mrb[50].mxu0  ;;  %v14875_v25 = vpop.f32.mrb[50].mxu1 }
 0x200   : > { %v2163_v26 = vmax.f32 %v2161_v13, %v2162_v20  ;;  %v2259_v27 = vmax.f32 %v2257_v14, %v2258_v21  ;;  %v2020_v28 = vmax.f32 %v1660_v15, 0.0  ;;  %v2084_v29 = vmax.f32 %v1916_v17, 0.0  ;;  %v1654_v2 = vpop.f32.mrb[51].mxu0  ;;  %v1910_v30 = vpop.f32.mrb[51].mxu1 }
 0x201   : > { %v2018_v31 = vmax.f32 %v1652_v22, 0.0  ;;  %v2082_v32 = vmax.f32 %v1908_v23, 0.0  ;;  %v1663_v33 = vadd.f32 %v14811_v24, %v16952_v19  ;;  %v1919_v34 = vadd.f32 %v14875_v25, %v16952_v19 }
 0x202   : > { %2314 = vst.msk [vmem:[%s16984_s19 + $0x228] sm:$0xff] %vm1232_vm15, %v2163_v26  ;;  %2346 = vst.msk [vmem:[%s16984_s19 + $0x628] sm:$0xff] %vm1232_vm15, %v2259_v27  ;;  %v1655_v35 = vadd.f32 %v16952_v19, %v1654_v2  ;;  %v1911_v37 = vadd.f32 %v16952_v19, %v1910_v30  ;;  %v2176_v40 = vsel %vm1232_vm15, %v2020_v28, -inf  ;;  %v2272_v41 = vsel %vm1232_vm15, %v2084_v29, -inf }
 0x203   : > { %v2021_v38 = vmax.f32 %v1663_v33, 0.0  ;;  %v2085_v39 = vmax.f32 %v1919_v34, 0.0  ;;  %v2170_v42 = vsel %vm1232_vm15, %v2018_v31, -inf  ;;  %v2266_v43 = vsel %vm1232_vm15, %v2082_v32, -inf }
 0x204   : > { %v2019_v46 = vmax.f32 %v1655_v35, 0.0  ;;  %v2083_v47 = vmax.f32 %v1911_v37, 0.0 }
 0x205   : > { %v14814_v44 = vpop.f32.mrb[52].mxu0  ;;  %v14878_v45 = vpop.f32.mrb[52].mxu1  ;;  %v2179_v51 = vsel %vm1232_vm15, %v2021_v38, -inf  ;;  %v2275_v52 = vsel %vm1232_vm15, %v2085_v39, -inf }
 0x206   : > { %v1676_v19 = vadd.f32 %v17261_v48, %v14814_v44  ;;  %v1932_v49 = vadd.f32 %v17261_v48, %v14878_v45  ;;  %v1667_v16 = vpop.f32.mrb[53].mxu0  ;;  %v1923_v50 = vpop.f32.mrb[53].mxu1  ;;  %v2173_v24 = vsel %vm1232_vm15, %v2019_v46, -inf  ;;  %v2269_v25 = vsel %vm1232_vm15, %v2083_v47, -inf }
 0x207   : > { %v1668_v53 = vadd.f32 %v17261_v48, %v1667_v16  ;;  %v1924_v54 = vadd.f32 %v17261_v48, %v1923_v50  ;;  %v14815_v55 = vpop.f32.mrb[54].mxu0  ;;  %v14879_v56 = vpop.f32.mrb[54].mxu1 }
 0x208   : > { %v2024_v57 = vmax.f32 %v1676_v19, 0.0  ;;  %v2088_v58 = vmax.f32 %v1932_v49, 0.0  ;;  %v1679_v59 = vadd.f32 %v17261_v48, %v14815_v55  ;;  %v1935_v60 = vadd.f32 %v17261_v48, %v14879_v56  ;;  %v1670_v62 = vpop.f32.mrb[55].mxu0  ;;  %v1926_v63 = vpop.f32.mrb[55].mxu1 }
 0x209   : > { %v2022_v1 = vmax.f32 %v1668_v53, 0.0  ;;  %v2086_v3 = vmax.f32 %v1924_v54, 0.0  ;;  %v1671_v36 = vadd.f32 %v17261_v48, %v1670_v62  ;;  %v1927_v4 = vadd.f32 %v17261_v48, %v1926_v63 }
 0x20a   : > { %v2177_v5 = vsel %vm1232_vm15, %v2024_v57, -inf  ;;  %v2273_v6 = vsel %vm1232_vm15, %v2088_v58, -inf  ;;  %v2025_v7 = vmax.f32 %v1679_v59, 0.0  ;;  %v2089_v8 = vmax.f32 %v1935_v60, 0.0 }
 0x20b   : > { %v2178_v9 = vmax.f32 %v2176_v40, %v2177_v5  ;;  %v2274_v10 = vmax.f32 %v2272_v41, %v2273_v6  ;;  %v2171_v11 = vsel %vm1232_vm15, %v2022_v1, -inf  ;;  %v2267_v12 = vsel %vm1232_vm15, %v2086_v3, -inf }
 0x20c   : > { %v2172_v13 = vmax.f32 %v2170_v42, %v2171_v11  ;;  %v2268_v14 = vmax.f32 %v2266_v43, %v2267_v12  ;;  %v2180_v15 = vsel %vm1232_vm15, %v2025_v7, -inf  ;;  %v2276_v17 = vsel %vm1232_vm15, %v2089_v8, -inf }
 0x20d   : > { %2319 = vst.msk [vmem:[%s16984_s19 + $0x250] sm:$0xff] %vm1232_vm15, %v2178_v9  ;;  %2351 = vst.msk [vmem:[%s16984_s19 + $0x650] sm:$0xff] %vm1232_vm15, %v2274_v10  ;;  %v2181_v61 = vmax.f32 %v2179_v51, %v2180_v15  ;;  %v2277_v18 = vmax.f32 %v2275_v52, %v2276_v17  ;;  %v2023_v20 = vmax.f32 %v1671_v36, 0.0  ;;  %v2087_v21 = vmax.f32 %v1927_v4, 0.0  ;;  %v14818_v22 = vpop.f32.mrb[56].mxu0  ;;  %v14882_v23 = vpop.f32.mrb[56].mxu1 }
 0x20e   : > { %2317 = vst.msk [vmem:[%s16984_s19 + $0x240] sm:$0xff] %vm1232_vm15, %v2172_v13  ;;  %2349 = vst.msk [vmem:[%s16984_s19 + $0x640] sm:$0xff] %vm1232_vm15, %v2268_v14  ;;  %v1692_v26 = vadd.f32 %v17261_v48, %v14818_v22  ;;  %v1948_v27 = vadd.f32 %v17261_v48, %v14882_v23  ;;  %v1683_v28 = vpop.f32.mrb[57].mxu0  ;;  %v1939_v29 = vpop.f32.mrb[57].mxu1 }
 0x20f   : > { %2320 = vst.msk [vmem:[%s16984_s19 + $0x258] sm:$0xff] %vm1232_vm15, %v2181_v61  ;;  %2352 = vst.msk [vmem:[%s16984_s19 + $0x658] sm:$0xff] %vm1232_vm15, %v2277_v18  ;;  %v2174_v2 = vsel %vm1232_vm15, %v2023_v20, -inf  ;;  %v2270_v30 = vsel %vm1232_vm15, %v2087_v21, -inf  ;;  %v1684_v31 = vadd.f32 %v17261_v48, %v1683_v28  ;;  %v1940_v32 = vadd.f32 %v17261_v48, %v1939_v29  ;;  %v14819_v33 = vpop.f32.mrb[58].mxu0  ;;  %v14883_v34 = vpop.f32.mrb[58].mxu1 }
 0x210   : > { %v2175_v35 = vmax.f32 %v2173_v24, %v2174_v2  ;;  %v2271_v37 = vmax.f32 %v2269_v25, %v2270_v30  ;;  %v2028_v38 = vmax.f32 %v1692_v26, 0.0  ;;  %v2092_v39 = vmax.f32 %v1948_v27, 0.0  ;;  %v1686_v40 = vpop.f32.mrb[59].mxu0  ;;  %v1942_v41 = vpop.f32.mrb[59].mxu1 }
 0x211   : > { %v2026_v42 = vmax.f32 %v1684_v31, 0.0  ;;  %v2090_v43 = vmax.f32 %v1940_v32, 0.0  ;;  %v1695_v44 = vadd.f32 %v17261_v48, %v14819_v33  ;;  %v1951_v45 = vadd.f32 %v17261_v48, %v14883_v34 }
 0x212   : > { %2318 = vst.msk [vmem:[%s16984_s19 + $0x248] sm:$0xff] %vm1232_vm15, %v2175_v35  ;;  %2350 = vst.msk [vmem:[%s16984_s19 + $0x648] sm:$0xff] %vm1232_vm15, %v2271_v37  ;;  %v1687_v46 = vadd.f32 %v17261_v48, %v1686_v40  ;;  %v1943_v47 = vadd.f32 %v17261_v48, %v1942_v41  ;;  %v2188_v16 = vsel %vm1232_vm15, %v2028_v38, -inf  ;;  %v2284_v50 = vsel %vm1232_vm15, %v2092_v39, -inf }
 0x213   : > { %v2029_v19 = vmax.f32 %v1695_v44, 0.0  ;;  %v2093_v49 = vmax.f32 %v1951_v45, 0.0  ;;  %v2182_v51 = vsel %vm1232_vm15, %v2026_v42, -inf  ;;  %v2278_v52 = vsel %vm1232_vm15, %v2090_v43, -inf }
 0x214   : > { %v2027_v55 = vmax.f32 %v1687_v46, 0.0  ;;  %v2091_v56 = vmax.f32 %v1943_v47, 0.0 }
 0x215   : > { %v14822_v53 = vpop.f32.mrb[60].mxu0  ;;  %v14886_v54 = vpop.f32.mrb[60].mxu1  ;;  %v2191_v62 = vsel %vm1232_vm15, %v2029_v19, -inf  ;;  %v2287_v63 = vsel %vm1232_vm15, %v2093_v49, -inf }
 0x216   : > { %v1708_v57 = vadd.f32 %v17261_v48, %v14822_v53  ;;  %v1964_v58 = vadd.f32 %v17261_v48, %v14886_v54  ;;  %v1699_v59 = vpop.f32.mrb[61].mxu0  ;;  %v1955_v60 = vpop.f32.mrb[61].mxu1  ;;  %v2185_v30 = vsel %vm1232_vm15, %v2027_v55, -inf  ;;  %v2281_v31 = vsel %vm1232_vm15, %v2091_v56, -inf }
 0x217   : > { %v1700_v1 = vadd.f32 %v17261_v48, %v1699_v59  ;;  %v1956_v3 = vadd.f32 %v17261_v48, %v1955_v60  ;;  %v14823_v36 = vpop.f32.mrb[62].mxu0  ;;  %v14887_v4 = vpop.f32.mrb[62].mxu1 }
 0x218   : > { %v2032_v5 = vmax.f32 %v1708_v57, 0.0  ;;  %v2096_v6 = vmax.f32 %v1964_v58, 0.0  ;;  %v1711_v7 = vadd.f32 %v17261_v48, %v14823_v36  ;;  %v1967_v8 = vadd.f32 %v17261_v48, %v14887_v4  ;;  %v1702_v9 = vpop.f32.mrb[63].mxu0  ;;  %v1958_v10 = vpop.f32.mrb[63].mxu1 }
 0x219   : > { %v2030_v11 = vmax.f32 %v1700_v1, 0.0  ;;  %v2094_v12 = vmax.f32 %v1956_v3, 0.0  ;;  %v1703_v13 = vadd.f32 %v17261_v48, %v1702_v9  ;;  %v1959_v14 = vadd.f32 %v17261_v48, %v1958_v10 }
 0x21a   : > { %v2189_v15 = vsel %vm1232_vm15, %v2032_v5, -inf  ;;  %v2285_v17 = vsel %vm1232_vm15, %v2096_v6, -inf  ;;  %v2033_v61 = vmax.f32 %v1711_v7, 0.0  ;;  %v2097_v18 = vmax.f32 %v1967_v8, 0.0 }
 0x21b   : > { %v2190_v20 = vmax.f32 %v2188_v16, %v2189_v15  ;;  %v2286_v21 = vmax.f32 %v2284_v50, %v2285_v17  ;;  %v2183_v22 = vsel %vm1232_vm15, %v2030_v11, -inf  ;;  %v2279_v23 = vsel %vm1232_vm15, %v2094_v12, -inf }
 0x21c   : > { %v2184_v24 = vmax.f32 %v2182_v51, %v2183_v22  ;;  %v2280_v25 = vmax.f32 %v2278_v52, %v2279_v23  ;;  %v2192_v48 = vsel %vm1232_vm15, %v2033_v61, -inf  ;;  %v2288_v26 = vsel %vm1232_vm15, %v2097_v18, -inf  ;;  %755 = sbr.rel (!%p753_p0) target bundleno = 193 (0xc1), region = 443 }
 0x21d   : > { %2323 = vst.msk [vmem:[%s16984_s19 + $0x270] sm:$0xff] %vm1232_vm15, %v2190_v20  ;;  %2355 = vst.msk [vmem:[%s16984_s19 + $0x670] sm:$0xff] %vm1232_vm15, %v2286_v21  ;;  %v2193_v27 = vmax.f32 %v2191_v62, %v2192_v48  ;;  %v2289_v28 = vmax.f32 %v2287_v63, %v2288_v26  ;;  %v2031_v29 = vmax.f32 %v1703_v13, 0.0  ;;  %v2095_v2 = vmax.f32 %v1959_v14, 0.0  ;;  %v15662_v21 = vld [vmem:[%s21513_s3 + $0x30] sm:$0xff] (%p753_p0)   ;;  %v15663_v48 = vld [vmem:[%s21513_s3 + $0x38] sm:$0xff] (%p753_p0)  }
 0x21e   : > { %2321 = vst.msk [vmem:[%s16984_s19 + $0x260] sm:$0xff] %vm1232_vm15, %v2184_v24  ;;  %2353 = vst.msk [vmem:[%s16984_s19 + $0x660] sm:$0xff] %vm1232_vm15, %v2280_v25  ;;  %14888 = vmatprep.subr.bf16.mxu0 (%p753_p0), %v15662_v21 }
 0x21f   : > { %2324 = vst.msk [vmem:[%s16984_s19 + $0x278] sm:$0xff] %vm1232_vm15, %v2193_v27  ;;  %2356 = vst.msk [vmem:[%s16984_s19 + $0x678] sm:$0xff] %vm1232_vm15, %v2289_v28  ;;  %v2186_v32 = vsel %vm1232_vm15, %v2031_v29, -inf  ;;  %v2282_v33 = vsel %vm1232_vm15, %v2095_v2, -inf  ;;  %14889 = vmatpush3.bf16.msra.mxu0 (%p753_p0), %v15662_v21 }
 0x220   : > { %v2187_v34 = vmax.f32 %v2185_v30, %v2186_v32  ;;  %v2283_v35 = vmax.f32 %v2281_v31, %v2282_v33  ;;  %14890 = vmatprep.subr.bf16.mxu0 (%p753_p0), %v15663_v48 }
 0x222   : > { %2322 = vst.msk [vmem:[%s16984_s19 + $0x268] sm:$0xff] %vm1232_vm15, %v2187_v34  ;;  %2354 = vst.msk [vmem:[%s16984_s19 + $0x668] sm:$0xff] %vm1232_vm15, %v2283_v35  ;;  %vm10858_vm15 = vcmask (%p753_p0), 1042434  }
 0x223   :  { %14891 = vmatpush3.bf16.msra.mxu0 %v15663_v48 }
 0x229   :  { %v2357_v37 = vld [vmem:[#allocation2] ss:$2 sm:$0xff]  ;;  %v2359_v38 = vld [vmem:[#allocation2 + $0x10] ss:$2 sm:$0xff]  ;;  %v2613_v39 = vld [vmem:[#allocation2 + $0x1] ss:$2 sm:$0xff] }
 0x22a   :  { %v2615_v40 = vld [vmem:[#allocation2 + $0x11] ss:$2 sm:$0xff]  ;;  %v2868_v41 = vmax.f32 %v2357_v37, %v2613_v39  ;;  %v2365_v42 = vld [vmem:[#allocation2 + $0x40] ss:$2 sm:$0xff]  ;;  %v2367_v44 = vld [vmem:[#allocation2 + $0x50] ss:$2 sm:$0xff] }
 0x22b   :  { %v2869_v43 = vmax.f32 %v2359_v38, %v2615_v40  ;;  %v2621_v45 = vld [vmem:[#allocation2 + $0x41] ss:$2 sm:$0xff]  ;;  %v2623_v46 = vld [vmem:[#allocation2 + $0x51] ss:$2 sm:$0xff]  ;;  %v2361_v49 = vld [vmem:[#allocation2 + $0x20] ss:$2 sm:$0xff] }
 0x22c   :  { %v2872_v47 = vmax.f32 %v2365_v42, %v2621_v45  ;;  %v2873_v19 = vmax.f32 %v2367_v44, %v2623_v46  ;;  %v2363_v16 = vld [vmem:[#allocation2 + $0x30] ss:$2 sm:$0xff]  ;;  %v2617_v50 = vld [vmem:[#allocation2 + $0x21] ss:$2 sm:$0xff]  ;;  %v2619_v52 = vld [vmem:[#allocation2 + $0x31] ss:$2 sm:$0xff] }
 0x22d   :  { %v17351_v51 = vpack.c.bf16 %v2869_v43, %v2868_v41  ;;  %v2870_v53 = vmax.f32 %v2361_v49, %v2617_v50  ;;  %v2369_v54 = vld [vmem:[#allocation2 + $0x60] ss:$2 sm:$0xff]  ;;  %v2371_v55 = vld [vmem:[#allocation2 + $0x70] ss:$2 sm:$0xff]  ;;  %v2871_v57 = vmax.f32 %v2363_v16, %v2619_v52  ;;  %v2625_v58 = vld [vmem:[#allocation2 + $0x61] ss:$2 sm:$0xff] }
 0x22e   :  { %v17353_v56 = vpack.c.bf16 %v2873_v19, %v2872_v47  ;;  %v2627_v59 = vld [vmem:[#allocation2 + $0x71] ss:$2 sm:$0xff]  ;;  %v2874_v63 = vmax.f32 %v2369_v54, %v2625_v58  ;;  %v2373_v3 = vld [vmem:[#allocation2 + $0x80] ss:$2 sm:$0xff]  ;;  %v2375_v4 = vld [vmem:[#allocation2 + $0x90] ss:$2 sm:$0xff] }
 0x22f   :  { %3832 = vrot.lane.b32.xlu0 %v17351_v51, %s16232_s0  ;;  %v3061_v60 = vshrl.u32 %v17351_v51, 16  ;;  %v3064_v62 = vshll.u32 %v17351_v51, 16  ;;  %v2875_v1 = vmax.f32 %v2371_v55, %v2627_v59  ;;  %v17361_v36 = vpack.c.bf16 %v2871_v57, %v2870_v53  ;;  %v2629_v5 = vld [vmem:[#allocation2 + $0x81] ss:$2 sm:$0xff]  ;;  %v2631_v6 = vld [vmem:[#allocation2 + $0x91] ss:$2 sm:$0xff] }
 0x230   :  { %3836 = vrot.lane.b32.xlu1 %v17353_v56, %s16232_s0  ;;  %v3078_v8 = vshll.u32 %v17353_v56, 16  ;;  %v2876_v13 = vmax.f32 %v2373_v3, %v2629_v5  ;;  %v2877_v14 = vmax.f32 %v2375_v4, %v2631_v6  ;;  %v2377_v15 = vld [vmem:[#allocation2 + $0xa0] ss:$2 sm:$0xff]  ;;  %v2379_v17 = vld [vmem:[#allocation2 + $0xb0] ss:$2 sm:$0xff]  ;;  %v3075_v22 = vshrl.u32 %v17353_v56, 16 }
 0x231   :  { %v4089_v7 = vrot.slane %v3064_v62, 1  ;;  %v3068_v9 = vshrl.u32 %v17361_v36, 16  ;;  %v3071_v10 = vshll.u32 %v17361_v36, 16  ;;  %v17372_v12 = vpack.c.bf16 %v2875_v1, %v2874_v63  ;;  %v2633_v18 = vld [vmem:[#allocation2 + $0xa1] ss:$2 sm:$0xff]  ;;  %v15666_v3 = vld [vmem:[%s21513_s3 + $0x50] sm:$0xff]  }
 0x232   :  { %v2635_v20 = vld [vmem:[#allocation2 + $0xb1] ss:$2 sm:$0xff]  ;;  %v4093_v23 = vrot.slane %v3078_v8, 1  ;;  %v17391_v26 = vpack.c.bf16 %v2877_v14, %v2876_v13  ;;  %v2878_v27 = vmax.f32 %v2377_v15, %v2633_v18  ;;  %v2381_v29 = vld [vmem:[#allocation2 + $0xc0] ss:$2 sm:$0xff] }
 0x233   :  { %3834 = vrot.lane.b32.xlu0 %v17361_v36, %s16232_s0  ;;  %v4090_v11 = vor.u32 %v4089_v7, %v3061_v60  ;;  %v4091_v61 = vrot.slane %v3071_v10, 1  ;;  %v3085_v24 = vshll.u32 %v17372_v12, 16  ;;  %v2879_v28 = vmax.f32 %v2379_v17, %v2635_v20  ;;  %v2383_v2 = vld [vmem:[#allocation2 + $0xd0] ss:$2 sm:$0xff]  ;;  %v2637_v30 = vld [vmem:[#allocation2 + $0xc1] ss:$2 sm:$0xff] }
 0x234   :  { %v2639_v31 = vld [vmem:[#allocation2 + $0xd1] ss:$2 sm:$0xff]  ;;  %v4094_v32 = vor.u32 %v4093_v23, %v3075_v22  ;;  %v3082_v33 = vshrl.u32 %v17372_v12, 16  ;;  %v3092_v35 = vshll.u32 %v17391_v26, 16  ;;  %v2880_v38 = vmax.f32 %v2381_v29, %v2637_v30  ;;  %v2385_v40 = vld [vmem:[#allocation2 + $0xe0] ss:$2 sm:$0xff] }
 0x235   :  { %4217 = vrot.lane.b32.xlu1 %v4090_v11, %s16233_s22  ;;  %v4092_v25 = vor.u32 %v4091_v61, %v3068_v9  ;;  %v4095_v34 = vrot.slane %v3085_v24, 1  ;;  %v17402_v37 = vpack.c.bf16 %v2879_v28, %v2878_v27  ;;  %v2881_v39 = vmax.f32 %v2383_v2, %v2639_v31  ;;  %v2387_v41 = vld [vmem:[#allocation2 + $0xf0] ss:$2 sm:$0xff]  ;;  %v2641_v42 = vld [vmem:[#allocation2 + $0xe1] ss:$2 sm:$0xff] }
 0x236   :  { %v2643_v43 = vld [vmem:[#allocation2 + $0xf1] ss:$2 sm:$0xff]  ;;  %v15664_v44 = vld [vmem:[%s21513_s3 + $0x40] sm:$0xff]   ;;  %v3089_v46 = vshrl.u32 %v17391_v26, 16  ;;  %v4097_v47 = vrot.slane %v3092_v35, 1  ;;  %v15665_v49 = vld [vmem:[%s21513_s3 + $0x48] sm:$0xff]   ;;  %v2882_v50 = vmax.f32 %v2385_v40, %v2641_v42 }
 0x237   :  { %3838 = vrot.lane.b32.xlu0 %v17372_v12, %s16232_s0  ;;  %v4096_v45 = vor.u32 %v4095_v34, %v3082_v33  ;;  %v3099_v19 = vshll.u32 %v17402_v37, 16  ;;  %14892 = vmatprep.subr.bf16.mxu0 %v15664_v44  ;;  %v17419_v16 = vpack.c.bf16 %v2881_v39, %v2880_v38  ;;  %v2883_v52 = vmax.f32 %v2387_v41, %v2643_v43  ;;  %v2389_v53 = vld [vmem:[#allocation2 + $0x100] ss:$2 sm:$0xff]  ;;  %v2391_v54 = vld [vmem:[#allocation2 + $0x110] ss:$2 sm:$0xff] }
 0x238   :  { %14893 = vmatpush3.bf16.msra.mxu0 %v15664_v44  ;;  %v2645_v55 = vld [vmem:[#allocation2 + $0x101] ss:$2 sm:$0xff]  ;;  %v2647_v57 = vld [vmem:[#allocation2 + $0x111] ss:$2 sm:$0xff]  ;;  %v4098_v58 = vor.u32 %v4097_v47, %v3089_v46  ;;  %v3096_v59 = vshrl.u32 %v17402_v37, 16 }
 0x239   :  { %4219 = vrot.lane.b32.xlu1 %v4092_v25, %s16233_s22  ;;  %14894 = vmatprep.subr.bf16.mxu0 %v15665_v49  ;;  %v4099_v63 = vrot.slane %v3099_v19, 1  ;;  %v3106_v1 = vshll.u32 %v17419_v16, 16  ;;  %v17433_v4 = vpack.c.bf16 %v2883_v52, %v2882_v50  ;;  %v2884_v5 = vmax.f32 %v2389_v53, %v2645_v55  ;;  %v2393_v7 = vld [vmem:[#allocation2 + $0x120] ss:$2 sm:$0xff]  ;;  %v2395_v11 = vld [vmem:[#allocation2 + $0x130] ss:$2 sm:$0xff] }
 0x23a   :  { %v2885_v6 = vmax.f32 %v2391_v54, %v2647_v57  ;;  %v2649_v13 = vld [vmem:[#allocation2 + $0x121] ss:$2 sm:$0xff]  ;;  %v2651_v14 = vld [vmem:[#allocation2 + $0x131] ss:$2 sm:$0xff]  ;;  %v3103_v17 = vshrl.u32 %v17419_v16, 16 }
 0x23b   :  { %3840 = vrot.lane.b32.xlu0 %v17391_v26, %s16232_s0  ;;  %v4100_v15 = vor.u32 %v4099_v63, %v3096_v59  ;;  %v4101_v61 = vrot.slane %v3106_v1, 1  ;;  %v3113_v18 = vshll.u32 %v17433_v4, 16  ;;  %v15667_v20 = vld [vmem:[%s21513_s3 + $0x58] sm:$0xff]   ;;  %v2886_v23 = vmax.f32 %v2393_v7, %v2649_v13  ;;  %v2397_v48 = vld [vmem:[#allocation2 + $0x140] ss:$2 sm:$0xff] }
 0x23c   :  { %14895 = vmatpush3.bf16.msra.mxu0 %v15665_v49  ;;  %v17447_v21 = vpack.c.bf16 %v2885_v6, %v2884_v5  ;;  %v2887_v25 = vmax.f32 %v2395_v11, %v2651_v14  ;;  %v2399_v27 = vld [vmem:[#allocation2 + $0x150] ss:$2 sm:$0xff]  ;;  %v2653_v28 = vld [vmem:[#allocation2 + $0x141] ss:$2 sm:$0xff]  ;;  %v2655_v29 = vld [vmem:[#allocation2 + $0x151] ss:$2 sm:$0xff] }
 0x23d   :  { %4221 = vrot.lane.b32.xlu1 %v4094_v32, %s16233_s22  ;;  %14896 = vmatprep.subr.bf16.mxu0 %v15666_v3  ;;  %v4102_v2 = vor.u32 %v4101_v61, %v3103_v17  ;;  %v3110_v30 = vshrl.u32 %v17433_v4, 16  ;;  %v4103_v31 = vrot.slane %v3113_v18, 1  ;;  %v15668_v34 = vld [vmem:[%s21513_s3] sm:$0xff]   ;;  %v2888_v39 = vmax.f32 %v2397_v48, %v2653_v28  ;;  %v2403_v42 = vld [vmem:[#allocation2 + $0x170] ss:$2 sm:$0xff] }
 0x23e   :  { %v3120_v32 = vshll.u32 %v17447_v21, 16  ;;  %v17461_v38 = vpack.c.bf16 %v2887_v25, %v2886_v23  ;;  %v2889_v40 = vmax.f32 %v2399_v27, %v2655_v29  ;;  %v2401_v41 = vld [vmem:[#allocation2 + $0x160] ss:$2 sm:$0xff]  ;;  %v2657_v43 = vld [vmem:[#allocation2 + $0x161] ss:$2 sm:$0xff]  ;;  %v3117_v47 = vshrl.u32 %v17447_v21, 16 }
 0x23f   :  { %3842 = vrot.lane.b32.xlu0 %v17402_v37, %s16232_s0  ;;  %v2659_v44 = vld [vmem:[#allocation2 + $0x171] ss:$2 sm:$0xff]  ;;  %v2890_v53 = vmax.f32 %v2401_v41, %v2657_v43  ;;  %v2405_v55 = vld [vmem:[#allocation2 + $0x180] ss:$2 sm:$0xff]  ;;  %v2407_v57 = vld [vmem:[#allocation2 + $0x190] ss:$2 sm:$0xff] }
 0x240   :  { %14897 = vmatpush3.bf16.msra.mxu0 %v15666_v3  ;;  %v4105_v49 = vrot.slane %v3120_v32, 1  ;;  %v3127_v50 = vshll.u32 %v17461_v38, 16  ;;  %v17472_v52 = vpack.c.bf16 %v2889_v40, %v2888_v39  ;;  %v2891_v54 = vmax.f32 %v2403_v42, %v2659_v44  ;;  %v2663_v63 = vld [vmem:[#allocation2 + $0x191] ss:$2 sm:$0xff]  ;;  %v2411_v61 = vld [vmem:[#allocation2 + $0x1b0] ss:$2 sm:$0xff] }
 0x241   :  { %4223 = vrot.lane.b32.xlu1 %v4096_v45, %s16233_s22  ;;  %14898 = vmatprep.subr.bf16.mxu0 %v15667_v20  ;;  %v4104_v45 = vor.u32 %v4103_v31, %v3110_v30  ;;  %v3124_v5 = vshrl.u32 %v17461_v38, 16  ;;  %v2893_v14 = vmax.f32 %v2407_v57, %v2663_v63  ;;  %v2667_v23 = vld [vmem:[#allocation2 + $0x1b1] ss:$2 sm:$0xff]  ;;  %v2413_v29 = vld [vmem:[#allocation2 + $0x1c0] ss:$2 sm:$0xff] }
 0x242   :  { %v4106_v3 = vor.u32 %v4105_v49, %v3117_v47  ;;  %v4107_v6 = vrot.slane %v3127_v50, 1  ;;  %v21530_v7 = vshll.u32 %v17472_v52, 16  ;;  %v17483_v11 = vpack.c.bf16 %v2891_v54, %v2890_v53  ;;  %v2415_v39 = vld [vmem:[#allocation2 + $0x1d0] ss:$2 sm:$0xff]  ;;  %v2669_v40 = vld [vmem:[#allocation2 + $0x1c1] ss:$2 sm:$0xff] }
 0x243   :  { %3844 = vrot.lane.b32.xlu0 %v17419_v16, %s16232_s0  ;;  %v3131_v48 = vshrl.u32 %v17472_v52, 16  ;;  %v2671_v41 = vld [vmem:[#allocation2 + $0x1d1] ss:$2 sm:$0xff]  ;;  %v3063_v49 = vrot.slane %v3061_v60, 7  ;;  %v3077_v53 = vrot.slane %v3075_v22, 7  ;;  %v2896_v54 = vmax.f32 %v2413_v29, %v2669_v40  ;;  %v3585_v26 = vld [vmem:[#allocation3 + $0x20] sm:$0xff] }
 0x244   :  { %14899 = vmatpush3.bf16.msra.mxu0 %v15667_v20  ;;  %v2665_v20 = vld [vmem:[#allocation2 + $0x1a1] ss:$2 sm:$0xff]  ;;  %v4108_v25 = vor.u32 %v4107_v6, %v3124_v5  ;;  %v4109_v27 = vrot.slane %v21530_v7, 1  ;;  %v21528_v28 = vshll.u32 %v17483_v11, 16  ;;  %v3138_v43 = vshrl.u32 %v17483_v11, 16 }
 0x245   :  { %4225 = vrot.lane.b32.xlu1 %v4098_v58, %s16233_s22  ;;  %15028 = vmatprep.subr.bf16.mxu0 %v15668_v34  ;;  %v2661_v58 = vld [vmem:[#allocation2 + $0x181] ss:$2 sm:$0xff]  ;;  %v2895_v34 = vmax.f32 %v2411_v61, %v2667_v23  ;;  %v2417_v57 = vld [vmem:[#allocation2 + $0x1e0] ss:$2 sm:$0xff]  ;;  %v2419_v63 = vld [vmem:[#allocation2 + $0x1f0] ss:$2 sm:$0xff] }
 0x246   :  { %v2892_v13 = vmax.f32 %v2405_v55, %v2661_v58  ;;  %v4110_v42 = vor.u32 %v4109_v27, %v3131_v48  ;;  %v4111_v44 = vrot.slane %v21528_v28, 1  ;;  %v2897_v55 = vmax.f32 %v2415_v39, %v2671_v41  ;;  %v2675_v6 = vld [vmem:[#allocation2 + $0x1f1] ss:$2 sm:$0xff]  ;;  %v2421_v29 = vld [vmem:[#allocation2 + $0x200] ss:$2 sm:$0xff] }
 0x247   :  { %3846 = vrot.lane.b32.xlu0 %v17433_v4, %s16232_s0  ;;  %v3084_v60 = vrot.slane %v3082_v33, 7  ;;  %v3091_v22 = vrot.slane %v3089_v46, 7  ;;  %v17524_v33 = vrot.slane %v3103_v17, 7  ;;  %v17534_v27 = vrot.slane %v3117_v47, 7  ;;  %v2677_v17 = vld [vmem:[#allocation2 + $0x201] ss:$2 sm:$0xff] }
 0x248   :  { %v17526_v23 = vpack.c.bf16 %v2897_v55, %v2896_v54  ;;  %v2679_v39 = vld [vmem:[#allocation2 + $0x211] ss:$2 sm:$0xff]  ;;  %v17541_v41 = vrot.slane %v3131_v48, 7  ;;  %v2425_v54 = vld [vmem:[#allocation2 + $0x220] ss:$2 sm:$0xff] }
 0x249   :  { %4227 = vrot.lane.b32.xlu1 %v4100_v15, %s16233_s22  ;;  %v2409_v15 = vld [vmem:[#allocation2 + $0x1a0] ss:$2 sm:$0xff]  ;;  %v2427_v55 = vld [vmem:[#allocation2 + $0x230] ss:$2 sm:$0xff]  ;;  %v2683_v48 = vld [vmem:[#allocation2 + $0x231] ss:$2 sm:$0xff]  ;;  %v3087_v7 = vor.u32 %v3085_v24, %v3084_v60 }
 0x24a   :  { %v2894_v31 = vmax.f32 %v2409_v15, %v2665_v20  ;;  %v4112_v15 = vor.u32 %v4111_v44, %v3138_v43  ;;  %v21529_v40 = vshll.u32 %v17526_v23, 16  ;;  %v2685_v28 = vld [vmem:[#allocation2 + $0x241] ss:$2 sm:$0xff] }
 0x24b   :  { %3848 = vrot.lane.b32.xlu0 %v17447_v21, %s16232_s0 }
 0x24c   :  { %v17505_v58 = vpack.c.bf16 %v2895_v34, %v2894_v31  ;;  %v2423_v31 = vld [vmem:[#allocation2 + $0x210] ss:$2 sm:$0xff]  ;;  %v17538_v34 = vrot.slane %v3124_v5, 7  ;;  %v2681_v5 = vld [vmem:[#allocation2 + $0x221] ss:$2 sm:$0xff] }
 0x24d   :  { %4229 = vrot.lane.b32.xlu1 %v4102_v2, %s16233_s22  ;;  %v17492_v2 = vpack.c.bf16 %v2893_v14, %v2892_v13  ;;  %v3070_v13 = vrot.slane %v3068_v9, 7  ;;  %v17515_v14 = vrot.slane %v3096_v59, 7  ;;  %v17530_v59 = vrot.slane %v3110_v30, 7 }
 0x24e   :  { %v21526_v9 = vshll.u32 %v17505_v58, 16 }
 0x24f   :  { %3850 = vrot.lane.b32.xlu0 %v17461_v38, %s16232_s0  ;;  %v3145_v61 = vshrl.u32 %v17492_v2, 16  ;;  %v3115_v37 = vor.u32 %v3113_v18, %v17530_v59  ;;  %v17628_v18 = vld [vmem:[#allocation2 + $0x280] ss:$2 sm:$0xff] }
 0x250   :  { %v4115_v47 = vrot.slane %v21526_v9, 1  ;;  %v2429_v9 = vld [vmem:[#allocation2 + $0x240] ss:$2 sm:$0xff] }
 0x251   :  { %4231 = vrot.lane.b32.xlu1 %v4104_v45, %s16233_s22  ;;  %v21527_v45 = vshll.u32 %v17492_v2, 16  ;;  %v2904_v12 = vmax.f32 %v2429_v9, %v2685_v28  ;;  %v3591_v28 = vld [vmem:[#allocation3 + $0x30] sm:$0xff]  ;;  %v3597_v59 = vld [vmem:[#allocation3 + $0x40] sm:$0xff] }
 0x253   :  { %3852 = vrot.lane.b32.xlu0 %v17472_v52, %s16232_s0  ;;  %v4113_v20 = vrot.slane %v21527_v45, 1  ;;  %v2431_v45 = vld [vmem:[#allocation2 + $0x250] ss:$2 sm:$0xff] }
 0x255   :  { %4233 = vrot.lane.b32.xlu1 %v4106_v3, %s16233_s22  ;;  %v2673_v3 = vld [vmem:[#allocation2 + $0x1e1] ss:$2 sm:$0xff]  ;;  %v4114_v30 = vor.u32 %v4113_v20, %v3145_v61 }
 0x256   :  { %v2898_v46 = vmax.f32 %v2417_v57, %v2673_v3  ;;  %v2900_v57 = vmax.f32 %v2421_v29, %v2677_v17  ;;  %v17551_v3 = vrot.slane %v3138_v43, 7  ;;  %v3066_v29 = vor.u32 %v3064_v62, %v3063_v49  ;;  %v3579_v62 = vld [vmem:[#allocation3 + $0x10] sm:$0xff] }
 0x257   :  { %3854 = vrot.lane.b32.xlu0 %v17483_v11, %s16232_s0  ;;  %v3080_v43 = vor.u32 %v3078_v8, %v3077_v53  ;;  %v2902_v17 = vmax.f32 %v2425_v54, %v2681_v5  ;;  %v17597_v54 = vld [vmem:[#allocation2 + $0x261] ss:$2 sm:$0xff]  ;;  %v3586_v5 = vsel %vm17581_vm2, %v3087_v7, %v3585_v26  ;;  %v3122_v7 = vor.u32 %v3120_v32, %v17534_v27  ;;  %v17633_v32 = vld [vmem:[#allocation2 + $0x290] ss:$2 sm:$0xff] }
 0x258   :  { %3587 = vst [vmem:[#allocation3 + $0x20] sm:$0xff] %v3586_v5  ;;  %v17635_v27 = vld [vmem:[#allocation2 + $0x281] ss:$2 sm:$0xff]  ;;  %v21544_v26 = vshll.u32 %v17505_v58, 16 }
 0x259   :  { %4235 = vrot.lane.b32.xlu1 %v4108_v25, %s16233_s22  ;;  %v2899_v25 = vmax.f32 %v2419_v63, %v2675_v6  ;;  %v2901_v63 = vmax.f32 %v2423_v31, %v2679_v39  ;;  %v3159_v6 = vshrl.u32 %v17526_v23, 16  ;;  %v3073_v31 = vor.u32 %v3071_v10, %v3070_v13  ;;  %v2701_v5 = vld [vmem:[#allocation2 + $0x2c1] ss:$2 sm:$0xff] }
 0x25a   :  { %v2903_v39 = vmax.f32 %v2427_v55, %v2683_v48 }
 0x25b   :  { %3856 = vrot.lane.b32.xlu0 %v17492_v2, %s16232_s0  ;;  %v17547_v44 = vpack.c.bf16 %v2899_v25, %v2898_v46  ;;  %v3576_v46 = vld [vmem:[#allocation3 + $0x8] sm:$0xff]  ;;  %v3582_v25 = vld [vmem:[#allocation3 + $0x18] sm:$0xff]  ;;  %v17574_v56 = vpack.c.bf16 %v2901_v63, %v2900_v57  ;;  %v3580_v55 = vsel %vm17581_vm2, %v3073_v31, %v3579_v62  ;;  %v3108_v57 = vor.u32 %v3106_v1, %v17524_v33 }
 0x25c   :  { %v3577_v13 = vsel %vm17581_vm2, %v3066_v29, %v3576_v46  ;;  %v3583_v60 = vsel %vm17581_vm2, %v3080_v43, %v3582_v25  ;;  %v3594_v63 = vld [vmem:[#allocation3 + $0x38] sm:$0xff]  ;;  %3581 = vst [vmem:[#allocation3 + $0x10] sm:$0xff] %v3580_v55  ;;  %v3129_v46 = vor.u32 %v3127_v50, %v17538_v34  ;;  %v3603_v25 = vld [vmem:[#allocation3 + $0x50] sm:$0xff]  ;;  %v21541_v29 = vshll.u32 %v17472_v52, 16 }
 0x25d   :  { %4237 = vrot.lane.b32.xlu1 %v4110_v42, %s16233_s22  ;;  %v3152_v42 = vshrl.u32 %v17505_v58, 16  ;;  %v3169_v20 = vshll.u32 %v17547_v44, 16  ;;  %v3166_v8 = vshrl.u32 %v17547_v44, 16  ;;  %v3176_v53 = vshll.u32 %v17574_v56, 16  ;;  %3578 = vst [vmem:[#allocation3 + $0x8] sm:$0xff] %v3577_v13  ;;  %3584 = vst [vmem:[#allocation3 + $0x18] sm:$0xff] %v3583_v60 }
 0x25e   :  { %v3136_v43 = vor.u32 %v21541_v29, %v17541_v41  ;;  %v21543_v50 = vshll.u32 %v17492_v2, 16  ;;  %v2695_v62 = vld [vmem:[#allocation2 + $0x291] ss:$2 sm:$0xff]  ;;  %v2908_v60 = vmax.f32 %v17628_v18, %v17635_v27  ;;  %v3621_v18 = vld [vmem:[#allocation3 + $0x80] sm:$0xff] }
 0x25f   :  { %3858 = vrot.lane.b32.xlu0 %v17505_v58, %s16232_s0  ;;  %v4116_v0 = vor.u32 %v4115_v47, %v3152_v42  ;;  %v17568_v47 = vrot.slane %v3145_v61, 7  ;;  %v17572_v51 = vrot.slane %v3152_v42, 7  ;;  %v4119_v10 = vrot.slane %v3169_v20, 1  ;;  %v17595_v42 = vld [vmem:[#allocation2 + $0x260] ss:$2 sm:$0xff]  ;;  %v3618_v55 = vld [vmem:[#allocation3 + $0x78] sm:$0xff] }
 0x260   :  { %v17591_v61 = vpack.c.bf16 %v2903_v39, %v2902_v17  ;;  %v17593_v9 = vrot.slane %v3166_v8, 7  ;;  %v4121_v1 = vrot.slane %v3176_v53, 1  ;;  %v2906_v4 = vmax.f32 %v17595_v42, %v17597_v54  ;;  %v3606_v39 = vld [vmem:[#allocation3 + $0x58] sm:$0xff] }
 0x261   :  { %4239 = vrot.lane.b32.xlu1 %v4112_v15, %s16233_s22  ;;  %v4117_v15 = vrot.slane %v21529_v40, 1  ;;  %v2687_v40 = vld [vmem:[#allocation2 + $0x251] ss:$2 sm:$0xff]  ;;  %v3595_v17 = vsel %vm17581_vm2, %v3108_v57, %v3594_v63  ;;  %v3150_v34 = vor.u32 %v21543_v50, %v17568_v47  ;;  %v2697_v47 = vld [vmem:[#allocation2 + $0x2a1] ss:$2 sm:$0xff] }
 0x262   :  { %v2905_v49 = vmax.f32 %v2431_v45, %v2687_v40  ;;  %v17604_v45 = vld [vmem:[#allocation2 + $0x270] ss:$2 sm:$0xff]  ;;  %v2691_v40 = vld [vmem:[#allocation2 + $0x271] ss:$2 sm:$0xff]  ;;  %v3183_v48 = vshll.u32 %v17591_v61, 16  ;;  %v3180_v31 = vshrl.u32 %v17591_v61, 16 }
 0x263   :  { %3860 = vrot.lane.b32.xlu0 %v17526_v23, %s16232_s0  ;;  %v4118_v36 = vor.u32 %v4117_v15, %v3159_v6  ;;  %v2907_v21 = vmax.f32 %v17604_v45, %v2691_v40  ;;  %3596 = vst [vmem:[#allocation3 + $0x38] sm:$0xff] %v3595_v17  ;;  %v2443_v42 = vld [vmem:[#allocation2 + $0x2b0] ss:$2 sm:$0xff]  ;;  %v2699_v54 = vld [vmem:[#allocation2 + $0x2b1] ss:$2 sm:$0xff]  ;;  %v3607_v45 = vsel %vm17581_vm2, %v3136_v43, %v3606_v39 }
 0x264   :  { %v17622_v16 = vpack.c.bf16 %v2905_v49, %v2904_v12  ;;  %v4123_v41 = vrot.slane %v3183_v48, 1  ;;  %v3612_v12 = vld [vmem:[#allocation3 + $0x68] sm:$0xff]  ;;  %v21545_v49 = vshll.u32 %v17526_v23, 16  ;;  %v3615_v40 = vld [vmem:[#allocation3 + $0x70] sm:$0xff]  ;;  %v2909_v23 = vmax.f32 %v17633_v32, %v2695_v62  ;;  %3608 = vst [vmem:[#allocation3 + $0x58] sm:$0xff] %v3607_v45 }
 0x265   :  { %4241 = vrot.lane.b32.xlu1 %v4114_v30, %s16233_s22  ;;  %v3094_v30 = vor.u32 %v3092_v35, %v3091_v22  ;;  %v3588_v35 = vld [vmem:[#allocation3 + $0x28] sm:$0xff]  ;;  %v3161_v22 = vrot.slane %v3159_v6, 7  ;;  %v17678_v58 = vpack.c.bf16 %v2907_v21, %v2906_v4  ;;  %v3613_v63 = vsel %vm17581_vm2, %v3150_v34, %v3612_v12  ;;  %v2455_v34 = vld [vmem:[#allocation2 + $0x310] ss:$2 sm:$0xff] }
 0x266   :  { %v3600_v6 = vld [vmem:[#allocation3 + $0x48] sm:$0xff]  ;;  %v3190_v2 = vshll.u32 %v17622_v16, 16  ;;  %3614 = vst [vmem:[#allocation3 + $0x68] sm:$0xff] %v3613_v63  ;;  %v2911_v21 = vmax.f32 %v2443_v42, %v2699_v54  ;;  %v2463_v45 = vld [vmem:[#allocation2 + $0x350] ss:$2 sm:$0xff] }
 0x267   :  { %3862 = vrot.lane.b32.xlu0 %v17547_v44, %s16232_s0  ;;  %v3589_v33 = vsel %vm17581_vm2, %v3094_v30, %v3588_v35  ;;  %v21542_v30 = vshll.u32 %v17483_v11, 16  ;;  %v3157_v35 = vor.u32 %v21544_v26, %v17572_v51  ;;  %v3164_v13 = vor.u32 %v21545_v49, %v3161_v22  ;;  %v2445_v51 = vld [vmem:[#allocation2 + $0x2c0] ss:$2 sm:$0xff]  ;;  %v2447_v22 = vld [vmem:[#allocation2 + $0x2d0] ss:$2 sm:$0xff] }
 0x268   :  { %3590 = vst [vmem:[#allocation3 + $0x28] sm:$0xff] %v3589_v33  ;;  %v2912_v32 = vmax.f32 %v2445_v51, %v2701_v5  ;;  %v2449_v17 = vld [vmem:[#allocation2 + $0x2e0] ss:$2 sm:$0xff]  ;;  %v2705_v39 = vld [vmem:[#allocation2 + $0x2e1] ss:$2 sm:$0xff] }
 0x269   :  { %4243 = vrot.lane.b32.xlu1 %v4116_v0, %s16233_s22  ;;  %v3101_v0 = vor.u32 %v3099_v19, %v17515_v14  ;;  %v4120_v19 = vor.u32 %v4119_v10, %v3166_v8  ;;  %v3173_v14 = vshrl.u32 %v17574_v56, 16  ;;  %v3143_v38 = vor.u32 %v21542_v30, %v17551_v3  ;;  %v3609_v10 = vld [vmem:[#allocation3 + $0x60] sm:$0xff]  ;;  %v2707_v30 = vld [vmem:[#allocation2 + $0x2f1] ss:$2 sm:$0xff]  ;;  %v2459_v49 = vld [vmem:[#allocation2 + $0x330] ss:$2 sm:$0xff] }
 0x26a   :  { %v3601_v8 = vsel %vm17581_vm2, %v3122_v7, %v3600_v6  ;;  %v2441_v3 = vld [vmem:[#allocation2 + $0x2a0] ss:$2 sm:$0xff]  ;;  %v3197_v7 = vshll.u32 %v17678_v58, 16  ;;  %v3619_v4 = vsel %vm17581_vm2, %v3164_v13, %v3618_v55  ;;  %v17698_v6 = vpack.c.bf16 %v2909_v23, %v2908_v60  ;;  %v2713_v13 = vld [vmem:[#allocation2 + $0x321] ss:$2 sm:$0xff] }
 0x26b   :  { %3864 = vrot.lane.b32.xlu0 %v17574_v56, %s16232_s0  ;;  %v3592_v15 = vsel %vm17581_vm2, %v3101_v0, %v3591_v28  ;;  %v3175_v52 = vrot.slane %v3173_v14, 7  ;;  %v4122_v11 = vor.u32 %v4121_v1, %v3173_v14  ;;  %3602 = vst [vmem:[#allocation3 + $0x48] sm:$0xff] %v3601_v8  ;;  %v3187_v28 = vshrl.u32 %v17622_v16, 16  ;;  %3620 = vst [vmem:[#allocation3 + $0x78] sm:$0xff] %v3619_v4  ;;  %v2715_v60 = vld [vmem:[#allocation2 + $0x331] ss:$2 sm:$0xff] }
 0x26c   :  { %3593 = vst [vmem:[#allocation3 + $0x30] sm:$0xff] %v3592_v15  ;;  %v3604_v0 = vsel %vm17581_vm2, %v3129_v46, %v3603_v25  ;;  %v3610_v57 = vsel %vm17581_vm2, %v3143_v38, %v3609_v10  ;;  %v4125_v14 = vrot.slane %v3190_v2, 1  ;;  %v3616_v1 = vsel %vm17581_vm2, %v3157_v35, %v3615_v40  ;;  %v3624_v15 = vld [vmem:[#allocation3 + $0x98] sm:$0xff]  ;;  %v2453_v38 = vld [vmem:[#allocation2 + $0x300] ss:$2 sm:$0xff] }
 0x26d   :  { %4245 = vrot.lane.b32.xlu1 %v4118_v36, %s16233_s22  ;;  %v3598_v36 = vsel %vm17581_vm2, %v3115_v37, %v3597_v59  ;;  %3605 = vst [vmem:[#allocation3 + $0x50] sm:$0xff] %v3604_v0  ;;  %v4124_v37 = vor.u32 %v4123_v41, %v3180_v31  ;;  %3611 = vst [vmem:[#allocation3 + $0x60] sm:$0xff] %v3610_v57  ;;  %v2910_v33 = vmax.f32 %v2441_v3, %v2697_v47  ;;  %v2711_v41 = vld [vmem:[#allocation2 + $0x311] ss:$2 sm:$0xff]  ;;  %v2461_v0 = vld [vmem:[#allocation2 + $0x340] ss:$2 sm:$0xff] }
 0x26e   :  { %3599 = vst [vmem:[#allocation3 + $0x40] sm:$0xff] %v3598_v36  ;;  %3617 = vst [vmem:[#allocation3 + $0x70] sm:$0xff] %v3616_v1  ;;  %v3171_v59 = vor.u32 %v3169_v20, %v17593_v9  ;;  %v3182_v46 = vrot.slane %v3180_v31, 7  ;;  %v3194_v25 = vshrl.u32 %v17678_v58, 16  ;;  %v3178_v43 = vor.u32 %v3176_v53, %v3175_v52  ;;  %v2451_v31 = vld [vmem:[#allocation2 + $0x2f0] ss:$2 sm:$0xff] }
 0x26f   :  { %3866 = vrot.lane.b32.xlu0 %v17591_v61, %s16232_s0  ;;  %v4126_v44 = vor.u32 %v4125_v14, %v3187_v28  ;;  %v4127_v20 = vrot.slane %v3197_v7, 1  ;;  %v3204_v9 = vshll.u32 %v17698_v6, 16  ;;  %v17715_v53 = vpack.c.bf16 %v2911_v21, %v2910_v33  ;;  %v2709_v52 = vld [vmem:[#allocation2 + $0x301] ss:$2 sm:$0xff]  ;;  %v2719_v51 = vld [vmem:[#allocation2 + $0x351] ss:$2 sm:$0xff] }
 0x270   :  { %v3622_v29 = vsel %vm17581_vm2, %v3171_v59, %v3621_v18  ;;  %v3625_v56 = vsel %vm17581_vm2, %v3178_v43, %v3624_v15  ;;  %v3201_v62 = vshrl.u32 %v17698_v6, 16  ;;  %v2914_v3 = vmax.f32 %v2449_v17, %v2705_v39  ;;  %v2717_v23 = vld [vmem:[#allocation2 + $0x341] ss:$2 sm:$0xff]  ;;  %v2723_v43 = vld [vmem:[#allocation2 + $0x371] ss:$2 sm:$0xff] }
 0x271   :  { %4247 = vrot.lane.b32.xlu1 %v4120_v19, %s16233_s22  ;;  %v2703_v19 = vld [vmem:[#allocation2 + $0x2d1] ss:$2 sm:$0xff]  ;;  %3623 = vst [vmem:[#allocation3 + $0x80] sm:$0xff] %v3622_v29  ;;  %3626 = vst [vmem:[#allocation3 + $0x98] sm:$0xff] %v3625_v56  ;;  %v4128_v36 = vor.u32 %v4127_v20, %v3194_v25  ;;  %v4129_v8 = vrot.slane %v3204_v9, 1  ;;  %v3211_v10 = vshll.u32 %v17715_v53, 16  ;;  %v2915_v47 = vmax.f32 %v2451_v31, %v2707_v30 }
 0x272   :  { %v2913_v27 = vmax.f32 %v2447_v22, %v2703_v19  ;;  %v2916_v26 = vmax.f32 %v2453_v38, %v2709_v52  ;;  %v2917_v35 = vmax.f32 %v2455_v34, %v2711_v41  ;;  %v3189_v42 = vrot.slane %v3187_v28, 7  ;;  %v3627_v22 = vld [vmem:[#allocation3 + $0xa0] sm:$0xff]  ;;  %v3630_v14 = vld [vmem:[#allocation3 + $0xa8] sm:$0xff] }
 0x273   :  { %3868 = vrot.lane.b32.xlu0 %v17622_v16, %s16232_s0  ;;  %v3196_v54 = vrot.slane %v3194_v25, 7  ;;  %v3185_v40 = vor.u32 %v3183_v48, %v3182_v46  ;;  %v3208_v55 = vshrl.u32 %v17715_v53, 16  ;;  %v4130_v5 = vor.u32 %v4129_v8, %v3201_v62  ;;  %v2721_v29 = vld [vmem:[#allocation2 + $0x361] ss:$2 sm:$0xff]  ;;  %v2469_v8 = vld [vmem:[#allocation2 + $0x380] ss:$2 sm:$0xff] }
 0x274   :  { %v17717_v50 = vpack.c.bf16 %v2913_v27, %v2912_v32  ;;  %v4131_v28 = vrot.slane %v3211_v10, 1  ;;  %v2919_v63 = vmax.f32 %v2459_v49, %v2715_v60  ;;  %v17737_v19 = vpack.c.bf16 %v2917_v35, %v2916_v26  ;;  %v2465_v32 = vld [vmem:[#allocation2 + $0x360] ss:$2 sm:$0xff]  ;;  %v2467_v27 = vld [vmem:[#allocation2 + $0x370] ss:$2 sm:$0xff] }
 0x275   :  { %4249 = vrot.lane.b32.xlu1 %v4122_v11, %s16233_s22  ;;  %v2457_v11 = vld [vmem:[#allocation2 + $0x320] ss:$2 sm:$0xff]  ;;  %v2920_v1 = vmax.f32 %v2461_v0, %v2717_v23  ;;  %v2921_v4 = vmax.f32 %v2463_v45, %v2719_v51  ;;  %v3628_v18 = vsel %vm17581_vm2, %v3185_v40, %v3627_v22  ;;  %v3192_v33 = vor.u32 %v3190_v2, %v3189_v42  ;;  %v2725_v26 = vld [vmem:[#allocation2 + $0x381] ss:$2 sm:$0xff]  ;;  %v2727_v35 = vld [vmem:[#allocation2 + $0x391] ss:$2 sm:$0xff] }
 0x276   :  { %v3218_v12 = vshll.u32 %v17717_v50, 16  ;;  %v2918_v57 = vmax.f32 %v2457_v11, %v2713_v13  ;;  %v3215_v61 = vshrl.u32 %v17717_v50, 16  ;;  %3629 = vst [vmem:[#allocation3 + $0xa0] sm:$0xff] %v3628_v18  ;;  %v4132_v15 = vor.u32 %v4131_v28, %v3208_v55  ;;  %v2473_v0 = vld [vmem:[#allocation2 + $0x3a0] ss:$2 sm:$0xff]  ;;  %v3633_v45 = vld [vmem:[#allocation3 + $0xb0] sm:$0xff] }
 0x277   :  { %3870 = vrot.lane.b32.xlu0 %v17678_v58, %s16232_s0  ;;  %v3232_v25 = vshll.u32 %v17737_v19, 16  ;;  %v3631_v16 = vsel %vm17581_vm2, %v3192_v33, %v3630_v14  ;;  %v3203_v2 = vrot.slane %v3201_v62, 7  ;;  %v3229_v17 = vshrl.u32 %v17737_v19, 16  ;;  %v2729_v23 = vld [vmem:[#allocation2 + $0x3a1] ss:$2 sm:$0xff] }
 0x278   :  { %v4133_v48 = vrot.slane %v3218_v12, 1  ;;  %v17751_v46 = vpack.c.bf16 %v2919_v63, %v2918_v57  ;;  %v17758_v20 = vrot.slane %v3215_v61, 7  ;;  %3632 = vst [vmem:[#allocation3 + $0xa8] sm:$0xff] %v3631_v16  ;;  %v17765_v30 = vpack.c.bf16 %v2921_v4, %v2920_v1  ;;  %v2731_v58 = vld [vmem:[#allocation2 + $0x3b1] ss:$2 sm:$0xff] }
 0x279   :  { %4251 = vrot.lane.b32.xlu1 %v4124_v37, %s16233_s22  ;;  %v17735_v37 = vpack.c.bf16 %v2915_v47, %v2914_v3  ;;  %v17770_v34 = vrot.slane %v3229_v17, 7  ;;  %v2922_v52 = vmax.f32 %v2465_v32, %v2721_v29  ;;  %v2923_v41 = vmax.f32 %v2467_v27, %v2723_v43  ;;  %v2471_v47 = vld [vmem:[#allocation2 + $0x390] ss:$2 sm:$0xff]  ;;  %v2477_v1 = vld [vmem:[#allocation2 + $0x3c0] ss:$2 sm:$0xff] }
 0x27a   :  { %v4134_v31 = vor.u32 %v4133_v48, %v3215_v61  ;;  %v3239_v38 = vshll.u32 %v17751_v46, 16  ;;  %v4137_v62 = vrot.slane %v3232_v25, 1  ;;  %v3243_v11 = vshrl.u32 %v17765_v30, 16  ;;  %v2479_v4 = vld [vmem:[#allocation2 + $0x3d0] ss:$2 sm:$0xff] }
 0x27b   :  { %3872 = vrot.lane.b32.xlu0 %v17698_v6, %s16232_s0  ;;  %v3222_v59 = vshrl.u32 %v17735_v37, 16  ;;  %v3225_v21 = vshll.u32 %v17735_v37, 16  ;;  %v3246_v3 = vshll.u32 %v17765_v30, 16  ;;  %v3199_v49 = vor.u32 %v3197_v7, %v3196_v54  ;;  %v2733_v18 = vld [vmem:[#allocation2 + $0x3c1] ss:$2 sm:$0xff] }
 0x27c   :  { %v4139_v60 = vrot.slane %v3239_v38, 1  ;;  %v17788_v42 = vrot.slane %v3243_v11, 7  ;;  %v17790_v40 = vpack.c.bf16 %v2923_v41, %v2922_v52  ;;  %v2924_v54 = vmax.f32 %v2469_v8, %v2725_v26  ;;  %v2735_v33 = vld [vmem:[#allocation2 + $0x3d1] ss:$2 sm:$0xff]  ;;  %v2483_v32 = vld [vmem:[#allocation2 + $0x3f0] ss:$2 sm:$0xff] }
 0x27d   :  { %4253 = vrot.lane.b32.xlu1 %v4126_v44, %s16233_s22  ;;  %v17756_v44 = vrot.slane %v3208_v55, 7  ;;  %v17763_v39 = vrot.slane %v3222_v59, 7  ;;  %v4135_v56 = vrot.slane %v3225_v21, 1  ;;  %v2475_v55 = vld [vmem:[#allocation2 + $0x3b0] ss:$2 sm:$0xff]  ;;  %v2925_v51 = vmax.f32 %v2471_v47, %v2727_v35 }
 0x27e   :  { %v4141_v22 = vrot.slane %v3246_v3, 1  ;;  %v3250_v28 = vshrl.u32 %v17790_v40, 16  ;;  %v3253_v57 = vshll.u32 %v17790_v40, 16  ;;  %v3634_v63 = vsel %vm17581_vm2, %v3199_v49, %v3633_v45  ;;  %v2737_v27 = vld [vmem:[#allocation2 + $0x3e1] ss:$2 sm:$0xff] }
 0x27f   :  { %3874 = vrot.lane.b32.xlu0 %v17715_v53, %s16232_s0  ;;  %v4136_v7 = vor.u32 %v4135_v56, %v3222_v59  ;;  %v3206_v61 = vor.u32 %v3204_v9, %v3203_v2  ;;  %v2926_v48 = vmax.f32 %v2473_v0, %v2729_v23  ;;  %v2927_v14 = vmax.f32 %v2475_v55, %v2731_v58  ;;  %v2481_v59 = vld [vmem:[#allocation2 + $0x3e0] ss:$2 sm:$0xff]  ;;  %v2487_v16 = vld [vmem:[#allocation2 + $0x410] ss:$2 sm:$0xff]  ;;  %v2741_v2 = vld [vmem:[#allocation2 + $0x401] ss:$2 sm:$0xff] }
 0x280   :  { %3635 = vst [vmem:[#allocation3 + $0xb0] sm:$0xff] %v3634_v63  ;;  %v4138_v6 = vor.u32 %v4137_v62, %v3229_v17  ;;  %v17806_v9 = vpack.c.bf16 %v2925_v51, %v2924_v54  ;;  %v2485_v43 = vld [vmem:[#allocation2 + $0x400] ss:$2 sm:$0xff]  ;;  %v17810_v56 = vrot.slane %v3250_v28, 7  ;;  %v4143_v52 = vrot.slane %v3253_v57, 1 }
 0x281   :  { %4255 = vrot.lane.b32.xlu1 %v4128_v36, %s16233_s22  ;;  %v3236_v36 = vshrl.u32 %v17751_v46, 16  ;;  %v2743_v41 = vld [vmem:[#allocation2 + $0x411] ss:$2 sm:$0xff]  ;;  %v3213_v8 = vor.u32 %v3211_v10, %v17756_v44  ;;  %v3639_v17 = vld [vmem:[#allocation3 + $0xc0] sm:$0xff]  ;;  %v3642_v62 = vld [vmem:[#allocation3 + $0xc8] sm:$0xff]  ;;  %v17819_v47 = vpack.c.bf16 %v2927_v14, %v2926_v48  ;;  %v3220_v35 = vor.u32 %v3218_v12, %v17758_v20 }
 0x282   :  { %v3260_v26 = vshll.u32 %v17806_v9, 16  ;;  %v2928_v49 = vmax.f32 %v2477_v1, %v2733_v18  ;;  %v2930_v0 = vmax.f32 %v2481_v59, %v2737_v27  ;;  %v2932_v10 = vmax.f32 %v2485_v43, %v2741_v2  ;;  %v2489_v45 = vld [vmem:[#allocation2 + $0x420] ss:$2 sm:$0xff]  ;;  %v2491_v58 = vld [vmem:[#allocation2 + $0x430] ss:$2 sm:$0xff] }
 0x283   :  { %3876 = vrot.lane.b32.xlu0 %v17717_v50, %s16232_s0  ;;  %v17782_v13 = vrot.slane %v3236_v36, 7  ;;  %v2933_v44 = vmax.f32 %v2487_v16, %v2743_v41  ;;  %v3640_v55 = vsel %vm17581_vm2, %v3213_v8, %v3639_v17  ;;  %v3643_v23 = vsel %vm17581_vm2, %v3220_v35, %v3642_v62  ;;  %v2747_v54 = vld [vmem:[#allocation2 + $0x431] ss:$2 sm:$0xff]  ;;  %v2495_v14 = vld [vmem:[#allocation2 + $0x450] ss:$2 sm:$0xff] }
 0x284   :  { %3641 = vst [vmem:[#allocation3 + $0xc0] sm:$0xff] %v3640_v55  ;;  %3644 = vst [vmem:[#allocation3 + $0xc8] sm:$0xff] %v3643_v23  ;;  %v4145_v12 = vrot.slane %v3260_v26, 1  ;;  %v3264_v20 = vshrl.u32 %v17819_v47, 16  ;;  %v3267_v51 = vshll.u32 %v17819_v47, 16  ;;  %v4142_v63 = vor.u32 %v4141_v22, %v3243_v11  ;;  %v3645_v16 = vld [vmem:[#allocation3 + $0xd0] sm:$0xff] }
 0x285   :  { %4257 = vrot.lane.b32.xlu1 %v4130_v5, %s16233_s22  ;;  %v3636_v5 = vld [vmem:[#allocation3 + $0xb8] sm:$0xff]  ;;  %v2749_v1 = vld [vmem:[#allocation2 + $0x441] ss:$2 sm:$0xff]  ;;  %v17848_v18 = vpack.c.bf16 %v2933_v44, %v2932_v10  ;;  %v2935_v59 = vmax.f32 %v2491_v58, %v2747_v54  ;;  %v3227_v11 = vor.u32 %v3225_v21, %v17763_v39  ;;  %v4144_v22 = vor.u32 %v4143_v52, %v3250_v28  ;;  %v2501_v8 = vld [vmem:[#allocation2 + $0x480] ss:$2 sm:$0xff] }
 0x286   :  { %v3637_v29 = vsel %vm17581_vm2, %v3206_v61, %v3636_v5  ;;  %v2493_v5 = vld [vmem:[#allocation2 + $0x440] ss:$2 sm:$0xff]  ;;  %v2499_v27 = vld [vmem:[#allocation2 + $0x470] ss:$2 sm:$0xff]  ;;  %v2755_v43 = vld [vmem:[#allocation2 + $0x471] ss:$2 sm:$0xff] }
 0x287   :  { %3878 = vrot.lane.b32.xlu0 %v17735_v37, %s16232_s0  ;;  %3638 = vst [vmem:[#allocation3 + $0xb8] sm:$0xff] %v3637_v29  ;;  %v17861_v2 = vrot.slane %v3264_v20, 7  ;;  %v2936_v37 = vmax.f32 %v2493_v5, %v2749_v1  ;;  %v3288_v39 = vshll.u32 %v17848_v18, 16  ;;  %v4147_v28 = vrot.slane %v3267_v51, 1  ;;  %v3648_v5 = vld [vmem:[#allocation3 + $0xd8] sm:$0xff] }
 0x288   :  { %v3285_v41 = vshrl.u32 %v17848_v18, 16  ;;  %v2939_v35 = vmax.f32 %v2499_v27, %v2755_v43 }
 0x289   :  { %4259 = vrot.lane.b32.xlu1 %v4132_v15, %s16233_s22  ;;  %v2739_v15 = vld [vmem:[#allocation2 + $0x3f1] ss:$2 sm:$0xff] }
 0x28a   :  { %v2931_v53 = vmax.f32 %v2483_v32, %v2739_v15  ;;  %v2497_v32 = vld [vmem:[#allocation2 + $0x460] ss:$2 sm:$0xff]  ;;  %v2753_v15 = vld [vmem:[#allocation2 + $0x461] ss:$2 sm:$0xff]  ;;  %v17894_v58 = vrot.slane %v3285_v41, 7 }
 0x28b   :  { %3880 = vrot.lane.b32.xlu0 %v17737_v19, %s16232_s0  ;;  %v2938_v62 = vmax.f32 %v2497_v32, %v2753_v15  ;;  %v2505_v19 = vld [vmem:[#allocation2 + $0x4a0] ss:$2 sm:$0xff] }
 0x28c   :  { %v17845_v48 = vpack.c.bf16 %v2931_v53, %v2930_v0  ;;  %v2759_v0 = vld [vmem:[#allocation2 + $0x491] ss:$2 sm:$0xff]  ;;  %v3646_v53 = vsel %vm17581_vm2, %v3227_v11, %v3645_v16  ;;  %v2509_v16 = vld [vmem:[#allocation2 + $0x4c0] ss:$2 sm:$0xff] }
 0x28d   :  { %4261 = vrot.lane.b32.xlu1 %v4134_v31, %s16233_s22  ;;  %v4140_v31 = vor.u32 %v4139_v60, %v3236_v36  ;;  %v3257_v36 = vshrl.u32 %v17806_v9, 16  ;;  %v2929_v60 = vmax.f32 %v2479_v4, %v2735_v33  ;;  %v2751_v4 = vld [vmem:[#allocation2 + $0x451] ss:$2 sm:$0xff]  ;;  %3647 = vst [vmem:[#allocation3 + $0xd0] sm:$0xff] %v3646_v53  ;;  %v17910_v27 = vpack.c.bf16 %v2939_v35, %v2938_v62  ;;  %v2765_v35 = vld [vmem:[#allocation2 + $0x4c1] ss:$2 sm:$0xff] }
 0x28e   :  { %v2937_v21 = vmax.f32 %v2495_v14, %v2751_v4  ;;  %v3278_v52 = vshrl.u32 %v17845_v48, 16  ;;  %v3234_v4 = vor.u32 %v3232_v25, %v17770_v34  ;;  %v2507_v25 = vld [vmem:[#allocation2 + $0x4b0] ss:$2 sm:$0xff] }
 0x28f   :  { %3882 = vrot.lane.b32.xlu0 %v17751_v46, %s16232_s0  ;;  %v17835_v50 = vrot.slane %v3257_v36, 7  ;;  %v17843_v61 = vpack.c.bf16 %v2929_v60, %v2928_v49  ;;  %v2503_v49 = vld [vmem:[#allocation2 + $0x490] ss:$2 sm:$0xff]  ;;  %v2757_v60 = vld [vmem:[#allocation2 + $0x481] ss:$2 sm:$0xff]  ;;  %v4146_v32 = vor.u32 %v4145_v12, %v3257_v36  ;;  %v3309_v43 = vshll.u32 %v17910_v27, 16 }
 0x290   :  { %v17890_v23 = vpack.c.bf16 %v2937_v21, %v2936_v37  ;;  %v2940_v14 = vmax.f32 %v2501_v8, %v2757_v60  ;;  %v2941_v1 = vmax.f32 %v2503_v49, %v2759_v0  ;;  %v3649_v36 = vsel %vm17581_vm2, %v3234_v4, %v3648_v5  ;;  %v2511_v37 = vld [vmem:[#allocation2 + $0x4d0] ss:$2 sm:$0xff]  ;;  %v3654_v21 = vld [vmem:[#allocation3 + $0xe8] sm:$0xff]  ;;  %v2767_v49 = vld [vmem:[#allocation2 + $0x4d1] ss:$2 sm:$0xff] }
 0x291   :  { %4263 = vrot.lane.b32.xlu1 %v4136_v7, %s16233_s22  ;;  %v2745_v7 = vld [vmem:[#allocation2 + $0x421] ss:$2 sm:$0xff]  ;;  %v3274_v29 = vshll.u32 %v17843_v61, 16  ;;  %3650 = vst [vmem:[#allocation3 + $0xd8] sm:$0xff] %v3649_v36  ;;  %v4148_v8 = vor.u32 %v4147_v28, %v3264_v20  ;;  %v3248_v60 = vor.u32 %v3246_v3, %v17788_v42  ;;  %v17951_v42 = vld [vmem:[#allocation2 + $0x4e0] ss:$2 sm:$0xff] }
 0x292   :  { %v2934_v33 = vmax.f32 %v2489_v45, %v2745_v7  ;;  %v17882_v45 = vrot.slane %v3278_v52, 7  ;;  %v17898_v7 = vrot.slane %v3288_v39, 1  ;;  %v3302_v34 = vshll.u32 %v17890_v23, 16  ;;  %v3657_v4 = vld [vmem:[#allocation3 + $0xf0] sm:$0xff] }
 0x293   :  { %3884 = vrot.lane.b32.xlu0 %v17765_v30, %s16232_s0  ;;  %v4149_v44 = vrot.slane %v3274_v29, 1  ;;  %v17930_v62 = vpack.c.bf16 %v2941_v1, %v2940_v14  ;;  %v17953_v14 = vld [vmem:[#allocation2 + $0x4f0] ss:$2 sm:$0xff]  ;;  %v3655_v1 = vsel %vm17581_vm2, %v3248_v60, %v3654_v21  ;;  %v17977_v36 = vrot.slane %v3309_v43, 1 }
 0x294   :  { %v17870_v17 = vpack.c.bf16 %v2935_v59, %v2934_v33  ;;  %v3241_v33 = vor.u32 %v3239_v38, %v17782_v13  ;;  %v3299_v38 = vshrl.u32 %v17890_v23, 16  ;;  %v2761_v13 = vld [vmem:[#allocation2 + $0x4a1] ss:$2 sm:$0xff]  ;;  %3656 = vst [vmem:[#allocation3 + $0xe8] sm:$0xff] %v3655_v1  ;;  %v17988_v21 = vld [vmem:[#allocation2 + $0x510] ss:$2 sm:$0xff] }
 0x295   :  { %4265 = vrot.lane.b32.xlu1 %v4138_v6, %s16233_s22  ;;  %v3281_v6 = vshll.u32 %v17845_v48, 16  ;;  %v2942_v28 = vmax.f32 %v2505_v19, %v2761_v13  ;;  %v3316_v3 = vshll.u32 %v17930_v62, 16  ;;  %v3313_v19 = vshrl.u32 %v17930_v62, 16  ;;  %v2775_v1 = vld [vmem:[#allocation2 + $0x511] ss:$2 sm:$0xff] }
 0x296   :  { %v3292_v54 = vshrl.u32 %v17870_v17, 16  ;;  %v3295_v11 = vshll.u32 %v17870_v17, 16  ;;  %v17969_v13 = vrot.slane %v3302_v34, 1  ;;  %v15676_v53 = vld [vmem:[%s21513_s3 + $0x70] sm:$0xff]  }
 0x297   :  { %3886 = vrot.lane.b32.xlu0 %v17790_v40, %s16232_s0  ;;  %v17886_v55 = vrot.slane %v3281_v6, 1  ;;  %v18000_v60 = vrot.slane %v3316_v3, 1 }
 0x298   :  { %v17914_v15 = vrot.slane %v3292_v54, 7  ;;  %v17944_v20 = vrot.slane %v3295_v11, 1 }
 0x299   :  { %4267 = vrot.lane.b32.xlu1 %v4140_v31, %s16233_s22  ;;  %v3271_v31 = vshrl.u32 %v17843_v61, 16 }
 0x29b   :  { %3888 = vrot.lane.b32.xlu0 %v17806_v9, %s16232_s0  ;;  %v17876_v10 = vrot.slane %v3271_v31, 7  ;;  %v4150_v30 = vor.u32 %v4149_v44, %v3271_v31  ;;  %v2771_v31 = vld [vmem:[#allocation2 + $0x4f1] ss:$2 sm:$0xff]  ;;  %v3255_v44 = vor.u32 %v3253_v57, %v17810_v56  ;;  %v17984_v56 = vrot.slane %v3313_v19, 7 }
 0x29d   :  { %4269 = vrot.lane.b32.xlu1 %v4142_v63, %s16233_s22  ;;  %v3651_v63 = vld [vmem:[#allocation3 + $0xe0] sm:$0xff] }
 0x29e   :  { %v3652_v12 = vsel %vm17581_vm2, %v3241_v33, %v3651_v63  ;;  %v3306_v63 = vshrl.u32 %v17910_v27, 16 }
 0x29f   :  { %3890 = vrot.lane.b32.xlu0 %v17819_v47, %s16232_s0  ;;  %3653 = vst [vmem:[#allocation3 + $0xe0] sm:$0xff] %v3652_v12  ;;  %v3660_v12 = vld [vmem:[#allocation3 + $0xf8] sm:$0xff] }
 0x2a1   :  { %v3833_v59 = vpop.permute.xlu0 %3832  ;;  %4271 = vrot.lane.b32.xlu1 %v4144_v22, %s16233_s22  ;;  %v2763_v22 = vld [vmem:[#allocation2 + $0x4b1] ss:$2 sm:$0xff] }
 0x2a2   :  { %4025 = vst.msk [vmem:[#allocation3 + $0x8] sm:$0xff] %vm4024_vm3, %v3833_v59  ;;  %v3837_v46 = vpop.permute.xlu1 %3836  ;;  %v2943_v5 = vmax.f32 %v2507_v25, %v2763_v22  ;;  %v2944_v59 = vmax.f32 %v2509_v16, %v2765_v35  ;;  %v2769_v25 = vld [vmem:[#allocation2 + $0x4e1] ss:$2 sm:$0xff]  ;;  %v17973_v22 = vrot.slane %v3306_v63, 7  ;;  %v3658_v35 = vsel %vm17581_vm2, %v3255_v44, %v3657_v4  ;;  %v2779_v44 = vld [vmem:[#allocation2 + $0x531] ss:$2 sm:$0xff] }
 0x2a3   :  { %4027 = vst.msk [vmem:[#allocation3 + $0x18] sm:$0xff] %vm4024_vm3, %v3837_v46  ;;  %3892 = vrot.lane.b32.xlu0 %v17843_v61, %s16232_s0  ;;  %v17965_v46 = vrot.slane %v3299_v38, 7  ;;  %3659 = vst [vmem:[#allocation3 + $0xf0] sm:$0xff] %v3658_v35  ;;  %v3663_v4 = vld [vmem:[#allocation3 + $0x100] sm:$0xff]  ;;  %v3666_v35 = vld [vmem:[#allocation3 + $0x108] sm:$0xff] }
 0x2a4   :  { %v17980_v57 = vpack.c.bf16 %v2943_v5, %v2942_v28  ;;  %v2947_v28 = vmax.f32 %v17953_v14, %v2771_v31  ;;  %v2773_v5 = vld [vmem:[#allocation2 + $0x501] ss:$2 sm:$0xff]  ;;  %v4152_v31 = vor.u32 %v17886_v55, %v3278_v52  ;;  %v18032_v52 = vld [vmem:[#allocation2 + $0x540] ss:$2 sm:$0xff]  ;;  %v3669_v61 = vld [vmem:[#allocation3 + $0x110] sm:$0xff] }
 0x2a5   :  { %v3835_v0 = vpop.permute.xlu0 %3834  ;;  %4273 = vrot.lane.b32.xlu1 %v4146_v32, %s16233_s22  ;;  %v2945_v32 = vmax.f32 %v2511_v37, %v2767_v49  ;;  %v17986_v37 = vld [vmem:[#allocation2 + $0x500] ss:$2 sm:$0xff]  ;;  %v3262_v49 = vor.u32 %v3260_v26, %v17835_v50 }
 0x2a6   :  { %4026 = vst.msk [vmem:[#allocation3 + $0x10] sm:$0xff] %vm4024_vm3, %v3835_v0  ;;  %v2946_v0 = vmax.f32 %v17951_v42, %v2769_v25  ;;  %v3320_v50 = vshrl.u32 %v17980_v57, 16  ;;  %v18012_v42 = vld [vmem:[#allocation2 + $0x530] ss:$2 sm:$0xff]  ;;  %v3269_v25 = vor.u32 %v3267_v51, %v17861_v2  ;;  %v2948_v47 = vmax.f32 %v17986_v37, %v2773_v5  ;;  %v2783_v5 = vld [vmem:[#allocation2 + $0x551] ss:$2 sm:$0xff] }
 0x2a7   :  { %v4218_v33 = vpop.permute.xlu1 %4217  ;;  %3894 = vrot.lane.b32.xlu0 %v17845_v48, %s16232_s0  ;;  %v18007_v26 = vpack.c.bf16 %v2945_v32, %v2944_v59  ;;  %v3661_v14 = vsel %vm17581_vm2, %v3262_v49, %v3660_v12  ;;  %v3323_v59 = vshll.u32 %v17980_v57, 16  ;;  %v2777_v32 = vld [vmem:[#allocation2 + $0x521] ss:$2 sm:$0xff]  ;;  %v2949_v51 = vmax.f32 %v17988_v21, %v2775_v1  ;;  %v2527_v21 = vld [vmem:[#allocation2 + $0x550] ss:$2 sm:$0xff] }
 0x2a8   :  { %3662 = vst [vmem:[#allocation3 + $0xf8] sm:$0xff] %v3661_v14  ;;  %v3664_v55 = vsel %vm17581_vm2, %v3269_v25, %v3663_v4  ;;  %v18042_v37 = vpack.c.bf16 %v2947_v28, %v2946_v0  ;;  %v3276_v1 = vor.u32 %v3274_v29, %v17876_v10  ;;  %v2951_v28 = vmax.f32 %v18012_v42, %v2779_v44  ;;  %v16196_v10 = vld [vmem:[%s21513_s3] sm:$0xff]   ;;  %v15670_v48 = vld [vmem:[%s21513_s3 + $0x10] sm:$0xff]  }
 0x2a9   :  { %v4412_v16 = vld [vmem:[#allocation3 + $0x8] sm:$0xff]  ;;  %4275 = vrot.lane.b32.xlu1 %v4148_v8, %s16233_s22  ;;  %v3839_v40 = vpop.permute.xlu0 %3838  ;;  %v3330_v2 = vshll.u32 %v18007_v26, 16  ;;  %3665 = vst [vmem:[#allocation3 + $0x100] sm:$0xff] %v3664_v55  ;;  %v18072_v44 = vrot.slane %v3323_v59, 1  ;;  %v2953_v55 = vmax.f32 %v2527_v21, %v2783_v5 }
 0x2aa   :  { %v4413_v8 = vsel %vm17938_vm6, %v4218_v33, %v4412_v16  ;;  %4028 = vst.msk [vmem:[#allocation3 + $0x20] sm:$0xff] %vm4024_vm3, %v3839_v40  ;;  %v18010_v33 = vld [vmem:[#allocation2 + $0x520] ss:$2 sm:$0xff]  ;;  %v4418_v4 = vld [vmem:[#allocation3 + $0x18] sm:$0xff]  ;;  %v3667_v25 = vsel %vm17581_vm2, %v3276_v1, %v3666_v35  ;;  %v2785_v5 = vld [vmem:[#allocation2 + $0x561] ss:$2 sm:$0xff] }
 0x2ab   :  { %4414 = vst [vmem:[#allocation3 + $0x8] sm:$0xff] %v4413_v8  ;;  %v4220_v9 = vpop.permute.xlu1 %4219  ;;  %3896 = vrot.lane.b32.xlu0 %v17848_v18, %s16232_s0  ;;  %14900 = vmatprep.mubr.msk.bf16.mxu0 %vm46_vm0, %v4413_v8  ;;  %v18026_v16 = vld [vmem:[%s21513_s3 + $0x8] sm:$0xff]   ;;  %v2950_v0 = vmax.f32 %v18010_v33, %v2777_v32  ;;  %v3283_v33 = vor.u32 %v3281_v6, %v17882_v45  ;;  %3668 = vst [vmem:[#allocation3 + $0x108] sm:$0xff] %v3667_v25  ;;  %v18087_v45 = vrot.slane %v3330_v2, 1  ;;  %v2787_v1 = vld [vmem:[#allocation2 + $0x571] ss:$2 sm:$0xff] }
 0x2ac   :  { %v2781_v8 = vld [vmem:[#allocation2 + $0x541] ss:$2 sm:$0xff] }
 0x2ad   :  { %v4415_v40 = vld [vmem:[#allocation3 + $0x10] sm:$0xff]  ;;  %4277 = vrot.lane.b32.xlu1 %v4150_v30, %s16233_s22  ;;  %v3841_v12 = vpop.permute.xlu0 %3840  ;;  %v4154_v30 = vor.u32 %v17898_v7, %v3285_v41  ;;  %v18052_v41 = vrot.slane %v3320_v50, 7  ;;  %v3327_v7 = vshrl.u32 %v18007_v26, 16  ;;  %v18100_v21 = vpack.c.bf16 %v2951_v28, %v2950_v0 }
 0x2ae   :  { %v4416_v49 = vsel %vm17938_vm6, %v4220_v9, %v4415_v40  ;;  %4029 = vst.msk [vmem:[#allocation3 + $0x28] sm:$0xff] %vm4024_vm3, %v3841_v12  ;;  %v3337_v9 = vshll.u32 %v18042_v37, 16  ;;  %v18074_v40 = vpack.c.bf16 %v2949_v51, %v2948_v47  ;;  %v2952_v12 = vmax.f32 %v18032_v52, %v2781_v8  ;;  %v18090_v47 = vld [vmem:[#allocation2 + $0x560] ss:$2 sm:$0xff]  ;;  %v2531_v8 = vld [vmem:[#allocation2 + $0x570] ss:$2 sm:$0xff] }
 0x2af   :  { %4417 = vst [vmem:[#allocation3 + $0x10] sm:$0xff] %v4416_v49  ;;  %v4222_v14 = vpop.permute.xlu1 %4221  ;;  %3898 = vrot.lane.b32.xlu0 %v17870_v17, %s16232_s0  ;;  %14901 = vmatmul.mubr.msk.bf16.vlgmr.msra.gmra.mrb[0].mxu0 %vm46_vm0, %v4416_v49  ;;  %v18083_v6 = vrot.slane %v3327_v7, 7  ;;  %v3670_v51 = vsel %vm17581_vm2, %v3283_v33, %v3669_v61  ;;  %v3672_v52 = vld [vmem:[#allocation3 + $0x128] sm:$0xff]  ;;  %v4156_v49 = vor.u32 %v17944_v20, %v3292_v54  ;;  %v3675_v0 = vld [vmem:[#allocation3 + $0x130] sm:$0xff]  ;;  %v15671_v17 = vld [vmem:[%s21513_s3 + $0x18] sm:$0xff]  }
 0x2b0   :  { %v4419_v29 = vsel %vm17938_vm6, %v4222_v14, %v4418_v4  ;;  %15029 = vmatpush3.bf16.msra.mxu0 %v16196_v10  ;;  %3671 = vst [vmem:[#allocation3 + $0x110] sm:$0xff] %v3670_v51  ;;  %v3290_v4 = vor.u32 %v3288_v39, %v17894_v58  ;;  %v18113_v54 = vrot.slane %v3337_v9, 1  ;;  %v3341_v20 = vshrl.u32 %v18074_v40, 16  ;;  %v18123_v10 = vld [vmem:[#allocation2 + $0x581] ss:$2 sm:$0xff]  ;;  %v3678_v51 = vld [vmem:[#allocation3 + $0x138] sm:$0xff] }
 0x2b1   :  { %4420 = vst [vmem:[#allocation3 + $0x18] sm:$0xff] %v4419_v29  ;;  %4279 = vrot.lane.b32.xlu1 %v4152_v31, %s16233_s22  ;;  %v3843_v42 = vpop.permute.xlu0 %3842  ;;  %v4421_v32 = vld [vmem:[#allocation3 + $0x20] sm:$0xff]  ;;  %14904 = vmatprep.mubr.msk.bf16.mxu0 %vm46_vm0, %v4419_v29  ;;  %v3334_v31 = vshrl.u32 %v18042_v37, 16  ;;  %v18118_v58 = vpack.c.bf16 %v2953_v55, %v2952_v12  ;;  %v3344_v28 = vshll.u32 %v18074_v40, 16  ;;  %v2954_v33 = vmax.f32 %v18090_v47, %v2785_v5  ;;  %v18137_v12 = vld [vmem:[#allocation2 + $0x590] ss:$2 sm:$0xff] }
 0x2b2   :  { %4030 = vst.msk [vmem:[#allocation3 + $0x30] sm:$0xff] %vm4024_vm3, %v3843_v42  ;;  %15030 = vmatprep.subr.bf16.mxu0 %v18026_v16  ;;  %v18121_v29 = vld [vmem:[#allocation2 + $0x580] ss:$2 sm:$0xff]  ;;  %v3673_v25 = vsel %vm17581_vm2, %v3290_v4, %v3672_v52  ;;  %v2955_v42 = vmax.f32 %v2531_v8, %v2787_v1  ;;  %v18139_v55 = vld [vmem:[#allocation2 + $0x591] ss:$2 sm:$0xff]  ;;  %v4158_v5 = vor.u32 %v17969_v13, %v3299_v38 }
 0x2b3   :  { %v4224_v35 = vpop.permute.xlu1 %4223  ;;  %3900 = vrot.lane.b32.xlu0 %v17890_v23, %s16232_s0  ;;  %v18109_v61 = vrot.slane %v3334_v31, 7  ;;  %3674 = vst [vmem:[#allocation3 + $0x128] sm:$0xff] %v3673_v25  ;;  %v3358_v47 = vshll.u32 %v18118_v58, 16 }
 0x2b4   :  { %v4422_v14 = vsel %vm17938_vm6, %v4224_v35, %v4421_v32  ;;  %15031 = vmatpush3.bf16.msra.mxu0 %v18026_v16  ;;  %v3297_v16 = vor.u32 %v3295_v11, %v17914_v15  ;;  %v3348_v32 = vshrl.u32 %v18100_v21, 16  ;;  %v3351_v11 = vshll.u32 %v18100_v21, 16 }
 0x2b5   :  { %4423 = vst [vmem:[#allocation3 + $0x20] sm:$0xff] %v4422_v14  ;;  %4281 = vrot.lane.b32.xlu1 %v4154_v30, %s16233_s22  ;;  %v3845_v18 = vpop.permute.xlu0 %3844  ;;  %v4424_v39 = vld [vmem:[#allocation3 + $0x28] sm:$0xff]  ;;  %15032 = vmatprep.subr.bf16.mxu0 %v15670_v48  ;;  %v18133_v30 = vrot.slane %v3341_v20, 7  ;;  %v3304_v35 = vor.u32 %v3302_v34, %v17965_v46  ;;  %v18166_v34 = vrot.slane %v3344_v28, 1  ;;  %v3681_v46 = vld [vmem:[#allocation3 + $0x140] sm:$0xff]  ;;  %v18175_v13 = vpack.c.bf16 %v2955_v42, %v2954_v33 }
 0x2b6   :  { %4031 = vst.msk [vmem:[#allocation3 + $0x38] sm:$0xff] %vm4024_vm3, %v3845_v18  ;;  %v3676_v52 = vsel %vm17581_vm2, %v3297_v16, %v3675_v0  ;;  %v18170_v23 = vrot.slane %v3348_v32, 7  ;;  %v3687_v0 = vld [vmem:[#allocation3 + $0x150] sm:$0xff]  ;;  %v18205_v16 = vrot.slane %v3358_v47, 1 }
 0x2b7   :  { %v4226_v15 = vpop.permute.xlu1 %4225  ;;  %3902 = vrot.lane.b32.xlu0 %v17910_v27, %s16232_s0  ;;  %14905 = vmatmul.mubr.msk.bf16.gmra.mrb[4].mxu0 %vm46_vm0, %v4422_v14  ;;  %3677 = vst [vmem:[#allocation3 + $0x130] sm:$0xff] %v3676_v52  ;;  %v4160_v14 = vor.u32 %v17977_v36, %v3306_v63  ;;  %v3679_v38 = vsel %vm17581_vm2, %v3304_v35, %v3678_v51  ;;  %v3355_v36 = vshrl.u32 %v18118_v58, 16  ;;  %v3365_v42 = vshll.u32 %v18175_v13, 16  ;;  %v3696_v51 = vld [vmem:[#allocation3 + $0x168] sm:$0xff] }
 0x2b8   :  { %v4425_v8 = vsel %vm17938_vm6, %v4226_v15, %v4424_v39  ;;  %15033 = vmatpush3.bf16.msra.mxu0 %v15670_v48  ;;  %v2956_v63 = vmax.f32 %v18121_v29, %v18123_v10  ;;  %3680 = vst [vmem:[#allocation3 + $0x138] sm:$0xff] %v3679_v38  ;;  %v3311_v48 = vor.u32 %v3309_v43, %v17973_v22  ;;  %v18187_v39 = vrot.slane %v3351_v11, 1  ;;  %v3690_v43 = vld [vmem:[#allocation3 + $0x158] sm:$0xff]  ;;  %v2793_v52 = vld [vmem:[#allocation2 + $0x5a1] ss:$2 sm:$0xff] }
 0x2b9   :  { %4426 = vst [vmem:[#allocation3 + $0x28] sm:$0xff] %v4425_v8  ;;  %4283 = vrot.lane.b32.xlu1 %v4156_v49, %s16233_s22  ;;  %v3847_v1 = vpop.permute.xlu0 %3846  ;;  %v4427_v4 = vld [vmem:[#allocation3 + $0x30] sm:$0xff]  ;;  %14908 = vmatprep.mubr.msk.bf16.mxu0 %vm46_vm0, %v4425_v8  ;;  %v3684_v49 = vld [vmem:[#allocation3 + $0x148] sm:$0xff]  ;;  %v2957_v29 = vmax.f32 %v18137_v12, %v18139_v55  ;;  %v3318_v10 = vor.u32 %v3316_v3, %v17984_v56  ;;  %v18201_v25 = vrot.slane %v3355_v36, 7  ;;  %v3693_v3 = vld [vmem:[#allocation3 + $0x160] sm:$0xff] }
 0x2ba   :  { %4032 = vst.msk [vmem:[#allocation3 + $0x40] sm:$0xff] %vm4024_vm3, %v3847_v1  ;;  %15034 = vmatprep.subr.bf16.mxu0 %v15671_v17  ;;  %v3325_v27 = vor.u32 %v3323_v59, %v18052_v41  ;;  %v3682_v33 = vsel %vm17581_vm2, %v3311_v48, %v3681_v46  ;;  %v3362_v41 = vshrl.u32 %v18175_v13, 16  ;;  %v2539_v15 = vld [vmem:[#allocation2 + $0x5b0] ss:$2 sm:$0xff]  ;;  %v3332_v35 = vor.u32 %v3330_v2, %v18083_v6 }
 0x2bb   :  { %v4228_v18 = vpop.permute.xlu1 %4227  ;;  %3904 = vrot.lane.b32.xlu0 %v17930_v62, %s16232_s0  ;;  %3683 = vst [vmem:[#allocation3 + $0x140] sm:$0xff] %v3682_v33  ;;  %v3685_v12 = vsel %vm17581_vm2, %v3318_v10, %v3684_v49  ;;  %v3339_v8 = vor.u32 %v3337_v9, %v18109_v61  ;;  %v2795_v9 = vld [vmem:[#allocation2 + $0x5b1] ss:$2 sm:$0xff]  ;;  %v18250_v48 = vrot.slane %v3365_v42, 1  ;;  %v2541_v49 = vld [vmem:[#allocation2 + $0x5c0] ss:$2 sm:$0xff]  ;;  %v4164_v33 = vor.u32 %v18072_v44, %v3320_v50 }
 0x2bc   :  { %v4428_v22 = vsel %vm17938_vm6, %v4228_v18, %v4427_v4  ;;  %15035 = vmatpush3.bf16.msra.mxu0 %v15671_v17  ;;  %v3688_v55 = vsel %vm17581_vm2, %v3325_v27, %v3687_v0  ;;  %v2537_v17 = vld [vmem:[#allocation2 + $0x5a0] ss:$2 sm:$0xff]  ;;  %3686 = vst [vmem:[#allocation3 + $0x148] sm:$0xff] %v3685_v12  ;;  %v18229_v4 = vpack.c.bf16 %v2957_v29, %v2956_v63  ;;  %v18233_v38 = vrot.slane %v3362_v41, 7  ;;  %v2797_v0 = vld [vmem:[#allocation2 + $0x5c1] ss:$2 sm:$0xff] }
 0x2bd   :  { %4429 = vst [vmem:[#allocation3 + $0x30] sm:$0xff] %v4428_v22  ;;  %4285 = vrot.lane.b32.xlu1 %v4158_v5, %s16233_s22  ;;  %v3849_v56 = vpop.permute.xlu0 %3848  ;;  %v4430_v59 = vld [vmem:[#allocation3 + $0x38] sm:$0xff]  ;;  %3689 = vst [vmem:[#allocation3 + $0x150] sm:$0xff] %v3688_v55  ;;  %v3346_v5 = vor.u32 %v3344_v28, %v18133_v30  ;;  %v3691_v6 = vsel %vm17581_vm2, %v3332_v35, %v3690_v43  ;;  %v3694_v61 = vsel %vm17581_vm2, %v3339_v8, %v3693_v3  ;;  %v3699_v62 = vld [vmem:[#allocation3 + $0x170] sm:$0xff] }
 0x2be   :  { %4033 = vst.msk [vmem:[#allocation3 + $0x48] sm:$0xff] %vm4024_vm3, %v3849_v56  ;;  %v4162_v63 = vor.u32 %v18000_v60, %v3313_v19  ;;  %v3369_v18 = vshrl.u32 %v18229_v4, 16  ;;  %3692 = vst [vmem:[#allocation3 + $0x158] sm:$0xff] %v3691_v6  ;;  %v2543_v19 = vld [vmem:[#allocation2 + $0x5d0] ss:$2 sm:$0xff]  ;;  %v2958_v29 = vmax.f32 %v2537_v17, %v2793_v52  ;;  %v2959_v10 = vmax.f32 %v2539_v15, %v2795_v9 }
 0x2bf   :  { %v4230_v1 = vpop.permute.xlu1 %4229  ;;  %3906 = vrot.lane.b32.xlu0 %v17980_v57, %s16232_s0  ;;  %14909 = vmatmul.mubr.msk.bf16.gmra.mrb[8].mxu0 %vm46_vm0, %v4428_v22  ;;  %v3697_v28 = vsel %vm17581_vm2, %v3346_v5, %v3696_v51  ;;  %3695 = vst [vmem:[#allocation3 + $0x160] sm:$0xff] %v3694_v61  ;;  %v2799_v22 = vld [vmem:[#allocation2 + $0x5d1] ss:$2 sm:$0xff]  ;;  %v3372_v56 = vshll.u32 %v18229_v4, 16  ;;  %v2960_v55 = vmax.f32 %v2541_v49, %v2797_v0  ;;  %v2545_v51 = vld [vmem:[#allocation2 + $0x5e0] ss:$2 sm:$0xff] }
 0x2c0   :  { %v4431_v2 = vsel %vm17938_vm6, %v4230_v1, %v4430_v59  ;;  %3698 = vst [vmem:[#allocation3 + $0x168] sm:$0xff] %v3697_v28  ;;  %v3371_v3 = vrot.slane %v3369_v18, 7  ;;  %v3360_v59 = vor.u32 %v3358_v47, %v18201_v25  ;;  %v3702_v12 = vld [vmem:[#allocation3 + $0x178] sm:$0xff]  ;;  %v2801_v15 = vld [vmem:[#allocation2 + $0x5e1] ss:$2 sm:$0xff]  ;;  %v18277_v57 = vpack.c.bf16 %v2959_v10, %v2958_v29 }
 0x2c1   :  { %4432 = vst [vmem:[#allocation3 + $0x38] sm:$0xff] %v4431_v2  ;;  %4287 = vrot.lane.b32.xlu1 %v4160_v14, %s16233_s22  ;;  %v3851_v30 = vpop.permute.xlu0 %3850  ;;  %v4433_v46 = vld [vmem:[#allocation3 + $0x40] sm:$0xff]  ;;  %14912 = vmatprep.mubr.msk.bf16.mxu0 %vm46_vm0, %v4431_v2  ;;  %v3353_v14 = vor.u32 %v3351_v11, %v18170_v23  ;;  %v2547_v17 = vld [vmem:[#allocation2 + $0x5f0] ss:$2 sm:$0xff]  ;;  %v2961_v50 = vmax.f32 %v2543_v19, %v2799_v22  ;;  %v2803_v25 = vld [vmem:[#allocation2 + $0x5f1] ss:$2 sm:$0xff] }
 0x2c2   :  { %4034 = vst.msk [vmem:[#allocation3 + $0x50] sm:$0xff] %vm4024_vm3, %v3851_v30  ;;  %v3703_v44 = vsel %vm17581_vm2, %v3360_v59, %v3702_v12  ;;  %v4166_v5 = vor.u32 %v18087_v45, %v3327_v7  ;;  %v18288_v1 = vrot.slane %v3372_v56, 1  ;;  %v3376_v2 = vshrl.u32 %v18277_v57, 16  ;;  %v2549_v9 = vld [vmem:[#allocation2 + $0x600] ss:$2 sm:$0xff] }
 0x2c3   :  { %v4232_v60 = vpop.permute.xlu1 %4231  ;;  %3908 = vrot.lane.b32.xlu0 %v18007_v26, %s16232_s0  ;;  %v3700_v27 = vsel %vm17581_vm2, %v3353_v14, %v3699_v62  ;;  %3704 = vst [vmem:[#allocation3 + $0x178] sm:$0xff] %v3703_v44  ;;  %v2551_v6 = vld [vmem:[#allocation2 + $0x610] ss:$2 sm:$0xff]  ;;  %v2805_v61 = vld [vmem:[#allocation2 + $0x601] ss:$2 sm:$0xff]  ;;  %v3367_v30 = vor.u32 %v3365_v42, %v18233_v38  ;;  %v18297_v7 = vpack.c.bf16 %v2961_v50, %v2960_v55  ;;  %v3379_v38 = vshll.u32 %v18277_v57, 16 }
 0x2c4   :  { %v4434_v43 = vsel %vm17938_vm6, %v4232_v60, %v4433_v46  ;;  %3701 = vst [vmem:[#allocation3 + $0x170] sm:$0xff] %v3700_v27  ;;  %v2807_v28 = vld [vmem:[#allocation2 + $0x611] ss:$2 sm:$0xff]  ;;  %v3705_v46 = vld [vmem:[#allocation3 + $0x180] sm:$0xff]  ;;  %v2962_v45 = vmax.f32 %v2545_v51, %v2801_v15  ;;  %v3378_v42 = vrot.slane %v3376_v2, 7  ;;  %v4168_v19 = vor.u32 %v18113_v54, %v3334_v31  ;;  %v3708_v27 = vld [vmem:[#allocation3 + $0x188] sm:$0xff] }
 0x2c5   :  { %4435 = vst [vmem:[#allocation3 + $0x40] sm:$0xff] %v4434_v43  ;;  %4289 = vrot.lane.b32.xlu1 %v4162_v63, %s16233_s22  ;;  %v3853_v11 = vpop.permute.xlu0 %3852  ;;  %v4436_v23 = vld [vmem:[#allocation3 + $0x48] sm:$0xff]  ;;  %v2963_v63 = vmax.f32 %v2547_v17, %v2803_v25  ;;  %v3706_v49 = vsel %vm17581_vm2, %v3367_v30, %v3705_v46  ;;  %v3383_v60 = vshrl.u32 %v18297_v7, 16  ;;  %v3386_v29 = vshll.u32 %v18297_v7, 16  ;;  %v3714_v30 = vld [vmem:[#allocation3 + $0x198] sm:$0xff] }
 0x2c6   :  { %4035 = vst.msk [vmem:[#allocation3 + $0x58] sm:$0xff] %vm4024_vm3, %v3853_v11  ;;  %3707 = vst [vmem:[#allocation3 + $0x180] sm:$0xff] %v3706_v49  ;;  %v3374_v10 = vor.u32 %v3372_v56, %v3371_v3  ;;  %v2965_v22 = vmax.f32 %v2551_v6, %v2807_v28  ;;  %v2553_v11 = vld [vmem:[#allocation2 + $0x620] ss:$2 sm:$0xff]  ;;  %v2811_v3 = vld [vmem:[#allocation2 + $0x631] ss:$2 sm:$0xff]  ;;  %v4170_v55 = vor.u32 %v18166_v34, %v3341_v20 }
 0x2c7   :  { %v4234_v52 = vpop.permute.xlu1 %4233  ;;  %3910 = vrot.lane.b32.xlu0 %v18042_v37, %s16232_s0  ;;  %14913 = vmatmul.mubr.msk.bf16.gmra.mrb[12].mxu0 %vm46_vm0, %v4434_v43  ;;  %v2964_v43 = vmax.f32 %v2549_v9, %v2805_v61  ;;  %v18316_v37 = vpack.c.bf16 %v2963_v63, %v2962_v45  ;;  %v3385_v51 = vrot.slane %v3383_v60, 7  ;;  %v3381_v15 = vor.u32 %v3379_v38, %v3378_v42  ;;  %v2815_v49 = vld [vmem:[#allocation2 + $0x651] ss:$2 sm:$0xff] }
 0x2c8   :  { %v4437_v47 = vsel %vm17938_vm6, %v4234_v52, %v4436_v23  ;;  %v2555_v23 = vld [vmem:[#allocation2 + $0x630] ss:$2 sm:$0xff]  ;;  %v3709_v31 = vsel %vm17581_vm2, %v3374_v10, %v3708_v27  ;;  %v4172_v9 = vor.u32 %v18187_v39, %v3348_v32  ;;  %v2557_v32 = vld [vmem:[#allocation2 + $0x640] ss:$2 sm:$0xff] }
 0x2c9   :  { %4438 = vst [vmem:[#allocation3 + $0x48] sm:$0xff] %v4437_v47  ;;  %4291 = vrot.lane.b32.xlu1 %v4164_v33, %s16233_s22  ;;  %v3855_v35 = vpop.permute.xlu0 %3854  ;;  %v4439_v8 = vld [vmem:[#allocation3 + $0x50] sm:$0xff]  ;;  %14916 = vmatprep.mubr.msk.bf16.mxu0 %vm46_vm0, %v4437_v47  ;;  %v2809_v33 = vld [vmem:[#allocation2 + $0x621] ss:$2 sm:$0xff]  ;;  %3710 = vst [vmem:[#allocation3 + $0x188] sm:$0xff] %v3709_v31  ;;  %v3390_v17 = vshrl.u32 %v18316_v37, 16  ;;  %v18333_v50 = vpack.c.bf16 %v2965_v22, %v2964_v43  ;;  %v2967_v20 = vmax.f32 %v2555_v23, %v2811_v3 }
 0x2ca   :  { %4036 = vst.msk [vmem:[#allocation3 + $0x60] sm:$0xff] %vm4024_vm3, %v3855_v35  ;;  %v3711_v52 = vld [vmem:[#allocation3 + $0x190] sm:$0xff]  ;;  %v3393_v35 = vshll.u32 %v18316_v37, 16  ;;  %v3388_v28 = vor.u32 %v3386_v29, %v3385_v51  ;;  %v3717_v27 = vld [vmem:[#allocation3 + $0x1a0] sm:$0xff]  ;;  %v4176_v3 = vor.u32 %v18250_v48, %v3362_v41  ;;  %v3720_v51 = vld [vmem:[#allocation3 + $0x1b8] sm:$0xff] }
 0x2cb   :  { %v4236_v26 = vpop.permute.xlu1 %4235  ;;  %3912 = vrot.lane.b32.xlu0 %v18074_v40, %s16232_s0  ;;  %v2966_v40 = vmax.f32 %v2553_v11, %v2809_v33  ;;  %v3712_v34 = vsel %vm17581_vm2, %v3381_v15, %v3711_v52  ;;  %v3397_v25 = vshrl.u32 %v18333_v50, 16  ;;  %v3400_v6 = vshll.u32 %v18333_v50, 16  ;;  %v2559_v39 = vld [vmem:[#allocation2 + $0x650] ss:$2 sm:$0xff]  ;;  %v2565_v15 = vld [vmem:[#allocation2 + $0x680] ss:$2 sm:$0xff] }
 0x2cc   :  { %v4440_v0 = vsel %vm17938_vm6, %v4236_v26, %v4439_v8  ;;  %3713 = vst [vmem:[#allocation3 + $0x190] sm:$0xff] %v3712_v34  ;;  %v3392_v61 = vrot.slane %v3390_v17, 7  ;;  %v2813_v26 = vld [vmem:[#allocation2 + $0x641] ss:$2 sm:$0xff]  ;;  %v3715_v45 = vsel %vm17581_vm2, %v3388_v28, %v3714_v30  ;;  %v2563_v22 = vld [vmem:[#allocation2 + $0x670] ss:$2 sm:$0xff]  ;;  %v2969_v33 = vmax.f32 %v2559_v39, %v2815_v49 }
 0x2cd   :  { %4441 = vst [vmem:[#allocation3 + $0x50] sm:$0xff] %v4440_v0  ;;  %4293 = vrot.lane.b32.xlu1 %v4166_v5, %s16233_s22  ;;  %v3857_v14 = vpop.permute.xlu0 %3856  ;;  %v4442_v62 = vld [vmem:[#allocation3 + $0x58] sm:$0xff]  ;;  %3716 = vst [vmem:[#allocation3 + $0x198] sm:$0xff] %v3715_v45  ;;  %v2968_v23 = vmax.f32 %v2557_v32, %v2813_v26  ;;  %v15672_v28 = vld [vmem:[%s21513_s3 + $0x20] sm:$0xff]  }
 0x2ce   :  { %4037 = vst.msk [vmem:[#allocation3 + $0x68] sm:$0xff] %vm4024_vm3, %v3857_v14  ;;  %v4174_v14 = vor.u32 %v18205_v16, %v3355_v36  ;;  %v3395_v10 = vor.u32 %v3393_v35, %v3392_v61  ;;  %v2817_v36 = vld [vmem:[#allocation2 + $0x661] ss:$2 sm:$0xff]  ;;  %v2567_v52 = vld [vmem:[#allocation2 + $0x690] ss:$2 sm:$0xff]  ;;  %v4179_v61 = vrot.slane %v3379_v38, 1  ;;  %15036 = vmatprep.subr.bf16.mxu0 %v15672_v28 }
 0x2cf   :  { %v4238_v59 = vpop.permute.xlu1 %4237  ;;  %3914 = vrot.lane.b32.xlu0 %v18100_v21, %s16232_s0  ;;  %14917 = vmatmul.mubr.msk.bf16.gmra.mrb[16].mxu0 %vm46_vm0, %v4440_v0  ;;  %v18356_v21 = vpack.c.bf16 %v2967_v20, %v2966_v40  ;;  %v18396_v48 = vpack.c.bf16 %v2969_v33, %v2968_v23  ;;  %v2571_v39 = vld [vmem:[#allocation2 + $0x6b0] ss:$2 sm:$0xff] }
 0x2d0   :  { %v4443_v54 = vsel %vm17938_vm6, %v4238_v59, %v4442_v62  ;;  %v3399_v62 = vrot.slane %v3397_v25, 7  ;;  %v3718_v16 = vsel %vm17581_vm2, %v3395_v10, %v3717_v27  ;;  %v2819_v59 = vld [vmem:[#allocation2 + $0x671] ss:$2 sm:$0xff]  ;;  %15037 = vmatpush3.bf16.msra.mxu0 %v15672_v28  ;;  %v4180_v27 = vor.u32 %v4179_v61, %v3376_v2 }
 0x2d1   :  { %4444 = vst [vmem:[#allocation3 + $0x58] sm:$0xff] %v4443_v54  ;;  %4295 = vrot.lane.b32.xlu1 %v4168_v19, %s16233_s22  ;;  %v3859_v56 = vpop.permute.xlu0 %3858  ;;  %v4445_v12 = vld [vmem:[#allocation3 + $0x60] sm:$0xff]  ;;  %14920 = vmatprep.mubr.msk.bf16.mxu0 %vm46_vm0, %v4443_v54  ;;  %v3404_v19 = vshrl.u32 %v18356_v21, 16  ;;  %3719 = vst [vmem:[#allocation3 + $0x1a0] sm:$0xff] %v3718_v16  ;;  %v2971_v34 = vmax.f32 %v2563_v22, %v2819_v59  ;;  %v3411_v32 = vshrl.u32 %v18396_v48, 16 }
 0x2d2   :  { %4038 = vst.msk [vmem:[#allocation3 + $0x70] sm:$0xff] %vm4024_vm3, %v3859_v56  ;;  %v2575_v16 = vld [vmem:[#allocation2 + $0x6d0] ss:$2 sm:$0xff] }
 0x2d3   :  { %v4240_v44 = vpop.permute.xlu1 %4239  ;;  %3916 = vrot.lane.b32.xlu0 %v18118_v58, %s16232_s0  ;;  %v2561_v58 = vld [vmem:[#allocation2 + $0x660] ss:$2 sm:$0xff]  ;;  %v3406_v56 = vrot.slane %v3404_v19, 7 }
 0x2d4   :  { %v4446_v47 = vsel %vm17938_vm6, %v4240_v44, %v4445_v12  ;;  %v3407_v12 = vshll.u32 %v18356_v21, 16  ;;  %v2821_v44 = vld [vmem:[#allocation2 + $0x681] ss:$2 sm:$0xff]  ;;  %v2970_v20 = vmax.f32 %v2561_v58, %v2817_v36  ;;  %v2573_v36 = vld [vmem:[#allocation2 + $0x6c0] ss:$2 sm:$0xff] }
 0x2d5   :  { %4447 = vst [vmem:[#allocation3 + $0x60] sm:$0xff] %v4446_v47  ;;  %4297 = vrot.lane.b32.xlu1 %v4170_v55, %s16233_s22  ;;  %v3861_v8 = vpop.permute.xlu0 %3860  ;;  %v4448_v5 = vld [vmem:[#allocation3 + $0x68] sm:$0xff]  ;;  %v3402_v55 = vor.u32 %v3400_v6, %v3399_v62  ;;  %v2972_v38 = vmax.f32 %v2565_v15, %v2821_v44  ;;  %v3729_v44 = vld [vmem:[#allocation3 + $0x1d0] sm:$0xff] }
 0x2d6   :  { %4039 = vst.msk [vmem:[#allocation3 + $0x78] sm:$0xff] %vm4024_vm3, %v3861_v8  ;;  %v3409_v30 = vor.u32 %v3407_v12, %v3406_v56  ;;  %v18418_v49 = vpack.c.bf16 %v2971_v34, %v2970_v20  ;;  %v3726_v58 = vld [vmem:[#allocation3 + $0x1c8] sm:$0xff] }
 0x2d7   :  { %v4242_v46 = vpop.permute.xlu1 %4241  ;;  %3918 = vrot.lane.b32.xlu0 %v18175_v13, %s16232_s0  ;;  %14921 = vmatmul.mubr.msk.bf16.gmra.mrb[20].mxu0 %vm46_vm0, %v4446_v47  ;;  %v3721_v13 = vsel %vm17581_vm2, %v3402_v55, %v3720_v51  ;;  %v2823_v47 = vld [vmem:[#allocation2 + $0x691] ss:$2 sm:$0xff]  ;;  %v2833_v20 = vld [vmem:[#allocation2 + $0x6e1] ss:$2 sm:$0xff] }
 0x2d8   :  { %v4449_v63 = vsel %vm17938_vm6, %v4242_v46, %v4448_v5  ;;  %3722 = vst [vmem:[#allocation3 + $0x1b8] sm:$0xff] %v3721_v13  ;;  %v3723_v46 = vld [vmem:[#allocation3 + $0x1c0] sm:$0xff]  ;;  %v2973_v26 = vmax.f32 %v2567_v52, %v2823_v47  ;;  %v3418_v22 = vshrl.u32 %v18418_v49, 16  ;;  %v4183_v52 = vrot.slane %v3393_v35, 1 }
 0x2d9   :  { %4450 = vst [vmem:[#allocation3 + $0x68] sm:$0xff] %v4449_v63  ;;  %4299 = vrot.lane.b32.xlu1 %v4172_v9, %s16233_s22  ;;  %v3863_v0 = vpop.permute.xlu0 %3862  ;;  %v4451_v42 = vld [vmem:[#allocation3 + $0x70] sm:$0xff]  ;;  %14924 = vmatprep.mubr.msk.bf16.mxu0 %vm46_vm0, %v4449_v63  ;;  %v4178_v9 = vor.u32 %v18288_v1, %v3369_v18  ;;  %v2825_v18 = vld [vmem:[#allocation2 + $0x6a1] ss:$2 sm:$0xff]  ;;  %v3724_v45 = vsel %vm17581_vm2, %v3409_v30, %v3723_v46  ;;  %v2577_v13 = vld [vmem:[#allocation2 + $0x6e0] ss:$2 sm:$0xff] }
 0x2da   :  { %4040 = vst.msk [vmem:[#allocation3 + $0x80] sm:$0xff] %vm4024_vm3, %v3863_v0  ;;  %v3414_v0 = vshll.u32 %v18396_v48, 16  ;;  %3725 = vst [vmem:[#allocation3 + $0x1c0] sm:$0xff] %v3724_v45  ;;  %v3420_v56 = vrot.slane %v3418_v22, 7  ;;  %v2837_v45 = vld [vmem:[#allocation2 + $0x701] ss:$2 sm:$0xff] }
 0x2db   :  { %v4244_v43 = vpop.permute.xlu1 %4243  ;;  %3920 = vrot.lane.b32.xlu0 %v18229_v4, %s16232_s0  ;;  %v2569_v4 = vld [vmem:[#allocation2 + $0x6a0] ss:$2 sm:$0xff] }
 0x2dc   :  { %v4452_v11 = vsel %vm17938_vm6, %v4244_v43, %v4451_v42  ;;  %v2827_v42 = vld [vmem:[#allocation2 + $0x6b1] ss:$2 sm:$0xff]  ;;  %v4181_v43 = vrot.slane %v3386_v29, 1  ;;  %v2974_v2 = vmax.f32 %v2569_v4, %v2825_v18  ;;  %v4184_v4 = vor.u32 %v4183_v52, %v3390_v17 }
 0x2dd   :  { %4453 = vst [vmem:[#allocation3 + $0x70] sm:$0xff] %v4452_v11  ;;  %4301 = vrot.lane.b32.xlu1 %v4174_v14, %s16233_s22  ;;  %v3865_v31 = vpop.permute.xlu0 %3864  ;;  %v4454_v54 = vld [vmem:[#allocation3 + $0x78] sm:$0xff]  ;;  %v3413_v14 = vrot.slane %v3411_v32, 7  ;;  %v2975_v29 = vmax.f32 %v2571_v39, %v2827_v42  ;;  %v4185_v39 = vrot.slane %v3400_v6, 1  ;;  %v2978_v17 = vmax.f32 %v2577_v13, %v2833_v20 }
 0x2de   :  { %4041 = vst.msk [vmem:[#allocation3 + $0x98] sm:$0xff] %vm4024_vm3, %v3865_v31  ;;  %v3421_v31 = vshll.u32 %v18418_v49, 16  ;;  %v4182_v15 = vor.u32 %v4181_v43, %v3383_v60  ;;  %v3732_v18 = vld [vmem:[#allocation3 + $0x1d8] sm:$0xff]  ;;  %v4189_v20 = vrot.slane %v3414_v0, 1 }
 0x2df   :  { %v4246_v40 = vpop.permute.xlu1 %4245  ;;  %3922 = vrot.lane.b32.xlu0 %v18277_v57, %s16232_s0  ;;  %14925 = vmatmul.mubr.msk.bf16.gmra.mrb[24].mxu0 %vm46_vm0, %v4452_v11  ;;  %v2829_v11 = vld [vmem:[#allocation2 + $0x6c1] ss:$2 sm:$0xff]  ;;  %v3416_v23 = vor.u32 %v3414_v0, %v3413_v14  ;;  %v18435_v57 = vpack.c.bf16 %v2973_v26, %v2972_v38  ;;  %v2581_v38 = vld [vmem:[#allocation2 + $0x700] ss:$2 sm:$0xff]  ;;  %v2583_v26 = vld [vmem:[#allocation2 + $0x710] ss:$2 sm:$0xff] }
 0x2e0   :  { %v4455_v41 = vsel %vm17938_vm6, %v4246_v40, %v4454_v54  ;;  %v2831_v54 = vld [vmem:[#allocation2 + $0x6d1] ss:$2 sm:$0xff]  ;;  %v3423_v34 = vor.u32 %v3421_v31, %v3420_v56  ;;  %v2976_v60 = vmax.f32 %v2573_v36, %v2829_v11  ;;  %v4187_v11 = vrot.slane %v3407_v12, 1 }
 0x2e1   :  { %4456 = vst [vmem:[#allocation3 + $0x78] sm:$0xff] %v4455_v41  ;;  %4303 = vrot.lane.b32.xlu1 %v4176_v3, %s16233_s22  ;;  %v3867_v8 = vpop.permute.xlu0 %3866  ;;  %v4457_v5 = vld [vmem:[#allocation3 + $0x80] sm:$0xff]  ;;  %14928 = vmatprep.mubr.msk.bf16.mxu0 %vm46_vm0, %v4455_v41  ;;  %v3727_v3 = vsel %vm17581_vm2, %v3416_v23, %v3726_v58  ;;  %v3425_v40 = vshrl.u32 %v18435_v57, 16  ;;  %v2579_v41 = vld [vmem:[#allocation2 + $0x6f0] ss:$2 sm:$0xff]  ;;  %v2977_v35 = vmax.f32 %v2575_v16, %v2831_v54 }
 0x2e2   :  { %4042 = vst.msk [vmem:[#allocation3 + $0xa0] sm:$0xff] %vm4024_vm3, %v3867_v8  ;;  %3728 = vst [vmem:[#allocation3 + $0x1c8] sm:$0xff] %v3727_v3  ;;  %v3730_v61 = vsel %vm17581_vm2, %v3423_v34, %v3729_v44  ;;  %v4186_v16 = vor.u32 %v4185_v39, %v3397_v25  ;;  %v3735_v23 = vld [vmem:[#allocation3 + $0x1e0] sm:$0xff]  ;;  %v2980_v25 = vmax.f32 %v2581_v38, %v2837_v45  ;;  %v3738_v34 = vld [vmem:[#allocation3 + $0x1e8] sm:$0xff]  ;;  %v4191_v45 = vrot.slane %v3421_v31, 1 }
 0x2e3   :  { %v4248_v1 = vpop.permute.xlu1 %4247  ;;  %3924 = vrot.lane.b32.xlu0 %v18297_v7, %s16232_s0  ;;  %v18456_v7 = vpack.c.bf16 %v2975_v29, %v2974_v2  ;;  %v3427_v28 = vrot.slane %v3425_v40, 7  ;;  %3731 = vst [vmem:[#allocation3 + $0x1d0] sm:$0xff] %v3730_v61  ;;  %v2585_v2 = vld [vmem:[#allocation2 + $0x720] ss:$2 sm:$0xff]  ;;  %v2587_v29 = vld [vmem:[#allocation2 + $0x730] ss:$2 sm:$0xff] }
 0x2e4   :  { %v4458_v63 = vsel %vm17938_vm6, %v4248_v1, %v4457_v5  ;;  %v3428_v5 = vshll.u32 %v18435_v57, 16 }
 0x2e5   :  { %4459 = vst [vmem:[#allocation3 + $0x80] sm:$0xff] %v4458_v63  ;;  %4305 = vrot.lane.b32.xlu1 %v4178_v9, %s16233_s22  ;;  %v3869_v62 = vpop.permute.xlu0 %3868  ;;  %v4460_v10 = vld [vmem:[#allocation3 + $0x98] sm:$0xff]  ;;  %v3432_v1 = vshrl.u32 %v18456_v7, 16 }
 0x2e6   :  { %4043 = vst.msk [vmem:[#allocation3 + $0xa8] sm:$0xff] %vm4024_vm3, %v3869_v62  ;;  %v2835_v9 = vld [vmem:[#allocation2 + $0x6f1] ss:$2 sm:$0xff]  ;;  %v3435_v62 = vshll.u32 %v18456_v7, 16 }
 0x2e7   :  { %v4250_v33 = vpop.permute.xlu1 %4249  ;;  %3926 = vrot.lane.b32.xlu0 %v18316_v37, %s16232_s0  ;;  %14929 = vmatmul.mubr.msk.bf16.gmra.mrb[28].mxu0 %vm46_vm0, %v4458_v63  ;;  %v3430_v63 = vor.u32 %v3428_v5, %v3427_v28  ;;  %v18477_v37 = vpack.c.bf16 %v2977_v35, %v2976_v60  ;;  %v2979_v6 = vmax.f32 %v2579_v41, %v2835_v9  ;;  %v3434_v43 = vrot.slane %v3432_v1, 7  ;;  %v2589_v60 = vld [vmem:[#allocation2 + $0x740] ss:$2 sm:$0xff]  ;;  %v2591_v35 = vld [vmem:[#allocation2 + $0x750] ss:$2 sm:$0xff] }
 0x2e8   :  { %v4461_v59 = vsel %vm17938_vm6, %v4250_v33, %v4460_v10  ;;  %v2839_v10 = vld [vmem:[#allocation2 + $0x711] ss:$2 sm:$0xff]  ;;  %v4188_v41 = vor.u32 %v4187_v11, %v3404_v19 }
 0x2e9   :  { %4462 = vst [vmem:[#allocation3 + $0x98] sm:$0xff] %v4461_v59  ;;  %4307 = vrot.lane.b32.xlu1 %v4180_v27, %s16233_s22  ;;  %v3871_v55 = vpop.permute.xlu0 %3870  ;;  %v4463_v51 = vld [vmem:[#allocation3 + $0xa0] sm:$0xff]  ;;  %14932 = vmatprep.mubr.msk.bf16.mxu0 %vm46_vm0, %v4461_v59  ;;  %v3733_v27 = vsel %vm17581_vm2, %v3430_v63, %v3732_v18  ;;  %v3439_v33 = vshrl.u32 %v18477_v37, 16  ;;  %v3437_v54 = vor.u32 %v3435_v62, %v3434_v43  ;;  %v3741_v63 = vld [vmem:[#allocation3 + $0x1f0] sm:$0xff] }
 0x2ea   :  { %4044 = vst.msk [vmem:[#allocation3 + $0xb0] sm:$0xff] %vm4024_vm3, %v3871_v55  ;;  %3734 = vst [vmem:[#allocation3 + $0x1d8] sm:$0xff] %v3733_v27  ;;  %v2841_v59 = vld [vmem:[#allocation2 + $0x721] ss:$2 sm:$0xff]  ;;  %v2981_v12 = vmax.f32 %v2583_v26, %v2839_v10  ;;  %v3442_v55 = vshll.u32 %v18477_v37, 16  ;;  %v4190_v26 = vor.u32 %v4189_v20, %v3411_v32 }
 0x2eb   :  { %v4252_v47 = vpop.permute.xlu1 %4251  ;;  %3928 = vrot.lane.b32.xlu0 %v18333_v50, %s16232_s0  ;;  %v18498_v50 = vpack.c.bf16 %v2979_v6, %v2978_v17  ;;  %v3441_v52 = vrot.slane %v3439_v33, 7  ;;  %v2982_v19 = vmax.f32 %v2585_v2, %v2841_v59  ;;  %v2593_v17 = vld [vmem:[#allocation2 + $0x760] ss:$2 sm:$0xff]  ;;  %v2595_v6 = vld [vmem:[#allocation2 + $0x770] ss:$2 sm:$0xff]  ;;  %v4193_v59 = vrot.slane %v3428_v5, 1 }
 0x2ec   :  { %v4464_v8 = vsel %vm17938_vm6, %v4252_v47, %v4463_v51  ;;  %v2843_v51 = vld [vmem:[#allocation2 + $0x731] ss:$2 sm:$0xff] }
 0x2ed   :  { %4465 = vst [vmem:[#allocation3 + $0xa0] sm:$0xff] %v4464_v8  ;;  %4309 = vrot.lane.b32.xlu1 %v4182_v15, %s16233_s22  ;;  %v3873_v30 = vpop.permute.xlu0 %3872  ;;  %v4466_v46 = vld [vmem:[#allocation3 + $0xa8] sm:$0xff]  ;;  %v3736_v15 = vsel %vm17581_vm2, %v3437_v54, %v3735_v23  ;;  %v3446_v47 = vshrl.u32 %v18498_v50, 16  ;;  %v3444_v9 = vor.u32 %v3442_v55, %v3441_v52  ;;  %v2983_v0 = vmax.f32 %v2587_v29, %v2843_v51  ;;  %v3744_v54 = vld [vmem:[#allocation3 + $0x1f8] sm:$0xff] }
 0x2ee   :  { %4045 = vst.msk [vmem:[#allocation3 + $0xb8] sm:$0xff] %vm4024_vm3, %v3873_v30  ;;  %3737 = vst [vmem:[#allocation3 + $0x1e0] sm:$0xff] %v3736_v15  ;;  %v3449_v30 = vshll.u32 %v18498_v50, 16  ;;  %v4192_v29 = vor.u32 %v4191_v45, %v3418_v22 }
 0x2ef   :  { %v4254_v42 = vpop.permute.xlu1 %4253  ;;  %3930 = vrot.lane.b32.xlu0 %v18356_v21, %s16232_s0  ;;  %14933 = vmatmul.mubr.msk.bf16.gmra.mrb[32].mxu0 %vm46_vm0, %v4464_v8  ;;  %v2845_v8 = vld [vmem:[#allocation2 + $0x741] ss:$2 sm:$0xff]  ;;  %v18519_v21 = vpack.c.bf16 %v2981_v12, %v2980_v25  ;;  %v3448_v39 = vrot.slane %v3446_v47, 7  ;;  %v2597_v25 = vld [vmem:[#allocation2 + $0x780] ss:$2 sm:$0xff] }
 0x2f0   :  { %v4467_v14 = vsel %vm17938_vm6, %v4254_v42, %v4466_v46  ;;  %v2847_v46 = vld [vmem:[#allocation2 + $0x751] ss:$2 sm:$0xff]  ;;  %v2984_v32 = vmax.f32 %v2589_v60, %v2845_v8  ;;  %v2599_v12 = vld [vmem:[#allocation2 + $0x790] ss:$2 sm:$0xff]  ;;  %v4195_v8 = vrot.slane %v3435_v62, 1 }
 0x2f1   :  { %4468 = vst [vmem:[#allocation3 + $0xa8] sm:$0xff] %v4467_v14  ;;  %4311 = vrot.lane.b32.xlu1 %v4184_v4, %s16233_s22  ;;  %v3875_v58 = vpop.permute.xlu0 %3874  ;;  %v4469_v36 = vld [vmem:[#allocation3 + $0xb0] sm:$0xff]  ;;  %14936 = vmatprep.mubr.msk.bf16.mxu0 %vm46_vm0, %v4467_v14  ;;  %v3739_v4 = vsel %vm17581_vm2, %v3444_v9, %v3738_v34  ;;  %v3453_v42 = vshrl.u32 %v18519_v21, 16  ;;  %v2849_v14 = vld [vmem:[#allocation2 + $0x761] ss:$2 sm:$0xff]  ;;  %v3451_v10 = vor.u32 %v3449_v30, %v3448_v39 }
 0x2f2   :  { %4046 = vst.msk [vmem:[#allocation3 + $0xc0] sm:$0xff] %vm4024_vm3, %v3875_v58  ;;  %3740 = vst [vmem:[#allocation3 + $0x1e8] sm:$0xff] %v3739_v4  ;;  %v2985_v31 = vmax.f32 %v2591_v35, %v2847_v46  ;;  %v3456_v58 = vshll.u32 %v18519_v21, 16  ;;  %v2986_v22 = vmax.f32 %v2593_v17, %v2849_v14  ;;  %v4194_v35 = vor.u32 %v4193_v59, %v3425_v40  ;;  %v3747_v9 = vld [vmem:[#allocation3 + $0x200] sm:$0xff] }
 0x2f3   :  { %v4256_v3 = vpop.permute.xlu1 %4255  ;;  %3932 = vrot.lane.b32.xlu0 %v18396_v48, %s16232_s0  ;;  %v18540_v48 = vpack.c.bf16 %v2983_v0, %v2982_v19  ;;  %v3455_v11 = vrot.slane %v3453_v42, 7  ;;  %v2601_v19 = vld [vmem:[#allocation2 + $0x7a0] ss:$2 sm:$0xff]  ;;  %v2603_v0 = vld [vmem:[#allocation2 + $0x7b0] ss:$2 sm:$0xff]  ;;  %v4197_v14 = vrot.slane %v3442_v55, 1 }
 0x2f4   :  { %v4470_v56 = vsel %vm17938_vm6, %v4256_v3, %v4469_v36  ;;  %v2851_v36 = vld [vmem:[#allocation2 + $0x771] ss:$2 sm:$0xff] }
 0x2f5   :  { %4471 = vst [vmem:[#allocation3 + $0xb0] sm:$0xff] %v4470_v56  ;;  %4313 = vrot.lane.b32.xlu1 %v4186_v16, %s16233_s22  ;;  %v3877_v44 = vpop.permute.xlu0 %3876  ;;  %v4472_v13 = vld [vmem:[#allocation3 + $0xb8] sm:$0xff]  ;;  %v3742_v16 = vsel %vm17581_vm2, %v3451_v10, %v3741_v63  ;;  %v3460_v3 = vshrl.u32 %v18540_v48, 16  ;;  %v3458_v51 = vor.u32 %v3456_v58, %v3455_v11  ;;  %v2987_v5 = vmax.f32 %v2595_v6, %v2851_v36  ;;  %v3750_v10 = vld [vmem:[#allocation3 + $0x208] sm:$0xff] }
 0x2f6   :  { %4047 = vst.msk [vmem:[#allocation3 + $0xc8] sm:$0xff] %vm4024_vm3, %v3877_v44  ;;  %3743 = vst [vmem:[#allocation3 + $0x1f0] sm:$0xff] %v3742_v16  ;;  %v3463_v44 = vshll.u32 %v18540_v48, 16  ;;  %v4196_v6 = vor.u32 %v4195_v8, %v3432_v1 }
 0x2f7   :  { %v4258_v61 = vpop.permute.xlu1 %4257  ;;  %3934 = vrot.lane.b32.xlu0 %v18418_v49, %s16232_s0  ;;  %14937 = vmatmul.mubr.msk.bf16.gmra.mrb[36].mxu0 %vm46_vm0, %v4470_v56  ;;  %v2853_v56 = vld [vmem:[#allocation2 + $0x781] ss:$2 sm:$0xff]  ;;  %v18561_v49 = vpack.c.bf16 %v2985_v31, %v2984_v32  ;;  %v3462_v20 = vrot.slane %v3460_v3, 7  ;;  %v2605_v32 = vld [vmem:[#allocation2 + $0x7c0] ss:$2 sm:$0xff] }
 0x2f8   :  { %v4473_v28 = vsel %vm17938_vm6, %v4258_v61, %v4472_v13  ;;  %v2855_v13 = vld [vmem:[#allocation2 + $0x791] ss:$2 sm:$0xff]  ;;  %v2988_v40 = vmax.f32 %v2597_v25, %v2853_v56  ;;  %v2607_v31 = vld [vmem:[#allocation2 + $0x7d0] ss:$2 sm:$0xff]  ;;  %v4199_v56 = vrot.slane %v3449_v30, 1 }
 0x2f9   :  { %4474 = vst [vmem:[#allocation3 + $0xb8] sm:$0xff] %v4473_v28  ;;  %4315 = vrot.lane.b32.xlu1 %v4188_v41, %s16233_s22  ;;  %v3879_v18 = vpop.permute.xlu0 %3878  ;;  %v4475_v38 = vld [vmem:[#allocation3 + $0xc0] sm:$0xff]  ;;  %14940 = vmatprep.mubr.msk.bf16.mxu0 %vm46_vm0, %v4473_v28  ;;  %v3745_v41 = vsel %vm17581_vm2, %v3458_v51, %v3744_v54  ;;  %v3467_v61 = vshrl.u32 %v18561_v49, 16  ;;  %v3465_v46 = vor.u32 %v3463_v44, %v3462_v20  ;;  %v15673_v51 = vld [vmem:[%s21513_s3 + $0x28] sm:$0xff]  }
 0x2fa   :  { %4048 = vst.msk [vmem:[#allocation3 + $0xd0] sm:$0xff] %vm4024_vm3, %v3879_v18  ;;  %3746 = vst [vmem:[#allocation3 + $0x1f8] sm:$0xff] %v3745_v41  ;;  %v2857_v28 = vld [vmem:[#allocation2 + $0x7a1] ss:$2 sm:$0xff]  ;;  %v2989_v62 = vmax.f32 %v2599_v12, %v2855_v13  ;;  %v3470_v18 = vshll.u32 %v18561_v49, 16  ;;  %v4198_v12 = vor.u32 %v4197_v14, %v3439_v33  ;;  %15038 = vmatprep.subr.bf16.mxu0 %v15673_v51 }
 0x2fb   :  { %v4260_v27 = vpop.permute.xlu1 %4259  ;;  %3936 = vrot.lane.b32.xlu0 %v18435_v57, %s16232_s0  ;;  %v18582_v57 = vpack.c.bf16 %v2987_v5, %v2986_v22  ;;  %v3469_v45 = vrot.slane %v3467_v61, 7  ;;  %v2990_v1 = vmax.f32 %v2601_v19, %v2857_v28  ;;  %v2609_v5 = vld [vmem:[#allocation2 + $0x7e0] ss:$2 sm:$0xff]  ;;  %v2865_v13 = vld [vmem:[#allocation2 + $0x7e1] ss:$2 sm:$0xff]  ;;  %15039 = vmatpush3.bf16.msra.mxu0 %v15673_v51  ;;  %v4200_v28 = vor.u32 %v4199_v56, %v3446_v47 }
 0x2fc   :  { %v4476_v43 = vsel %vm17938_vm6, %v4260_v27, %v4475_v38  ;;  %v2859_v38 = vld [vmem:[#allocation2 + $0x7b1] ss:$2 sm:$0xff]  ;;  %v2994_v47 = vmax.f32 %v2609_v5, %v2865_v13 }
 0x2fd   :  { %4477 = vst [vmem:[#allocation3 + $0xc0] sm:$0xff] %v4476_v43  ;;  %4317 = vrot.lane.b32.xlu1 %v4190_v26, %s16233_s22  ;;  %v3881_v23 = vpop.permute.xlu0 %3880  ;;  %v4478_v2 = vld [vmem:[#allocation3 + $0xc8] sm:$0xff]  ;;  %v3748_v26 = vsel %vm17581_vm2, %v3465_v46, %v3747_v9  ;;  %v3474_v27 = vshrl.u32 %v18582_v57, 16  ;;  %v3472_v36 = vor.u32 %v3470_v18, %v3469_v45  ;;  %v2991_v55 = vmax.f32 %v2603_v0, %v2859_v38  ;;  %v3765_v13 = vld [vmem:[#allocation3 + $0x230] sm:$0xff] }
 0x2fe   :  { %4049 = vst.msk [vmem:[#allocation3 + $0xd8] sm:$0xff] %vm4024_vm3, %v3881_v23  ;;  %3749 = vst [vmem:[#allocation3 + $0x200] sm:$0xff] %v3748_v26  ;;  %v3477_v23 = vshll.u32 %v18582_v57, 16  ;;  %v4201_v46 = vrot.slane %v3456_v58, 1 }
 0x2ff   :  { %v4262_v15 = vpop.permute.xlu1 %4261  ;;  %3938 = vrot.lane.b32.xlu0 %v18456_v7, %s16232_s0  ;;  %14941 = vmatmul.mubr.msk.bf16.gmra.mrb[40].mxu0 %vm46_vm0, %v4476_v43  ;;  %v2861_v43 = vld [vmem:[#allocation2 + $0x7c1] ss:$2 sm:$0xff]  ;;  %v18603_v7 = vpack.c.bf16 %v2989_v62, %v2988_v40  ;;  %v3476_v59 = vrot.slane %v3474_v27, 7  ;;  %v18627_v30 = vpack.c.bf16 %v2991_v55, %v2990_v1 }
 0x300   :  { %v4479_v52 = vsel %vm17938_vm6, %v4262_v15, %v4478_v2  ;;  %v2863_v2 = vld [vmem:[#allocation2 + $0x7d1] ss:$2 sm:$0xff]  ;;  %v2992_v41 = vmax.f32 %v2605_v32, %v2861_v43  ;;  %v4202_v14 = vor.u32 %v4201_v46, %v3453_v42  ;;  %v3759_v32 = vld [vmem:[#allocation3 + $0x220] sm:$0xff] }
 0x301   :  { %4480 = vst [vmem:[#allocation3 + $0xc8] sm:$0xff] %v4479_v52  ;;  %4319 = vrot.lane.b32.xlu1 %v4192_v29, %s16233_s22  ;;  %v3883_v34 = vpop.permute.xlu0 %3882  ;;  %v4481_v60 = vld [vmem:[#allocation3 + $0xd0] sm:$0xff]  ;;  %14944 = vmatprep.mubr.msk.bf16.mxu0 %vm46_vm0, %v4479_v52  ;;  %v3751_v29 = vsel %vm17581_vm2, %v3472_v36, %v3750_v10  ;;  %v3481_v22 = vshrl.u32 %v18603_v7, 16  ;;  %v2993_v20 = vmax.f32 %v2607_v31, %v2863_v2  ;;  %v3488_v40 = vshrl.u32 %v18627_v30, 16 }
 0x302   :  { %4050 = vst.msk [vmem:[#allocation3 + $0xe0] sm:$0xff] %vm4024_vm3, %v3883_v34  ;;  %3752 = vst [vmem:[#allocation3 + $0x208] sm:$0xff] %v3751_v29  ;;  %v3753_v15 = vld [vmem:[#allocation3 + $0x210] sm:$0xff]  ;;  %v3491_v26 = vshll.u32 %v18627_v30, 16  ;;  %v4203_v10 = vrot.slane %v3463_v44, 1  ;;  %v4205_v29 = vrot.slane %v3470_v18, 1 }
 0x303   :  { %v4264_v4 = vpop.permute.xlu1 %4263  ;;  %3940 = vrot.lane.b32.xlu0 %v18477_v37, %s16232_s0  ;;  %v2611_v52 = vld [vmem:[#allocation2 + $0x7f0] ss:$2 sm:$0xff]  ;;  %v3479_v37 = vor.u32 %v3477_v23, %v3476_v59  ;;  %v3483_v9 = vrot.slane %v3481_v22, 7  ;;  %v3762_v59 = vld [vmem:[#allocation3 + $0x228] sm:$0xff] }
 0x304   :  { %v4482_v39 = vsel %vm17938_vm6, %v4264_v4, %v4481_v60  ;;  %v3484_v60 = vshll.u32 %v18603_v7, 16  ;;  %v3756_v4 = vld [vmem:[#allocation3 + $0x218] sm:$0xff]  ;;  %v4204_v2 = vor.u32 %v4203_v10, %v3460_v3  ;;  %v4206_v5 = vor.u32 %v4205_v29, %v3467_v61 }
 0x305   :  { %4483 = vst [vmem:[#allocation3 + $0xd0] sm:$0xff] %v4482_v39  ;;  %4321 = vrot.lane.b32.xlu1 %v4194_v35, %s16233_s22  ;;  %v3885_v63 = vpop.permute.xlu0 %3884  ;;  %v4484_v17 = vld [vmem:[#allocation3 + $0xd8] sm:$0xff]  ;;  %v3754_v8 = vsel %vm17581_vm2, %v3479_v37, %v3753_v15 }
 0x306   :  { %4051 = vst.msk [vmem:[#allocation3 + $0xe8] sm:$0xff] %vm4024_vm3, %v3885_v63  ;;  %v2867_v35 = vld [vmem:[#allocation2 + $0x7f1] ss:$2 sm:$0xff]  ;;  %3755 = vst [vmem:[#allocation3 + $0x210] sm:$0xff] %v3754_v8  ;;  %v3486_v62 = vor.u32 %v3484_v60, %v3483_v9  ;;  %v3490_v63 = vrot.slane %v3488_v40, 7  ;;  %v4211_v8 = vrot.slane %v3491_v26, 1 }
 0x307   :  { %v4266_v16 = vpop.permute.xlu1 %4265  ;;  %3942 = vrot.lane.b32.xlu0 %v18498_v50, %s16232_s0  ;;  %14945 = vmatmul.mubr.msk.bf16.gmra.mrb[44].mxu0 %vm46_vm0, %v4482_v39  ;;  %v18648_v50 = vpack.c.bf16 %v2993_v20, %v2992_v41  ;;  %v2995_v38 = vmax.f32 %v2611_v52, %v2867_v35  ;;  %v4207_v52 = vrot.slane %v3477_v23, 1 }
 0x308   :  { %v4485_v11 = vsel %vm17938_vm6, %v4266_v16, %v4484_v17  ;;  %v3757_v45 = vsel %vm17581_vm2, %v3486_v62, %v3756_v4  ;;  %v3493_v43 = vor.u32 %v3491_v26, %v3490_v63 }
 0x309   :  { %4486 = vst [vmem:[#allocation3 + $0xd8] sm:$0xff] %v4485_v11  ;;  %4323 = vrot.lane.b32.xlu1 %v4196_v6, %s16233_s22  ;;  %v3887_v54 = vpop.permute.xlu0 %3886  ;;  %v4487_v25 = vld [vmem:[#allocation3 + $0xe0] sm:$0xff]  ;;  %14948 = vmatprep.mubr.msk.bf16.mxu0 %vm46_vm0, %v4485_v11  ;;  %3758 = vst [vmem:[#allocation3 + $0x218] sm:$0xff] %v3757_v45  ;;  %v3495_v31 = vshrl.u32 %v18648_v50, 16  ;;  %v3498_v44 = vshll.u32 %v18648_v50, 16  ;;  %v4208_v20 = vor.u32 %v4207_v52, %v3474_v27 }
 0x30a   :  { %4052 = vst.msk [vmem:[#allocation3 + $0xf0] sm:$0xff] %vm4024_vm3, %v3887_v54  ;;  %v3760_v16 = vsel %vm17581_vm2, %v3493_v43, %v3759_v32 }
 0x30b   :  { %v4268_v33 = vpop.permute.xlu1 %4267  ;;  %3944 = vrot.lane.b32.xlu0 %v18519_v21, %s16232_s0  ;;  %v18669_v21 = vpack.c.bf16 %v2995_v38, %v2994_v47  ;;  %v3497_v1 = vrot.slane %v3495_v31, 7  ;;  %3761 = vst [vmem:[#allocation3 + $0x220] sm:$0xff] %v3760_v16 }
 0x30c   :  { %v4488_v34 = vsel %vm17938_vm6, %v4268_v33, %v4487_v25 }
 0x30d   :  { %4489 = vst [vmem:[#allocation3 + $0xe0] sm:$0xff] %v4488_v34  ;;  %4325 = vrot.lane.b32.xlu1 %v4198_v12, %s16233_s22  ;;  %v3889_v19 = vpop.permute.xlu0 %3888  ;;  %v4490_v0 = vld [vmem:[#allocation3 + $0xe8] sm:$0xff]  ;;  %v3502_v54 = vshrl.u32 %v18669_v21, 16  ;;  %v3500_v25 = vor.u32 %v3498_v44, %v3497_v1  ;;  %v3505_v3 = vshll.u32 %v18669_v21, 16 }
 0x30e   :  { %4053 = vst.msk [vmem:[#allocation3 + $0xf8] sm:$0xff] %vm4024_vm3, %v3889_v19  ;;  %v4213_v19 = vrot.slane %v3498_v44, 1 }
 0x30f   :  { %v4270_v39 = vpop.permute.xlu1 %4269  ;;  %3946 = vrot.lane.b32.xlu0 %v18540_v48, %s16232_s0  ;;  %14949 = vmatmul.mubr.msk.bf16.gmra.mrb[48].mxu0 %vm46_vm0, %v4488_v34  ;;  %v3763_v18 = vsel %vm17581_vm2, %v3500_v25, %v3762_v59  ;;  %v3504_v56 = vrot.slane %v3502_v54, 7  ;;  %v4209_v34 = vrot.slane %v3484_v60, 1  ;;  %v4215_v46 = vrot.slane %v3505_v3, 1 }
 0x310   :  { %v4491_v58 = vsel %vm17938_vm6, %v4270_v39, %v4490_v0  ;;  %3764 = vst [vmem:[#allocation3 + $0x228] sm:$0xff] %v3763_v18  ;;  %v4214_v62 = vor.u32 %v4213_v19, %v3495_v31 }
 0x311   :  { %4492 = vst [vmem:[#allocation3 + $0xe8] sm:$0xff] %v4491_v58  ;;  %4327 = vrot.lane.b32.xlu1 %v4200_v28, %s16233_s22  ;;  %v3891_v17 = vpop.permute.xlu0 %3890  ;;  %v4493_v6 = vld [vmem:[#allocation3 + $0xf0] sm:$0xff]  ;;  %14952 = vmatprep.mubr.msk.bf16.mxu0 %vm46_vm0, %v4491_v58  ;;  %v3507_v37 = vor.u32 %v3505_v3, %v3504_v56  ;;  %v4210_v60 = vor.u32 %v4209_v34, %v3481_v22 }
 0x312   :  { %4054 = vst.msk [vmem:[#allocation3 + $0x100] sm:$0xff] %vm4024_vm3, %v3891_v17  ;;  %v4212_v28 = vor.u32 %v4211_v8, %v3488_v40 }
 0x313   :  { %v4272_v36 = vpop.permute.xlu1 %4271  ;;  %3948 = vrot.lane.b32.xlu0 %v18561_v49, %s16232_s0  ;;  %v3766_v49 = vsel %vm17581_vm2, %v3507_v37, %v3765_v13  ;;  %vm16236_vm2 = vmmov 0  }
 0x314   :  { %v4494_v42 = vsel %vm17938_vm6, %v4272_v36, %v4493_v6  ;;  %3767 = vst [vmem:[#allocation3 + $0x230] sm:$0xff] %v3766_v49 }
 0x315   :  { %4495 = vst [vmem:[#allocation3 + $0xf0] sm:$0xff] %v4494_v42  ;;  %4329 = vrot.lane.b32.xlu1 %v4202_v14, %s16233_s22  ;;  %v3893_v55 = vpop.permute.xlu0 %3892  ;;  %v4496_v11 = vld [vmem:[#allocation3 + $0xf8] sm:$0xff] }
 0x316   :  { %4055 = vst.msk [vmem:[#allocation3 + $0x108] sm:$0xff] %vm4024_vm3, %v3893_v55 }
 0x317   :  { %v4274_v12 = vpop.permute.xlu1 %4273  ;;  %3950 = vrot.lane.b32.xlu0 %v18582_v57, %s16232_s0  ;;  %14953 = vmatmul.mubr.msk.bf16.gmra.mrb[52].mxu0 %vm46_vm0, %v4494_v42 }
 0x318   :  { %v4497_v48 = vsel %vm17938_vm6, %v4274_v12, %v4496_v11 }
 0x319   :  { %4498 = vst [vmem:[#allocation3 + $0xf8] sm:$0xff] %v4497_v48  ;;  %4331 = vrot.lane.b32.xlu1 %v4204_v2, %s16233_s22  ;;  %v3895_v51 = vpop.permute.xlu0 %3894  ;;  %v4499_v15 = vld [vmem:[#allocation3 + $0x100] sm:$0xff]  ;;  %14956 = vmatprep.mubr.msk.bf16.mxu0 %vm46_vm0, %v4497_v48 }
 0x31a   :  { %4056 = vst.msk [vmem:[#allocation3 + $0x110] sm:$0xff] %vm4024_vm3, %v3895_v51 }
 0x31b   :  { %v4276_v33 = vpop.permute.xlu1 %4275  ;;  %3952 = vrot.lane.b32.xlu0 %v18603_v7, %s16232_s0 }
 0x31c   :  { %v4500_v41 = vsel %vm17938_vm6, %v4276_v33, %v4499_v15 }
 0x31d   :  { %4501 = vst [vmem:[#allocation3 + $0x100] sm:$0xff] %v4500_v41  ;;  %4333 = vrot.lane.b32.xlu1 %v4206_v5, %s16233_s22  ;;  %v3897_v61 = vpop.permute.xlu0 %3896  ;;  %v4502_v23 = vld [vmem:[#allocation3 + $0x108] sm:$0xff] }
 0x31e   :  { %4057 = vst.msk [vmem:[#allocation3 + $0x128] sm:$0xff] %vm4024_vm3, %v3897_v61 }
 0x31f   :  { %v4278_v35 = vpop.permute.xlu1 %4277  ;;  %3954 = vrot.lane.b32.xlu0 %v18627_v30, %s16232_s0  ;;  %14957 = vmatmul.mubr.msk.bf16.gmra.mrb[56].mxu0 %vm46_vm0, %v4500_v41  ;;  %v18746_v30 = vld [vmem:[%s21513_s3 + $0x60] sm:$0xff]  }
 0x320   :  { %v4503_v24 = vsel %vm17938_vm6, %v4278_v35, %v4502_v23  ;;  %15168 = vmatprep.subr.bf16.mxu0 %v18746_v30 }
 0x321   :  { %4504 = vst [vmem:[#allocation3 + $0x108] sm:$0xff] %v4503_v24  ;;  %4335 = vrot.lane.b32.xlu1 %v4208_v20, %s16233_s22  ;;  %v3899_v57 = vpop.permute.xlu0 %3898  ;;  %v4505_v27 = vld [vmem:[#allocation3 + $0x110] sm:$0xff]  ;;  %14960 = vmatprep.mubr.msk.bf16.mxu0 %vm46_vm0, %v4503_v24 }
 0x322   :  { %4058 = vst.msk [vmem:[#allocation3 + $0x130] sm:$0xff] %vm4024_vm3, %v3899_v57 }
 0x323   :  { %v4280_v9 = vpop.permute.xlu1 %4279  ;;  %3956 = vrot.lane.b32.xlu0 %v18648_v50, %s16232_s0  ;;  %v4216_v50 = vor.u32 %v4215_v46, %v3502_v54 }
 0x324   :  { %v4506_v0 = vsel %vm17938_vm6, %v4280_v9, %v4505_v27 }
 0x325   :  { %4507 = vst [vmem:[#allocation3 + $0x110] sm:$0xff] %v4506_v0  ;;  %4337 = vrot.lane.b32.xlu1 %v4210_v60, %s16233_s22  ;;  %v3901_v7 = vpop.permute.xlu0 %3900  ;;  %v4508_v22 = vld [vmem:[#allocation3 + $0x128] sm:$0xff] }
 0x326   :  { %4059 = vst.msk [vmem:[#allocation3 + $0x138] sm:$0xff] %vm4024_vm3, %v3901_v7 }
 0x327   :  { %v4282_v4 = vpop.permute.xlu1 %4281  ;;  %3958 = vrot.lane.b32.xlu0 %v18669_v21, %s16232_s0  ;;  %14961 = vmatmul.mubr.msk.bf16.gmra.mrb[60].mxu0 %vm46_vm0, %v4506_v0 }
 0x328   :  { %v18741_v39 = vsel %vm17938_vm6, %v4282_v4, %v4508_v22 }
 0x329   :  { %4510 = vst [vmem:[#allocation3 + $0x128] sm:$0xff] %v18741_v39  ;;  %4339 = vrot.lane.b32.xlu1 %v4212_v28, %s16233_s22  ;;  %v3903_v40 = vpop.permute.xlu0 %3902  ;;  %v4511_v47 = vld [vmem:[#allocation3 + $0x130] sm:$0xff]  ;;  %14964 = vmatprep.mubr.msk.bf16.mxu0 %vm46_vm0, %v18741_v39 }
 0x32a   :  { %4060 = vst.msk [vmem:[#allocation3 + $0x140] sm:$0xff] %vm4024_vm3, %v3903_v40 }
 0x32b   :  { %v4284_v38 = vpop.permute.xlu1 %4283  ;;  %4341 = vrot.lane.b32.xlu0 %v4214_v62, %s16233_s22 }
 0x32c   :  { %v18759_v58 = vsel %vm17938_vm6, %v4284_v38, %v4511_v47 }
 0x32d   :  { %4513 = vst [vmem:[#allocation3 + $0x130] sm:$0xff] %v18759_v58  ;;  %v3905_v26 = vpop.permute.xlu0 %3904  ;;  %v4514_v45 = vld [vmem:[#allocation3 + $0x138] sm:$0xff]  ;;  %4343 = vrot.lane.b32.xlu1 %v4216_v50, %s16233_s22 }
 0x32e   :  { %4061 = vst.msk [vmem:[#allocation3 + $0x148] sm:$0xff] %vm4024_vm3, %v3905_v26 }
 0x32f   :  { %v4286_v63 = vpop.permute.xlu1 %4285  ;;  %14965 = vmatmul.mubr.msk.bf16.gmra.mrb[64].mxu0 %vm46_vm0, %v18759_v58 }
 0x330   :  { %v18768_v17 = vsel %vm17938_vm6, %v4286_v63, %v4514_v45 }
 0x331   :  { %4516 = vst [vmem:[#allocation3 + $0x138] sm:$0xff] %v18768_v17  ;;  %v3907_v6 = vpop.permute.xlu0 %3906  ;;  %v4517_v14 = vld [vmem:[#allocation3 + $0x140] sm:$0xff]  ;;  %14968 = vmatprep.mubr.msk.bf16.mxu0 %vm46_vm0, %v18768_v17 }
 0x332   :  { %4062 = vst.msk [vmem:[#allocation3 + $0x150] sm:$0xff] %vm4024_vm3, %v3907_v6 }
 0x333   :  { %v4288_v10 = vpop.permute.xlu1 %4287 }
 0x334   :  { %v18776_v32 = vsel %vm17938_vm6, %v4288_v10, %v4517_v14 }
 0x335   :  { %4519 = vst [vmem:[#allocation3 + $0x140] sm:$0xff] %v18776_v32  ;;  %v3909_v31 = vpop.permute.xlu0 %3908  ;;  %v4520_v43 = vld [vmem:[#allocation3 + $0x148] sm:$0xff] }
 0x336   :  { %4063 = vst.msk [vmem:[#allocation3 + $0x158] sm:$0xff] %vm4024_vm3, %v3909_v31 }
 0x337   :  { %v4290_v36 = vpop.permute.xlu1 %4289  ;;  %14969 = vmatmul.mubr.msk.bf16.gmra.mrb[68].mxu0 %vm46_vm0, %v18776_v32 }
 0x338   :  { %v18784_v21 = vsel %vm17938_vm6, %v4290_v36, %v4520_v43 }
 0x339   :  { %4522 = vst [vmem:[#allocation3 + $0x148] sm:$0xff] %v18784_v21  ;;  %v3911_v42 = vpop.permute.xlu0 %3910  ;;  %v4523_v44 = vld [vmem:[#allocation3 + $0x150] sm:$0xff]  ;;  %14972 = vmatprep.mubr.msk.bf16.mxu0 %vm46_vm0, %v18784_v21 }
 0x33a   :  { %4064 = vst.msk [vmem:[#allocation3 + $0x160] sm:$0xff] %vm4024_vm3, %v3911_v42 }
 0x33b   :  { %v4292_v16 = vpop.permute.xlu1 %4291 }
 0x33c   :  { %v18792_v1 = vsel %vm17938_vm6, %v4292_v16, %v4523_v44 }
 0x33d   :  { %4525 = vst [vmem:[#allocation3 + $0x150] sm:$0xff] %v18792_v1  ;;  %v3913_v55 = vpop.permute.xlu0 %3912  ;;  %v4526_v11 = vld [vmem:[#allocation3 + $0x158] sm:$0xff] }
 0x33e   :  { %4065 = vst.msk [vmem:[#allocation3 + $0x168] sm:$0xff] %vm4024_vm3, %v3913_v55 }
 0x33f   :  { %v4294_v2 = vpop.permute.xlu1 %4293  ;;  %14973 = vmatmul.mubr.msk.bf16.gmra.mrb[72].mxu0 %vm46_vm0, %v18792_v1 }
 0x340   :  { %v18800_v29 = vsel %vm17938_vm6, %v4294_v2, %v4526_v11 }
 0x341   :  { %4528 = vst [vmem:[#allocation3 + $0x158] sm:$0xff] %v18800_v29  ;;  %v3915_v59 = vpop.permute.xlu0 %3914  ;;  %v4529_v54 = vld [vmem:[#allocation3 + $0x160] sm:$0xff]  ;;  %14976 = vmatprep.mubr.msk.bf16.mxu0 %vm46_vm0, %v18800_v29 }
 0x342   :  { %4066 = vst.msk [vmem:[#allocation3 + $0x170] sm:$0xff] %vm4024_vm3, %v3915_v59 }
 0x343   :  { %v4296_v25 = vpop.permute.xlu1 %4295 }
 0x344   :  { %v18808_v12 = vsel %vm17938_vm6, %v4296_v25, %v4529_v54 }
 0x345   :  { %4531 = vst [vmem:[#allocation3 + $0x160] sm:$0xff] %v18808_v12  ;;  %v3917_v48 = vpop.permute.xlu0 %3916  ;;  %v4532_v3 = vld [vmem:[#allocation3 + $0x168] sm:$0xff] }
 0x346   :  { %4067 = vst.msk [vmem:[#allocation3 + $0x178] sm:$0xff] %vm4024_vm3, %v3917_v48 }
 0x347   :  { %v4298_v18 = vpop.permute.xlu1 %4297  ;;  %14977 = vmatmul.mubr.msk.bf16.gmra.mrb[76].mxu0 %vm46_vm0, %v18808_v12 }
 0x348   :  { %v18816_v56 = vsel %vm17938_vm6, %v4298_v18, %v4532_v3 }
 0x349   :  { %4534 = vst [vmem:[#allocation3 + $0x168] sm:$0xff] %v18816_v56  ;;  %v3919_v51 = vpop.permute.xlu0 %3918  ;;  %v4535_v15 = vld [vmem:[#allocation3 + $0x170] sm:$0xff]  ;;  %14980 = vmatprep.mubr.msk.bf16.mxu0 %vm46_vm0, %v18816_v56 }
 0x34a   :  { %4068 = vst.msk [vmem:[#allocation3 + $0x180] sm:$0xff] %vm4024_vm3, %v3919_v51 }
 0x34b   :  { %v4300_v5 = vpop.permute.xlu1 %4299 }
 0x34c   :  { %v18824_v52 = vsel %vm17938_vm6, %v4300_v5, %v4535_v15 }
 0x34d   :  { %4537 = vst [vmem:[#allocation3 + $0x170] sm:$0xff] %v18824_v52  ;;  %v3921_v13 = vpop.permute.xlu0 %3920  ;;  %v4538_v37 = vld [vmem:[#allocation3 + $0x178] sm:$0xff] }
 0x34e   :  { %4069 = vst.msk [vmem:[#allocation3 + $0x188] sm:$0xff] %vm4024_vm3, %v3921_v13 }
 0x34f   :  { %v4302_v33 = vpop.permute.xlu1 %4301  ;;  %14981 = vmatmul.mubr.msk.bf16.gmra.mrb[80].mxu0 %vm46_vm0, %v18824_v52 }
 0x350   :  { %v18832_v41 = vsel %vm17938_vm6, %v4302_v33, %v4538_v37 }
 0x351   :  { %4540 = vst [vmem:[#allocation3 + $0x178] sm:$0xff] %v18832_v41  ;;  %v3923_v49 = vpop.permute.xlu0 %3922  ;;  %v4541_v61 = vld [vmem:[#allocation3 + $0x180] sm:$0xff]  ;;  %14984 = vmatprep.mubr.msk.bf16.mxu0 %vm46_vm0, %v18832_v41 }
 0x352   :  { %4070 = vst.msk [vmem:[#allocation3 + $0x190] sm:$0xff] %vm4024_vm3, %v3923_v49 }
 0x353   :  { %v4304_v23 = vpop.permute.xlu1 %4303 }
 0x354   :  { %v18840_v20 = vsel %vm17938_vm6, %v4304_v23, %v4541_v61 }
 0x355   :  { %4543 = vst [vmem:[#allocation3 + $0x180] sm:$0xff] %v18840_v20  ;;  %v3925_v34 = vpop.permute.xlu0 %3924  ;;  %v4544_v35 = vld [vmem:[#allocation3 + $0x188] sm:$0xff] }
 0x356   :  { %4071 = vst.msk [vmem:[#allocation3 + $0x198] sm:$0xff] %vm4024_vm3, %v3925_v34 }
 0x357   :  { %v4306_v24 = vpop.permute.xlu1 %4305  ;;  %14985 = vmatmul.mubr.msk.bf16.gmra.mrb[84].mxu0 %vm46_vm0, %v18840_v20 }
 0x358   :  { %v18848_v57 = vsel %vm17938_vm6, %v4306_v24, %v4544_v35 }
 0x359   :  { %4546 = vst [vmem:[#allocation3 + $0x188] sm:$0xff] %v18848_v57  ;;  %v3927_v27 = vpop.permute.xlu0 %3926  ;;  %v4547_v60 = vld [vmem:[#allocation3 + $0x190] sm:$0xff]  ;;  %14988 = vmatprep.mubr.msk.bf16.mxu0 %vm46_vm0, %v18848_v57 }
 0x35a   :  { %4072 = vst.msk [vmem:[#allocation3 + $0x1a0] sm:$0xff] %vm4024_vm3, %v3927_v27 }
 0x35b   :  { %v4308_v8 = vpop.permute.xlu1 %4307 }
 0x35c   :  { %v18856_v9 = vsel %vm17938_vm6, %v4308_v8, %v4547_v60 }
 0x35d   :  { %4549 = vst [vmem:[#allocation3 + $0x190] sm:$0xff] %v18856_v9  ;;  %v3929_v19 = vpop.permute.xlu0 %3928  ;;  %v4550_v0 = vld [vmem:[#allocation3 + $0x198] sm:$0xff] }
 0x35e   :  { %4073 = vst.msk [vmem:[#allocation3 + $0x1b8] sm:$0xff] %vm4024_vm3, %v3929_v19 }
 0x35f   :  { %v4310_v7 = vpop.permute.xlu1 %4309  ;;  %14989 = vmatmul.mubr.msk.bf16.gmra.mrb[88].mxu0 %vm46_vm0, %v18856_v9 }
 0x360   :  { %v18864_v22 = vsel %vm17938_vm6, %v4310_v7, %v4550_v0 }
 0x361   :  { %4552 = vst [vmem:[#allocation3 + $0x198] sm:$0xff] %v18864_v22  ;;  %v3931_v28 = vpop.permute.xlu0 %3930  ;;  %v4553_v46 = vld [vmem:[#allocation3 + $0x1a0] sm:$0xff]  ;;  %14992 = vmatprep.mubr.msk.bf16.mxu0 %vm46_vm0, %v18864_v22 }
 0x362   :  { %4074 = vst.msk [vmem:[#allocation3 + $0x1c0] sm:$0xff] %vm4024_vm3, %v3931_v28 }
 0x363   :  { %v4312_v4 = vpop.permute.xlu1 %4311 }
 0x364   :  { %v18872_v62 = vsel %vm17938_vm6, %v4312_v4, %v4553_v46 }
 0x365   :  { %4555 = vst [vmem:[#allocation3 + $0x1a0] sm:$0xff] %v18872_v62  ;;  %v3933_v40 = vpop.permute.xlu0 %3932  ;;  %v4556_v47 = vld [vmem:[#allocation3 + $0x1b8] sm:$0xff] }
 0x366   :  { %4075 = vst.msk [vmem:[#allocation3 + $0x1c8] sm:$0xff] %vm4024_vm3, %v3933_v40 }
 0x367   :  { %v4314_v50 = vpop.permute.xlu1 %4313  ;;  %14993 = vmatmul.mubr.msk.bf16.gmra.mrb[92].mxu0 %vm46_vm0, %v18872_v62 }
 0x368   :  { %v18880_v38 = vsel %vm17938_vm6, %v4314_v50, %v4556_v47 }
 0x369   :  { %4558 = vst [vmem:[#allocation3 + $0x1b8] sm:$0xff] %v18880_v38  ;;  %v3935_v26 = vpop.permute.xlu0 %3934  ;;  %v4559_v45 = vld [vmem:[#allocation3 + $0x1c0] sm:$0xff]  ;;  %14996 = vmatprep.mubr.msk.bf16.mxu0 %vm46_vm0, %v18880_v38 }
 0x36a   :  { %4076 = vst.msk [vmem:[#allocation3 + $0x1d0] sm:$0xff] %vm4024_vm3, %v3935_v26 }
 0x36b   :  { %v4316_v63 = vpop.permute.xlu1 %4315 }
 0x36c   :  { %v18888_v6 = vsel %vm17938_vm6, %v4316_v63, %v4559_v45 }
 0x36d   :  { %4561 = vst [vmem:[#allocation3 + $0x1c0] sm:$0xff] %v18888_v6  ;;  %v3937_v14 = vpop.permute.xlu0 %3936  ;;  %v4562_v10 = vld [vmem:[#allocation3 + $0x1c8] sm:$0xff] }
 0x36e   :  { %4077 = vst.msk [vmem:[#allocation3 + $0x1d8] sm:$0xff] %vm4024_vm3, %v3937_v14 }
 0x36f   :  { %v4318_v31 = vpop.permute.xlu1 %4317  ;;  %14997 = vmatmul.mubr.msk.bf16.gmra.mrb[96].mxu0 %vm46_vm0, %v18888_v6 }
 0x370   :  { %v18896_v43 = vsel %vm17938_vm6, %v4318_v31, %v4562_v10 }
 0x371   :  { %4564 = vst [vmem:[#allocation3 + $0x1c8] sm:$0xff] %v18896_v43  ;;  %v3939_v36 = vpop.permute.xlu0 %3938  ;;  %v4565_v42 = vld [vmem:[#allocation3 + $0x1d0] sm:$0xff]  ;;  %15000 = vmatprep.mubr.msk.bf16.mxu0 %vm46_vm0, %v18896_v43 }
 0x372   :  { %4078 = vst.msk [vmem:[#allocation3 + $0x1e0] sm:$0xff] %vm4024_vm3, %v3939_v36 }
 0x373   :  { %v4320_v44 = vpop.permute.xlu1 %4319 }
 0x374   :  { %v18904_v16 = vsel %vm17938_vm6, %v4320_v44, %v4565_v42 }
 0x375   :  { %4567 = vst [vmem:[#allocation3 + $0x1d0] sm:$0xff] %v18904_v16  ;;  %v3941_v55 = vpop.permute.xlu0 %3940  ;;  %v4568_v11 = vld [vmem:[#allocation3 + $0x1d8] sm:$0xff] }
 0x376   :  { %4079 = vst.msk [vmem:[#allocation3 + $0x1e8] sm:$0xff] %vm4024_vm3, %v3941_v55 }
 0x377   :  { %v4322_v2 = vpop.permute.xlu1 %4321  ;;  %15001 = vmatmul.mubr.msk.bf16.gmra.mrb[100].mxu0 %vm46_vm0, %v18904_v16 }
 0x378   :  { %v18912_v59 = vsel %vm17938_vm6, %v4322_v2, %v4568_v11 }
 0x379   :  { %4570 = vst [vmem:[#allocation3 + $0x1d8] sm:$0xff] %v18912_v59  ;;  %v3943_v54 = vpop.permute.xlu0 %3942  ;;  %v4571_v25 = vld [vmem:[#allocation3 + $0x1e0] sm:$0xff]  ;;  %15004 = vmatprep.mubr.msk.bf16.mxu0 %vm46_vm0, %v18912_v59 }
 0x37a   :  { %4080 = vst.msk [vmem:[#allocation3 + $0x1f0] sm:$0xff] %vm4024_vm3, %v3943_v54 }
 0x37b   :  { %v4324_v48 = vpop.permute.xlu1 %4323 }
 0x37c   :  { %v18920_v3 = vsel %vm17938_vm6, %v4324_v48, %v4571_v25  ;;  %v4604_v25 = vld [vmem:[#allocation3] sm:$0xff]  ;;  %v15675_v48 = vld [vmem:[%s21513_s3 + $0x68] sm:$0xff]  }
 0x37d   :  { %4573 = vst [vmem:[#allocation3 + $0x1e0] sm:$0xff] %v18920_v3  ;;  %v3945_v18 = vpop.permute.xlu0 %3944  ;;  %v4574_v51 = vld [vmem:[#allocation3 + $0x1e8] sm:$0xff] }
 0x37e   :  { %4081 = vst.msk [vmem:[#allocation3 + $0x1f8] sm:$0xff] %vm4024_vm3, %v3945_v18  ;;  %v4605_v18 = vld [vmem:[#allocation3 + $0x8] sm:$0xff] }
 0x37f   :  { %v4326_v15 = vpop.permute.xlu1 %4325  ;;  %15005 = vmatmul.mubr.msk.bf16.gmra.mrb[104].mxu0 %vm46_vm0, %v18920_v3 }
 0x380   :  { %v18928_v5 = vsel %vm17938_vm6, %v4326_v15, %v4574_v51  ;;  %v19008_v51 = vld [vmem:[#allocation3 + $0x10] sm:$0xff]  ;;  %v15677_v15 = vld [vmem:[%s21513_s3 + $0x78] sm:$0xff]  }
 0x381   :  { %4576 = vst [vmem:[#allocation3 + $0x1e8] sm:$0xff] %v18928_v5  ;;  %v3947_v13 = vpop.permute.xlu0 %3946  ;;  %v4577_v37 = vld [vmem:[#allocation3 + $0x1f0] sm:$0xff]  ;;  %15008 = vmatprep.mubr.msk.bf16.mxu0 %vm46_vm0, %v18928_v5 }
 0x382   :  { %4082 = vst.msk [vmem:[#allocation3 + $0x200] sm:$0xff] %vm4024_vm3, %v3947_v13  ;;  %v19019_v13 = vld [vmem:[#allocation3 + $0x18] sm:$0xff] }
 0x383   :  { %v4328_v33 = vpop.permute.xlu1 %4327 }
 0x384   :  { %v18936_v49 = vsel %vm17938_vm6, %v4328_v33, %v4577_v37  ;;  %v19027_v37 = vld [vmem:[#allocation3 + $0x28] sm:$0xff]  ;;  %v19031_v33 = vld [vmem:[#allocation3 + $0x30] sm:$0xff] }
 0x385   :  { %4579 = vst [vmem:[#allocation3 + $0x1f0] sm:$0xff] %v18936_v49  ;;  %v3949_v61 = vpop.permute.xlu0 %3948  ;;  %v4580_v23 = vld [vmem:[#allocation3 + $0x1f8] sm:$0xff] }
 0x386   :  { %4083 = vst.msk [vmem:[#allocation3 + $0x208] sm:$0xff] %vm4024_vm3, %v3949_v61  ;;  %v19035_v61 = vld [vmem:[#allocation3 + $0x38] sm:$0xff] }
 0x387   :  { %v4330_v34 = vpop.permute.xlu1 %4329  ;;  %15009 = vmatmul.mubr.msk.bf16.gmra.mrb[108].mxu0 %vm46_vm0, %v18936_v49 }
 0x388   :  { %v18944_v35 = vsel %vm17938_vm6, %v4330_v34, %v4580_v23  ;;  %v19039_v23 = vld [vmem:[#allocation3 + $0x40] sm:$0xff]  ;;  %v19043_v34 = vld [vmem:[#allocation3 + $0x48] sm:$0xff] }
 0x389   :  { %4582 = vst [vmem:[#allocation3 + $0x1f8] sm:$0xff] %v18944_v35  ;;  %v3951_v24 = vpop.permute.xlu0 %3950  ;;  %v4583_v27 = vld [vmem:[#allocation3 + $0x200] sm:$0xff]  ;;  %15012 = vmatprep.mubr.msk.bf16.mxu0 %vm46_vm0, %v18944_v35 }
 0x38a   :  { %4084 = vst.msk [vmem:[#allocation3 + $0x210] sm:$0xff] %vm4024_vm3, %v3951_v24  ;;  %v19047_v24 = vld [vmem:[#allocation3 + $0x50] sm:$0xff] }
 0x38b   :  { %v4332_v60 = vpop.permute.xlu1 %4331 }
 0x38c   :  { %v18952_v8 = vsel %vm17938_vm6, %v4332_v60, %v4583_v27  ;;  %v19051_v27 = vld [vmem:[#allocation3 + $0x58] sm:$0xff]  ;;  %v19055_v60 = vld [vmem:[#allocation3 + $0x60] sm:$0xff] }
 0x38d   :  { %4585 = vst [vmem:[#allocation3 + $0x200] sm:$0xff] %v18952_v8  ;;  %v3953_v19 = vpop.permute.xlu0 %3952  ;;  %v4586_v0 = vld [vmem:[#allocation3 + $0x208] sm:$0xff] }
 0x38e   :  { %4085 = vst.msk [vmem:[#allocation3 + $0x218] sm:$0xff] %vm4024_vm3, %v3953_v19  ;;  %v15678_v19 = vld [vmem:[%s21513_s3 + $0x80] sm:$0xff]  }
 0x38f   :  { %v4334_v7 = vpop.permute.xlu1 %4333  ;;  %15013 = vmatmul.mubr.msk.bf16.gmra.mrb[112].mxu0 %vm46_vm0, %v18952_v8 }
 0x390   :  { %v18960_v28 = vsel %vm17938_vm6, %v4334_v7, %v4586_v0  ;;  %v19062_v0 = vld [vmem:[#allocation3 + $0x68] sm:$0xff]  ;;  %v19066_v7 = vld [vmem:[#allocation3 + $0x70] sm:$0xff] }
 0x391   :  { %4588 = vst [vmem:[#allocation3 + $0x208] sm:$0xff] %v18960_v28  ;;  %v3955_v46 = vpop.permute.xlu0 %3954  ;;  %v4589_v4 = vld [vmem:[#allocation3 + $0x210] sm:$0xff]  ;;  %15016 = vmatprep.mubr.msk.bf16.mxu0 %vm46_vm0, %v18960_v28 }
 0x392   :  { %4086 = vst.msk [vmem:[#allocation3 + $0x220] sm:$0xff] %vm4024_vm3, %v3955_v46  ;;  %v4620_v46 = vld [vmem:[#allocation3 + $0x90] sm:$0xff] }
 0x393   :  { %v4336_v40 = vpop.permute.xlu1 %4335 }
 0x394   :  { %v18968_v47 = vsel %vm17938_vm6, %v4336_v40, %v4589_v4  ;;  %v19070_v4 = vld [vmem:[#allocation3 + $0x78] sm:$0xff] }
 0x395   :  { %4591 = vst [vmem:[#allocation3 + $0x210] sm:$0xff] %v18968_v47  ;;  %v3957_v50 = vpop.permute.xlu0 %3956  ;;  %v4592_v26 = vld [vmem:[#allocation3 + $0x218] sm:$0xff] }
 0x396   :  { %4087 = vst.msk [vmem:[#allocation3 + $0x228] sm:$0xff] %vm4024_vm3, %v3957_v50  ;;  %v4621_v40 = vld [vmem:[#allocation3 + $0x98] sm:$0xff]  ;;  %v19076_v50 = vld [vmem:[#allocation3 + $0xa0] sm:$0xff] }
 0x397   :  { %v4338_v45 = vpop.permute.xlu1 %4337  ;;  %15017 = vmatmul.mubr.msk.bf16.gmra.mrb[116].mxu0 %vm46_vm0, %v18968_v47 }
 0x398   :  { %v18976_v63 = vsel %vm17938_vm6, %v4338_v45, %v4592_v26  ;;  %v19080_v26 = vld [vmem:[#allocation3 + $0xa8] sm:$0xff]  ;;  %v19084_v45 = vld [vmem:[#allocation3 + $0xb0] sm:$0xff] }
 0x399   :  { %4594 = vst [vmem:[#allocation3 + $0x218] sm:$0xff] %v18976_v63  ;;  %v3959_v14 = vpop.permute.xlu0 %3958  ;;  %v4595_v10 = vld [vmem:[#allocation3 + $0x220] sm:$0xff]  ;;  %15020 = vmatprep.mubr.msk.bf16.mxu0 %vm46_vm0, %v18976_v63 }
 0x39a   :  { %4088 = vst.msk [vmem:[#allocation3 + $0x230] sm:$0xff] %vm4024_vm3, %v3959_v14  ;;  %v19088_v14 = vld [vmem:[#allocation3 + $0xb8] sm:$0xff]  ;;  %vm13224_vm3 = vcmask 76800  }
 0x39b   :  { %v4340_v31 = vpop.permute.xlu1 %4339 }
 0x39c   :  { %v18984_v36 = vsel %vm17938_vm6, %v4340_v31, %v4595_v10  ;;  %v19092_v10 = vld [vmem:[#allocation3 + $0xc0] sm:$0xff]  ;;  %v15679_v31 = vld [vmem:[%s21513_s3 + $0x88] sm:$0xff]  }
 0x39d   :  { %4597 = vst [vmem:[#allocation3 + $0x220] sm:$0xff] %v18984_v36  ;;  %v4598_v42 = vld [vmem:[#allocation3 + $0x228] sm:$0xff]  ;;  %v4342_v44 = vpop.permute.xlu0 %4341 }
 0x39e   :  { %v18989_v55 = vsel %vm17938_vm6, %v4342_v44, %v4598_v42  ;;  %v19099_v42 = vld [vmem:[#allocation3 + $0xc8] sm:$0xff]  ;;  %v19103_v44 = vld [vmem:[#allocation3 + $0xd0] sm:$0xff] }
 0x39f   :  { %4600 = vst [vmem:[#allocation3 + $0x228] sm:$0xff] %v18989_v55  ;;  %v4344_v11 = vpop.permute.xlu1 %4343  ;;  %15021 = vmatmul.mubr.msk.bf16.gmra.mrb[120].mxu0 %vm46_vm0, %v18984_v36 }
 0x3a0   :  { %15024 = vmatprep.mubr.msk.bf16.mxu0 %vm46_vm0, %v18989_v55 }
 0x3a1   :  { %v4601_v2 = vld [vmem:[#allocation3 + $0x230] sm:$0xff] }
 0x3a2   :  { %v18998_v54 = vsel %vm17938_vm6, %v4344_v11, %v4601_v2  ;;  %v19107_v11 = vld [vmem:[#allocation3 + $0xd8] sm:$0xff]  ;;  %v19111_v2 = vld [vmem:[#allocation3 + $0xe0] sm:$0xff] }
 0x3a3   :  { %4603 = vst [vmem:[#allocation3 + $0x230] sm:$0xff] %v18998_v54 }
 0x3a7   :  { %15025 = vmatmul.mubr.msk.bf16.gmra.mrb[124].mxu0 %vm46_vm0, %v18998_v54 }
 0x3a8   :  { %15040 = vmatprep.mubr.msk.bf16.mxu0 %vm46_vm0, %v4604_v25  ;;  %v19115_v25 = vld [vmem:[#allocation3 + $0xe8] sm:$0xff] }
 0x3af   :  { %15041 = vmatmul.mubr.msk.bf16.vlgmr.msra.gmra.mrb[0].mxu0 %vm46_vm0, %v4605_v18  ;;  %v19123_v18 = vld [vmem:[#allocation3 + $0xf8] sm:$0xff] }
 0x3b0   :  { %15169 = vmatpush3.bf16.msra.mxu0 %v18746_v30  ;;  %15044 = vmatprep.mubr.msk.bf16.mxu0 %vm46_vm0, %v19008_v51  ;;  %v19023_v30 = vld [vmem:[#allocation3 + $0x20] sm:$0xff] }
 0x3b1   :  { %15170 = vmatprep.subr.bf16.mxu0 %v15675_v48 }
 0x3b4   :  { %15171 = vmatpush3.bf16.msra.mxu0 %v15675_v48  ;;  %v19119_v48 = vld [vmem:[#allocation3 + $0xf0] sm:$0xff] }
 0x3b5   :  { %15172 = vmatprep.subr.bf16.mxu0 %v15676_v53 }
 0x3b7   :  { %15045 = vmatmul.mubr.msk.bf16.gmra.mrb[4].mxu0 %vm46_vm0, %v19019_v13 }
 0x3b8   :  { %15048 = vmatprep.mubr.msk.bf16.mxu0 %vm46_vm0, %v19023_v30  ;;  %15173 = vmatpush3.bf16.msra.mxu0 %v15676_v53  ;;  %v19127_v53 = vld [vmem:[#allocation3 + $0x100] sm:$0xff] }
 0x3b9   :  { %15174 = vmatprep.subr.bf16.mxu0 %v15677_v15 }
 0x3bc   :  { %15175 = vmatpush3.bf16.msra.mxu0 %v15677_v15  ;;  %v4636_v15 = vld [vmem:[#allocation3 + $0x120] sm:$0xff] }
 0x3bd   :  { %15176 = vmatprep.subr.bf16.mxu0 %v15678_v19 }
 0x3bf   :  { %15049 = vmatmul.mubr.msk.bf16.gmra.mrb[8].mxu0 %vm46_vm0, %v19027_v37 }
 0x3c0   :  { %15052 = vmatprep.mubr.msk.bf16.mxu0 %vm46_vm0, %v19031_v33  ;;  %15177 = vmatpush3.bf16.msra.mxu0 %v15678_v19  ;;  %v19131_v19 = vld [vmem:[#allocation3 + $0x108] sm:$0xff] }
 0x3c1   :  { %15178 = vmatprep.subr.bf16.mxu0 %v15679_v31 }
 0x3c4   :  { %15179 = vmatpush3.bf16.msra.mxu0 %v15679_v31 }
 0x3c7   :  { %15053 = vmatmul.mubr.msk.bf16.gmra.mrb[12].mxu0 %vm46_vm0, %v19035_v61 }
 0x3c8   :  { %15056 = vmatprep.mubr.msk.bf16.mxu0 %vm46_vm0, %v19039_v23 }
 0x3cf   :  { %15057 = vmatmul.mubr.msk.bf16.gmra.mrb[16].mxu0 %vm46_vm0, %v19043_v34 }
 0x3d0   :  { %15060 = vmatprep.mubr.msk.bf16.mxu0 %vm46_vm0, %v19047_v24 }
 0x3d7   :  { %15061 = vmatmul.mubr.msk.bf16.gmra.mrb[20].mxu0 %vm46_vm0, %v19051_v27 }
 0x3d8   :  { %15064 = vmatprep.mubr.msk.bf16.mxu0 %vm46_vm0, %v19055_v60 }
 0x3df   :  { %15065 = vmatmul.mubr.msk.bf16.gmra.mrb[24].mxu0 %vm46_vm0, %v19062_v0 }
 0x3e0   :  { %15068 = vmatprep.mubr.msk.bf16.mxu0 %vm46_vm0, %v19066_v7 }
 0x3e7   :  { %15069 = vmatmul.mubr.msk.bf16.gmra.mrb[28].mxu0 %vm46_vm0, %v19070_v4 }
 0x3e8   :  { %15072 = vmatprep.mubr.msk.bf16.mxu0 %vm46_vm0, %v4620_v46 }
 0x3ef   :  { %15073 = vmatmul.mubr.msk.bf16.gmra.mrb[32].mxu0 %vm46_vm0, %v4621_v40  ;;  %v15686_v40 = vld [vmem:[%s21515_s5 + $0x90] sm:$0xff]  }
 0x3f0   :  { %15076 = vmatprep.mubr.msk.bf16.mxu0 %vm46_vm0, %v19076_v50 }
 0x3f7   :  { %15077 = vmatmul.mubr.msk.bf16.gmra.mrb[36].mxu0 %vm46_vm0, %v19080_v26 }
 0x3f8   :  { %15080 = vmatprep.mubr.msk.bf16.mxu0 %vm46_vm0, %v19084_v45 }
 0x3ff   :  { %15081 = vmatmul.mubr.msk.bf16.gmra.mrb[40].mxu0 %vm46_vm0, %v19088_v14 }
 0x400   :  { %15084 = vmatprep.mubr.msk.bf16.mxu0 %vm46_vm0, %v19092_v10 }
 0x407   :  { %15085 = vmatmul.mubr.msk.bf16.gmra.mrb[44].mxu0 %vm46_vm0, %v19099_v42 }
 0x408   :  { %15088 = vmatprep.mubr.msk.bf16.mxu0 %vm46_vm0, %v19103_v44 }
 0x40f   :  { %15089 = vmatmul.mubr.msk.bf16.gmra.mrb[48].mxu0 %vm46_vm0, %v19107_v11 }
 0x410   :  { %15092 = vmatprep.mubr.msk.bf16.mxu0 %vm46_vm0, %v19111_v2 }
 0x417   :  { %15093 = vmatmul.mubr.msk.bf16.gmra.mrb[52].mxu0 %vm46_vm0, %v19115_v25 }
 0x418   :  { %15096 = vmatprep.mubr.msk.bf16.mxu0 %vm46_vm0, %v19119_v48 }
 0x41f   :  { %15097 = vmatmul.mubr.msk.bf16.gmra.mrb[56].mxu0 %vm46_vm0, %v19123_v18 }
 0x420   :  { %15100 = vmatprep.mubr.msk.bf16.mxu0 %vm46_vm0, %v19127_v53 }
 0x427   :  { %15101 = vmatmul.mubr.msk.bf16.gmra.mrb[60].mxu0 %vm46_vm0, %v19131_v19 }
 0x428   :  { %15104 = vmatprep.mubr.msk.bf16.mxu0 %vm46_vm0, %v4636_v15 }
 0x42f   :  { %15105 = vmatmul.mubr.msk.bf16.gmra.mrb[64].mxu0 %vm46_vm0, %v18741_v39  ;;  %v4652_v39 = vld [vmem:[#allocation3 + $0x1b0] sm:$0xff] }
 0x430   :  { %15108 = vmatprep.mubr.msk.bf16.mxu0 %vm46_vm0, %v18759_v58  ;;  %v6318_v58 = vld [vmem:[#allocation3 + $0x80] sm:$0xff] }
 0x437   :  { %15109 = vmatmul.mubr.msk.bf16.gmra.mrb[68].mxu0 %vm46_vm0, %v18768_v17  ;;  %v6319_v17 = vld [vmem:[#allocation3 + $0x88] sm:$0xff] }
 0x438   :  { %15112 = vmatprep.mubr.msk.bf16.mxu0 %vm46_vm0, %v18776_v32  ;;  %v6334_v32 = vld [vmem:[#allocation3 + $0x110] sm:$0xff] }
 0x43f   :  { %15113 = vmatmul.mubr.msk.bf16.gmra.mrb[72].mxu0 %vm46_vm0, %v18784_v21  ;;  %v6335_v21 = vld [vmem:[#allocation3 + $0x118] sm:$0xff] }
 0x440   :  { %15116 = vmatprep.mubr.msk.bf16.mxu0 %vm46_vm0, %v18792_v1  ;;  %v6336_v1 = vld [vmem:[#allocation3 + $0x130] sm:$0xff] }
 0x447   :  { %15117 = vmatmul.mubr.msk.bf16.gmra.mrb[76].mxu0 %vm46_vm0, %v18800_v29  ;;  %v6337_v29 = vld [vmem:[#allocation3 + $0x138] sm:$0xff] }
 0x448   :  { %15120 = vmatprep.mubr.msk.bf16.mxu0 %vm46_vm0, %v18808_v12  ;;  %v6338_v12 = vld [vmem:[#allocation3 + $0x140] sm:$0xff] }
 0x44f   :  { %15121 = vmatmul.mubr.msk.bf16.gmra.mrb[80].mxu0 %vm46_vm0, %v18816_v56  ;;  %v6339_v56 = vld [vmem:[#allocation3 + $0x148] sm:$0xff] }
 0x450   :  { %15124 = vmatprep.mubr.msk.bf16.mxu0 %vm46_vm0, %v18824_v52  ;;  %v6340_v52 = vld [vmem:[#allocation3 + $0x150] sm:$0xff] }
 0x457   :  { %15125 = vmatmul.mubr.msk.bf16.gmra.mrb[84].mxu0 %vm46_vm0, %v18832_v41 }
 0x458   :  { %15128 = vmatprep.mubr.msk.bf16.mxu0 %vm46_vm0, %v18840_v20 }
 0x45f   :  { %15129 = vmatmul.mubr.msk.bf16.gmra.mrb[88].mxu0 %vm46_vm0, %v18848_v57 }
 0x460   :  { %15132 = vmatprep.mubr.msk.bf16.mxu0 %vm46_vm0, %v18856_v9 }
 0x467   :  { %15133 = vmatmul.mubr.msk.bf16.gmra.mrb[92].mxu0 %vm46_vm0, %v18864_v22 }
 0x468   :  { %15136 = vmatprep.mubr.msk.bf16.mxu0 %vm46_vm0, %v4652_v39 }
 0x46f   :  { %15137 = vmatmul.mubr.msk.bf16.gmra.mrb[96].mxu0 %vm46_vm0, %v18880_v38  ;;  %v6341_v38 = vld [vmem:[#allocation3 + $0x158] sm:$0xff] }
 0x470   :  { %15140 = vmatprep.mubr.msk.bf16.mxu0 %vm46_vm0, %v18888_v6 }
 0x477   :  { %15141 = vmatmul.mubr.msk.bf16.gmra.mrb[100].mxu0 %vm46_vm0, %v18896_v43 }
 0x478   :  { %15144 = vmatprep.mubr.msk.bf16.mxu0 %vm46_vm0, %v18904_v16 }
 0x47f   :  { %15145 = vmatmul.mubr.msk.bf16.gmra.mrb[104].mxu0 %vm46_vm0, %v18912_v59 }
 0x480   :  { %15148 = vmatprep.mubr.msk.bf16.mxu0 %vm46_vm0, %v18920_v3 }
 0x487   :  { %15149 = vmatmul.mubr.msk.bf16.gmra.mrb[108].mxu0 %vm46_vm0, %v18928_v5 }
 0x488   :  { %15152 = vmatprep.mubr.msk.bf16.mxu0 %vm46_vm0, %v18936_v49 }
 0x48f   :  { %15153 = vmatmul.mubr.msk.bf16.gmra.mrb[112].mxu0 %vm46_vm0, %v18944_v35 }
 0x490   :  { %15156 = vmatprep.mubr.msk.bf16.mxu0 %vm46_vm0, %v18952_v8 }
 0x497   :  { %15157 = vmatmul.mubr.msk.bf16.gmra.mrb[116].mxu0 %vm46_vm0, %v18960_v28 }
 0x498   :  { %15160 = vmatprep.mubr.msk.bf16.mxu0 %vm46_vm0, %v18968_v47 }
 0x49f   :  { %15161 = vmatmul.mubr.msk.bf16.gmra.mrb[120].mxu0 %vm46_vm0, %v18976_v63 }
 0x4a0   :  { %15164 = vmatprep.mubr.msk.bf16.mxu0 %vm46_vm0, %v18984_v36 }
 0x4a7   :  { %15165 = vmatmul.mubr.msk.bf16.gmra.mrb[124].mxu0 %vm46_vm0, %v18989_v55 }
 0x4a8   :  { %15180 = vmatprep.mubr.msk.bf16.mxu0 %vm46_vm0, %v19008_v51  ;;  %v6342_v51 = vld [vmem:[#allocation3 + $0x160] sm:$0xff] }
 0x4af   :  { %15181 = vmatmul.mubr.msk.bf16.vlgmr.msra.gmra.mrb[0].mxu0 %vm46_vm0, %v19019_v13  ;;  %v6343_v13 = vld [vmem:[#allocation3 + $0x168] sm:$0xff] }
 0x4b0   :  { %15184 = vmatprep.mubr.msk.bf16.mxu0 %vm46_vm0, %v19023_v30  ;;  %v6344_v30 = vld [vmem:[#allocation3 + $0x170] sm:$0xff] }
 0x4b7   :  { %15185 = vmatmul.mubr.msk.bf16.gmra.mrb[4].mxu0 %vm46_vm0, %v19027_v37  ;;  %v6351_v37 = vld [vmem:[#allocation3 + $0x1a8] sm:$0xff] }
 0x4b8   :  { %15188 = vmatprep.mubr.msk.bf16.mxu0 %vm46_vm0, %v19031_v33 }
 0x4bf   :  { %15189 = vmatmul.mubr.msk.bf16.gmra.mrb[8].mxu0 %vm46_vm0, %v19035_v61 }
 0x4c0   :  { %15192 = vmatprep.mubr.msk.bf16.mxu0 %vm46_vm0, %v19039_v23  ;;  %v15685_v23 = vld [vmem:[%s21515_s5 + $0x88] sm:$0xff]  }
 0x4c7   :  { %15193 = vmatmul.mubr.msk.bf16.gmra.mrb[12].mxu0 %vm46_vm0, %v19043_v34 }
 0x4c8   :  { %15196 = vmatprep.mubr.msk.bf16.mxu0 %vm46_vm0, %v19047_v24 }
 0x4cf   :  { %15197 = vmatmul.mubr.msk.bf16.gmra.mrb[16].mxu0 %vm46_vm0, %v19051_v27 }
 0x4d0   :  { %15200 = vmatprep.mubr.msk.bf16.mxu0 %vm46_vm0, %v19055_v60 }
 0x4d7   :  { %15201 = vmatmul.mubr.msk.bf16.gmra.mrb[20].mxu0 %vm46_vm0, %v19062_v0 }
 0x4d8   :  { %15204 = vmatprep.mubr.msk.bf16.mxu0 %vm46_vm0, %v19066_v7 }
 0x4df   :  { %15205 = vmatmul.mubr.msk.bf16.gmra.mrb[24].mxu0 %vm46_vm0, %v19070_v4 }
 0x4e0   :  { %15208 = vmatprep.mubr.msk.bf16.mxu0 %vm46_vm0, %v6318_v58  ;;  %v15688_v58 = vld [vmem:[%s21515_s5 + $0xa0] sm:$0xff]  }
 0x4e7   :  { %15209 = vmatmul.mubr.msk.bf16.gmra.mrb[28].mxu0 %vm46_vm0, %v6319_v17 }
 0x4e8   :  { %15212 = vmatprep.mubr.msk.bf16.mxu0 %vm46_vm0, %v19076_v50 }
 0x4ef   :  { %15213 = vmatmul.mubr.msk.bf16.gmra.mrb[32].mxu0 %vm46_vm0, %v19080_v26 }
 0x4f0   :  { %15216 = vmatprep.mubr.msk.bf16.mxu0 %vm46_vm0, %v19084_v45 }
 0x4f7   :  { %15217 = vmatmul.mubr.msk.bf16.gmra.mrb[36].mxu0 %vm46_vm0, %v19088_v14 }
 0x4f8   :  { %15220 = vmatprep.mubr.msk.bf16.mxu0 %vm46_vm0, %v19092_v10 }
 0x4ff   :  { %15221 = vmatmul.mubr.msk.bf16.gmra.mrb[40].mxu0 %vm46_vm0, %v19099_v42 }
 0x500   :  { %15224 = vmatprep.mubr.msk.bf16.mxu0 %vm46_vm0, %v19103_v44 }
 0x507   :  { %15225 = vmatmul.mubr.msk.bf16.gmra.mrb[44].mxu0 %vm46_vm0, %v19107_v11  ;;  %v15687_v11 = vld [vmem:[%s21515_s5 + $0x98] sm:$0xff]  }
 0x508   :  { %15228 = vmatprep.mubr.msk.bf16.mxu0 %vm46_vm0, %v19111_v2 }
 0x50f   :  { %15229 = vmatmul.mubr.msk.bf16.gmra.mrb[48].mxu0 %vm46_vm0, %v19115_v25 }
 0x510   :  { %15232 = vmatprep.mubr.msk.bf16.mxu0 %vm46_vm0, %v19119_v48 }
 0x517   :  { %15233 = vmatmul.mubr.msk.bf16.gmra.mrb[52].mxu0 %vm46_vm0, %v19123_v18 }
 0x518   :  { %15236 = vmatprep.mubr.msk.bf16.mxu0 %vm46_vm0, %v19127_v53 }
 0x51f   :  { %15237 = vmatmul.mubr.msk.bf16.gmra.mrb[56].mxu0 %vm46_vm0, %v19131_v19 }
 0x520   :  { %15240 = vmatprep.mubr.msk.bf16.mxu0 %vm46_vm0, %v6334_v32 }
 0x527   :  { %15241 = vmatmul.mubr.msk.bf16.gmra.mrb[60].mxu0 %vm46_vm0, %v6335_v21 }
 0x528   :  { %15244 = vmatprep.mubr.msk.bf16.mxu0 %vm46_vm0, %v6336_v1 }
 0x52f   :  { %15245 = vmatmul.mubr.msk.bf16.gmra.mrb[64].mxu0 %vm46_vm0, %v6337_v29 }
 0x530   :  { %15248 = vmatprep.mubr.msk.bf16.mxu0 %vm46_vm0, %v6338_v12 }
 0x537   :  { %15249 = vmatmul.mubr.msk.bf16.gmra.mrb[68].mxu0 %vm46_vm0, %v6339_v56 }
 0x538   :  { %15252 = vmatprep.mubr.msk.bf16.mxu0 %vm46_vm0, %v6340_v52 }
 0x53f   :  { %15253 = vmatmul.mubr.msk.bf16.gmra.mrb[72].mxu0 %vm46_vm0, %v6341_v38 }
 0x540   :  { %15256 = vmatprep.mubr.msk.bf16.mxu0 %vm46_vm0, %v6342_v51 }
 0x547   :  { %15257 = vmatmul.mubr.msk.bf16.gmra.mrb[76].mxu0 %vm46_vm0, %v6343_v13 }
 0x548   :  { %15260 = vmatprep.mubr.msk.bf16.mxu0 %vm46_vm0, %v6344_v30  ;;  %v15689_v30 = vld [vmem:[%s21515_s5 + $0xa8] sm:$0xff]  }
 0x54f   :  { %15261 = vmatmul.mubr.msk.bf16.gmra.mrb[80].mxu0 %vm46_vm0, %v18832_v41  ;;  %v15680_v41 = vld [vmem:[%s21515_s5 + $0x60] sm:$0xff]  }
 0x550   :  { %15264 = vmatprep.mubr.msk.bf16.mxu0 %vm46_vm0, %v18840_v20  ;;  %9209 = vmatpush1.bf16.msra.mxu1 %v15680_v41  ;;  %v21548_v20 = vmov 0  }
 0x551   :  { %9210 = vmatprep.subr.bf16.mxu1 %v21548_v20 }
 0x557   :  { %15265 = vmatmul.mubr.msk.bf16.gmra.mrb[84].mxu0 %vm46_vm0, %v18848_v57  ;;  %v15681_v57 = vld [vmem:[%s21515_s5 + $0x68] sm:$0xff]  }
 0x558   :  { %15268 = vmatprep.mubr.msk.bf16.mxu0 %vm46_vm0, %v18856_v9  ;;  %9211 = vmatpush1.bf16.msra.mxu1 %v15681_v57  ;;  %v15682_v9 = vld [vmem:[%s21515_s5 + $0x70] sm:$0xff]  }
 0x559   :  { %9212 = vmatprep.subr.bf16.mxu1 %v21548_v20 }
 0x55c   :  { %9213 = vmatpush1.bf16.msra.mxu1 %v15682_v9 }
 0x55d   :  { %9214 = vmatprep.subr.bf16.mxu1 %v21548_v20 }
 0x55f   :  { %15269 = vmatmul.mubr.msk.bf16.gmra.mrb[88].mxu0 %vm46_vm0, %v18864_v22  ;;  %v15683_v22 = vld [vmem:[%s21515_s5 + $0x78] sm:$0xff]  }
 0x560   :  { %15272 = vmatprep.mubr.msk.bf16.mxu0 %vm46_vm0, %v18872_v62  ;;  %9215 = vmatpush1.bf16.msra.mxu1 %v15683_v22  ;;  %v19311_v62 = vld [vmem:[%s21514_s4] ss:$0 sm:$0xff] }
 0x561   :  { %9216 = vmatprep.subr.bf16.mxu1 %v21548_v20 }
 0x567   :  { %15273 = vmatmul.mubr.msk.bf16.gmra.mrb[92].mxu0 %vm46_vm0, %v6351_v37 }
 0x568   :  { %15276 = vmatprep.mubr.msk.bf16.mxu0 %vm46_vm0, %v18888_v6  ;;  %v15684_v6 = vld [vmem:[%s21515_s5 + $0x80] sm:$0xff]  }
 0x569   :  { %9217 = vmatpush1.bf16.msra.mxu1 %v15684_v6 }
 0x56a   :  { %9218 = vmatprep.subr.bf16.mxu1 %v21548_v20 }
 0x56d   :  { %9219 = vmatpush1.bf16.msra.mxu1 %v15685_v23 }
 0x56e   :  { %9220 = vmatprep.subr.bf16.mxu1 %v21548_v20 }
 0x56f   :  { %15277 = vmatmul.mubr.msk.bf16.gmra.mrb[96].mxu0 %vm46_vm0, %v18896_v43 }
 0x570   :  { %15280 = vmatprep.mubr.msk.bf16.mxu0 %vm46_vm0, %v18904_v16 }
 0x571   :  { %9221 = vmatpush1.bf16.msra.mxu1 %v15686_v40 }
 0x572   :  { %9222 = vmatprep.subr.bf16.mxu1 %v21548_v20 }
 0x575   :  { %9223 = vmatpush1.bf16.msra.mxu1 %v15687_v11 }
 0x576   :  { %9224 = vmatprep.subr.bf16.mxu1 %v21548_v20 }
 0x577   :  { %15281 = vmatmul.mubr.msk.bf16.gmra.mrb[100].mxu0 %vm46_vm0, %v18912_v59 }
 0x578   :  { %15284 = vmatprep.mubr.msk.bf16.mxu0 %vm46_vm0, %v18920_v3 }
 0x579   :  { %9225 = vmatpush1.bf16.msra.mxu1 %v15688_v58 }
 0x57a   :  { %9226 = vmatprep.subr.bf16.mxu1 %v21548_v20 }
 0x57d   :  { %9227 = vmatpush1.bf16.msra.mxu1 %v15689_v30 }
 0x57e   :  { %9228 = vmatprep.subr.bf16.mxu1 %v21548_v20 }
 0x57f   :  { %15285 = vmatmul.mubr.msk.bf16.gmra.mrb[104].mxu0 %vm46_vm0, %v18928_v5 }
 0x580   :  { %15288 = vmatprep.mubr.msk.bf16.mxu0 %vm46_vm0, %v18936_v49 }
 0x582   :  { %v15182_v43 = vpop.f32.mrb[0].mxu0 }
 0x583   :  { %v7291_v16 = vadd.f32 %v15182_v43, %v19311_v62  ;;  %v6643_v59 = vpop.f32.mrb[1].mxu0 }
 0x584   :  { %v7289_v3 = vadd.f32 %v19311_v62, %v6643_v59  ;;  %v15183_v5 = vpop.f32.mrb[2].mxu0 }
 0x585   :  { %v7419_v49 = vmax.f32 %v7291_v16, 0.0  ;;  %v7292_v33 = vadd.f32 %v15183_v5, %v19311_v62  ;;  %v6646_v61 = vpop.f32.mrb[3].mxu0 }
 0x586   :  { %v7417_v34 = vmax.f32 %v7289_v3, 0.0  ;;  %v7290_v24 = vadd.f32 %v19311_v62, %v6646_v61 }
 0x587   :  { %v7547_v27 = vsel %vm7545_vm7, %v7419_v49, -inf  ;;  %v7420_v60 = vmax.f32 %v7292_v33, 0.0  ;;  %15289 = vmatmul.mubr.msk.bf16.gmra.mrb[108].mxu0 %vm46_vm0, %v18944_v35 }
 0x588   :  { %v7546_v0 = vsel %vm7545_vm7, %v7417_v34, -inf  ;;  %v7418_v7 = vmax.f32 %v7290_v24, 0.0  ;;  %15292 = vmatprep.mubr.msk.bf16.mxu0 %vm46_vm0, %v18952_v8 }
 0x589   :  { %v7548_v46 = vmax.f32 %v7546_v0, %v7547_v27  ;;  %v7550_v4 = vsel %vm7545_vm7, %v7420_v60, -inf  ;;  %v8348_v27 = vld [vmem:[#allocation5 + $0x8] sm:$0xf] }
 0x58a   :  { %v7549_v50 = vsel %vm7545_vm7, %v7418_v7, -inf  ;;  %v15186_v26 = vpop.f32.mrb[4].mxu0 }
 0x58b   :  { %7738 = vst.msk [vmem:[#allocation4] sm:$0xff] %vm7545_vm7, %v7548_v46  ;;  %v7551_v35 = vmax.f32 %v7549_v50, %v7550_v4  ;;  %v7295_v45 = vadd.f32 %v15186_v26, %v19311_v62  ;;  %v6659_v14 = vpop.f32.mrb[5].mxu0 }
 0x58c   :  { %v7293_v8 = vadd.f32 %v19311_v62, %v6659_v14  ;;  %v15187_v10 = vpop.f32.mrb[6].mxu0 }
 0x58d   :  { %7739 = vst.msk [vmem:[#allocation4 + $0x8] sm:$0xff] %vm7545_vm7, %v7551_v35  ;;  %v7423_v31 = vmax.f32 %v7295_v45, 0.0  ;;  %v7296_v42 = vadd.f32 %v15187_v10, %v19311_v62  ;;  %v6662_v44 = vpop.f32.mrb[7].mxu0 }
 0x58e   :  { %v7421_v2 = vmax.f32 %v7293_v8, 0.0  ;;  %v7294_v25 = vadd.f32 %v19311_v62, %v6662_v44  ;;  %v15691_v8 = vld [vmem:[%s21515_s5 + $0xb8] sm:$0xff]  }
 0x58f   :  { %v7553_v48 = vsel %vm7545_vm7, %v7423_v31, -inf  ;;  %v7424_v18 = vmax.f32 %v7296_v42, 0.0  ;;  %15293 = vmatmul.mubr.msk.bf16.gmra.mrb[112].mxu0 %vm46_vm0, %v18960_v28  ;;  %v8735_v31 = vld [vmem:[#allocation5 + $0xc] sm:$0xf] }
 0x590   :  { %v7552_v53 = vsel %vm7545_vm7, %v7421_v2, -inf  ;;  %v7422_v15 = vmax.f32 %v7294_v25, 0.0  ;;  %15296 = vmatprep.mubr.msk.bf16.mxu0 %vm46_vm0, %v18968_v47 }
 0x591   :  { %v7554_v19 = vmax.f32 %v7552_v53, %v7553_v48  ;;  %v7556_v39 = vsel %vm7545_vm7, %v7424_v18, -inf }
 0x592   :  { %v7555_v17 = vsel %vm7545_vm7, %v7422_v15, -inf  ;;  %v15190_v32 = vpop.f32.mrb[8].mxu0 }
 0x593   :  { %7740 = vst.msk [vmem:[#allocation4 + $0x10] sm:$0xff] %vm7545_vm7, %v7554_v19  ;;  %v7557_v28 = vmax.f32 %v7555_v17, %v7556_v39  ;;  %v7299_v21 = vadd.f32 %v15190_v32, %v19311_v62  ;;  %v6675_v1 = vpop.f32.mrb[9].mxu0 }
 0x594   :  { %v7297_v47 = vadd.f32 %v19311_v62, %v6675_v1  ;;  %v15191_v29 = vpop.f32.mrb[10].mxu0  ;;  %v7802_v12 = vld [vmem:[#allocation4] ss:$2 sm:$0xff]  ;;  %v7866_v56 = vld [vmem:[#allocation4 + $0x1] ss:$2 sm:$0xff] }
 0x595   :  { %7741 = vst.msk [vmem:[#allocation4 + $0x18] sm:$0xff] %vm7545_vm7, %v7557_v28  ;;  %v7427_v52 = vmax.f32 %v7299_v21, 0.0  ;;  %v7300_v38 = vadd.f32 %v15191_v29, %v19311_v62  ;;  %v6678_v51 = vpop.f32.mrb[11].mxu0  ;;  %v7929_v13 = vmax.f32 %v7802_v12, %v7866_v56  ;;  %v6367_v56 = vld [vmem:[#allocation3 + $0x238] sm:$0xff] }
 0x596   :  { %v7425_v37 = vmax.f32 %v7297_v47, 0.0  ;;  %v7298_v41 = vadd.f32 %v19311_v62, %v6678_v51 }
 0x597   :  { %v7559_v57 = vsel %vm7545_vm7, %v7427_v52, -inf  ;;  %v7428_v9 = vmax.f32 %v7300_v38, 0.0  ;;  %15297 = vmatmul.mubr.msk.bf16.gmra.mrb[116].mxu0 %vm46_vm0, %v18976_v63  ;;  %v14399_v22 = vpack.c.bf16 %v7929_v13, %v7929_v13  ;;  %v15690_v63 = vld [vmem:[%s21515_s5 + $0xb0] sm:$0xff]  }
 0x598   :  { %v7558_v6 = vsel %vm7545_vm7, %v7425_v37, -inf  ;;  %v7426_v43 = vmax.f32 %v7298_v41, 0.0  ;;  %15300 = vmatprep.mubr.msk.bf16.mxu0 %vm46_vm0, %v18984_v36  ;;  %9229 = vmatpush1.bf16.msra.mxu1 %v15690_v63  ;;  %v8351_v52 = vld [vmem:[#allocation5 + $0x10] sm:$0xf] }
 0x599   :  { %v7560_v16 = vmax.f32 %v7558_v6, %v7559_v57  ;;  %v7562_v59 = vsel %vm7545_vm7, %v7428_v9, -inf  ;;  %8444 = vrot.lane.b32.xlu0 %v14399_v22, %s16233_s22  ;;  %v8090_v3 = vshrl.u32 %v14399_v22, 16  ;;  %v8093_v5 = vshll.u32 %v14399_v22, 16  ;;  %9230 = vmatprep.subr.bf16.mxu1 %v21548_v20 }
 0x59a   :  { %v7561_v49 = vsel %vm7545_vm7, %v7426_v43, -inf  ;;  %v15194_v33 = vpop.f32.mrb[12].mxu0 }
 0x59b   :  { %7742 = vst.msk [vmem:[#allocation4 + $0x20] sm:$0xff] %vm7545_vm7, %v7560_v16  ;;  %v7563_v36 = vmax.f32 %v7561_v49, %v7562_v59  ;;  %v8092_v61 = vrot.slane %v8090_v3, 7  ;;  %v8573_v23 = vrot.slane %v8090_v3, 4  ;;  %v8574_v34 = vrot.slane %v8093_v5, 5  ;;  %v6691_v24 = vpop.f32.mrb[13].mxu0 }
 0x59c   :  { %v7303_v60 = vadd.f32 %v15194_v33, %v19311_v62  ;;  %v7301_v0 = vadd.f32 %v19311_v62, %v6691_v24  ;;  %v15195_v7 = vpop.f32.mrb[14].mxu0  ;;  %v7804_v46 = vld [vmem:[#allocation4 + $0x10] ss:$2 sm:$0xff]  ;;  %v7868_v4 = vld [vmem:[#allocation4 + $0x11] ss:$2 sm:$0xff]  ;;  %9231 = vmatpush1.bf16.msra.mxu1 %v15691_v8 }
 0x59d   :  { %7743 = vst.msk [vmem:[#allocation4 + $0x28] sm:$0xff] %vm7545_vm7, %v7563_v36  ;;  %v8575_v50 = vor.u32 %v8574_v34, %v8573_v23  ;;  %v7304_v26 = vadd.f32 %v15195_v7, %v19311_v62  ;;  %v6694_v35 = vpop.f32.mrb[15].mxu0  ;;  %v7930_v45 = vmax.f32 %v7804_v46, %v7868_v4  ;;  %v8095_v14 = vor.u32 %v8093_v5, %v8092_v61  ;;  %v8738_v3 = vld [vmem:[#allocation5 + $0x14] sm:$0xf] }
 0x59e   :  { %v7431_v42 = vmax.f32 %v7303_v60, 0.0  ;;  %v7429_v44 = vmax.f32 %v7301_v0, 0.0  ;;  %v7302_v11 = vadd.f32 %v19311_v62, %v6694_v35  ;;  %9633 = vmatprep.subr.bf16.mxu1 %v21548_v20 }
 0x59f   :  { %v8576_v2 = vrot.slane %v8575_v50, 4  ;;  %v7432_v25 = vmax.f32 %v7304_v26, 0.0  ;;  %15301 = vmatmul.mubr.msk.bf16.gmra.mrb[120].mxu0 %vm46_vm0, %v18989_v55  ;;  %v14400_v48 = vpack.c.bf16 %v7930_v45, %v7930_v45  ;;  %v8349_v18 = vsel %vm19387_vm10, %v8095_v14, %v8348_v27  ;;  %v8354_v14 = vld [vmem:[#allocation5 + $0x18] sm:$0xf] }
 0x5a0   :  { %v7565_v53 = vsel %vm7545_vm7, %v7431_v42, -inf  ;;  %v7564_v15 = vsel %vm7545_vm7, %v7429_v44, -inf  ;;  %v7430_v19 = vmax.f32 %v7302_v11, 0.0  ;;  %15304 = vmatprep.mubr.msk.bf16.mxu0 %vm46_vm0, %v18998_v54  ;;  %8350 = vst [vmem:[#allocation5 + $0x8] sm:$0xf] %v8349_v18 }
 0x5a1   :  { %v8736_v39 = vsel %vm19399_vm11, %v8576_v2, %v8735_v31  ;;  %v7566_v55 = vmax.f32 %v7564_v15, %v7565_v53  ;;  %v7568_v58 = vsel %vm7545_vm7, %v7432_v25, -inf  ;;  %8446 = vrot.lane.b32.xlu1 %v14400_v48, %s16233_s22  ;;  %v8097_v17 = vshrl.u32 %v14400_v48, 16  ;;  %v8741_v15 = vld [vmem:[#allocation5 + $0x1c] sm:$0xf] }
 0x5a2   :  { %8737 = vst [vmem:[#allocation5 + $0xc] sm:$0xf] %v8736_v39  ;;  %v7567_v32 = vsel %vm7545_vm7, %v7430_v19, -inf  ;;  %v8100_v28 = vshll.u32 %v14400_v48, 16  ;;  %v15198_v21 = vpop.f32.mrb[16].mxu0 }
 0x5a3   :  { %7744 = vst.msk [vmem:[#allocation4 + $0x30] sm:$0xff] %vm7545_vm7, %v7566_v55  ;;  %v7569_v54 = vmax.f32 %v7567_v32, %v7568_v58  ;;  %v8099_v1 = vrot.slane %v8097_v17, 7  ;;  %v8577_v47 = vrot.slane %v8097_v17, 4  ;;  %v7307_v29 = vadd.f32 %v15198_v21, %v19311_v62  ;;  %v6707_v12 = vpop.f32.mrb[17].mxu0 }
 0x5a4   :  { %v8578_v38 = vrot.slane %v8100_v28, 5  ;;  %v7305_v51 = vadd.f32 %v19311_v62, %v6707_v12  ;;  %v15199_v13 = vpop.f32.mrb[18].mxu0  ;;  %v7806_v30 = vld [vmem:[#allocation4 + $0x20] ss:$2 sm:$0xff]  ;;  %v7870_v37 = vld [vmem:[#allocation4 + $0x21] ss:$2 sm:$0xff] }
 0x5a5   :  { %7745 = vst.msk [vmem:[#allocation4 + $0x38] sm:$0xff] %vm7545_vm7, %v7569_v54  ;;  %v7435_v41 = vmax.f32 %v7307_v29, 0.0  ;;  %v7308_v57 = vadd.f32 %v15199_v13, %v19311_v62  ;;  %v6710_v9 = vpop.f32.mrb[19].mxu0  ;;  %v7931_v22 = vmax.f32 %v7806_v30, %v7870_v37  ;;  %v8102_v6 = vor.u32 %v8100_v28, %v8099_v1 }
 0x5a6   :  { %v8579_v43 = vor.u32 %v8578_v38, %v8577_v47  ;;  %v7433_v16 = vmax.f32 %v7305_v51, 0.0  ;;  %v7306_v59 = vadd.f32 %v19311_v62, %v6710_v9  ;;  %v8357_v9 = vld [vmem:[#allocation5 + $0x20] sm:$0xf] }
 0x5a7   :  { %v7571_v5 = vsel %vm7545_vm7, %v7435_v41, -inf  ;;  %v7436_v63 = vmax.f32 %v7308_v57, 0.0  ;;  %15305 = vmatmul.mubr.msk.bf16.gmra.mrb[124].mxu0 %vm46_vm0, %v6367_v56  ;;  %v14401_v49 = vpack.c.bf16 %v7931_v22, %v7931_v22  ;;  %v8352_v33 = vsel %vm19387_vm10, %v8102_v6, %v8351_v52 }
 0x5a8   :  { %v8580_v36 = vrot.slane %v8579_v43, 4  ;;  %v7570_v61 = vsel %vm7545_vm7, %v7433_v16, -inf  ;;  %v7434_v23 = vmax.f32 %v7306_v59, 0.0  ;;  %8353 = vst [vmem:[#allocation5 + $0x10] sm:$0xf] %v8352_v33  ;;  %vm8540_vm0 = vcmask 1043968  }
 0x5a9   :  { %v7572_v34 = vmax.f32 %v7570_v61, %v7571_v5  ;;  %v7574_v24 = vsel %vm7545_vm7, %v7436_v63, -inf  ;;  %8448 = vrot.lane.b32.xlu0 %v14401_v49, %s16233_s22  ;;  %v8104_v27 = vshrl.u32 %v14401_v49, 16  ;;  %v8107_v60 = vshll.u32 %v14401_v49, 16 }
 0x5aa   :  { %v8739_v0 = vsel %vm19399_vm11, %v8580_v36, %v8738_v3  ;;  %v7573_v7 = vsel %vm7545_vm7, %v7434_v23, -inf  ;;  %v15202_v46 = vpop.f32.mrb[20].mxu0 }
 0x5ab   :  { %8740 = vst [vmem:[#allocation5 + $0x14] sm:$0xf] %v8739_v0  ;;  %7746 = vst.msk [vmem:[#allocation4 + $0x40] sm:$0xff] %vm7545_vm7, %v7572_v34  ;;  %v7575_v4 = vmax.f32 %v7573_v7, %v7574_v24  ;;  %v8106_v50 = vrot.slane %v8104_v27, 7  ;;  %v8581_v26 = vrot.slane %v8104_v27, 4  ;;  %v8582_v35 = vrot.slane %v8107_v60, 5 }
 0x5ac   :  { %v6723_v45 = vpop.f32.mrb[21].mxu0  ;;  %v7311_v8 = vadd.f32 %v15202_v46, %v19311_v62  ;;  %v7808_v44 = vld [vmem:[#allocation4 + $0x30] ss:$2 sm:$0xff]  ;;  %v7872_v11 = vld [vmem:[#allocation4 + $0x31] ss:$2 sm:$0xff] }
 0x5ad   :  { %v7309_v31 = vadd.f32 %v19311_v62, %v6723_v45  ;;  %v15203_v42 = vpop.f32.mrb[22].mxu0  ;;  %7747 = vst.msk [vmem:[#allocation4 + $0x48] sm:$0xff] %vm7545_vm7, %v7575_v4  ;;  %v8583_v2 = vor.u32 %v8582_v35, %v8581_v26  ;;  %v7932_v18 = vmax.f32 %v7808_v44, %v7872_v11  ;;  %v8109_v53 = vor.u32 %v8107_v60, %v8106_v50  ;;  %v8744_v34 = vld [vmem:[#allocation5 + $0x24] sm:$0xf] }
 0x5ae   :  { %v7312_v25 = vadd.f32 %v15203_v42, %v19311_v62  ;;  %v6726_v48 = vpop.f32.mrb[23].mxu0  ;;  %v7439_v19 = vmax.f32 %v7311_v8, 0.0 }
 0x5af   :  { %v7437_v39 = vmax.f32 %v7309_v31, 0.0  ;;  %v7310_v55 = vadd.f32 %v19311_v62, %v6726_v48  ;;  %v8584_v58 = vrot.slane %v8583_v2, 4  ;;  %v14402_v32 = vpack.c.bf16 %v7932_v18, %v7932_v18  ;;  %v8360_v48 = vld [vmem:[#allocation5 + $0x28] sm:$0xf] }
 0x5b0   :  { %v7440_v17 = vmax.f32 %v7312_v25, 0.0  ;;  %v8355_v28 = vsel %vm19387_vm10, %v8109_v53, %v8354_v14  ;;  %v7577_v21 = vsel %vm7545_vm7, %v7439_v19, -inf }
 0x5b1   :  { %v7576_v54 = vsel %vm7545_vm7, %v7437_v39, -inf  ;;  %v7438_v1 = vmax.f32 %v7310_v55, 0.0  ;;  %8356 = vst [vmem:[#allocation5 + $0x18] sm:$0xf] %v8355_v28  ;;  %v8742_v47 = vsel %vm19399_vm11, %v8584_v58, %v8741_v15  ;;  %8450 = vrot.lane.b32.xlu1 %v14402_v32, %s16233_s22  ;;  %v8111_v56 = vshrl.u32 %v14402_v32, 16 }
 0x5b2   :  { %v7578_v29 = vmax.f32 %v7576_v54, %v7577_v21  ;;  %v7580_v12 = vsel %vm7545_vm7, %v7440_v17, -inf  ;;  %8743 = vst [vmem:[#allocation5 + $0x1c] sm:$0xf] %v8742_v47  ;;  %v8114_v38 = vshll.u32 %v14402_v32, 16  ;;  %v15206_v51 = vpop.f32.mrb[24].mxu0 }
 0x5b3   :  { %v7579_v52 = vsel %vm7545_vm7, %v7438_v1, -inf  ;;  %v8113_v30 = vrot.slane %v8111_v56, 7  ;;  %v8585_v37 = vrot.slane %v8111_v56, 4  ;;  %v7315_v41 = vadd.f32 %v15206_v51, %v19311_v62  ;;  %v6739_v57 = vpop.f32.mrb[25].mxu0  ;;  %v8747_v21 = vld [vmem:[#allocation5 + $0x2c] sm:$0xf] }
 0x5b4   :  { %7748 = vst.msk [vmem:[#allocation4 + $0x50] sm:$0xff] %vm7545_vm7, %v7578_v29  ;;  %v7581_v13 = vmax.f32 %v7579_v52, %v7580_v12  ;;  %v8586_v22 = vrot.slane %v8114_v38, 5  ;;  %v7313_v6 = vadd.f32 %v19311_v62, %v6739_v57  ;;  %v15207_v43 = vpop.f32.mrb[26].mxu0  ;;  %v7810_v16 = vld [vmem:[#allocation4 + $0x40] ss:$2 sm:$0xff] }
 0x5b5   :  { %v7874_v59 = vld [vmem:[#allocation4 + $0x41] ss:$2 sm:$0xff]  ;;  %v7443_v3 = vmax.f32 %v7315_v41, 0.0  ;;  %v7316_v5 = vadd.f32 %v15207_v43, %v19311_v62  ;;  %v6742_v63 = vpop.f32.mrb[27].mxu0  ;;  %v8116_v33 = vor.u32 %v8114_v38, %v8113_v30 }
 0x5b6   :  { %7749 = vst.msk [vmem:[#allocation4 + $0x58] sm:$0xff] %vm7545_vm7, %v7581_v13  ;;  %v7933_v49 = vmax.f32 %v7810_v16, %v7874_v59  ;;  %v8587_v36 = vor.u32 %v8586_v22, %v8585_v37  ;;  %v7441_v61 = vmax.f32 %v7313_v6, 0.0  ;;  %v7314_v23 = vadd.f32 %v19311_v62, %v6742_v63  ;;  %v8363_v63 = vld [vmem:[#allocation5 + $0x30] sm:$0xf] }
 0x5b7   :  { %v7583_v24 = vsel %vm7545_vm7, %v7443_v3, -inf  ;;  %v7444_v27 = vmax.f32 %v7316_v5, 0.0  ;;  %v8358_v0 = vsel %vm19387_vm10, %v8116_v33, %v8357_v9 }
 0x5b8   :  { %v14403_v60 = vpack.c.bf16 %v7933_v49, %v7933_v49  ;;  %v8588_v7 = vrot.slane %v8587_v36, 4  ;;  %v7582_v46 = vsel %vm7545_vm7, %v7441_v61, -inf  ;;  %v7442_v4 = vmax.f32 %v7314_v23, 0.0  ;;  %8359 = vst [vmem:[#allocation5 + $0x20] sm:$0xf] %v8358_v0 }
 0x5b9   :  { %v7584_v50 = vmax.f32 %v7582_v46, %v7583_v24  ;;  %v7586_v26 = vsel %vm7545_vm7, %v7444_v27, -inf }
 0x5ba   :  { %8452 = vrot.lane.b32.xlu0 %v14403_v60, %s16233_s22  ;;  %v8118_v35 = vshrl.u32 %v14403_v60, 16  ;;  %v8121_v45 = vshll.u32 %v14403_v60, 16  ;;  %v8745_v14 = vsel %vm19399_vm11, %v8588_v7, %v8744_v34  ;;  %v7585_v8 = vsel %vm7545_vm7, %v7442_v4, -inf  ;;  %v15210_v31 = vpop.f32.mrb[28].mxu0 }
 0x5bb   :  { %8746 = vst [vmem:[#allocation5 + $0x24] sm:$0xf] %v8745_v14  ;;  %7750 = vst.msk [vmem:[#allocation4 + $0x60] sm:$0xff] %vm7545_vm7, %v7584_v50  ;;  %v7587_v42 = vmax.f32 %v7585_v8, %v7586_v26  ;;  %v6755_v25 = vpop.f32.mrb[29].mxu0  ;;  %v7319_v18 = vadd.f32 %v15210_v31, %v19311_v62  ;;  %v8750_v50 = vld [vmem:[#allocation5 + $0x34] sm:$0xf] }
 0x5bc   :  { %v8120_v44 = vrot.slane %v8118_v35, 7  ;;  %v8589_v11 = vrot.slane %v8118_v35, 4  ;;  %v8590_v2 = vrot.slane %v8121_v45, 5  ;;  %v7317_v53 = vadd.f32 %v19311_v62, %v6755_v25  ;;  %v15211_v15 = vpop.f32.mrb[30].mxu0 }
 0x5bd   :  { %v7812_v19 = vld [vmem:[#allocation4 + $0x50] ss:$2 sm:$0xff]  ;;  %v7876_v39 = vld [vmem:[#allocation4 + $0x51] ss:$2 sm:$0xff]  ;;  %7751 = vst.msk [vmem:[#allocation4 + $0x68] sm:$0xff] %vm7545_vm7, %v7587_v42  ;;  %v7320_v58 = vadd.f32 %v15211_v15, %v19311_v62  ;;  %v6758_v17 = vpop.f32.mrb[31].mxu0 }
 0x5be   :  { %v8591_v55 = vor.u32 %v8590_v2, %v8589_v11  ;;  %v7934_v32 = vmax.f32 %v7812_v19, %v7876_v39  ;;  %v8123_v28 = vor.u32 %v8121_v45, %v8120_v44  ;;  %v7447_v54 = vmax.f32 %v7319_v18, 0.0 }
 0x5bf   :  { %v7445_v1 = vmax.f32 %v7317_v53, 0.0  ;;  %v7318_v47 = vadd.f32 %v19311_v62, %v6758_v17  ;;  %v7448_v12 = vmax.f32 %v7320_v58, 0.0  ;;  %v8366_v17 = vld [vmem:[#allocation5 + $0x38] sm:$0xf] }
 0x5c0   :  { %v8592_v29 = vrot.slane %v8591_v55, 4  ;;  %v14404_v56 = vpack.c.bf16 %v7934_v32, %v7934_v32  ;;  %v8361_v52 = vsel %vm19387_vm10, %v8123_v28, %v8360_v48  ;;  %v7589_v38 = vsel %vm7545_vm7, %v7447_v54, -inf }
 0x5c1   :  { %v7588_v51 = vsel %vm7545_vm7, %v7445_v1, -inf  ;;  %v7446_v13 = vmax.f32 %v7318_v47, 0.0  ;;  %8362 = vst [vmem:[#allocation5 + $0x28] sm:$0xf] %v8361_v52  ;;  %v7592_v41 = vsel %vm7545_vm7, %v7448_v12, -inf }
 0x5c2   :  { %v8748_v30 = vsel %vm19399_vm11, %v8592_v29, %v8747_v21  ;;  %v7590_v37 = vmax.f32 %v7588_v51, %v7589_v38  ;;  %8454 = vrot.lane.b32.xlu1 %v14404_v56, %s16233_s22  ;;  %v8125_v57 = vshrl.u32 %v14404_v56, 16  ;;  %v8128_v22 = vshll.u32 %v14404_v56, 16  ;;  %v15214_v6 = vpop.f32.mrb[32].mxu0  ;;  %v8753_v38 = vld [vmem:[#allocation5 + $0x3c] sm:$0xf] }
 0x5c3   :  { %8749 = vst [vmem:[#allocation5 + $0x2c] sm:$0xf] %v8748_v30  ;;  %v7591_v9 = vsel %vm7545_vm7, %v7446_v13, -inf  ;;  %v7323_v3 = vadd.f32 %v15214_v6, %v19311_v62  ;;  %v6771_v5 = vpop.f32.mrb[33].mxu0 }
 0x5c4   :  { %7752 = vst.msk [vmem:[#allocation4 + $0x70] sm:$0xff] %vm7545_vm7, %v7590_v37  ;;  %v7593_v43 = vmax.f32 %v7591_v9, %v7592_v41  ;;  %v8127_v16 = vrot.slane %v8125_v57, 7  ;;  %v8593_v59 = vrot.slane %v8125_v57, 4  ;;  %v8594_v49 = vrot.slane %v8128_v22, 5  ;;  %v15215_v36 = vpop.f32.mrb[34].mxu0 }
 0x5c5   :  { %v7321_v33 = vadd.f32 %v19311_v62, %v6771_v5  ;;  %v7814_v61 = vld [vmem:[#allocation4 + $0x60] ss:$2 sm:$0xff]  ;;  %v7878_v23 = vld [vmem:[#allocation4 + $0x61] ss:$2 sm:$0xff]  ;;  %v7451_v34 = vmax.f32 %v7323_v3, 0.0  ;;  %v7324_v24 = vadd.f32 %v15215_v36, %v19311_v62  ;;  %v6774_v27 = vpop.f32.mrb[35].mxu0 }
 0x5c6   :  { %7753 = vst.msk [vmem:[#allocation4 + $0x78] sm:$0xff] %vm7545_vm7, %v7593_v43  ;;  %v7935_v60 = vmax.f32 %v7814_v61, %v7878_v23  ;;  %v8130_v0 = vor.u32 %v8128_v22, %v8127_v16  ;;  %v8595_v7 = vor.u32 %v8594_v49, %v8593_v59  ;;  %v7322_v4 = vadd.f32 %v19311_v62, %v6774_v27  ;;  %v8369_v27 = vld [vmem:[#allocation5 + $0x40] sm:$0xf] }
 0x5c7   :  { %v7449_v46 = vmax.f32 %v7321_v33, 0.0  ;;  %v7595_v26 = vsel %vm7545_vm7, %v7451_v34, -inf  ;;  %v7452_v35 = vmax.f32 %v7324_v24, 0.0 }
 0x5c8   :  { %v14405_v45 = vpack.c.bf16 %v7935_v60, %v7935_v60  ;;  %v8364_v14 = vsel %vm19387_vm10, %v8130_v0, %v8363_v63  ;;  %v8596_v8 = vrot.slane %v8595_v7, 4  ;;  %v7450_v42 = vmax.f32 %v7322_v4, 0.0 }
 0x5c9   :  { %v7594_v31 = vsel %vm7545_vm7, %v7449_v46, -inf  ;;  %8365 = vst [vmem:[#allocation5 + $0x30] sm:$0xf] %v8364_v14  ;;  %v7598_v11 = vsel %vm7545_vm7, %v7452_v35, -inf }
 0x5ca   :  { %v7596_v44 = vmax.f32 %v7594_v31, %v7595_v26  ;;  %8456 = vrot.lane.b32.xlu0 %v14405_v45, %s16233_s22  ;;  %v8132_v2 = vshrl.u32 %v14405_v45, 16  ;;  %v8135_v25 = vshll.u32 %v14405_v45, 16  ;;  %v8751_v48 = vsel %vm19399_vm11, %v8596_v8, %v8750_v50  ;;  %v15218_v53 = vpop.f32.mrb[36].mxu0 }
 0x5cb   :  { %v7597_v18 = vsel %vm7545_vm7, %v7450_v42, -inf  ;;  %8752 = vst [vmem:[#allocation5 + $0x34] sm:$0xf] %v8751_v48  ;;  %v6787_v58 = vpop.f32.mrb[37].mxu0  ;;  %v7327_v32 = vadd.f32 %v15218_v53, %v19311_v62 }
 0x5cc   :  { %7754 = vst.msk [vmem:[#allocation4 + $0x80] sm:$0xff] %vm7545_vm7, %v7596_v44  ;;  %v7599_v15 = vmax.f32 %v7597_v18, %v7598_v11  ;;  %v8134_v19 = vrot.slane %v8132_v2, 7  ;;  %v8597_v39 = vrot.slane %v8132_v2, 4  ;;  %v8598_v55 = vrot.slane %v8135_v25, 5  ;;  %v15219_v21 = vpop.f32.mrb[38].mxu0 }
 0x5cd   :  { %v7325_v28 = vadd.f32 %v19311_v62, %v6787_v58  ;;  %v7816_v54 = vld [vmem:[#allocation4 + $0x70] ss:$2 sm:$0xff]  ;;  %v7880_v1 = vld [vmem:[#allocation4 + $0x71] ss:$2 sm:$0xff]  ;;  %v7328_v29 = vadd.f32 %v15219_v21, %v19311_v62  ;;  %v6790_v12 = vpop.f32.mrb[39].mxu0  ;;  %v7455_v51 = vmax.f32 %v7327_v32, 0.0 }
 0x5ce   :  { %7755 = vst.msk [vmem:[#allocation4 + $0x88] sm:$0xff] %vm7545_vm7, %v7599_v15  ;;  %v8599_v47 = vor.u32 %v8598_v55, %v8597_v39  ;;  %v7936_v56 = vmax.f32 %v7816_v54, %v7880_v1  ;;  %v8137_v52 = vor.u32 %v8135_v25, %v8134_v19  ;;  %v7326_v30 = vadd.f32 %v19311_v62, %v6790_v12  ;;  %v8756_v44 = vld [vmem:[#allocation5 + $0x44] sm:$0xf]  ;;  %v8372_v12 = vld [vmem:[#allocation5 + $0x58] sm:$0xf] }
 0x5cf   :  { %v7453_v13 = vmax.f32 %v7325_v28, 0.0  ;;  %v7456_v41 = vmax.f32 %v7328_v29, 0.0  ;;  %v7601_v22 = vsel %vm7545_vm7, %v7455_v51, -inf }
 0x5d0   :  { %v8600_v37 = vrot.slane %v8599_v47, 4  ;;  %v14406_v57 = vpack.c.bf16 %v7936_v56, %v7936_v56  ;;  %v8367_v9 = vsel %vm19387_vm10, %v8137_v52, %v8366_v17  ;;  %v7454_v43 = vmax.f32 %v7326_v30, 0.0 }
 0x5d1   :  { %v7600_v6 = vsel %vm7545_vm7, %v7453_v13, -inf  ;;  %8368 = vst [vmem:[#allocation5 + $0x38] sm:$0xf] %v8367_v9  ;;  %v7604_v3 = vsel %vm7545_vm7, %v7456_v41, -inf }
 0x5d2   :  { %v8754_v16 = vsel %vm19399_vm11, %v8600_v37, %v8753_v38  ;;  %v7602_v59 = vmax.f32 %v7600_v6, %v7601_v22  ;;  %8458 = vrot.lane.b32.xlu1 %v14406_v57, %s16233_s22  ;;  %v8139_v5 = vshrl.u32 %v14406_v57, 16  ;;  %v7603_v63 = vsel %vm7545_vm7, %v7454_v43, -inf  ;;  %v15222_v33 = vpop.f32.mrb[40].mxu0  ;;  %v8759_v22 = vld [vmem:[#allocation5 + $0x5c] sm:$0xf] }
 0x5d3   :  { %8755 = vst [vmem:[#allocation5 + $0x3c] sm:$0xf] %v8754_v16  ;;  %v8142_v49 = vshll.u32 %v14406_v57, 16  ;;  %v7605_v36 = vmax.f32 %v7603_v63, %v7604_v3  ;;  %v7331_v34 = vadd.f32 %v15222_v33, %v19311_v62  ;;  %v6803_v24 = vpop.f32.mrb[41].mxu0 }
 0x5d4   :  { %7756 = vst.msk [vmem:[#allocation4 + $0x90] sm:$0xff] %vm7545_vm7, %v7602_v59  ;;  %v8141_v61 = vrot.slane %v8139_v5, 7  ;;  %v8601_v23 = vrot.slane %v8139_v5, 4  ;;  %v7329_v0 = vadd.f32 %v19311_v62, %v6803_v24  ;;  %v15223_v7 = vpop.f32.mrb[42].mxu0 }
 0x5d5   :  { %v8602_v60 = vrot.slane %v8142_v49, 5  ;;  %v7818_v46 = vld [vmem:[#allocation4 + $0x80] ss:$2 sm:$0xff]  ;;  %v7882_v4 = vld [vmem:[#allocation4 + $0x81] ss:$2 sm:$0xff]  ;;  %7757 = vst.msk [vmem:[#allocation4 + $0x98] sm:$0xff] %vm7545_vm7, %v7605_v36  ;;  %v7332_v26 = vadd.f32 %v15223_v7, %v19311_v62 }
 0x5d6   :  { %v7459_v50 = vmax.f32 %v7331_v34, 0.0  ;;  %v6806_v35 = vpop.f32.mrb[43].mxu0  ;;  %v7937_v45 = vmax.f32 %v7818_v46, %v7882_v4  ;;  %v8144_v14 = vor.u32 %v8142_v49, %v8141_v61  ;;  %v7457_v31 = vmax.f32 %v7329_v0, 0.0 }
 0x5d7   :  { %v8603_v8 = vor.u32 %v8602_v60, %v8601_v23  ;;  %v7330_v42 = vadd.f32 %v19311_v62, %v6806_v35  ;;  %v7460_v2 = vmax.f32 %v7332_v26, 0.0  ;;  %v8375_v35 = vld [vmem:[#allocation5 + $0x60] sm:$0xf] }
 0x5d8   :  { %v7607_v11 = vsel %vm7545_vm7, %v7459_v50, -inf  ;;  %v14407_v25 = vpack.c.bf16 %v7937_v45, %v7937_v45  ;;  %v8370_v48 = vsel %vm19387_vm10, %v8144_v14, %v8369_v27  ;;  %v7606_v53 = vsel %vm7545_vm7, %v7457_v31, -inf }
 0x5d9   :  { %v8604_v18 = vrot.slane %v8603_v8, 4  ;;  %v7458_v15 = vmax.f32 %v7330_v42, 0.0  ;;  %8371 = vst [vmem:[#allocation5 + $0x40] sm:$0xf] %v8370_v48  ;;  %v7608_v19 = vmax.f32 %v7606_v53, %v7607_v11  ;;  %v7610_v39 = vsel %vm7545_vm7, %v7460_v2, -inf }
 0x5da   :  { %8460 = vrot.lane.b32.xlu0 %v14407_v25, %s16233_s22  ;;  %v8146_v55 = vshrl.u32 %v14407_v25, 16  ;;  %v8149_v58 = vshll.u32 %v14407_v25, 16  ;;  %v15226_v28 = vpop.f32.mrb[44].mxu0 }
 0x5db   :  { %v8757_v17 = vsel %vm19399_vm11, %v8604_v18, %v8756_v44  ;;  %v7609_v32 = vsel %vm7545_vm7, %v7458_v15, -inf  ;;  %7758 = vst.msk [vmem:[#allocation4 + $0xa0] sm:$0xff] %vm7545_vm7, %v7608_v19  ;;  %v6819_v29 = vpop.f32.mrb[45].mxu0  ;;  %v7335_v56 = vadd.f32 %v15226_v28, %v19311_v62  ;;  %v8762_v19 = vld [vmem:[#allocation5 + $0x64] sm:$0xf] }
 0x5dc   :  { %8758 = vst [vmem:[#allocation5 + $0x44] sm:$0xf] %v8757_v17  ;;  %v7611_v21 = vmax.f32 %v7609_v32, %v7610_v39  ;;  %v8148_v54 = vrot.slane %v8146_v55, 7  ;;  %v8605_v1 = vrot.slane %v8146_v55, 4  ;;  %v8606_v47 = vrot.slane %v8149_v58, 5  ;;  %v15227_v38 = vpop.f32.mrb[46].mxu0 }
 0x5dd   :  { %v7333_v52 = vadd.f32 %v19311_v62, %v6819_v29  ;;  %v7820_v51 = vld [vmem:[#allocation4 + $0x90] ss:$2 sm:$0xff]  ;;  %v7884_v13 = vld [vmem:[#allocation4 + $0x91] ss:$2 sm:$0xff]  ;;  %v7336_v37 = vadd.f32 %v15227_v38, %v19311_v62  ;;  %v6822_v41 = vpop.f32.mrb[47].mxu0  ;;  %v7463_v6 = vmax.f32 %v7335_v56, 0.0 }
 0x5de   :  { %7759 = vst.msk [vmem:[#allocation4 + $0xa8] sm:$0xff] %vm7545_vm7, %v7611_v21  ;;  %v8607_v30 = vor.u32 %v8606_v47, %v8605_v1  ;;  %v7938_v57 = vmax.f32 %v7820_v51, %v7884_v13  ;;  %v8151_v9 = vor.u32 %v8149_v58, %v8148_v54  ;;  %v7334_v16 = vadd.f32 %v19311_v62, %v6822_v41  ;;  %v8378_v41 = vld [vmem:[#allocation5 + $0x68] sm:$0xf] }
 0x5df   :  { %v7461_v43 = vmax.f32 %v7333_v52, 0.0  ;;  %v7464_v3 = vmax.f32 %v7336_v37, 0.0  ;;  %v7613_v49 = vsel %vm7545_vm7, %v7463_v6, -inf }
 0x5e0   :  { %v8608_v59 = vrot.slane %v8607_v30, 4  ;;  %v14408_v5 = vpack.c.bf16 %v7938_v57, %v7938_v57  ;;  %v8373_v63 = vsel %vm19387_vm10, %v8151_v9, %v8372_v12  ;;  %v7462_v36 = vmax.f32 %v7334_v16, 0.0 }
 0x5e1   :  { %v7612_v33 = vsel %vm7545_vm7, %v7461_v43, -inf  ;;  %8374 = vst [vmem:[#allocation5 + $0x58] sm:$0xf] %v8373_v63  ;;  %v7616_v34 = vsel %vm7545_vm7, %v7464_v3, -inf }
 0x5e2   :  { %v8760_v61 = vsel %vm19399_vm11, %v8608_v59, %v8759_v22  ;;  %v7614_v23 = vmax.f32 %v7612_v33, %v7613_v49  ;;  %8462 = vrot.lane.b32.xlu1 %v14408_v5, %s16233_s22  ;;  %v8153_v24 = vshrl.u32 %v14408_v5, 16  ;;  %v7615_v27 = vsel %vm7545_vm7, %v7462_v36, -inf  ;;  %v15230_v0 = vpop.f32.mrb[48].mxu0  ;;  %v8765_v49 = vld [vmem:[#allocation5 + $0x6c] sm:$0xf] }
 0x5e3   :  { %8761 = vst [vmem:[#allocation5 + $0x5c] sm:$0xf] %v8760_v61  ;;  %v8156_v60 = vshll.u32 %v14408_v5, 16  ;;  %v7617_v7 = vmax.f32 %v7615_v27, %v7616_v34  ;;  %v7339_v50 = vadd.f32 %v15230_v0, %v19311_v62  ;;  %v6835_v26 = vpop.f32.mrb[49].mxu0  ;;  %v19562_v61 = vld [vmem:[%s21514_s4] ss:$0 sm:$0xff] }
 0x5e4   :  { %7760 = vst.msk [vmem:[#allocation4 + $0xb0] sm:$0xff] %vm7545_vm7, %v7614_v23  ;;  %v8155_v46 = vrot.slane %v8153_v24, 7  ;;  %v8609_v4 = vrot.slane %v8153_v24, 4  ;;  %v7337_v14 = vadd.f32 %v19311_v62, %v6835_v26  ;;  %v15231_v8 = vpop.f32.mrb[50].mxu0 }
 0x5e5   :  { %v8610_v45 = vrot.slane %v8156_v60, 5  ;;  %v7822_v31 = vld [vmem:[#allocation4 + $0xa0] ss:$2 sm:$0xff]  ;;  %v7886_v42 = vld [vmem:[#allocation4 + $0xa1] ss:$2 sm:$0xff]  ;;  %7761 = vst.msk [vmem:[#allocation4 + $0xb8] sm:$0xff] %vm7545_vm7, %v7617_v7  ;;  %v7340_v11 = vadd.f32 %v15231_v8, %v19311_v62 }
 0x5e6   :  { %v7467_v44 = vmax.f32 %v7339_v50, 0.0  ;;  %v6838_v2 = vpop.f32.mrb[51].mxu0  ;;  %v7939_v25 = vmax.f32 %v7822_v31, %v7886_v42  ;;  %v8158_v48 = vor.u32 %v8156_v60, %v8155_v46  ;;  %v7465_v53 = vmax.f32 %v7337_v14, 0.0 }
 0x5e7   :  { %v8611_v18 = vor.u32 %v8610_v45, %v8609_v4  ;;  %v7338_v15 = vadd.f32 %v19311_v62, %v6838_v2  ;;  %v7468_v55 = vmax.f32 %v7340_v11, 0.0  ;;  %v8381_v2 = vld [vmem:[#allocation5 + $0x70] sm:$0xf] }
 0x5e8   :  { %v7619_v39 = vsel %vm7545_vm7, %v7467_v44, -inf  ;;  %v14409_v58 = vpack.c.bf16 %v7939_v25, %v7939_v25  ;;  %v8376_v17 = vsel %vm19387_vm10, %v8158_v48, %v8375_v35  ;;  %v7618_v28 = vsel %vm7545_vm7, %v7465_v53, -inf }
 0x5e9   :  { %v8612_v32 = vrot.slane %v8611_v18, 4  ;;  %v7466_v21 = vmax.f32 %v7338_v15, 0.0  ;;  %8377 = vst [vmem:[#allocation5 + $0x60] sm:$0xf] %v8376_v17  ;;  %v7620_v54 = vmax.f32 %v7618_v28, %v7619_v39  ;;  %v7622_v1 = vsel %vm7545_vm7, %v7468_v55, -inf }
 0x5ea   :  { %8464 = vrot.lane.b32.xlu0 %v14409_v58, %s16233_s22  ;;  %v8160_v47 = vshrl.u32 %v14409_v58, 16  ;;  %v8163_v29 = vshll.u32 %v14409_v58, 16  ;;  %v15234_v52 = vpop.f32.mrb[52].mxu0 }
 0x5eb   :  { %v8763_v12 = vsel %vm19399_vm11, %v8612_v32, %v8762_v19  ;;  %v7621_v56 = vsel %vm7545_vm7, %v7466_v21, -inf  ;;  %7762 = vst.msk [vmem:[#allocation4 + $0xc0] sm:$0xff] %vm7545_vm7, %v7620_v54  ;;  %v6851_v37 = vpop.f32.mrb[53].mxu0  ;;  %v7343_v57 = vadd.f32 %v15234_v52, %v19311_v62  ;;  %v8768_v54 = vld [vmem:[#allocation5 + $0x74] sm:$0xf] }
 0x5ec   :  { %8764 = vst [vmem:[#allocation5 + $0x64] sm:$0xf] %v8763_v12  ;;  %v7623_v38 = vmax.f32 %v7621_v56, %v7622_v1  ;;  %v8162_v51 = vrot.slane %v8160_v47, 7  ;;  %v8613_v13 = vrot.slane %v8160_v47, 4  ;;  %v8614_v30 = vrot.slane %v8163_v29, 5  ;;  %v15235_v22 = vpop.f32.mrb[54].mxu0 }
 0x5ed   :  { %v7341_v9 = vadd.f32 %v19311_v62, %v6851_v37  ;;  %v7824_v6 = vld [vmem:[#allocation4 + $0xb0] ss:$2 sm:$0xff]  ;;  %v7888_v43 = vld [vmem:[#allocation4 + $0xb1] ss:$2 sm:$0xff]  ;;  %v7344_v59 = vadd.f32 %v15235_v22, %v19311_v62  ;;  %v6854_v3 = vpop.f32.mrb[55].mxu0  ;;  %v7471_v33 = vmax.f32 %v7343_v57, 0.0 }
 0x5ee   :  { %7763 = vst.msk [vmem:[#allocation4 + $0xc8] sm:$0xff] %vm7545_vm7, %v7623_v38  ;;  %v8615_v16 = vor.u32 %v8614_v30, %v8613_v13  ;;  %v7940_v5 = vmax.f32 %v7824_v6, %v7888_v43  ;;  %v8165_v63 = vor.u32 %v8163_v29, %v8162_v51  ;;  %v7342_v23 = vadd.f32 %v19562_v61, %v6854_v3  ;;  %v8384_v3 = vld [vmem:[#allocation5 + $0x78] sm:$0xf] }
 0x5ef   :  { %v7469_v36 = vmax.f32 %v7341_v9, 0.0  ;;  %v7472_v24 = vmax.f32 %v7344_v59, 0.0  ;;  %v7625_v62 = vsel %vm7545_vm7, %v7471_v33, -inf }
 0x5f0   :  { %v8616_v34 = vrot.slane %v8615_v16, 4  ;;  %v14410_v27 = vpack.c.bf16 %v7940_v5, %v7940_v5  ;;  %v8379_v60 = vsel %vm19387_vm10, %v8165_v63, %v8378_v41  ;;  %v7470_v7 = vmax.f32 %v7342_v23, 0.0 }
 0x5f1   :  { %v7624_v0 = vsel %vm7545_vm7, %v7469_v36, -inf  ;;  %8380 = vst [vmem:[#allocation5 + $0x68] sm:$0xf] %v8379_v60  ;;  %v7628_v50 = vsel %vm7545_vm7, %v7472_v24, -inf }
 0x5f2   :  { %v8766_v46 = vsel %vm19399_vm11, %v8616_v34, %v8765_v49  ;;  %v7626_v4 = vmax.f32 %v7624_v0, %v7625_v62  ;;  %8466 = vrot.lane.b32.xlu1 %v14410_v27, %s16233_s22  ;;  %v8167_v26 = vshrl.u32 %v14410_v27, 16  ;;  %v7627_v35 = vsel %vm7545_vm7, %v7470_v7, -inf  ;;  %v15238_v14 = vpop.f32.mrb[56].mxu0  ;;  %v8771_v62 = vld [vmem:[#allocation5 + $0x7c] sm:$0xf] }
 0x5f3   :  { %8767 = vst [vmem:[#allocation5 + $0x6c] sm:$0xf] %v8766_v46  ;;  %v8170_v45 = vshll.u32 %v14410_v27, 16  ;;  %v7629_v8 = vmax.f32 %v7627_v35, %v7628_v50  ;;  %v7347_v44 = vadd.f32 %v19562_v61, %v15238_v14  ;;  %v6867_v11 = vpop.f32.mrb[57].mxu0 }
 0x5f4   :  { %7764 = vst.msk [vmem:[#allocation4 + $0xd0] sm:$0xff] %vm7545_vm7, %v7626_v4  ;;  %v8169_v31 = vrot.slane %v8167_v26, 7  ;;  %v8617_v42 = vrot.slane %v8167_v26, 4  ;;  %v7345_v48 = vadd.f32 %v19562_v61, %v6867_v11  ;;  %v15239_v18 = vpop.f32.mrb[58].mxu0 }
 0x5f5   :  { %v8618_v25 = vrot.slane %v8170_v45, 5  ;;  %v7826_v53 = vld [vmem:[#allocation4 + $0xc0] ss:$2 sm:$0xff]  ;;  %v7890_v15 = vld [vmem:[#allocation4 + $0xc1] ss:$2 sm:$0xff]  ;;  %7765 = vst.msk [vmem:[#allocation4 + $0xd8] sm:$0xff] %vm7545_vm7, %v7629_v8  ;;  %v7348_v39 = vadd.f32 %v19562_v61, %v15239_v18 }
 0x5f6   :  { %v7475_v19 = vmax.f32 %v7347_v44, 0.0  ;;  %v6870_v55 = vpop.f32.mrb[59].mxu0  ;;  %v7941_v58 = vmax.f32 %v7826_v53, %v7890_v15  ;;  %v8172_v17 = vor.u32 %v8170_v45, %v8169_v31  ;;  %v7473_v28 = vmax.f32 %v7345_v48, 0.0 }
 0x5f7   :  { %v8619_v32 = vor.u32 %v8618_v25, %v8617_v42  ;;  %v7346_v21 = vadd.f32 %v19562_v61, %v6870_v55  ;;  %v7476_v47 = vmax.f32 %v7348_v39, 0.0  ;;  %v8387_v55 = vld [vmem:[#allocation5 + $0x80] sm:$0xf] }
 0x5f8   :  { %v7631_v1 = vsel %vm7545_vm7, %v7475_v19, -inf  ;;  %v14411_v29 = vpack.c.bf16 %v7941_v58, %v7941_v58  ;;  %v8382_v12 = vsel %vm19387_vm10, %v8172_v17, %v8381_v2  ;;  %v7630_v52 = vsel %vm7545_vm7, %v7473_v28, -inf }
 0x5f9   :  { %v8620_v56 = vrot.slane %v8619_v32, 4  ;;  %v7474_v38 = vmax.f32 %v7346_v21, 0.0  ;;  %8383 = vst [vmem:[#allocation5 + $0x70] sm:$0xf] %v8382_v12  ;;  %v7632_v51 = vmax.f32 %v7630_v52, %v7631_v1  ;;  %v7634_v13 = vsel %vm7545_vm7, %v7476_v47, -inf }
 0x5fa   :  { %8468 = vrot.lane.b32.xlu0 %v14411_v29, %s16233_s22  ;;  %v8174_v30 = vshrl.u32 %v14411_v29, 16  ;;  %v8177_v37 = vshll.u32 %v14411_v29, 16  ;;  %v15242_v9 = vpop.f32.mrb[60].mxu0 }
 0x5fb   :  { %v8769_v41 = vsel %vm19399_vm11, %v8620_v56, %v8768_v54  ;;  %v7633_v57 = vsel %vm7545_vm7, %v7474_v38, -inf  ;;  %7766 = vst.msk [vmem:[#allocation4 + $0xe0] sm:$0xff] %vm7545_vm7, %v7632_v51  ;;  %v6883_v59 = vpop.f32.mrb[61].mxu0  ;;  %v7351_v5 = vadd.f32 %v19562_v61, %v15242_v9  ;;  %v8774_v51 = vld [vmem:[#allocation5 + $0x84] sm:$0xf] }
 0x5fc   :  { %8770 = vst [vmem:[#allocation5 + $0x74] sm:$0xf] %v8769_v41  ;;  %v7635_v22 = vmax.f32 %v7633_v57, %v7634_v13  ;;  %v8176_v6 = vrot.slane %v8174_v30, 7  ;;  %v8621_v43 = vrot.slane %v8174_v30, 4  ;;  %v8622_v16 = vrot.slane %v8177_v37, 5  ;;  %v15243_v49 = vpop.f32.mrb[62].mxu0 }
 0x5fd   :  { %v7349_v63 = vadd.f32 %v19562_v61, %v6883_v59  ;;  %v7828_v33 = vld [vmem:[#allocation4 + $0xd0] ss:$2 sm:$0xff]  ;;  %v7892_v36 = vld [vmem:[#allocation4 + $0xd1] ss:$2 sm:$0xff]  ;;  %v7352_v34 = vadd.f32 %v19562_v61, %v15243_v49  ;;  %v6886_v24 = vpop.f32.mrb[63].mxu0  ;;  %v7479_v0 = vmax.f32 %v7351_v5, 0.0 }
 0x5fe   :  { %7767 = vst.msk [vmem:[#allocation4 + $0xe8] sm:$0xff] %vm7545_vm7, %v7635_v22  ;;  %v8623_v23 = vor.u32 %v8622_v16, %v8621_v43  ;;  %v7942_v27 = vmax.f32 %v7828_v33, %v7892_v36  ;;  %v8179_v60 = vor.u32 %v8177_v37, %v8176_v6  ;;  %v7350_v46 = vadd.f32 %v19562_v61, %v6886_v24 }
 0x5ff   :  { %v7477_v7 = vmax.f32 %v7349_v63, 0.0  ;;  %v7480_v50 = vmax.f32 %v7352_v34, 0.0  ;;  %v7637_v45 = vsel %vm7545_vm7, %v7479_v0, -inf }
 0x600   :  { %v8624_v4 = vrot.slane %v8623_v23, 4  ;;  %v14412_v26 = vpack.c.bf16 %v7942_v27, %v7942_v27  ;;  %v8385_v35 = vsel %vm19387_vm10, %v8179_v60, %v8384_v3  ;;  %v7478_v8 = vmax.f32 %v7350_v46, 0.0  ;;  %v8390_v27 = vld [vmem:[#allocation5 + $0x88] sm:$0xf] }
 0x601   :  { %v7636_v14 = vsel %vm7545_vm7, %v7477_v7, -inf  ;;  %8386 = vst [vmem:[#allocation5 + $0x78] sm:$0xf] %v8385_v35  ;;  %v7640_v44 = vsel %vm7545_vm7, %v7480_v50, -inf }
 0x602   :  { %v8772_v31 = vsel %vm19399_vm11, %v8624_v4, %v8771_v62  ;;  %v7638_v42 = vmax.f32 %v7636_v14, %v7637_v45  ;;  %8470 = vrot.lane.b32.xlu1 %v14412_v26, %s16233_s22  ;;  %v8181_v11 = vshrl.u32 %v14412_v26, 16  ;;  %v7639_v2 = vsel %vm7545_vm7, %v7478_v8, -inf  ;;  %v15246_v48 = vpop.f32.mrb[64].mxu0  ;;  %v8777_v14 = vld [vmem:[#allocation5 + $0x8c] sm:$0xf] }
 0x603   :  { %8773 = vst [vmem:[#allocation5 + $0x7c] sm:$0xf] %v8772_v31  ;;  %v8184_v25 = vshll.u32 %v14412_v26, 16  ;;  %v7641_v18 = vmax.f32 %v7639_v2, %v7640_v44  ;;  %v7355_v19 = vadd.f32 %v19562_v61, %v15246_v48  ;;  %v6899_v39 = vpop.f32.mrb[65].mxu0 }
 0x604   :  { %7768 = vst.msk [vmem:[#allocation4 + $0xf0] sm:$0xff] %vm7545_vm7, %v7638_v42  ;;  %v8183_v53 = vrot.slane %v8181_v11, 7  ;;  %v8625_v15 = vrot.slane %v8181_v11, 4  ;;  %v7353_v17 = vadd.f32 %v19562_v61, %v6899_v39  ;;  %v15247_v32 = vpop.f32.mrb[66].mxu0 }
 0x605   :  { %v8626_v58 = vrot.slane %v8184_v25, 5  ;;  %v7830_v28 = vld [vmem:[#allocation4 + $0xe0] ss:$2 sm:$0xff]  ;;  %v7894_v21 = vld [vmem:[#allocation4 + $0xe1] ss:$2 sm:$0xff]  ;;  %7769 = vst.msk [vmem:[#allocation4 + $0xf8] sm:$0xff] %vm7545_vm7, %v7641_v18  ;;  %v7356_v1 = vadd.f32 %v19562_v61, %v15247_v32 }
 0x606   :  { %v7483_v54 = vmax.f32 %v7355_v19, 0.0  ;;  %v6902_v47 = vpop.f32.mrb[67].mxu0  ;;  %v7943_v29 = vmax.f32 %v7830_v28, %v7894_v21  ;;  %v8186_v12 = vor.u32 %v8184_v25, %v8183_v53  ;;  %v7481_v52 = vmax.f32 %v7353_v17, 0.0 }
 0x607   :  { %v8627_v56 = vor.u32 %v8626_v58, %v8625_v15  ;;  %v7354_v38 = vadd.f32 %v19562_v61, %v6902_v47  ;;  %v7484_v30 = vmax.f32 %v7356_v1, 0.0 }
 0x608   :  { %v7643_v13 = vsel %vm7545_vm7, %v7483_v54, -inf  ;;  %v14413_v37 = vpack.c.bf16 %v7943_v29, %v7943_v29  ;;  %v8388_v41 = vsel %vm19387_vm10, %v8186_v12, %v8387_v55  ;;  %v7642_v9 = vsel %vm7545_vm7, %v7481_v52, -inf  ;;  %v8393_v12 = vld [vmem:[#allocation5 + $0x90] sm:$0xf] }
 0x609   :  { %v8628_v57 = vrot.slane %v8627_v56, 4  ;;  %v7482_v22 = vmax.f32 %v7354_v38, 0.0  ;;  %8389 = vst [vmem:[#allocation5 + $0x80] sm:$0xf] %v8388_v41  ;;  %v7644_v6 = vmax.f32 %v7642_v9, %v7643_v13  ;;  %v7646_v43 = vsel %vm7545_vm7, %v7484_v30, -inf }
 0x60a   :  { %8472 = vrot.lane.b32.xlu0 %v14413_v37, %s16233_s22  ;;  %v8188_v16 = vshrl.u32 %v14413_v37, 16  ;;  %v8191_v59 = vshll.u32 %v14413_v37, 16  ;;  %v15250_v63 = vpop.f32.mrb[68].mxu0 }
 0x60b   :  { %v8775_v3 = vsel %vm19399_vm11, %v8628_v57, %v8774_v51  ;;  %v7645_v5 = vsel %vm7545_vm7, %v7482_v22, -inf  ;;  %7770 = vst.msk [vmem:[#allocation4 + $0x100] sm:$0xff] %vm7545_vm7, %v7644_v6  ;;  %v8445_v34 = vpop.permute.xlu0 %8444  ;;  %v6915_v24 = vpop.f32.mrb[69].mxu0  ;;  %v7359_v60 = vadd.f32 %v19562_v61, %v15250_v63 }
 0x60c   :  { %8776 = vst [vmem:[#allocation5 + $0x84] sm:$0xf] %v8775_v3  ;;  %v7647_v49 = vmax.f32 %v7645_v5, %v7646_v43  ;;  %v8190_v33 = vrot.slane %v8188_v16, 7  ;;  %v8629_v36 = vrot.slane %v8188_v16, 4  ;;  %v8630_v23 = vrot.slane %v8191_v59, 5  ;;  %v15251_v0 = vpop.f32.mrb[70].mxu0 }
 0x60d   :  { %8541 = vst.msk [vmem:[#allocation5 + $0x8] sm:$0xf] %vm8540_vm0, %v8445_v34  ;;  %v7357_v62 = vadd.f32 %v19562_v61, %v6915_v24  ;;  %v7832_v7 = vld [vmem:[#allocation4 + $0xf0] ss:$2 sm:$0xff]  ;;  %v7896_v46 = vld [vmem:[#allocation4 + $0xf1] ss:$2 sm:$0xff]  ;;  %v7360_v50 = vadd.f32 %v19562_v61, %v15251_v0 }
 0x60e   :  { %7771 = vst.msk [vmem:[#allocation4 + $0x108] sm:$0xff] %vm7545_vm7, %v7647_v49  ;;  %v8631_v4 = vor.u32 %v8630_v23, %v8629_v36  ;;  %v6918_v26 = vpop.f32.mrb[71].mxu0  ;;  %v7944_v35 = vmax.f32 %v7832_v7, %v7896_v46  ;;  %v8193_v45 = vor.u32 %v8191_v59, %v8190_v33  ;;  %v7487_v8 = vmax.f32 %v7359_v60, 0.0  ;;  %v8780_v16 = vld [vmem:[#allocation5 + $0x94] sm:$0xf] }
 0x60f   :  { %v7485_v31 = vmax.f32 %v7357_v62, 0.0  ;;  %v7358_v42 = vadd.f32 %v19562_v61, %v6918_v26  ;;  %v7488_v11 = vmax.f32 %v7360_v50, 0.0  ;;  %v8396_v7 = vld [vmem:[#allocation5 + $0xa8] sm:$0xf] }
 0x610   :  { %v8632_v44 = vrot.slane %v8631_v4, 4  ;;  %v14414_v2 = vpack.c.bf16 %v7944_v35, %v7944_v35  ;;  %v8391_v25 = vsel %vm19387_vm10, %v8193_v45, %v8390_v27  ;;  %v7649_v48 = vsel %vm7545_vm7, %v7487_v8, -inf }
 0x611   :  { %v7648_v18 = vsel %vm7545_vm7, %v7485_v31, -inf  ;;  %v7486_v53 = vmax.f32 %v7358_v42, 0.0  ;;  %8392 = vst [vmem:[#allocation5 + $0x88] sm:$0xf] %v8391_v25  ;;  %v7652_v39 = vsel %vm7545_vm7, %v7488_v11, -inf }
 0x612   :  { %v8778_v15 = vsel %vm19399_vm11, %v8632_v44, %v8777_v14  ;;  %v7650_v19 = vmax.f32 %v7648_v18, %v7649_v48  ;;  %8474 = vrot.lane.b32.xlu1 %v14414_v2, %s16233_s22  ;;  %v8195_v55 = vshrl.u32 %v14414_v2, 16  ;;  %v8198_v17 = vshll.u32 %v14414_v2, 16  ;;  %v15254_v32 = vpop.f32.mrb[72].mxu0  ;;  %v15712_v14 = vld [vmem:[%s21515_s5] sm:$0xff]   ;;  %v15694_v11 = vld [vmem:[#allocation5 + $0xc] ss:$8 sps:$4 sm:$0xff]  }
 0x613   :  { %8779 = vst [vmem:[#allocation5 + $0x8c] sm:$0xf] %v8778_v15  ;;  %v7651_v58 = vsel %vm7545_vm7, %v7486_v53, -inf  ;;  %v7363_v1 = vadd.f32 %v19562_v61, %v15254_v32  ;;  %v8447_v47 = vpop.permute.xlu1 %8446  ;;  %v6931_v29 = vpop.f32.mrb[73].mxu0  ;;  %13732 = vmatprep.mubr.msk.bf16.mxu1 %vm7545_vm7, %v15694_v11 }
 0x614   :  { %7772 = vst.msk [vmem:[#allocation4 + $0x110] sm:$0xff] %vm7545_vm7, %v7650_v19  ;;  %v7653_v28 = vmax.f32 %v7651_v58, %v7652_v39  ;;  %v8197_v21 = vrot.slane %v8195_v55, 7  ;;  %v8633_v54 = vrot.slane %v8195_v55, 4  ;;  %v8634_v56 = vrot.slane %v8198_v17, 5  ;;  %v15255_v38 = vpop.f32.mrb[74].mxu0 }
 0x615   :  { %8542 = vst.msk [vmem:[#allocation5 + $0x10] sm:$0xf] %vm8540_vm0, %v8447_v47  ;;  %v7361_v52 = vadd.f32 %v19562_v61, %v6931_v29  ;;  %v7834_v51 = vld [vmem:[#allocation4 + $0x100] ss:$2 sm:$0xff]  ;;  %v7898_v13 = vld [vmem:[#allocation4 + $0x101] ss:$2 sm:$0xff]  ;;  %v7364_v37 = vadd.f32 %v19562_v61, %v15255_v38 }
 0x616   :  { %7773 = vst.msk [vmem:[#allocation4 + $0x118] sm:$0xff] %vm7545_vm7, %v7653_v28  ;;  %v7491_v30 = vmax.f32 %v7363_v1, 0.0  ;;  %v6934_v41 = vpop.f32.mrb[75].mxu0  ;;  %v7945_v57 = vmax.f32 %v7834_v51, %v7898_v13  ;;  %v8200_v9 = vor.u32 %v8198_v17, %v8197_v21  ;;  %v8635_v22 = vor.u32 %v8634_v56, %v8633_v54  ;;  %v8783_v19 = vld [vmem:[#allocation5 + $0xac] sm:$0xf] }
 0x617   :  { %v7489_v6 = vmax.f32 %v7361_v52, 0.0  ;;  %v7362_v43 = vadd.f32 %v19562_v61, %v6934_v41  ;;  %v7492_v3 = vmax.f32 %v7364_v37, 0.0 }
 0x618   :  { %v7655_v59 = vsel %vm7545_vm7, %v7491_v30, -inf  ;;  %v14415_v5 = vpack.c.bf16 %v7945_v57, %v7945_v57  ;;  %v8394_v63 = vsel %vm19387_vm10, %v8200_v9, %v8393_v12  ;;  %v8636_v49 = vrot.slane %v8635_v22, 4  ;;  %v15715_v12 = vld [vmem:[%s21515_s5 + $0x8] sm:$0xff]  }
 0x619   :  { %v7654_v33 = vsel %vm7545_vm7, %v7489_v6, -inf  ;;  %v7490_v36 = vmax.f32 %v7362_v43, 0.0  ;;  %8395 = vst [vmem:[#allocation5 + $0x90] sm:$0xf] %v8394_v63  ;;  %v7658_v34 = vsel %vm7545_vm7, %v7492_v3, -inf }
 0x61a   :  { %v7656_v23 = vmax.f32 %v7654_v33, %v7655_v59  ;;  %8476 = vrot.lane.b32.xlu0 %v14415_v5, %s16233_s22  ;;  %v8202_v24 = vshrl.u32 %v14415_v5, 16  ;;  %v8205_v27 = vshll.u32 %v14415_v5, 16  ;;  %v8781_v60 = vsel %vm19399_vm11, %v8636_v49, %v8780_v16  ;;  %v15258_v0 = vpop.f32.mrb[76].mxu0 }
 0x61b   :  { %v7657_v62 = vsel %vm7545_vm7, %v7490_v36, -inf  ;;  %8782 = vst [vmem:[#allocation5 + $0x94] sm:$0xf] %v8781_v60  ;;  %v8449_v35 = vpop.permute.xlu0 %8448  ;;  %v6947_v45 = vpop.f32.mrb[77].mxu0  ;;  %v7367_v8 = vadd.f32 %v19562_v61, %v15258_v0  ;;  %v8399_v60 = vld [vmem:[#allocation5 + $0xb0] sm:$0xf] }
 0x61c   :  { %7774 = vst.msk [vmem:[#allocation4 + $0x120] sm:$0xff] %vm7545_vm7, %v7656_v23  ;;  %v7659_v46 = vmax.f32 %v7657_v62, %v7658_v34  ;;  %v8204_v4 = vrot.slane %v8202_v24, 7  ;;  %v8637_v50 = vrot.slane %v8202_v24, 4  ;;  %v8638_v26 = vrot.slane %v8205_v27, 5  ;;  %v15259_v42 = vpop.f32.mrb[78].mxu0 }
 0x61d   :  { %8543 = vst.msk [vmem:[#allocation5 + $0x18] sm:$0xf] %vm8540_vm0, %v8449_v35  ;;  %v7365_v31 = vadd.f32 %v19562_v61, %v6947_v45  ;;  %v15692_v44 = vld [vmem:[#allocation5 + $0x8] ss:$8 sps:$4 sm:$0xff]   ;;  %v7368_v25 = vadd.f32 %v19562_v61, %v15259_v42  ;;  %v6950_v48 = vpop.f32.mrb[79].mxu0  ;;  %v7495_v39 = vmax.f32 %v7367_v8, 0.0 }
 0x61e   :  { %7775 = vst.msk [vmem:[#allocation4 + $0x128] sm:$0xff] %vm7545_vm7, %v7659_v46  ;;  %v8639_v2 = vor.u32 %v8638_v26, %v8637_v50  ;;  %v7836_v18 = vld [vmem:[#allocation4 + $0x110] ss:$2 sm:$0xff]  ;;  %v7900_v53 = vld [vmem:[#allocation4 + $0x111] ss:$2 sm:$0xff]  ;;  %v8207_v15 = vor.u32 %v8205_v27, %v8204_v4  ;;  %v7366_v58 = vadd.f32 %v19562_v61, %v6950_v48  ;;  %9241 = vmatmul.mubr.bf16.vlgmr.msra.gmra.mrb[0].mxu1 %v15692_v44 }
 0x61f   :  { %v7493_v55 = vmax.f32 %v7365_v31, 0.0  ;;  %v7946_v17 = vmax.f32 %v7836_v18, %v7900_v53  ;;  %v7496_v28 = vmax.f32 %v7368_v25, 0.0  ;;  %v7661_v54 = vsel %vm7545_vm7, %v7495_v39, -inf  ;;  %9634 = vmatpush1.bf16.msra.mxu1 %v15712_v14  ;;  %v8786_v62 = vld [vmem:[#allocation5 + $0xb4] sm:$0xf] }
 0x620   :  { %v8640_v32 = vrot.slane %v8639_v2, 4  ;;  %v8397_v21 = vsel %vm19387_vm10, %v8207_v15, %v8396_v7  ;;  %v7494_v47 = vmax.f32 %v7366_v58, 0.0  ;;  %9635 = vmatprep.subr.bf16.mxu1 %v21548_v20  ;;  %v15695_v15 = vld [vmem:[#allocation5 + $0x1c] ss:$8 sps:$4 sm:$0xff]  }
 0x621   :  { %v7660_v1 = vsel %vm7545_vm7, %v7493_v55, -inf  ;;  %v14416_v29 = vpack.c.bf16 %v7946_v17, %v7946_v17  ;;  %8398 = vst [vmem:[#allocation5 + $0xa8] sm:$0xf] %v8397_v21  ;;  %v7664_v38 = vsel %vm7545_vm7, %v7496_v28, -inf  ;;  %13733 = vmatprep.mubr.msk.bf16.mxu1 %vm7545_vm7, %v15695_v15 }
 0x622   :  { %v8784_v56 = vsel %vm19399_vm11, %v8640_v32, %v8783_v19  ;;  %v7662_v52 = vmax.f32 %v7660_v1, %v7661_v54  ;;  %v7663_v51 = vsel %vm7545_vm7, %v7494_v47, -inf  ;;  %v15262_v37 = vpop.f32.mrb[80].mxu0 }
 0x623   :  { %8785 = vst [vmem:[#allocation5 + $0xac] sm:$0xf] %v8784_v56  ;;  %8478 = vrot.lane.b32.xlu1 %v14416_v29, %s16233_s22  ;;  %v8209_v13 = vshrl.u32 %v14416_v29, 16  ;;  %v8212_v30 = vshll.u32 %v14416_v29, 16  ;;  %v7665_v41 = vmax.f32 %v7663_v51, %v7664_v38  ;;  %v7371_v57 = vadd.f32 %v19562_v61, %v15262_v37  ;;  %v8451_v9 = vpop.permute.xlu1 %8450  ;;  %v6963_v22 = vpop.f32.mrb[81].mxu0  ;;  %9636 = vmatpush1.bf16.msra.mxu1 %v15715_v12  ;;  %v15716_v29 = vld [vmem:[%s21515_s5 + $0x10] sm:$0xff]  }
 0x624   :  { %7776 = vst.msk [vmem:[#allocation4 + $0x130] sm:$0xff] %vm7545_vm7, %v7662_v52  ;;  %v7369_v59 = vadd.f32 %v19562_v61, %v6963_v22  ;;  %v15263_v3 = vpop.f32.mrb[82].mxu0  ;;  %9637 = vmatprep.subr.bf16.mxu1 %v21548_v20  ;;  %v8402_v51 = vld [vmem:[#allocation5 + $0xb8] sm:$0xf] }
 0x625   :  { %v8211_v6 = vrot.slane %v8209_v13, 7  ;;  %v8641_v43 = vrot.slane %v8209_v13, 4  ;;  %v8642_v16 = vrot.slane %v8212_v30, 5  ;;  %8544 = vst.msk [vmem:[#allocation5 + $0x20] sm:$0xf] %vm8540_vm0, %v8451_v9  ;;  %v7499_v63 = vmax.f32 %v7371_v57, 0.0 }
 0x626   :  { %v7838_v5 = vld [vmem:[#allocation4 + $0x120] ss:$2 sm:$0xff]  ;;  %7777 = vst.msk [vmem:[#allocation4 + $0x138] sm:$0xff] %vm7545_vm7, %v7665_v41  ;;  %v7372_v49 = vadd.f32 %v19562_v61, %v15263_v3  ;;  %v6966_v33 = vpop.f32.mrb[83].mxu0  ;;  %v7902_v36 = vld [vmem:[#allocation4 + $0x121] ss:$2 sm:$0xff] }
 0x627   :  { %v8643_v23 = vor.u32 %v8642_v16, %v8641_v43  ;;  %v7497_v34 = vmax.f32 %v7369_v59, 0.0  ;;  %v7370_v24 = vadd.f32 %v19562_v61, %v6966_v33  ;;  %v7947_v27 = vmax.f32 %v7838_v5, %v7902_v36  ;;  %v8789_v13 = vld [vmem:[#allocation5 + $0xbc] sm:$0xf]  ;;  %9638 = vmatpush1.bf16.msra.mxu1 %v15716_v29 }
 0x628   :  { %v7667_v0 = vsel %vm7545_vm7, %v7499_v63, -inf  ;;  %v7500_v7 = vmax.f32 %v7372_v49, 0.0  ;;  %v8214_v46 = vor.u32 %v8212_v30, %v8211_v6  ;;  %9639 = vmatprep.subr.bf16.mxu1 %v21548_v20 }
 0x629   :  { %v8644_v4 = vrot.slane %v8643_v23, 4  ;;  %v7666_v50 = vsel %vm7545_vm7, %v7497_v34, -inf  ;;  %v7498_v26 = vmax.f32 %v7370_v24, 0.0  ;;  %v14417_v35 = vpack.c.bf16 %v7947_v27, %v7947_v27 }
 0x62a   :  { %v7668_v45 = vmax.f32 %v7666_v50, %v7667_v0  ;;  %v7670_v14 = vsel %vm7545_vm7, %v7500_v7, -inf  ;;  %v8400_v8 = vsel %vm19387_vm10, %v8214_v46, %v8399_v60  ;;  %v15266_v2 = vpop.f32.mrb[84].mxu0 }
 0x62b   :  { %v8787_v31 = vsel %vm19399_vm11, %v8644_v4, %v8786_v62  ;;  %v7669_v42 = vsel %vm7545_vm7, %v7498_v26, -inf  ;;  %8480 = vrot.lane.b32.xlu0 %v14417_v35, %s16233_s22  ;;  %v8216_v44 = vshrl.u32 %v14417_v35, 16  ;;  %v8219_v11 = vshll.u32 %v14417_v35, 16  ;;  %8401 = vst [vmem:[#allocation5 + $0xb0] sm:$0xf] %v8400_v8  ;;  %v6979_v53 = vpop.f32.mrb[85].mxu0 }
 0x62c   :  { %8788 = vst [vmem:[#allocation5 + $0xb4] sm:$0xf] %v8787_v31  ;;  %7778 = vst.msk [vmem:[#allocation4 + $0x140] sm:$0xff] %vm7545_vm7, %v7668_v45  ;;  %v7671_v25 = vmax.f32 %v7669_v42, %v7670_v14  ;;  %v7375_v48 = vadd.f32 %v19562_v61, %v15266_v2  ;;  %v8453_v18 = vpop.permute.xlu0 %8452  ;;  %v15697_v19 = vld [vmem:[#allocation5 + $0x18] ss:$8 sps:$4 sm:$0xff]   ;;  %v7373_v17 = vadd.f32 %v19562_v61, %v6979_v53  ;;  %v15267_v32 = vpop.f32.mrb[86].mxu0 }
 0x62d   :  { %v8218_v39 = vrot.slane %v8216_v44, 7  ;;  %v8645_v55 = vrot.slane %v8216_v44, 4  ;;  %v8646_v58 = vrot.slane %v8219_v11, 5  ;;  %8545 = vst.msk [vmem:[#allocation5 + $0x28] sm:$0xf] %vm8540_vm0, %v8453_v18  ;;  %v7376_v54 = vadd.f32 %v19562_v61, %v15267_v32  ;;  %v6982_v1 = vpop.f32.mrb[87].mxu0  ;;  %9249 = vmatmul.mubr.bf16.gmra.mrb[4].mxu1 %v15697_v19 }
 0x62e   :  { %v7840_v28 = vld [vmem:[#allocation4 + $0x130] ss:$2 sm:$0xff]  ;;  %7779 = vst.msk [vmem:[#allocation4 + $0x148] sm:$0xff] %vm7545_vm7, %v7671_v25  ;;  %v7503_v21 = vmax.f32 %v7375_v48, 0.0  ;;  %v7904_v47 = vld [vmem:[#allocation4 + $0x131] ss:$2 sm:$0xff]  ;;  %v7374_v52 = vadd.f32 %v19562_v61, %v6982_v1 }
 0x62f   :  { %v8647_v12 = vor.u32 %v8646_v58, %v8645_v55  ;;  %v7501_v56 = vmax.f32 %v7373_v17, 0.0  ;;  %v7948_v38 = vmax.f32 %v7840_v28, %v7904_v47  ;;  %v7504_v37 = vmax.f32 %v7376_v54, 0.0  ;;  %v15719_v45 = vld [vmem:[%s21515_s5 + $0x18] sm:$0xff]   ;;  %v8405_v44 = vld [vmem:[#allocation5 + $0xc0] sm:$0xf] }
 0x630   :  { %v7673_v30 = vsel %vm7545_vm7, %v7503_v21, -inf  ;;  %v8221_v41 = vor.u32 %v8219_v11, %v8218_v39  ;;  %v7502_v22 = vmax.f32 %v7374_v52, 0.0  ;;  %v8792_v11 = vld [vmem:[#allocation5 + $0xc4] sm:$0xf]  ;;  %9640 = vmatpush1.bf16.msra.mxu1 %v15719_v45 }
 0x631   :  { %v8648_v57 = vrot.slane %v8647_v12, 4  ;;  %v7672_v9 = vsel %vm7545_vm7, %v7501_v56, -inf  ;;  %v14418_v6 = vpack.c.bf16 %v7948_v38, %v7948_v38  ;;  %v7676_v16 = vsel %vm7545_vm7, %v7504_v37, -inf  ;;  %9641 = vmatprep.subr.bf16.mxu1 %v21548_v20  ;;  %v15698_v56 = vld [vmem:[#allocation5 + $0x2c] ss:$8 sps:$4 sm:$0xff]  }
 0x632   :  { %v7674_v43 = vmax.f32 %v7672_v9, %v7673_v30  ;;  %v8403_v59 = vsel %vm19387_vm10, %v8221_v41, %v8402_v51  ;;  %v7675_v5 = vsel %vm7545_vm7, %v7502_v22, -inf  ;;  %v15270_v33 = vpop.f32.mrb[88].mxu0  ;;  %13734 = vmatprep.mubr.msk.bf16.mxu1 %vm7545_vm7, %v15698_v56 }
 0x633   :  { %v8790_v3 = vsel %vm19399_vm11, %v8648_v57, %v8789_v13  ;;  %8482 = vrot.lane.b32.xlu1 %v14418_v6, %s16233_s22  ;;  %v8223_v63 = vshrl.u32 %v14418_v6, 16  ;;  %v8226_v49 = vshll.u32 %v14418_v6, 16  ;;  %8404 = vst [vmem:[#allocation5 + $0xb8] sm:$0xf] %v8403_v59  ;;  %v7677_v36 = vmax.f32 %v7675_v5, %v7676_v16  ;;  %v6995_v24 = vpop.f32.mrb[89].mxu0 }
 0x634   :  { %8791 = vst [vmem:[#allocation5 + $0xbc] sm:$0xf] %v8790_v3  ;;  %7780 = vst.msk [vmem:[#allocation4 + $0x150] sm:$0xff] %vm7545_vm7, %v7674_v43  ;;  %v7379_v23 = vadd.f32 %v19562_v61, %v15270_v33  ;;  %v8455_v34 = vpop.permute.xlu1 %8454  ;;  %v7377_v0 = vadd.f32 %v19562_v61, %v6995_v24  ;;  %v15271_v7 = vpop.f32.mrb[90].mxu0  ;;  %v8408_v5 = vld [vmem:[#allocation5 + $0xc8] sm:$0xf] }
 0x635   :  { %v8225_v27 = vrot.slane %v8223_v63, 7  ;;  %v8649_v60 = vrot.slane %v8223_v63, 4  ;;  %v8650_v62 = vrot.slane %v8226_v49, 5  ;;  %8546 = vst.msk [vmem:[#allocation5 + $0x30] sm:$0xf] %vm8540_vm0, %v8455_v34  ;;  %v7380_v50 = vadd.f32 %v19562_v61, %v15271_v7  ;;  %v6998_v26 = vpop.f32.mrb[91].mxu0 }
 0x636   :  { %v7842_v46 = vld [vmem:[#allocation4 + $0x140] ss:$2 sm:$0xff]  ;;  %7781 = vst.msk [vmem:[#allocation4 + $0x158] sm:$0xff] %vm7545_vm7, %v7677_v36  ;;  %v7507_v4 = vmax.f32 %v7379_v23, 0.0  ;;  %v7906_v35 = vld [vmem:[#allocation4 + $0x141] ss:$2 sm:$0xff]  ;;  %v7378_v31 = vadd.f32 %v19562_v61, %v6998_v26 }
 0x637   :  { %v8651_v14 = vor.u32 %v8650_v62, %v8649_v60  ;;  %v7505_v8 = vmax.f32 %v7377_v0, 0.0  ;;  %v7949_v42 = vmax.f32 %v7842_v46, %v7906_v35  ;;  %v7508_v25 = vmax.f32 %v7380_v50, 0.0  ;;  %v8795_v63 = vld [vmem:[#allocation5 + $0xcc] sm:$0xf]  ;;  %v15722_v60 = vld [vmem:[%s21515_s5 + $0x20] sm:$0xff]  }
 0x638   :  { %v7679_v2 = vsel %vm7545_vm7, %v7507_v4, -inf  ;;  %v8228_v48 = vor.u32 %v8226_v49, %v8225_v27  ;;  %v7506_v15 = vmax.f32 %v7378_v31, 0.0  ;;  %9642 = vmatpush1.bf16.msra.mxu1 %v15722_v60  ;;  %v15723_v60 = vld [vmem:[%s21515_s5 + $0x28] sm:$0xff]  }
 0x639   :  { %v8652_v18 = vrot.slane %v8651_v14, 4  ;;  %v7678_v53 = vsel %vm7545_vm7, %v7505_v8, -inf  ;;  %v14419_v19 = vpack.c.bf16 %v7949_v42, %v7949_v42  ;;  %v7682_v55 = vsel %vm7545_vm7, %v7508_v25, -inf  ;;  %9643 = vmatprep.subr.bf16.mxu1 %v21548_v20 }
 0x63a   :  { %v7680_v39 = vmax.f32 %v7678_v53, %v7679_v2  ;;  %v8406_v58 = vsel %vm19387_vm10, %v8228_v48, %v8405_v44  ;;  %v7681_v32 = vsel %vm7545_vm7, %v7506_v15, -inf  ;;  %v15274_v54 = vpop.f32.mrb[92].mxu0 }
 0x63b   :  { %v8793_v17 = vsel %vm19399_vm11, %v8652_v18, %v8792_v11  ;;  %8484 = vrot.lane.b32.xlu0 %v14419_v19, %s16233_s22  ;;  %v8230_v28 = vshrl.u32 %v14419_v19, 16  ;;  %v8233_v21 = vshll.u32 %v14419_v19, 16  ;;  %8407 = vst [vmem:[#allocation5 + $0xc0] sm:$0xf] %v8406_v58  ;;  %v7683_v1 = vmax.f32 %v7681_v32, %v7682_v55  ;;  %v7011_v12 = vpop.f32.mrb[93].mxu0 }
 0x63c   :  { %8794 = vst [vmem:[#allocation5 + $0xc4] sm:$0xf] %v8793_v17  ;;  %7782 = vst.msk [vmem:[#allocation4 + $0x160] sm:$0xff] %vm7545_vm7, %v7680_v39  ;;  %v7383_v47 = vadd.f32 %v19562_v61, %v15274_v54  ;;  %v8457_v29 = vpop.permute.xlu0 %8456  ;;  %v15700_v52 = vld [vmem:[#allocation5 + $0x28] ss:$8 sps:$4 sm:$0xff]   ;;  %v7381_v30 = vadd.f32 %v19562_v61, %v7011_v12  ;;  %v15275_v37 = vpop.f32.mrb[94].mxu0  ;;  %9644 = vmatpush1.bf16.msra.mxu1 %v15723_v60 }
 0x63d   :  { %v8232_v38 = vrot.slane %v8230_v28, 7  ;;  %v8653_v51 = vrot.slane %v8230_v28, 4  ;;  %v8654_v13 = vrot.slane %v8233_v21, 5  ;;  %8547 = vst.msk [vmem:[#allocation5 + $0x38] sm:$0xf] %vm8540_vm0, %v8457_v29  ;;  %v7384_v9 = vadd.f32 %v19562_v61, %v15275_v37  ;;  %v7014_v22 = vpop.f32.mrb[95].mxu0  ;;  %9257 = vmatmul.mubr.bf16.gmra.mrb[8].mxu1 %v15700_v52  ;;  %9645 = vmatprep.subr.bf16.mxu1 %v21548_v20 }
 0x63e   :  { %v7844_v41 = vld [vmem:[#allocation4 + $0x150] ss:$2 sm:$0xff]  ;;  %7783 = vst.msk [vmem:[#allocation4 + $0x168] sm:$0xff] %vm7545_vm7, %v7683_v1  ;;  %v7511_v57 = vmax.f32 %v7383_v47, 0.0  ;;  %v7908_v6 = vld [vmem:[#allocation4 + $0x151] ss:$2 sm:$0xff]  ;;  %v7382_v59 = vadd.f32 %v19562_v61, %v7014_v22 }
 0x63f   :  { %v8655_v43 = vor.u32 %v8654_v13, %v8653_v51  ;;  %v7509_v16 = vmax.f32 %v7381_v30, 0.0  ;;  %v7950_v3 = vmax.f32 %v7844_v41, %v7908_v6  ;;  %v7512_v33 = vmax.f32 %v7384_v9, 0.0  ;;  %v8411_v32 = vld [vmem:[#allocation5 + $0xd0] sm:$0xf]  ;;  %v8798_v28 = vld [vmem:[#allocation5 + $0xd4] sm:$0xf] }
 0x640   :  { %v7685_v49 = vsel %vm7545_vm7, %v7511_v57, -inf  ;;  %v8235_v36 = vor.u32 %v8233_v21, %v8232_v38  ;;  %v7510_v24 = vmax.f32 %v7382_v59, 0.0 }
 0x641   :  { %v8656_v23 = vrot.slane %v8655_v43, 4  ;;  %v7684_v34 = vsel %vm7545_vm7, %v7509_v16, -inf  ;;  %v14420_v27 = vpack.c.bf16 %v7950_v3, %v7950_v3  ;;  %v7688_v0 = vsel %vm7545_vm7, %v7512_v33, -inf  ;;  %v15701_v16 = vld [vmem:[#allocation5 + $0x3c] ss:$8 sps:$4 sm:$0xff]  }
 0x642   :  { %v7686_v62 = vmax.f32 %v7684_v34, %v7685_v49  ;;  %v8409_v7 = vsel %vm19387_vm10, %v8235_v36, %v8408_v5  ;;  %v7687_v4 = vsel %vm7545_vm7, %v7510_v24, -inf  ;;  %v15278_v35 = vpop.f32.mrb[96].mxu0  ;;  %v19776_v49 = vld [vmem:[%s21514_s4] ss:$0 sm:$0xff]  ;;  %13735 = vmatprep.mubr.msk.bf16.mxu1 %vm7545_vm7, %v15701_v16 }
 0x643   :  { %v8796_v46 = vsel %vm19399_vm11, %v8656_v23, %v8795_v63  ;;  %8486 = vrot.lane.b32.xlu1 %v14420_v27, %s16233_s22  ;;  %v8237_v50 = vshrl.u32 %v14420_v27, 16  ;;  %v8240_v26 = vshll.u32 %v14420_v27, 16  ;;  %8410 = vst [vmem:[#allocation5 + $0xc8] sm:$0xf] %v8409_v7  ;;  %v7689_v45 = vmax.f32 %v7687_v4, %v7688_v0  ;;  %v7027_v31 = vpop.f32.mrb[97].mxu0 }
 0x644   :  { %8797 = vst [vmem:[#allocation5 + $0xcc] sm:$0xf] %v8796_v46  ;;  %7784 = vst.msk [vmem:[#allocation4 + $0x170] sm:$0xff] %vm7545_vm7, %v7686_v62  ;;  %v7387_v14 = vadd.f32 %v19562_v61, %v15278_v35  ;;  %v8459_v8 = vpop.permute.xlu1 %8458  ;;  %v7385_v2 = vadd.f32 %v19562_v61, %v7027_v31  ;;  %v15279_v25 = vpop.f32.mrb[98].mxu0  ;;  %v8414_v4 = vld [vmem:[#allocation5 + $0xd8] sm:$0xf] }
 0x645   :  { %v8239_v42 = vrot.slane %v8237_v50, 7  ;;  %v8657_v44 = vrot.slane %v8237_v50, 4  ;;  %v8658_v11 = vrot.slane %v8240_v26, 5  ;;  %8548 = vst.msk [vmem:[#allocation5 + $0x40] sm:$0xf] %vm8540_vm0, %v8459_v8  ;;  %v7388_v53 = vadd.f32 %v19562_v61, %v15279_v25  ;;  %v7030_v15 = vpop.f32.mrb[99].mxu0 }
 0x646   :  { %v7846_v48 = vld [vmem:[#allocation4 + $0x160] ss:$2 sm:$0xff]  ;;  %7785 = vst.msk [vmem:[#allocation4 + $0x178] sm:$0xff] %vm7545_vm7, %v7689_v45  ;;  %v7515_v18 = vmax.f32 %v7387_v14, 0.0  ;;  %v7910_v19 = vld [vmem:[#allocation4 + $0x161] ss:$2 sm:$0xff]  ;;  %v7386_v58 = vadd.f32 %v19562_v61, %v7030_v15 }
 0x647   :  { %v8659_v39 = vor.u32 %v8658_v11, %v8657_v44  ;;  %v7513_v55 = vmax.f32 %v7385_v2, 0.0  ;;  %v7951_v17 = vmax.f32 %v7846_v48, %v7910_v19  ;;  %v7516_v54 = vmax.f32 %v7388_v53, 0.0  ;;  %v8801_v50 = vld [vmem:[#allocation5 + $0xdc] sm:$0xf] }
 0x648   :  { %v7691_v21 = vsel %vm7545_vm7, %v7515_v18, -inf  ;;  %v8242_v1 = vor.u32 %v8240_v26, %v8239_v42  ;;  %v7514_v12 = vmax.f32 %v7386_v58, 0.0 }
 0x649   :  { %v8660_v47 = vrot.slane %v8659_v39, 4  ;;  %v7690_v29 = vsel %vm7545_vm7, %v7513_v55, -inf  ;;  %v14421_v56 = vpack.c.bf16 %v7951_v17, %v7951_v17  ;;  %v7694_v38 = vsel %vm7545_vm7, %v7516_v54, -inf }
 0x64a   :  { %v7692_v52 = vmax.f32 %v7690_v29, %v7691_v21  ;;  %v8412_v51 = vsel %vm19387_vm10, %v8242_v1, %v8411_v32  ;;  %v7693_v30 = vsel %vm7545_vm7, %v7514_v12, -inf  ;;  %v15282_v57 = vpop.f32.mrb[100].mxu0 }
 0x64b   :  { %v8799_v13 = vsel %vm19399_vm11, %v8660_v47, %v8798_v28  ;;  %8488 = vrot.lane.b32.xlu0 %v14421_v56, %s16233_s22  ;;  %v8244_v37 = vshrl.u32 %v14421_v56, 16  ;;  %v8247_v41 = vshll.u32 %v14421_v56, 16  ;;  %8413 = vst [vmem:[#allocation5 + $0xd0] sm:$0xf] %v8412_v51  ;;  %v7695_v9 = vmax.f32 %v7693_v30, %v7694_v38  ;;  %v7043_v43 = vpop.f32.mrb[101].mxu0 }
 0x64c   :  { %8800 = vst [vmem:[#allocation5 + $0xd4] sm:$0xf] %v8799_v13  ;;  %7786 = vst.msk [vmem:[#allocation4 + $0x180] sm:$0xff] %vm7545_vm7, %v7692_v52  ;;  %v7391_v22 = vadd.f32 %v19562_v61, %v15282_v57  ;;  %v8461_v6 = vpop.permute.xlu0 %8460  ;;  %v15703_v59 = vld [vmem:[#allocation5 + $0x38] ss:$8 sps:$4 sm:$0xff]   ;;  %v7389_v33 = vadd.f32 %v19776_v49, %v7043_v43  ;;  %v15283_v36 = vpop.f32.mrb[102].mxu0 }
 0x64d   :  { %v8246_v3 = vrot.slane %v8244_v37, 7  ;;  %v8661_v5 = vrot.slane %v8244_v37, 4  ;;  %v8662_v63 = vrot.slane %v8247_v41, 5  ;;  %8549 = vst.msk [vmem:[#allocation5 + $0x58] sm:$0xf] %vm8540_vm0, %v8461_v6  ;;  %v7392_v34 = vadd.f32 %v19776_v49, %v15283_v36  ;;  %v7046_v24 = vpop.f32.mrb[103].mxu0  ;;  %9265 = vmatmul.mubr.bf16.gmra.mrb[12].mxu1 %v15703_v59 }
 0x64e   :  { %v7848_v23 = vld [vmem:[#allocation4 + $0x170] ss:$2 sm:$0xff]  ;;  %7787 = vst.msk [vmem:[#allocation4 + $0x188] sm:$0xff] %vm7545_vm7, %v7695_v9  ;;  %v7519_v61 = vmax.f32 %v7391_v22, 0.0  ;;  %v7912_v27 = vld [vmem:[#allocation4 + $0x171] ss:$2 sm:$0xff]  ;;  %v7390_v7 = vadd.f32 %v19776_v49, %v7046_v24 }
 0x64f   :  { %v8663_v62 = vor.u32 %v8662_v63, %v8661_v5  ;;  %v7517_v0 = vmax.f32 %v7389_v33, 0.0  ;;  %v7952_v46 = vmax.f32 %v7848_v23, %v7912_v27  ;;  %v7520_v35 = vmax.f32 %v7392_v34, 0.0  ;;  %v15726_v52 = vld [vmem:[%s21515_s5 + $0x30] sm:$0xff]   ;;  %v8417_v37 = vld [vmem:[#allocation5 + $0xe0] sm:$0xf] }
 0x650   :  { %v7697_v26 = vsel %vm7545_vm7, %v7519_v61, -inf  ;;  %v8249_v45 = vor.u32 %v8247_v41, %v8246_v3  ;;  %v7518_v31 = vmax.f32 %v7390_v7, 0.0  ;;  %v8804_v41 = vld [vmem:[#allocation5 + $0xe4] sm:$0xf]  ;;  %9646 = vmatpush1.bf16.msra.mxu1 %v15726_v52 }
 0x651   :  { %v8664_v14 = vrot.slane %v8663_v62, 4  ;;  %v7696_v8 = vsel %vm7545_vm7, %v7517_v0, -inf  ;;  %v14422_v42 = vpack.c.bf16 %v7952_v46, %v7952_v46  ;;  %v7700_v11 = vsel %vm7545_vm7, %v7520_v35, -inf  ;;  %9647 = vmatprep.subr.bf16.mxu1 %v21548_v20 }
 0x652   :  { %v7698_v44 = vmax.f32 %v7696_v8, %v7697_v26  ;;  %v8415_v2 = vsel %vm19387_vm10, %v8249_v45, %v8414_v4  ;;  %v7699_v48 = vsel %vm7545_vm7, %v7518_v31, -inf  ;;  %v15286_v15 = vpop.f32.mrb[104].mxu0 }
 0x653   :  { %v8802_v25 = vsel %vm19399_vm11, %v8664_v14, %v8801_v50  ;;  %8490 = vrot.lane.b32.xlu1 %v14422_v42, %s16233_s22  ;;  %v8251_v18 = vshrl.u32 %v14422_v42, 16  ;;  %v8254_v53 = vshll.u32 %v14422_v42, 16  ;;  %8416 = vst [vmem:[#allocation5 + $0xd8] sm:$0xf] %v8415_v2  ;;  %v7701_v19 = vmax.f32 %v7699_v48, %v7700_v11  ;;  %v7059_v58 = vpop.f32.mrb[105].mxu0 }
 0x654   :  { %8803 = vst [vmem:[#allocation5 + $0xdc] sm:$0xf] %v8802_v25  ;;  %7788 = vst.msk [vmem:[#allocation4 + $0x190] sm:$0xff] %vm7545_vm7, %v7698_v44  ;;  %v7395_v39 = vadd.f32 %v19776_v49, %v15286_v15  ;;  %v8463_v55 = vpop.permute.xlu1 %8462  ;;  %v7393_v21 = vadd.f32 %v19776_v49, %v7059_v58  ;;  %v15287_v54 = vpop.f32.mrb[106].mxu0  ;;  %v19818_v0 = vld [vmem:[#allocation5 + $0x58] sm:$0xff] }
 0x655   :  { %v8253_v17 = vrot.slane %v8251_v18, 7  ;;  %v8665_v32 = vrot.slane %v8251_v18, 4  ;;  %v8666_v28 = vrot.slane %v8254_v53, 5  ;;  %8550 = vst.msk [vmem:[#allocation5 + $0x60] sm:$0xf] %vm8540_vm0, %v8463_v55  ;;  %v7396_v29 = vadd.f32 %v19776_v49, %v15287_v54  ;;  %v7062_v12 = vpop.f32.mrb[107].mxu0 }
 0x656   :  { %v7850_v1 = vld [vmem:[#allocation4 + $0x180] ss:$2 sm:$0xff]  ;;  %7789 = vst.msk [vmem:[#allocation4 + $0x198] sm:$0xff] %vm7545_vm7, %v7701_v19  ;;  %v7523_v47 = vmax.f32 %v7395_v39, 0.0  ;;  %v7914_v56 = vld [vmem:[#allocation4 + $0x181] ss:$2 sm:$0xff]  ;;  %v7394_v13 = vadd.f32 %v19776_v49, %v7062_v12 }
 0x657   :  { %v8667_v38 = vor.u32 %v8666_v28, %v8665_v32  ;;  %v7521_v51 = vmax.f32 %v7393_v21, 0.0  ;;  %v7953_v30 = vmax.f32 %v7850_v1, %v7914_v56  ;;  %v7524_v9 = vmax.f32 %v7396_v29, 0.0  ;;  %v8807_v15 = vld [vmem:[#allocation5 + $0xfc] sm:$0xf] }
 0x658   :  { %v7703_v57 = vsel %vm7545_vm7, %v7523_v47, -inf  ;;  %v8256_v22 = vor.u32 %v8254_v53, %v8253_v17  ;;  %v7522_v16 = vmax.f32 %v7394_v13, 0.0  ;;  %v8420_v53 = vld [vmem:[#allocation5 + $0xf8] sm:$0xf] }
 0x659   :  { %v8668_v6 = vrot.slane %v8667_v38, 4  ;;  %v7702_v43 = vsel %vm7545_vm7, %v7521_v51, -inf  ;;  %v14423_v59 = vpack.c.bf16 %v7953_v30, %v7953_v30  ;;  %v7706_v5 = vsel %vm7545_vm7, %v7524_v9, -inf  ;;  %v15729_v21 = vld [vmem:[%s21515_s5 + $0x38] sm:$0xff]  }
 0x65a   :  { %v7704_v3 = vmax.f32 %v7702_v43, %v7703_v57  ;;  %v8418_v63 = vsel %vm19387_vm10, %v8256_v22, %v8417_v37  ;;  %v7705_v36 = vsel %vm7545_vm7, %v7522_v16, -inf  ;;  %v15290_v34 = vpop.f32.mrb[108].mxu0  ;;  %9648 = vmatpush1.bf16.msra.mxu1 %v15729_v21 }
 0x65b   :  { %v8805_v33 = vsel %vm19399_vm11, %v8668_v6, %v8804_v41  ;;  %8492 = vrot.lane.b32.xlu0 %v14423_v59, %s16233_s22  ;;  %v8258_v23 = vshrl.u32 %v14423_v59, 16  ;;  %v8261_v61 = vshll.u32 %v14423_v59, 16  ;;  %8419 = vst [vmem:[#allocation5 + $0xe0] sm:$0xf] %v8418_v63  ;;  %v7707_v24 = vmax.f32 %v7705_v36, %v7706_v5  ;;  %v7075_v62 = vpop.f32.mrb[109].mxu0  ;;  %9649 = vmatprep.subr.bf16.mxu1 %v21548_v20 }
 0x65c   :  { %8806 = vst [vmem:[#allocation5 + $0xe4] sm:$0xf] %v8805_v33  ;;  %7790 = vst.msk [vmem:[#allocation4 + $0x1a0] sm:$0xff] %vm7545_vm7, %v7704_v3  ;;  %v7399_v27 = vadd.f32 %v19776_v49, %v15290_v34  ;;  %v8465_v60 = vpop.permute.xlu0 %8464  ;;  %v19820_v7 = vld [vmem:[#allocation5 + $0x60] sm:$0xff]  ;;  %v7397_v26 = vadd.f32 %v19776_v49, %v7075_v62  ;;  %v15291_v35 = vpop.f32.mrb[110].mxu0 }
 0x65d   :  { %v8260_v46 = vrot.slane %v8258_v23, 7  ;;  %v8669_v4 = vrot.slane %v8258_v23, 4  ;;  %v8670_v50 = vrot.slane %v8261_v61, 5  ;;  %8551 = vst.msk [vmem:[#allocation5 + $0x68] sm:$0xf] %vm8540_vm0, %v8465_v60  ;;  %v7400_v8 = vadd.f32 %v19776_v49, %v15291_v35  ;;  %v7078_v31 = vpop.f32.mrb[111].mxu0 }
 0x65e   :  { %v7852_v45 = vld [vmem:[#allocation4 + $0x190] ss:$2 sm:$0xff]  ;;  %7791 = vst.msk [vmem:[#allocation4 + $0x1a8] sm:$0xff] %vm7545_vm7, %v7707_v24  ;;  %v7527_v14 = vmax.f32 %v7399_v27, 0.0  ;;  %v13697_v42 = vcombine.high %v19818_v0, %v19820_v7  ;;  %v13696_v44 = vcombine.low %v19818_v0, %v19820_v7  ;;  %v7916_v11 = vld [vmem:[#allocation4 + $0x191] ss:$2 sm:$0xff]  ;;  %v7398_v48 = vadd.f32 %v19776_v49, %v7078_v31 }
 0x65f   :  { %v8671_v2 = vor.u32 %v8670_v50, %v8669_v4  ;;  %v7525_v25 = vmax.f32 %v7397_v26, 0.0  ;;  %v7954_v18 = vmax.f32 %v7852_v45, %v7916_v11  ;;  %v7528_v39 = vmax.f32 %v7400_v8, 0.0  ;;  %v8423_v27 = vld [vmem:[#allocation5 + $0x100] sm:$0xf]  ;;  %v8810_v60 = vld [vmem:[#allocation5 + $0x104] sm:$0xf] }
 0x660   :  { %v7709_v19 = vsel %vm7545_vm7, %v7527_v14, -inf  ;;  %13736 = vmatprep.mubr.msk.bf16.mxu1 %vm7545_vm7, %v13697_v42  ;;  %v8263_v55 = vor.u32 %v8261_v61, %v8260_v46  ;;  %v7526_v32 = vmax.f32 %v7398_v48, 0.0 }
 0x661   :  { %v8672_v58 = vrot.slane %v8671_v2, 4  ;;  %v7708_v17 = vsel %vm7545_vm7, %v7525_v25, -inf  ;;  %9273 = vmatmul.mubr.bf16.gmra.mrb[16].mxu1 %v13696_v44  ;;  %v14424_v28 = vpack.c.bf16 %v7954_v18, %v7954_v18  ;;  %v7712_v1 = vsel %vm7545_vm7, %v7528_v39, -inf }
 0x662   :  { %v7710_v54 = vmax.f32 %v7708_v17, %v7709_v19  ;;  %v8421_v47 = vsel %vm19387_vm10, %v8263_v55, %v8420_v53  ;;  %v7711_v12 = vsel %vm7545_vm7, %v7526_v32, -inf  ;;  %v15294_v38 = vpop.f32.mrb[112].mxu0 }
 0x663   :  { %v8808_v29 = vsel %vm19399_vm11, %v8672_v58, %v8807_v15  ;;  %8494 = vrot.lane.b32.xlu1 %v14424_v28, %s16233_s22  ;;  %v8265_v56 = vshrl.u32 %v14424_v28, 16  ;;  %v8268_v52 = vshll.u32 %v14424_v28, 16  ;;  %8422 = vst [vmem:[#allocation5 + $0xf8] sm:$0xf] %v8421_v47  ;;  %v7713_v51 = vmax.f32 %v7711_v12, %v7712_v1  ;;  %v7091_v37 = vpop.f32.mrb[113].mxu0 }
 0x664   :  { %8809 = vst [vmem:[#allocation5 + $0xfc] sm:$0xf] %v8808_v29  ;;  %7792 = vst.msk [vmem:[#allocation4 + $0x1b0] sm:$0xff] %vm7545_vm7, %v7710_v54  ;;  %v7403_v13 = vadd.f32 %v19776_v49, %v15294_v38  ;;  %v8467_v30 = vpop.permute.xlu1 %8466  ;;  %v19846_v41 = vld [vmem:[#allocation5 + $0x68] sm:$0xff]  ;;  %v7401_v6 = vadd.f32 %v19776_v49, %v7091_v37  ;;  %v15295_v43 = vpop.f32.mrb[114].mxu0 }
 0x665   :  { %v8267_v57 = vrot.slane %v8265_v56, 7  ;;  %v8673_v9 = vrot.slane %v8265_v56, 4  ;;  %v8674_v22 = vrot.slane %v8268_v52, 5  ;;  %8552 = vst.msk [vmem:[#allocation5 + $0x70] sm:$0xf] %vm8540_vm0, %v8467_v30  ;;  %v7404_v3 = vadd.f32 %v19776_v49, %v15295_v43  ;;  %v7094_v5 = vpop.f32.mrb[115].mxu0 }
 0x666   :  { %v7854_v16 = vld [vmem:[#allocation4 + $0x1a0] ss:$2 sm:$0xff]  ;;  %7793 = vst.msk [vmem:[#allocation4 + $0x1b8] sm:$0xff] %vm7545_vm7, %v7713_v51  ;;  %v7531_v59 = vmax.f32 %v7403_v13, 0.0  ;;  %v7918_v63 = vld [vmem:[#allocation4 + $0x1a1] ss:$2 sm:$0xff]  ;;  %v13759_v33 = vcombine.high %v19820_v7, %v19846_v41  ;;  %v13758_v36 = vcombine.low %v19820_v7, %v19846_v41  ;;  %v7402_v34 = vadd.f32 %v19776_v49, %v7094_v5 }
 0x667   :  { %v8675_v23 = vor.u32 %v8674_v22, %v8673_v9  ;;  %v7529_v61 = vmax.f32 %v7401_v6, 0.0  ;;  %v7955_v24 = vmax.f32 %v7854_v16, %v7918_v63  ;;  %v7532_v46 = vmax.f32 %v7404_v3, 0.0  ;;  %v15730_v56 = vld [vmem:[%s21515_s5 + $0x40] sm:$0xff]   ;;  %v8426_v30 = vld [vmem:[#allocation5 + $0x108] sm:$0xf] }
 0x668   :  { %v7715_v62 = vsel %vm7545_vm7, %v7531_v59, -inf  ;;  %v8270_v4 = vor.u32 %v8268_v52, %v8267_v57  ;;  %v7530_v35 = vmax.f32 %v7402_v34, 0.0  ;;  %v8813_v37 = vld [vmem:[#allocation5 + $0x10c] sm:$0xf]  ;;  %9650 = vmatpush1.bf16.msra.mxu1 %v15730_v56 }
 0x669   :  { %v8676_v50 = vrot.slane %v8675_v23, 4  ;;  %v7714_v26 = vsel %vm7545_vm7, %v7529_v61, -inf  ;;  %v14425_v45 = vpack.c.bf16 %v7955_v24, %v7955_v24  ;;  %v7718_v8 = vsel %vm7545_vm7, %v7532_v46, -inf  ;;  %9651 = vmatprep.subr.bf16.mxu1 %v21548_v20 }
 0x66a   :  { %v7716_v14 = vmax.f32 %v7714_v26, %v7715_v62  ;;  %v8424_v31 = vsel %vm19387_vm10, %v8270_v4, %v8423_v27  ;;  %v7717_v44 = vsel %vm7545_vm7, %v7530_v35, -inf  ;;  %v15298_v25 = vpop.f32.mrb[116].mxu0 }
 0x66b   :  { %v8811_v42 = vsel %vm19399_vm11, %v8676_v50, %v8810_v60  ;;  %8496 = vrot.lane.b32.xlu0 %v14425_v45, %s16233_s22  ;;  %v8272_v11 = vshrl.u32 %v14425_v45, 16  ;;  %v8275_v2 = vshll.u32 %v14425_v45, 16  ;;  %8425 = vst [vmem:[#allocation5 + $0x100] sm:$0xf] %v8424_v31  ;;  %v7719_v48 = vmax.f32 %v7717_v44, %v7718_v8  ;;  %v7107_v15 = vpop.f32.mrb[117].mxu0 }
 0x66c   :  { %8812 = vst [vmem:[#allocation5 + $0x104] sm:$0xf] %v8811_v42  ;;  %7794 = vst.msk [vmem:[#allocation4 + $0x1c0] sm:$0xff] %vm7545_vm7, %v7716_v14  ;;  %v7407_v18 = vadd.f32 %v19776_v49, %v15298_v25  ;;  %v8469_v53 = vpop.permute.xlu0 %8468  ;;  %v19869_v19 = vld [vmem:[#allocation5 + $0x70] sm:$0xff]  ;;  %v7405_v17 = vadd.f32 %v19776_v49, %v7107_v15  ;;  %v15299_v32 = vpop.f32.mrb[118].mxu0  ;;  %v15733_v25 = vld [vmem:[%s21515_s5 + $0x48] sm:$0xff]  }
 0x66d   :  { %v8274_v39 = vrot.slane %v8272_v11, 7  ;;  %v8677_v55 = vrot.slane %v8272_v11, 4  ;;  %v8678_v58 = vrot.slane %v8275_v2, 5  ;;  %8553 = vst.msk [vmem:[#allocation5 + $0x78] sm:$0xf] %vm8540_vm0, %v8469_v53  ;;  %v7408_v54 = vadd.f32 %v19776_v49, %v15299_v32  ;;  %v7110_v1 = vpop.f32.mrb[119].mxu0  ;;  %9652 = vmatpush1.bf16.msra.mxu1 %v15733_v25 }
 0x66e   :  { %v7856_v28 = vld [vmem:[#allocation4 + $0x1b0] ss:$2 sm:$0xff]  ;;  %7795 = vst.msk [vmem:[#allocation4 + $0x1c8] sm:$0xff] %vm7545_vm7, %v7719_v48  ;;  %v7535_v21 = vmax.f32 %v7407_v18, 0.0  ;;  %v13699_v47 = vcombine.high %v19846_v41, %v19869_v19  ;;  %v13698_v29 = vcombine.low %v19846_v41, %v19869_v19  ;;  %v7920_v12 = vld [vmem:[#allocation4 + $0x1b1] ss:$2 sm:$0xff]  ;;  %v7406_v51 = vadd.f32 %v19776_v49, %v7110_v1  ;;  %9653 = vmatprep.subr.bf16.mxu1 %v21548_v20 }
 0x66f   :  { %v8679_v52 = vor.u32 %v8678_v58, %v8677_v55  ;;  %v7533_v38 = vmax.f32 %v7405_v17, 0.0  ;;  %v7956_v13 = vmax.f32 %v7856_v28, %v7920_v12  ;;  %v7536_v9 = vmax.f32 %v7408_v54, 0.0  ;;  %v8429_v58 = vld [vmem:[#allocation5 + $0x110] sm:$0xf]  ;;  %v8816_v17 = vld [vmem:[#allocation5 + $0x114] sm:$0xf] }
 0x670   :  { %v7721_v57 = vsel %vm7545_vm7, %v7535_v21, -inf  ;;  %13737 = vmatprep.mubr.msk.bf16.mxu1 %vm7545_vm7, %v13699_v47  ;;  %v8277_v22 = vor.u32 %v8275_v2, %v8274_v39  ;;  %v7534_v16 = vmax.f32 %v7406_v51, 0.0  ;;  %v8847_v41 = vld [vmem:[#allocation5 + $0xa0] sm:$0xff] }
 0x671   :  { %v8680_v6 = vrot.slane %v8679_v52, 4  ;;  %v7720_v43 = vsel %vm7545_vm7, %v7533_v38, -inf  ;;  %9281 = vmatmul.mubr.bf16.gmra.mrb[20].mxu1 %v13698_v29  ;;  %v14426_v59 = vpack.c.bf16 %v7956_v13, %v7956_v13  ;;  %v7724_v5 = vsel %vm7545_vm7, %v7536_v9, -inf }
 0x672   :  { %v7722_v3 = vmax.f32 %v7720_v43, %v7721_v57  ;;  %v8427_v63 = vsel %vm19387_vm10, %v8277_v22, %v8426_v30  ;;  %v7723_v61 = vsel %vm7545_vm7, %v7534_v16, -inf  ;;  %v15302_v27 = vpop.f32.mrb[120].mxu0 }
 0x673   :  { %v8814_v23 = vsel %vm19399_vm11, %v8680_v6, %v8813_v37  ;;  %8498 = vrot.lane.b32.xlu1 %v14426_v59, %s16233_s22  ;;  %v8279_v34 = vshrl.u32 %v14426_v59, 16  ;;  %v8282_v24 = vshll.u32 %v14426_v59, 16  ;;  %8428 = vst [vmem:[#allocation5 + $0x108] sm:$0xf] %v8427_v63  ;;  %v7725_v60 = vmax.f32 %v7723_v61, %v7724_v5  ;;  %v7123_v4 = vpop.f32.mrb[121].mxu0 }
 0x674   :  { %8815 = vst [vmem:[#allocation5 + $0x10c] sm:$0xf] %v8814_v23  ;;  %7796 = vst.msk [vmem:[#allocation4 + $0x1d0] sm:$0xff] %vm7545_vm7, %v7722_v3  ;;  %v7411_v62 = vadd.f32 %v19776_v49, %v15302_v27  ;;  %v8471_v46 = vpop.permute.xlu1 %8470  ;;  %v19896_v50 = vld [vmem:[#allocation5 + $0x78] sm:$0xff]  ;;  %v7409_v14 = vadd.f32 %v19776_v49, %v7123_v4  ;;  %v15303_v8 = vpop.f32.mrb[122].mxu0 }
 0x675   :  { %v8281_v26 = vrot.slane %v8279_v34, 7  ;;  %v8681_v35 = vrot.slane %v8279_v34, 4  ;;  %v8682_v45 = vrot.slane %v8282_v24, 5  ;;  %8554 = vst.msk [vmem:[#allocation5 + $0x80] sm:$0xf] %vm8540_vm0, %v8471_v46  ;;  %v7412_v44 = vadd.f32 %v19776_v49, %v15303_v8  ;;  %v7126_v11 = vpop.f32.mrb[123].mxu0 }
 0x676   :  { %v7858_v31 = vld [vmem:[#allocation4 + $0x1c0] ss:$2 sm:$0xff]  ;;  %7797 = vst.msk [vmem:[#allocation4 + $0x1d8] sm:$0xff] %vm7545_vm7, %v7725_v60  ;;  %v7539_v42 = vmax.f32 %v7411_v62, 0.0  ;;  %v7922_v2 = vld [vmem:[#allocation4 + $0x1c1] ss:$2 sm:$0xff]  ;;  %v13761_v48 = vcombine.high %v19869_v19, %v19896_v50  ;;  %v13760_v18 = vcombine.low %v19869_v19, %v19896_v50  ;;  %v7410_v39 = vadd.f32 %v19776_v49, %v7126_v11 }
 0x677   :  { %v8683_v53 = vor.u32 %v8682_v45, %v8681_v35  ;;  %v7537_v15 = vmax.f32 %v7409_v14, 0.0  ;;  %v7957_v55 = vmax.f32 %v7858_v31, %v7922_v2  ;;  %v7540_v28 = vmax.f32 %v7412_v44, 0.0  ;;  %v8432_v45 = vld [vmem:[#allocation5 + $0x118] sm:$0xf]  ;;  %v8819_v14 = vld [vmem:[#allocation5 + $0x11c] sm:$0xf] }
 0x678   :  { %v7727_v32 = vsel %vm7545_vm7, %v7539_v42, -inf  ;;  %v8284_v21 = vor.u32 %v8282_v24, %v8281_v26  ;;  %v7538_v47 = vmax.f32 %v7410_v39, 0.0  ;;  %v15736_v39 = vld [vmem:[%s21515_s5 + $0x50] sm:$0xff]  }
 0x679   :  { %v8684_v54 = vrot.slane %v8683_v53, 4  ;;  %v7726_v1 = vsel %vm7545_vm7, %v7537_v15, -inf  ;;  %v14427_v29 = vpack.c.bf16 %v7957_v55, %v7957_v55  ;;  %v7730_v56 = vsel %vm7545_vm7, %v7540_v28, -inf  ;;  %9654 = vmatpush1.bf16.msra.mxu1 %v15736_v39 }
 0x67a   :  { %v7728_v12 = vmax.f32 %v7726_v1, %v7727_v32  ;;  %v8430_v52 = vsel %vm19387_vm10, %v8284_v21, %v8429_v58  ;;  %v7729_v51 = vsel %vm7545_vm7, %v7538_v47, -inf  ;;  %v15306_v37 = vpop.f32.mrb[124].mxu0  ;;  %9655 = vmatprep.subr.bf16.mxu1 %v21548_v20 }
 0x67b   :  { %v8817_v38 = vsel %vm19399_vm11, %v8684_v54, %v8816_v17  ;;  %8500 = vrot.lane.b32.xlu0 %v14427_v29, %s16233_s22  ;;  %v8286_v13 = vshrl.u32 %v14427_v29, 16  ;;  %v8289_v30 = vshll.u32 %v14427_v29, 16  ;;  %8431 = vst [vmem:[#allocation5 + $0x110] sm:$0xf] %v8430_v52  ;;  %v7731_v57 = vmax.f32 %v7729_v51, %v7730_v56  ;;  %v7139_v6 = vpop.f32.mrb[125].mxu0  ;;  %v15737_v51 = vld [vmem:[%s21515_s5 + $0x58] sm:$0xff]  }
 0x67c   :  { %8818 = vst [vmem:[#allocation5 + $0x114] sm:$0xf] %v8817_v38  ;;  %7798 = vst.msk [vmem:[#allocation4 + $0x1e0] sm:$0xff] %vm7545_vm7, %v7728_v12  ;;  %v7415_v9 = vadd.f32 %v19776_v49, %v15306_v37  ;;  %v8473_v22 = vpop.permute.xlu0 %8472  ;;  %v8900_v43 = vld [vmem:[#allocation5 + $0x80] sm:$0xff]  ;;  %v7413_v5 = vadd.f32 %v19776_v49, %v7139_v6  ;;  %v15307_v63 = vpop.f32.mrb[126].mxu0 }
 0x67d   :  { %v8288_v16 = vrot.slane %v8286_v13, 7  ;;  %v8685_v59 = vrot.slane %v8286_v13, 4  ;;  %v8686_v3 = vrot.slane %v8289_v30, 5  ;;  %8555 = vst.msk [vmem:[#allocation5 + $0x88] sm:$0xf] %vm8540_vm0, %v8473_v22  ;;  %v7416_v34 = vadd.f32 %v19776_v49, %v15307_v63  ;;  %v7142_v24 = vpop.f32.mrb[127].mxu0  ;;  %9656 = vmatpush1.bf16.msra.mxu1 %v15737_v51 }
 0x67e   :  { %v7860_v23 = vld [vmem:[#allocation4 + $0x1d0] ss:$2 sm:$0xff]  ;;  %7799 = vst.msk [vmem:[#allocation4 + $0x1e8] sm:$0xff] %vm7545_vm7, %v7731_v57  ;;  %v7543_v61 = vmax.f32 %v7415_v9, 0.0  ;;  %v13701_v27 = vcombine.high %v19896_v50, %v8900_v43  ;;  %v13700_v60 = vcombine.low %v19896_v50, %v8900_v43  ;;  %v7924_v62 = vld [vmem:[#allocation4 + $0x1d1] ss:$2 sm:$0xff]  ;;  %v7414_v26 = vadd.f32 %v19776_v49, %v7142_v24  ;;  %10116 = vmatprep.subr.bf16.mxu1 %v21548_v20 }
 0x67f   :  { %v8687_v46 = vor.u32 %v8686_v3, %v8685_v59  ;;  %v7541_v4 = vmax.f32 %v7413_v5, 0.0  ;;  %v7958_v35 = vmax.f32 %v7860_v23, %v7924_v62  ;;  %v7544_v31 = vmax.f32 %v7416_v34, 0.0  ;;  %v8435_v38 = vld [vmem:[#allocation5 + $0x120] sm:$0xf]  ;;  %v8822_v9 = vld [vmem:[#allocation5 + $0x124] sm:$0xf] }
 0x680   :  { %v7733_v8 = vsel %vm7545_vm7, %v7543_v61, -inf  ;;  %13738 = vmatprep.mubr.msk.bf16.mxu1 %vm7545_vm7, %v13701_v27  ;;  %v8291_v42 = vor.u32 %v8289_v30, %v8288_v16  ;;  %v7542_v2 = vmax.f32 %v7414_v26, 0.0 }
 0x681   :  { %v8688_v44 = vrot.slane %v8687_v46, 4  ;;  %v7732_v11 = vsel %vm7545_vm7, %v7541_v4, -inf  ;;  %9289 = vmatmul.mubr.bf16.gmra.mrb[24].mxu1 %v13700_v60  ;;  %v14428_v25 = vpack.c.bf16 %v7958_v35, %v7958_v35  ;;  %v7736_v15 = vsel %vm7545_vm7, %v7544_v31, -inf  ;;  %v8438_v46 = vld [vmem:[#allocation5 + $0x128] sm:$0xf] }
 0x682   :  { %v7734_v53 = vmax.f32 %v7732_v11, %v7733_v8  ;;  %v8433_v49 = vsel %vm19387_vm10, %v8291_v42, %v8432_v45  ;;  %v7735_v58 = vsel %vm7545_vm7, %v7542_v2, -inf  ;;  %v8825_v45 = vld [vmem:[#allocation5 + $0x12c] sm:$0xf] }
 0x683   :  { %v8820_v55 = vsel %vm19399_vm11, %v8688_v44, %v8819_v14  ;;  %8502 = vrot.lane.b32.xlu1 %v14428_v25, %s16233_s22  ;;  %v8293_v17 = vshrl.u32 %v14428_v25, 16  ;;  %v8296_v32 = vshll.u32 %v14428_v25, 16  ;;  %8434 = vst [vmem:[#allocation5 + $0x118] sm:$0xf] %v8433_v49  ;;  %v7737_v28 = vmax.f32 %v7735_v58, %v7736_v15  ;;  %v8441_v49 = vld [vmem:[#allocation5 + $0x130] sm:$0xf] }
 0x684   :  { %8821 = vst [vmem:[#allocation5 + $0x11c] sm:$0xf] %v8820_v55  ;;  %7800 = vst.msk [vmem:[#allocation4 + $0x1f0] sm:$0xff] %vm7545_vm7, %v7734_v53  ;;  %v8475_v21 = vpop.permute.xlu1 %8474  ;;  %v8901_v54 = vld [vmem:[#allocation5 + $0x88] sm:$0xff]  ;;  %v8828_v58 = vld [vmem:[#allocation5 + $0x134] sm:$0xf] }
 0x685   :  { %v8295_v1 = vrot.slane %v8293_v17, 7  ;;  %v8689_v47 = vrot.slane %v8293_v17, 4  ;;  %v8690_v29 = vrot.slane %v8296_v32, 5  ;;  %8556 = vst.msk [vmem:[#allocation5 + $0x90] sm:$0xf] %vm8540_vm0, %v8475_v21  ;;  %v19945_v56 = vcombine.high %v8900_v43, %v8901_v54 }
 0x686   :  { %v7862_v12 = vld [vmem:[#allocation4 + $0x1e0] ss:$2 sm:$0xff]  ;;  %7801 = vst.msk [vmem:[#allocation4 + $0x1f8] sm:$0xff] %vm7545_vm7, %v7737_v28  ;;  %v7926_v52 = vld [vmem:[#allocation4 + $0x1e1] ss:$2 sm:$0xff]  ;;  %v19951_v13 = vcombine.low %v8900_v43, %v8901_v54 }
 0x687   :  { %v8691_v30 = vor.u32 %v8690_v29, %v8689_v47  ;;  %v7959_v37 = vmax.f32 %v7862_v12, %v7926_v52  ;;  %v8298_v57 = vor.u32 %v8296_v32, %v8295_v1 }
 0x689   :  { %v8692_v22 = vrot.slane %v8691_v30, 4  ;;  %v14429_v6 = vpack.c.bf16 %v7959_v37, %v7959_v37  ;;  %v8436_v16 = vsel %vm19387_vm10, %v8298_v57, %v8435_v38 }
 0x68a   :  { %8437 = vst [vmem:[#allocation5 + $0x120] sm:$0xf] %v8436_v16 }
 0x68b   :  { %v8823_v59 = vsel %vm19399_vm11, %v8692_v22, %v8822_v9  ;;  %8504 = vrot.lane.b32.xlu0 %v14429_v6, %s16233_s22  ;;  %v8300_v43 = vshrl.u32 %v14429_v6, 16  ;;  %v8303_v3 = vshll.u32 %v14429_v6, 16 }
 0x68c   :  { %8824 = vst [vmem:[#allocation5 + $0x124] sm:$0xf] %v8823_v59  ;;  %v8477_v5 = vpop.permute.xlu0 %8476  ;;  %v19959_v63 = vld [vmem:[#allocation5 + $0x90] sm:$0xff] }
 0x68d   :  { %v8302_v23 = vrot.slane %v8300_v43, 7  ;;  %v8693_v61 = vrot.slane %v8300_v43, 4  ;;  %v8694_v34 = vrot.slane %v8303_v3, 5  ;;  %8557 = vst.msk [vmem:[#allocation5 + $0xa8] sm:$0xf] %vm8540_vm0, %v8477_v5  ;;  %v13703_v24 = vcombine.high %v8901_v54, %v19959_v63 }
 0x68e   :  { %v7864_v27 = vld [vmem:[#allocation4 + $0x1f0] ss:$2 sm:$0xff]  ;;  %v13702_v60 = vcombine.low %v8901_v54, %v19959_v63  ;;  %v7928_v62 = vld [vmem:[#allocation4 + $0x1f1] ss:$2 sm:$0xff] }
 0x68f   :  { %v8695_v4 = vor.u32 %v8694_v34, %v8693_v61  ;;  %13739 = vmatprep.mubr.msk.bf16.mxu1 %vm7545_vm7, %v13703_v24  ;;  %v7960_v26 = vmax.f32 %v7864_v27, %v7928_v62  ;;  %v8305_v35 = vor.u32 %v8303_v3, %v8302_v23 }
 0x690   :  { %9297 = vmatmul.mubr.bf16.gmra.mrb[28].mxu1 %v13702_v60 }
 0x691   :  { %v8696_v14 = vrot.slane %v8695_v4, 4  ;;  %v14430_v8 = vpack.c.bf16 %v7960_v26, %v7960_v26  ;;  %v8439_v31 = vsel %vm19387_vm10, %v8305_v35, %v8438_v46 }
 0x692   :  { %8440 = vst [vmem:[#allocation5 + $0x128] sm:$0xf] %v8439_v31 }
 0x693   :  { %v8826_v42 = vsel %vm19399_vm11, %v8696_v14, %v8825_v45  ;;  %8506 = vrot.lane.b32.xlu1 %v14430_v8, %s16233_s22  ;;  %v8307_v44 = vshrl.u32 %v14430_v8, 16  ;;  %v8310_v11 = vshll.u32 %v14430_v8, 16 }
 0x694   :  { %8827 = vst [vmem:[#allocation5 + $0x12c] sm:$0xf] %v8826_v42  ;;  %v19975_v54 = vld [vmem:[#allocation5 + $0xa8] sm:$0xff] }
 0x695   :  { %v8309_v2 = vrot.slane %v8307_v44, 7  ;;  %v8697_v25 = vrot.slane %v8307_v44, 4  ;;  %v8698_v53 = vrot.slane %v8310_v11, 5  ;;  %v8479_v15 = vpop.permute.xlu1 %8478 }
 0x696   :  { %8558 = vst.msk [vmem:[#allocation5 + $0xb0] sm:$0xf] %vm8540_vm0, %v8479_v15 }
 0x697   :  { %v8699_v39 = vor.u32 %v8698_v53, %v8697_v25  ;;  %v8312_v55 = vor.u32 %v8310_v11, %v8309_v2 }
 0x699   :  { %v8700_v17 = vrot.slane %v8699_v39, 4  ;;  %v8442_v32 = vsel %vm19387_vm10, %v8312_v55, %v8441_v49 }
 0x69a   :  { %8443 = vst [vmem:[#allocation5 + $0x130] sm:$0xf] %v8442_v32 }
 0x69b   :  { %v8829_v28 = vsel %vm19399_vm11, %v8700_v17, %v8828_v58 }
 0x69c   :  { %8830 = vst [vmem:[#allocation5 + $0x134] sm:$0xf] %v8829_v28 }
 0x69d   :  { %v8481_v21 = vpop.permute.xlu0 %8480  ;;  %v8904_v1 = vld [vmem:[#allocation5 + $0xb0] sm:$0xff] }
 0x69e   :  { %8559 = vst.msk [vmem:[#allocation5 + $0xb8] sm:$0xf] %vm8540_vm0, %v8481_v21  ;;  %v13705_v47 = vcombine.high %v19975_v54, %v8904_v1  ;;  %v13704_v29 = vcombine.low %v19975_v54, %v8904_v1 }
 0x6a0   :  { %13740 = vmatprep.mubr.msk.bf16.mxu1 %vm7545_vm7, %v13705_v47 }
 0x6a1   :  { %9305 = vmatmul.mubr.bf16.gmra.mrb[32].mxu1 %v13704_v29 }
 0x6a5   :  { %v8483_v40 = vpop.permute.xlu1 %8482  ;;  %v8905_v12 = vld [vmem:[#allocation5 + $0xb8] sm:$0xff] }
 0x6a6   :  { %8560 = vst.msk [vmem:[#allocation5 + $0xc0] sm:$0xf] %vm8540_vm0, %v8483_v40  ;;  %v19982_v10 = vcombine.high %v8904_v1, %v8905_v12  ;;  %v19984_v52 = vcombine.low %v8904_v1, %v8905_v12 }
 0x6ad   :  { %v8485_v38 = vpop.permute.xlu0 %8484  ;;  %v8906_v51 = vld [vmem:[#allocation5 + $0xc0] sm:$0xff] }
 0x6ae   :  { %8561 = vst.msk [vmem:[#allocation5 + $0xc8] sm:$0xf] %vm8540_vm0, %v8485_v38  ;;  %v13707_v30 = vcombine.high %v8905_v12, %v8906_v51  ;;  %v13706_v37 = vcombine.low %v8905_v12, %v8906_v51 }
 0x6b0   :  { %13741 = vmatprep.mubr.msk.bf16.mxu1 %vm7545_vm7, %v13707_v30 }
 0x6b1   :  { %9313 = vmatmul.mubr.bf16.gmra.mrb[36].mxu1 %v13706_v37 }
 0x6b5   :  { %v8487_v57 = vpop.permute.xlu1 %8486  ;;  %v8907_v9 = vld [vmem:[#allocation5 + $0xc8] sm:$0xff] }
 0x6b6   :  { %8562 = vst.msk [vmem:[#allocation5 + $0xd0] sm:$0xf] %vm8540_vm0, %v8487_v57  ;;  %v19989_v22 = vcombine.high %v8906_v51, %v8907_v9  ;;  %v19991_v6 = vcombine.low %v8906_v51, %v8907_v9 }
 0x6bd   :  { %v8489_v16 = vpop.permute.xlu0 %8488  ;;  %v8908_v59 = vld [vmem:[#allocation5 + $0xd0] sm:$0xff] }
 0x6be   :  { %8563 = vst.msk [vmem:[#allocation5 + $0xd8] sm:$0xf] %vm8540_vm0, %v8489_v16  ;;  %v13709_v43 = vcombine.high %v8907_v9, %v8908_v59  ;;  %v13708_v3 = vcombine.low %v8907_v9, %v8908_v59 }
 0x6c0   :  { %13742 = vmatprep.mubr.msk.bf16.mxu1 %vm7545_vm7, %v13709_v43 }
 0x6c1   :  { %9321 = vmatmul.mubr.bf16.gmra.mrb[40].mxu1 %v13708_v3  ;;  %v15742_v3 = vld [vmem:[#allocation5 + $0x4] ss:$8 sps:$4 sm:$0xff]  }
 0x6c5   :  { %v8491_v5 = vpop.permute.xlu1 %8490  ;;  %v8909_v23 = vld [vmem:[#allocation5 + $0xd8] sm:$0xff] }
 0x6c6   :  { %8564 = vst.msk [vmem:[#allocation5 + $0xe0] sm:$0xf] %vm8540_vm0, %v8491_v5  ;;  %v19996_v61 = vcombine.high %v8908_v59, %v8909_v23  ;;  %v19998_v34 = vcombine.low %v8908_v59, %v8909_v23 }
 0x6cd   :  { %v8493_v24 = vpop.permute.xlu0 %8492  ;;  %v20000_v27 = vld [vmem:[#allocation5 + $0xe0] sm:$0xff] }
 0x6ce   :  { %8565 = vst.msk [vmem:[#allocation5 + $0xf8] sm:$0xf] %vm8540_vm0, %v8493_v24  ;;  %v13711_v60 = vcombine.high %v8909_v23, %v20000_v27  ;;  %v13710_v62 = vcombine.low %v8909_v23, %v20000_v27 }
 0x6d0   :  { %13743 = vmatprep.mubr.msk.bf16.mxu1 %vm7545_vm7, %v13711_v60 }
 0x6d1   :  { %9329 = vmatmul.mubr.bf16.gmra.mrb[44].mxu1 %v13710_v62  ;;  %v15743_v62 = vld [vmem:[%s21515_s5 + $0xc0] sm:$0xff]  }
 0x6d5   :  { %v8495_v46 = vpop.permute.xlu1 %8494  ;;  %v20007_v26 = vld [vmem:[#allocation5 + $0xf8] sm:$0xff] }
 0x6d6   :  { %8566 = vst.msk [vmem:[#allocation5 + $0x100] sm:$0xf] %vm8540_vm0, %v8495_v46  ;;  %v15740_v46 = vld [vmem:[#allocation5] ss:$8 sps:$4 sm:$0xff]  }
 0x6dd   :  { %v8497_v4 = vpop.permute.xlu0 %8496  ;;  %v8912_v35 = vld [vmem:[#allocation5 + $0x100] sm:$0xff] }
 0x6de   :  { %8567 = vst.msk [vmem:[#allocation5 + $0x108] sm:$0xf] %vm8540_vm0, %v8497_v4  ;;  %v13713_v45 = vcombine.high %v20007_v26, %v8912_v35  ;;  %v13712_v14 = vcombine.low %v20007_v26, %v8912_v35  ;;  %v20053_v4 = vld [vmem:[#allocation5 + $0x14] ss:$8 sps:$4 sm:$0xff]  }
 0x6e0   :  { %13744 = vmatprep.mubr.msk.bf16.mxu1 %vm7545_vm7, %v13713_v45  ;;  %v15753_v45 = vld [vmem:[%s21515_s5 + $0xd0] sm:$0xff]  }
 0x6e1   :  { %9337 = vmatmul.mubr.bf16.gmra.mrb[48].mxu1 %v13712_v14  ;;  %v20064_v14 = vld [vmem:[#allocation5 + $0x10] ss:$8 sps:$4 sm:$0xff]  }
 0x6e5   :  { %v8499_v8 = vpop.permute.xlu1 %8498  ;;  %v8913_v31 = vld [vmem:[#allocation5 + $0x108] sm:$0xff] }
 0x6e6   :  { %8568 = vst.msk [vmem:[#allocation5 + $0x110] sm:$0xf] %vm8540_vm0, %v8499_v8  ;;  %v20014_v42 = vcombine.high %v8912_v35, %v8913_v31  ;;  %v20016_v44 = vcombine.low %v8912_v35, %v8913_v31  ;;  %v15749_v35 = vld [vmem:[%s21515_s5 + $0xc8] sm:$0xff]  }
 0x6e7   :  { %v20067_v8 = vld [vmem:[#allocation5 + $0x24] ss:$8 sps:$4 sm:$0xff]  }
 0x6ed   :  { %v8501_v11 = vpop.permute.xlu0 %8500  ;;  %v8914_v2 = vld [vmem:[#allocation5 + $0x110] sm:$0xff] }
 0x6ee   :  { %8569 = vst.msk [vmem:[#allocation5 + $0x118] sm:$0xf] %vm8540_vm0, %v8501_v11  ;;  %v13715_v25 = vcombine.high %v8913_v31, %v8914_v2  ;;  %v13714_v53 = vcombine.low %v8913_v31, %v8914_v2  ;;  %v15755_v11 = vld [vmem:[%s21515_s5 + $0xd8] sm:$0xff]  }
 0x6f0   :  { %13745 = vmatprep.mubr.msk.bf16.mxu1 %vm7545_vm7, %v13715_v25 }
 0x6f1   :  { %9345 = vmatmul.mubr.bf16.gmra.mrb[52].mxu1 %v13714_v53  ;;  %v20020_v15 = vpop.f32.mrb[0].mxu1 }
 0x6f2   :  { %v9244_v49 = vpop.f32.mrb[1].mxu1 }
 0x6f3   :  { %v20022_v55 = vpop.f32.mrb[2].mxu1  ;;  %v15756_v49 = vld [vmem:[%s21515_s5 + $0xe0] sm:$0xff]  }
 0x6f4   :  { %v9247_v17 = vpop.f32.mrb[3].mxu1 }
 0x6f5   :  { %v8503_v39 = vpop.permute.xlu1 %8502  ;;  %v8915_v58 = vld [vmem:[#allocation5 + $0x118] sm:$0xff]  ;;  %v15757_v17 = vld [vmem:[%s21515_s5 + $0xe8] sm:$0xff]  }
 0x6f6   :  { %8570 = vst.msk [vmem:[#allocation5 + $0x120] sm:$0xf] %vm8540_vm0, %v8503_v39  ;;  %v20025_v32 = vcombine.high %v8914_v2, %v8915_v58  ;;  %v20027_v28 = vcombine.low %v8914_v2, %v8915_v58  ;;  %v20083_v39 = vld [vmem:[#allocation5 + $0x20] ss:$8 sps:$4 sm:$0xff]  }
 0x6fd   :  { %v8505_v21 = vpop.permute.xlu0 %8504  ;;  %v8916_v1 = vld [vmem:[#allocation5 + $0x120] sm:$0xff] }
 0x6fe   :  { %8571 = vst.msk [vmem:[#allocation5 + $0x128] sm:$0xf] %vm8540_vm0, %v8505_v21  ;;  %v13717_v47 = vcombine.high %v8915_v58, %v8916_v1  ;;  %v13716_v29 = vcombine.low %v8915_v58, %v8916_v1  ;;  %v20086_v58 = vld [vmem:[#allocation5 + $0x34] ss:$8 sps:$4 sm:$0xff]  }
 0x6ff   :  { %v8839_v21 = vld [vmem:[#allocation5 + $0x50] sm:$0xff] }
 0x700   :  { %13746 = vmatprep.mubr.msk.bf16.mxu1 %vm7545_vm7, %v13717_v47  ;;  %v20031_v40 = vpop.f32.mrb[4].mxu1  ;;  %v20098_v47 = vld [vmem:[#allocation5 + $0x30] ss:$8 sps:$4 sm:$0xff]  }
 0x701   :  { %9353 = vmatmul.mubr.bf16.gmra.mrb[56].mxu1 %v13716_v29  ;;  %v9252_v12 = vpop.f32.mrb[5].mxu1  ;;  %v13757_v29 = vcombine.high %v8839_v21, %v19818_v0 }
 0x702   :  { %v20033_v38 = vpop.f32.mrb[6].mxu1  ;;  %v15759_v12 = vld [vmem:[%s21515_s5 + $0xf8] sm:$0xff]  }
 0x703   :  { %v9255_v30 = vpop.f32.mrb[7].mxu1 }
 0x705   :  { %v8507_v51 = vpop.permute.xlu1 %8506  ;;  %v8917_v37 = vld [vmem:[#allocation5 + $0x128] sm:$0xff] }
 0x706   :  { %8572 = vst.msk [vmem:[#allocation5 + $0x130] sm:$0xf] %vm8540_vm0, %v8507_v51  ;;  %v20036_v57 = vcombine.high %v8916_v1, %v8917_v37  ;;  %v20038_v9 = vcombine.low %v8916_v1, %v8917_v37  ;;  %v15758_v1 = vld [vmem:[%s21515_s5 + $0xf0] sm:$0xff]  }
 0x70d   :  { %v20040_v16 = vld [vmem:[#allocation5 + $0x130] sm:$0xff] }
 0x70e   :  { %v13719_v59 = vcombine.high %v8917_v37, %v20040_v16  ;;  %v13718_v43 = vcombine.low %v8917_v37, %v20040_v16 }
 0x710   :  { %13747 = vmatprep.mubr.msk.bf16.mxu1 %vm7545_vm7, %v13719_v59  ;;  %v20046_v5 = vpop.f32.mrb[8].mxu1  ;;  %v15760_v59 = vld [vmem:[%s21515_s5 + $0x100] sm:$0xff]  }
 0x711   :  { %9361 = vmatmul.mubr.bf16.gmra.mrb[60].mxu1 %v13718_v43  ;;  %v9260_v23 = vpop.f32.mrb[9].mxu1 }
 0x712   :  { %13792 = vmatprep.mubr.msk.bf16.mxu1 %vm7545_vm7, %v15742_v3  ;;  %v20048_v24 = vpop.f32.mrb[10].mxu1  ;;  %v13756_v3 = vcombine.low %v8839_v21, %v19818_v0  ;;  %v15761_v23 = vld [vmem:[%s21515_s5 + $0x108] sm:$0xff]   ;;  %v15762_v0 = vld [vmem:[%s21515_s5 + $0x110] sm:$0xff]  }
 0x713   :  { %v9263_v60 = vpop.f32.mrb[11].mxu1 }
 0x719   :  { %9666 = vmatmul.mubr.bf16.vlgmr.msra.gmra.mrb[64].mxu1 %v15740_v46 }
 0x71a   :  { %10117 = vmatpush1.bf16.msra.mxu1 %v15743_v62  ;;  %13793 = vmatprep.mubr.msk.bf16.mxu1 %vm7545_vm7, %v20053_v4 }
 0x71b   :  { %10118 = vmatprep.subr.bf16.mxu1 %v21548_v20 }
 0x71e   :  { %10119 = vmatpush1.bf16.msra.mxu1 %v15749_v35 }
 0x71f   :  { %10120 = vmatprep.subr.bf16.mxu1 %v21548_v20 }
 0x720   :  { %v20072_v31 = vpop.f32.mrb[12].mxu1 }
 0x721   :  { %9674 = vmatmul.mubr.bf16.gmra.mrb[68].mxu1 %v20064_v14  ;;  %v9268_v2 = vpop.f32.mrb[13].mxu1 }
 0x722   :  { %13794 = vmatprep.mubr.msk.bf16.mxu1 %vm7545_vm7, %v20067_v8  ;;  %10121 = vmatpush1.bf16.msra.mxu1 %v15753_v45  ;;  %v20078_v25 = vpop.f32.mrb[14].mxu1 }
 0x723   :  { %10122 = vmatprep.subr.bf16.mxu1 %v21548_v20  ;;  %v9271_v53 = vpop.f32.mrb[15].mxu1 }
 0x726   :  { %10123 = vmatpush1.bf16.msra.mxu1 %v15755_v11  ;;  %v13764_v11 = vcombine.low %v8847_v41, %v19975_v54 }
 0x727   :  { %10124 = vmatprep.subr.bf16.mxu1 %v21548_v20 }
 0x729   :  { %9682 = vmatmul.mubr.bf16.gmra.mrb[72].mxu1 %v20083_v39 }
 0x72a   :  { %13795 = vmatprep.mubr.msk.bf16.mxu1 %vm7545_vm7, %v20086_v58  ;;  %10125 = vmatpush1.bf16.msra.mxu1 %v15756_v49 }
 0x72b   :  { %10126 = vmatprep.subr.bf16.mxu1 %v21548_v20 }
 0x72e   :  { %10127 = vmatpush1.bf16.msra.mxu1 %v15757_v17 }
 0x72f   :  { %10128 = vmatprep.subr.bf16.mxu1 %v21548_v20 }
 0x731   :  { %9690 = vmatmul.mubr.bf16.gmra.mrb[76].mxu1 %v20098_v47 }
 0x732   :  { %13796 = vmatprep.mubr.msk.bf16.mxu1 %vm7545_vm7, %v13757_v29  ;;  %10129 = vmatpush1.bf16.msra.mxu1 %v15758_v1 }
 0x733   :  { %10130 = vmatprep.subr.bf16.mxu1 %v21548_v20 }
 0x734   :  { %v20108_v51 = vpop.f32.mrb[16].mxu1 }
 0x735   :  { %v9276_v30 = vpop.f32.mrb[17].mxu1 }
 0x736   :  { %v20110_v37 = vpop.f32.mrb[18].mxu1  ;;  %10131 = vmatpush1.bf16.msra.mxu1 %v15759_v12 }
 0x737   :  { %v9279_v43 = vpop.f32.mrb[19].mxu1  ;;  %10132 = vmatprep.subr.bf16.mxu1 %v21548_v20 }
 0x739   :  { %9698 = vmatmul.mubr.bf16.gmra.mrb[80].mxu1 %v13756_v3 }
 0x73a   :  { %13797 = vmatprep.mubr.msk.bf16.mxu1 %vm7545_vm7, %v13759_v33  ;;  %10133 = vmatpush1.bf16.msra.mxu1 %v15760_v59  ;;  %v15763_v33 = vld [vmem:[%s21515_s5 + $0x118] sm:$0xff]  }
 0x73b   :  { %10134 = vmatprep.subr.bf16.mxu1 %v21548_v20 }
 0x73e   :  { %10135 = vmatpush1.bf16.msra.mxu1 %v15761_v23 }
 0x73f   :  { %10136 = vmatprep.subr.bf16.mxu1 %v21548_v20 }
 0x741   :  { %9706 = vmatmul.mubr.bf16.gmra.mrb[84].mxu1 %v13758_v36  ;;  %v13765_v36 = vcombine.high %v8847_v41, %v19975_v54  ;;  %v8855_v54 = vld [vmem:[#allocation5 + $0xf0] sm:$0xff] }
 0x742   :  { %13798 = vmatprep.mubr.msk.bf16.mxu1 %vm7545_vm7, %v13761_v48  ;;  %10137 = vmatpush1.bf16.msra.mxu1 %v15762_v0  ;;  %v13773_v49 = vcombine.high %v8855_v54, %v20007_v26  ;;  %v13772_v12 = vcombine.low %v8855_v54, %v20007_v26 }
 0x743   :  { %10138 = vmatprep.subr.bf16.mxu1 %v21548_v20 }
 0x744   :  { %v20140_v60 = vpop.f32.mrb[20].mxu1 }
 0x745   :  { %v9284_v62 = vpop.f32.mrb[21].mxu1 }
 0x746   :  { %v20142_v46 = vpop.f32.mrb[22].mxu1  ;;  %10139 = vmatpush1.bf16.msra.mxu1 %v15763_v33 }
 0x747   :  { %v9287_v7 = vpop.f32.mrb[23].mxu1 }
 0x749   :  { %9714 = vmatmul.mubr.bf16.gmra.mrb[88].mxu1 %v13760_v18 }
 0x74a   :  { %13799 = vmatprep.mubr.msk.bf16.mxu1 %vm7545_vm7, %v19945_v56 }
 0x751   :  { %9722 = vmatmul.mubr.bf16.gmra.mrb[92].mxu1 %v19951_v13 }
 0x752   :  { %13800 = vmatprep.mubr.msk.bf16.mxu1 %vm7545_vm7, %v13765_v36  ;;  %v15764_v36 = vld [vmem:[#allocation5 + $0x44] ss:$8 sps:$4 sm:$0xff]  }
 0x754   :  { %v20152_v20 = vpop.f32.mrb[24].mxu1 }
 0x755   :  { %v9292_v48 = vpop.f32.mrb[25].mxu1 }
 0x756   :  { %v20154_v35 = vpop.f32.mrb[26].mxu1  ;;  %v15767_v48 = vld [vmem:[#allocation5 + $0x64] ss:$8 sps:$4 sm:$0xff]  }
 0x757   :  { %v9295_v45 = vpop.f32.mrb[27].mxu1 }
 0x759   :  { %9730 = vmatmul.mubr.bf16.gmra.mrb[96].mxu1 %v13764_v11  ;;  %v15769_v11 = vld [vmem:[#allocation5 + $0x60] ss:$8 sps:$4 sm:$0xff]  }
 0x75a   :  { %13801 = vmatprep.mubr.msk.bf16.mxu1 %vm7545_vm7, %v19982_v10 }
 0x761   :  { %9738 = vmatmul.mubr.bf16.gmra.mrb[100].mxu1 %v19984_v52 }
 0x762   :  { %13802 = vmatprep.mubr.msk.bf16.mxu1 %vm7545_vm7, %v19989_v22 }
 0x763   :  { %v20162_v19 = vpop.f32.mrb[28].mxu1 }
 0x764   :  { %v9300_v18 = vpop.f32.mrb[29].mxu1 }
 0x765   :  { %v20164_v2 = vpop.f32.mrb[30].mxu1  ;;  %v9805_v18 = vld [vmem:[#allocation5 + $0x70] sm:$0xff] }
 0x766   :  { %v9303_v53 = vpop.f32.mrb[31].mxu1 }
 0x767   :  { %v13843_v53 = vcombine.high %v9805_v18, %v19896_v50 }
 0x769   :  { %9746 = vmatmul.mubr.bf16.gmra.mrb[104].mxu1 %v19991_v6 }
 0x76a   :  { %13803 = vmatprep.mubr.msk.bf16.mxu1 %vm7545_vm7, %v19996_v61 }
 0x771   :  { %9754 = vmatmul.mubr.bf16.gmra.mrb[108].mxu1 %v19998_v34 }
 0x772   :  { %13804 = vmatprep.mubr.msk.bf16.mxu1 %vm7545_vm7, %v13773_v49 }
 0x774   :  { %v20172_v17 = vpop.f32.mrb[32].mxu1 }
 0x775   :  { %v9308_v21 = vpop.f32.mrb[33].mxu1 }
 0x776   :  { %v20174_v1 = vpop.f32.mrb[34].mxu1  ;;  %v9810_v21 = vld [vmem:[#allocation5 + $0x98] sm:$0xff] }
 0x777   :  { %v9311_v29 = vpop.f32.mrb[35].mxu1 }
 0x779   :  { %9762 = vmatmul.mubr.bf16.gmra.mrb[112].mxu1 %v13772_v12 }
 0x77a   :  { %13805 = vmatprep.mubr.msk.bf16.mxu1 %vm7545_vm7, %v20014_v42 }
 0x781   :  { %9770 = vmatmul.mubr.bf16.gmra.mrb[116].mxu1 %v20016_v44 }
 0x782   :  { %13806 = vmatprep.mubr.msk.bf16.mxu1 %vm7545_vm7, %v20025_v32 }
 0x784   :  { %v20182_v30 = vpop.f32.mrb[36].mxu1 }
 0x785   :  { %v9316_v59 = vpop.f32.mrb[37].mxu1 }
 0x786   :  { %v20184_v43 = vpop.f32.mrb[38].mxu1  ;;  %v13847_v59 = vcombine.high %v19959_v63, %v9810_v21 }
 0x787   :  { %v9319_v3 = vpop.f32.mrb[39].mxu1 }
 0x788   :  { %v13846_v3 = vcombine.low %v19959_v63, %v9810_v21  ;;  %v9826_v21 = vld [vmem:[#allocation5 + $0x138] sm:$0xff] }
 0x789   :  { %9778 = vmatmul.mubr.bf16.gmra.mrb[120].mxu1 %v20027_v28 }
 0x78a   :  { %13807 = vmatprep.mubr.msk.bf16.mxu1 %vm7545_vm7, %v20036_v57 }
 0x791   :  { %9786 = vmatmul.mubr.bf16.gmra.mrb[124].mxu1 %v20038_v9 }
 0x792   :  { %13876 = vmatprep.mubr.msk.bf16.mxu1 %vm7545_vm7, %v20053_v4 }
 0x794   :  { %v20192_v26 = vpop.f32.mrb[40].mxu1 }
 0x795   :  { %v9324_v23 = vpop.f32.mrb[41].mxu1 }
 0x796   :  { %v20194_v0 = vpop.f32.mrb[42].mxu1 }
 0x797   :  { %v9327_v33 = vpop.f32.mrb[43].mxu1 }
 0x799   :  { %10149 = vmatmul.mubr.bf16.vlgmr.msra.gmra.mrb[128].mxu1 %v20064_v14  ;;  %v15766_v14 = vld [vmem:[#allocation5 + $0x40] ss:$8 sps:$4 sm:$0xff]  }
 0x79a   :  { %13877 = vmatprep.mubr.msk.bf16.mxu1 %vm7545_vm7, %v20067_v8 }
 0x7a1   :  { %10157 = vmatmul.mubr.bf16.gmra.mrb[132].mxu1 %v20083_v39 }
 0x7a2   :  { %13878 = vmatprep.mubr.msk.bf16.mxu1 %vm7545_vm7, %v20086_v58 }
 0x7a4   :  { %v20202_v62 = vpop.f32.mrb[44].mxu1 }
 0x7a5   :  { %v9332_v7 = vpop.f32.mrb[45].mxu1 }
 0x7a6   :  { %v20204_v4 = vpop.f32.mrb[46].mxu1 }
 0x7a7   :  { %v9335_v41 = vpop.f32.mrb[47].mxu1 }
 0x7a9   :  { %10165 = vmatmul.mubr.bf16.gmra.mrb[136].mxu1 %v20098_v47  ;;  %v13842_v47 = vcombine.low %v9805_v18, %v19896_v50 }
 0x7aa   :  { %13879 = vmatprep.mubr.msk.bf16.mxu1 %vm7545_vm7, %v15764_v36 }
 0x7b1   :  { %10173 = vmatmul.mubr.bf16.gmra.mrb[140].mxu1 %v15766_v14 }
 0x7b2   :  { %13880 = vmatprep.mubr.msk.bf16.mxu1 %vm7545_vm7, %v15767_v48 }
 0x7b4   :  { %v20209_v8 = vpop.f32.mrb[48].mxu1 }
 0x7b5   :  { %v9340_v39 = vpop.f32.mrb[49].mxu1 }
 0x7b6   :  { %v20211_v58 = vpop.f32.mrb[50].mxu1 }
 0x7b7   :  { %v9343_v45 = vpop.f32.mrb[51].mxu1 }
 0x7b9   :  { %10181 = vmatmul.mubr.bf16.gmra.mrb[144].mxu1 %v15769_v11 }
 0x7ba   :  { %13881 = vmatprep.mubr.msk.bf16.mxu1 %vm7545_vm7, %v13843_v53 }
 0x7c1   :  { %10189 = vmatmul.mubr.bf16.gmra.mrb[148].mxu1 %v13842_v47 }
 0x7c2   :  { %13882 = vmatprep.mubr.msk.bf16.mxu1 %vm7545_vm7, %v19945_v56 }
 0x7c4   :  { %v20218_v54 = vpop.f32.mrb[52].mxu1 }
 0x7c5   :  { %v9348_v49 = vpop.f32.mrb[53].mxu1 }
 0x7c6   :  { %v20220_v29 = vpop.f32.mrb[54].mxu1 }
 0x7c7   :  { %v9351_v12 = vpop.f32.mrb[55].mxu1 }
 0x7c9   :  { %10197 = vmatmul.mubr.bf16.gmra.mrb[152].mxu1 %v19951_v13 }
 0x7ca   :  { %13883 = vmatprep.mubr.msk.bf16.mxu1 %vm7545_vm7, %v13847_v59 }
 0x7d1   :  { %10205 = vmatmul.mubr.bf16.gmra.mrb[156].mxu1 %v13846_v3 }
 0x7d2   :  { %13884 = vmatprep.mubr.msk.bf16.mxu1 %vm7545_vm7, %v19982_v10  ;;  %v9818_v10 = vld [vmem:[#allocation5 + $0xe8] sm:$0xff] }
 0x7d3   :  { %v13855_v36 = vcombine.high %v20000_v27, %v9818_v10  ;;  %v13854_v39 = vcombine.low %v20000_v27, %v9818_v10 }
 0x7d4   :  { %v20228_v50 = vpop.f32.mrb[56].mxu1 }
 0x7d5   :  { %v9356_v56 = vpop.f32.mrb[57].mxu1 }
 0x7d6   :  { %v20230_v23 = vpop.f32.mrb[58].mxu1 }
 0x7d7   :  { %v9359_v33 = vpop.f32.mrb[59].mxu1 }
 0x7d9   :  { %10213 = vmatmul.mubr.bf16.gmra.mrb[160].mxu1 %v19984_v52 }
 0x7da   :  { %13885 = vmatprep.mubr.msk.bf16.mxu1 %vm7545_vm7, %v19989_v22 }
 0x7e1   :  { %10221 = vmatmul.mubr.bf16.gmra.mrb[164].mxu1 %v19991_v6 }
 0x7e2   :  { %13886 = vmatprep.mubr.msk.bf16.mxu1 %vm7545_vm7, %v19996_v61 }
 0x7e4   :  { %v20238_v13 = vpop.f32.mrb[60].mxu1 }
 0x7e5   :  { %v9364_v63 = vpop.f32.mrb[61].mxu1 }
 0x7e6   :  { %v20240_v7 = vpop.f32.mrb[62].mxu1 }
 0x7e7   :  { %v9367_v41 = vpop.f32.mrb[63].mxu1 }
 0x7e9   :  { %10229 = vmatmul.mubr.bf16.gmra.mrb[168].mxu1 %v19998_v34 }
 0x7ea   :  { %13887 = vmatprep.mubr.msk.bf16.mxu1 %vm7545_vm7, %v13855_v36 }
 0x7ec   :  { %v9667_v52 = vpop.f32.mrb[64].mxu1 }
 0x7ed   :  { %v20246_v22 = vadd.f32 %v9667_v52, %v20020_v15  ;;  %v9669_v6 = vpop.f32.mrb[65].mxu1 }
 0x7ee   :  { %v9670_v14 = vpop.f32.mrb[66].mxu1 }
 0x7ef   :  { %v20249_v61 = vadd.f32 %v9670_v14, %v20022_v55  ;;  %v9672_v48 = vpop.f32.mrb[67].mxu1 }
 0x7f1   :  { %10237 = vmatmul.mubr.bf16.gmra.mrb[172].mxu1 %v13854_v39 }
 0x7f2   :  { %13888 = vmatprep.mubr.msk.bf16.mxu1 %vm7545_vm7, %v20014_v42 }
 0x7f4   :  { %v9675_v45 = vpop.f32.mrb[68].mxu1 }
 0x7f5   :  { %v20255_v34 = vadd.f32 %v9675_v45, %v20031_v40  ;;  %v9677_v11 = vpop.f32.mrb[69].mxu1 }
 0x7f6   :  { %v9678_v18 = vpop.f32.mrb[70].mxu1 }
 0x7f7   :  { %v20258_v15 = vadd.f32 %v9678_v18, %v20033_v38  ;;  %v9680_v53 = vpop.f32.mrb[71].mxu1 }
 0x7f9   :  { %10245 = vmatmul.mubr.bf16.gmra.mrb[176].mxu1 %v20016_v44 }
 0x7fa   :  { %13889 = vmatprep.mubr.msk.bf16.mxu1 %vm7545_vm7, %v20025_v32 }
 0x7fc   :  { %v9683_v27 = vpop.f32.mrb[72].mxu1 }
 0x7fd   :  { %v20264_v55 = vadd.f32 %v9683_v27, %v20046_v5  ;;  %v9685_v42 = vpop.f32.mrb[73].mxu1 }
 0x7fe   :  { %v9686_v47 = vpop.f32.mrb[74].mxu1 }
 0x7ff   :  { %v20267_v40 = vadd.f32 %v9686_v47, %v20048_v24  ;;  %v9688_v49 = vpop.f32.mrb[75].mxu1  ;;  %v13863_v24 = vcombine.high %v20040_v16, %v9826_v21 }
 0x801   :  { %10253 = vmatmul.mubr.bf16.gmra.mrb[180].mxu1 %v20027_v28 }
 0x802   :  { %13890 = vmatprep.mubr.msk.bf16.mxu1 %vm7545_vm7, %v20036_v57 }
 0x804   :  { %v9691_v38 = vpop.f32.mrb[76].mxu1 }
 0x805   :  { %v20273_v44 = vadd.f32 %v9691_v38, %v20072_v31  ;;  %v9693_v32 = vpop.f32.mrb[77].mxu1 }
 0x806   :  { %v9694_v12 = vpop.f32.mrb[78].mxu1 }
 0x807   :  { %v20276_v5 = vadd.f32 %v9694_v12, %v20078_v25  ;;  %v9696_v59 = vpop.f32.mrb[79].mxu1  ;;  %v13862_v25 = vcombine.low %v20040_v16, %v9826_v21 }
 0x809   :  { %10261 = vmatmul.mubr.bf16.gmra.mrb[184].mxu1 %v20038_v9 }
 0x80a   :  { %13891 = vmatprep.mubr.msk.bf16.mxu1 %vm7545_vm7, %v13863_v24 }
 0x80c   :  { %v9699_v28 = vpop.f32.mrb[80].mxu1 }
 0x80d   :  { %v20282_v57 = vadd.f32 %v9699_v28, %v20108_v51  ;;  %v9701_v3 = vpop.f32.mrb[81].mxu1 }
 0x80e   :  { %v9702_v31 = vpop.f32.mrb[82].mxu1 }
 0x80f   :  { %v20285_v56 = vadd.f32 %v9702_v31, %v20110_v37  ;;  %v9704_v33 = vpop.f32.mrb[83].mxu1 }
 0x811   :  { %10269 = vmatmul.mubr.bf16.gmra.mrb[188].mxu1 %v13862_v25 }
 0x814   :  { %v9707_v63 = vpop.f32.mrb[84].mxu1 }
 0x815   :  { %v20289_v10 = vadd.f32 %v9707_v63, %v20140_v60  ;;  %v9709_v9 = vpop.f32.mrb[85].mxu1 }
 0x816   :  { %v9710_v41 = vpop.f32.mrb[86].mxu1 }
 0x817   :  { %v20292_v36 = vadd.f32 %v9710_v41, %v20142_v46  ;;  %v9712_v51 = vpop.f32.mrb[87].mxu1 }
 0x81c   :  { %v9715_v52 = vpop.f32.mrb[88].mxu1 }
 0x81d   :  { %v20295_v6 = vadd.f32 %v9715_v52, %v20152_v20  ;;  %v9717_v37 = vpop.f32.mrb[89].mxu1 }
 0x81e   :  { %v9718_v14 = vpop.f32.mrb[90].mxu1 }
 0x81f   :  { %v20298_v48 = vadd.f32 %v9718_v14, %v20154_v35  ;;  %v9720_v16 = vpop.f32.mrb[91].mxu1 }
 0x824   :  { %v9723_v39 = vpop.f32.mrb[92].mxu1 }
 0x825   :  { %v20301_v60 = vadd.f32 %v9723_v39, %v20162_v19  ;;  %v9725_v45 = vpop.f32.mrb[93].mxu1 }
 0x826   :  { %v9726_v11 = vpop.f32.mrb[94].mxu1 }
 0x827   :  { %v20304_v46 = vadd.f32 %v9726_v11, %v20164_v2  ;;  %v9728_v18 = vpop.f32.mrb[95].mxu1 }
 0x82c   :  { %v9731_v53 = vpop.f32.mrb[96].mxu1 }
 0x82d   :  { %v20307_v20 = vadd.f32 %v9731_v53, %v20172_v17  ;;  %v9733_v27 = vpop.f32.mrb[97].mxu1 }
 0x82e   :  { %v9734_v42 = vpop.f32.mrb[98].mxu1 }
 0x82f   :  { %v20310_v35 = vadd.f32 %v9734_v42, %v20174_v1  ;;  %v9736_v47 = vpop.f32.mrb[99].mxu1 }
 0x834   :  { %v9739_v49 = vpop.f32.mrb[100].mxu1 }
 0x835   :  { %v20313_v19 = vadd.f32 %v9739_v49, %v20182_v30  ;;  %v9741_v38 = vpop.f32.mrb[101].mxu1 }
 0x836   :  { %v9742_v32 = vpop.f32.mrb[102].mxu1 }
 0x837   :  { %v20316_v2 = vadd.f32 %v9742_v32, %v20184_v43  ;;  %v9744_v21 = vpop.f32.mrb[103].mxu1 }
 0x83c   :  { %v9747_v12 = vpop.f32.mrb[104].mxu1 }
 0x83d   :  { %v20319_v17 = vadd.f32 %v9747_v12, %v20192_v26  ;;  %v9749_v59 = vpop.f32.mrb[105].mxu1 }
 0x83e   :  { %v9750_v24 = vpop.f32.mrb[106].mxu1 }
 0x83f   :  { %v20322_v1 = vadd.f32 %v9750_v24, %v20194_v0  ;;  %v9752_v28 = vpop.f32.mrb[107].mxu1 }
 0x844   :  { %v9755_v3 = vpop.f32.mrb[108].mxu1 }
 0x845   :  { %v20325_v30 = vadd.f32 %v9755_v3, %v20202_v62  ;;  %v9757_v31 = vpop.f32.mrb[109].mxu1 }
 0x846   :  { %v9758_v33 = vpop.f32.mrb[110].mxu1 }
 0x847   :  { %v20328_v43 = vadd.f32 %v9758_v33, %v20204_v4  ;;  %v9760_v25 = vpop.f32.mrb[111].mxu1 }
 0x84c   :  { %v9763_v63 = vpop.f32.mrb[112].mxu1 }
 0x84d   :  { %v20331_v26 = vadd.f32 %v9763_v63, %v20209_v8  ;;  %v9765_v9 = vpop.f32.mrb[113].mxu1 }
 0x84e   :  { %v9766_v41 = vpop.f32.mrb[114].mxu1 }
 0x84f   :  { %v20334_v0 = vadd.f32 %v9766_v41, %v20211_v58  ;;  %v9768_v51 = vpop.f32.mrb[115].mxu1 }
 0x854   :  { %v9771_v52 = vpop.f32.mrb[116].mxu1 }
 0x855   :  { %v20337_v62 = vadd.f32 %v9771_v52, %v20218_v54  ;;  %v9773_v37 = vpop.f32.mrb[117].mxu1 }
 0x856   :  { %v9774_v14 = vpop.f32.mrb[118].mxu1 }
 0x857   :  { %v20340_v4 = vadd.f32 %v9774_v14, %v20220_v29  ;;  %v9776_v16 = vpop.f32.mrb[119].mxu1 }
 0x85c   :  { %v9779_v39 = vpop.f32.mrb[120].mxu1 }
 0x85d   :  { %v20343_v8 = vadd.f32 %v9779_v39, %v20228_v50  ;;  %v9781_v45 = vpop.f32.mrb[121].mxu1  ;;  %v20357_v50 = vld [vmem:[%s21516_s6] ss:$0 sm:$0xff] }
 0x85e   :  { %v9782_v11 = vpop.f32.mrb[122].mxu1 }
 0x85f   :  { %v20346_v58 = vadd.f32 %v9782_v11, %v20230_v23  ;;  %v9784_v18 = vpop.f32.mrb[123].mxu1 }
 0x864   :  { %v9787_v53 = vpop.f32.mrb[124].mxu1 }
 0x865   :  { %v20349_v54 = vadd.f32 %v9787_v53, %v20238_v13  ;;  %v9789_v27 = vpop.f32.mrb[125].mxu1 }
 0x866   :  { %v9790_v42 = vpop.f32.mrb[126].mxu1 }
 0x867   :  { %v20352_v29 = vadd.f32 %v9790_v42, %v20240_v7  ;;  %v9792_v47 = vpop.f32.mrb[127].mxu1 }
 0x86c   :  { %v10150_v49 = vpop.f32.mrb[128].mxu1 }
 0x86d   :  { %v10277_v23 = vadd.f32 %v10150_v49, %v20246_v22  ;;  %v10152_v38 = vpop.f32.mrb[129].mxu1 }
 0x86e   :  { %v10153_v32 = vpop.f32.mrb[130].mxu1 }
 0x86f   :  { %v10316_v21 = vadd.f32 %v20357_v50, %v10277_v23  ;;  %v10278_v13 = vadd.f32 %v10153_v32, %v20249_v61  ;;  %v10155_v12 = vpop.f32.mrb[131].mxu1 }
 0x871   :  { %v10348_v59 = vmax.f32 %v10316_v21, 0.0  ;;  %v10317_v7 = vadd.f32 %v20357_v50, %v10278_v13 }
 0x873   :  { %v10349_v24 = vmax.f32 %v10317_v7, 0.0  ;;  %v10380_v3 = vsel %vm7545_vm7, %v10348_v59, -inf  ;;  %v15774_v59 = vld [vmem:[%s21517_s7 + $0x204] ss:$16 sps:$4 sm:$0xff]  }
 0x874   :  { %v10158_v28 = vpop.f32.mrb[132].mxu1  ;;  %11193 = vmatprep.subr.bf16.mxu1 %v15774_v59 }
 0x875   :  { %v10381_v31 = vsel %vm7545_vm7, %v10349_v24, -inf  ;;  %v10279_v33 = vadd.f32 %v10158_v28, %v20255_v34  ;;  %v10160_v25 = vpop.f32.mrb[133].mxu1 }
 0x876   :  { %v10382_v22 = vmax.f32 %v10380_v3, %v10381_v31  ;;  %v10161_v63 = vpop.f32.mrb[134].mxu1 }
 0x877   :  { %v10318_v9 = vadd.f32 %v20357_v50, %v10279_v33  ;;  %v10280_v41 = vadd.f32 %v10161_v63, %v20258_v15  ;;  %v10163_v61 = vpop.f32.mrb[135].mxu1  ;;  %v15775_v33 = vld [vmem:[%s21517_s7 + $0x220] ss:$16 sps:$4 sm:$0xff]  }
 0x878   :  { %10428 = vst.msk [vmem:[#allocation6] sm:$0xff] %vm7545_vm7, %v10382_v22 }
 0x879   :  { %v10350_v51 = vmax.f32 %v10318_v9, 0.0  ;;  %v10319_v52 = vadd.f32 %v20357_v50, %v10280_v41 }
 0x87b   :  { %v10351_v37 = vmax.f32 %v10319_v52, 0.0  ;;  %v10383_v16 = vsel %vm7545_vm7, %v10350_v51, -inf }
 0x87c   :  { %v10166_v14 = vpop.f32.mrb[136].mxu1 }
 0x87d   :  { %v10384_v39 = vsel %vm7545_vm7, %v10351_v37, -inf  ;;  %v10281_v34 = vadd.f32 %v10166_v14, %v20264_v55  ;;  %v10168_v45 = vpop.f32.mrb[137].mxu1 }
 0x87e   :  { %v10385_v11 = vmax.f32 %v10383_v16, %v10384_v39  ;;  %v10169_v18 = vpop.f32.mrb[138].mxu1 }
 0x87f   :  { %v10320_v53 = vadd.f32 %v20357_v50, %v10281_v34  ;;  %v10282_v15 = vadd.f32 %v10169_v18, %v20267_v40  ;;  %v10171_v27 = vpop.f32.mrb[139].mxu1  ;;  %v15772_v40 = vld [vmem:[%s21517_s7 + $0x200] ss:$16 sps:$4 sm:$0xff]   ;;  %v16234_v34 = vmov 1983009808  }
 0x880   :  { %10429 = vst.msk [vmem:[#allocation6 + $0x8] sm:$0xff] %vm7545_vm7, %v10385_v11  ;;  %11194 = vmatpush1.bf16.msra.mxu1 %v15772_v40  ;;  %v10569_v45 = vunpack.c.l.s4 %v16234_v34  ;;  %v15780_v40 = vld [vmem:[%s21517_s7 + $0x244] ss:$16 sps:$4 sm:$0xff]  }
 0x881   :  { %v10352_v42 = vmax.f32 %v10320_v53, 0.0  ;;  %v10321_v47 = vadd.f32 %v20357_v50, %v10282_v15  ;;  %v10571_v53 = vlaneseq  ;;  %v10476_v15 = vld [vmem:[#allocation6 + $0x1] ss:$2 sm:$0xf] }
 0x883   :  { %v10353_v49 = vmax.f32 %v10321_v47, 0.0  ;;  %v10386_v38 = vsel %vm7545_vm7, %v10352_v42, -inf }
 0x884   :  { %v10174_v23 = vpop.f32.mrb[140].mxu1 }
 0x885   :  { %v10387_v32 = vsel %vm7545_vm7, %v10353_v49, -inf  ;;  %v10283_v55 = vadd.f32 %v10174_v23, %v20273_v44  ;;  %v10176_v21 = vpop.f32.mrb[141].mxu1  ;;  %v15777_v44 = vld [vmem:[%s21517_s7 + $0x224] ss:$16 sps:$4 sm:$0xff]  }
 0x886   :  { %v10388_v13 = vmax.f32 %v10386_v38, %v10387_v32  ;;  %v10177_v12 = vpop.f32.mrb[142].mxu1  ;;  %11195 = vmatprep.subr.bf16.mxu1 %v15777_v44 }
 0x887   :  { %v10322_v7 = vadd.f32 %v20357_v50, %v10283_v55  ;;  %v10284_v24 = vadd.f32 %v10177_v12, %v20276_v5  ;;  %v10179_v28 = vpop.f32.mrb[143].mxu1  ;;  %11196 = vmatpush1.bf16.msra.mxu1 %v15775_v33  ;;  %v10446_v11 = vld [vmem:[#allocation6 + $0x8] ss:$2 sm:$0xf]  ;;  %v15778_v12 = vld [vmem:[%s21517_s7 + $0x240] ss:$16 sps:$4 sm:$0xff]  }
 0x888   :  { %10430 = vst.msk [vmem:[#allocation6 + $0x10] sm:$0xff] %vm7545_vm7, %v10388_v13  ;;  %v10478_v27 = vld [vmem:[#allocation6 + $0x9] ss:$2 sm:$0xf]  ;;  %v10570_v13 = vunpack.c.0.s8 %v10569_v45  ;;  %11197 = vmatprep.subr.bf16.mxu1 %v15780_v40  ;;  %v15783_v33 = vld [vmem:[%s21517_s7 + $0x264] ss:$16 sps:$4 sm:$0xff]  }
 0x889   :  { %v10354_v3 = vmax.f32 %v10322_v7, 0.0  ;;  %v10323_v31 = vadd.f32 %v20357_v50, %v10284_v24  ;;  %v10508_v44 = vmax.f32 %v10446_v11, %v10478_v27 }
 0x88b   :  { %v10355_v25 = vmax.f32 %v10323_v31, 0.0  ;;  %v10389_v5 = vsel %vm7545_vm7, %v10354_v3, -inf  ;;  %11198 = vmatpush1.bf16.msra.mxu1 %v15778_v12 }
 0x88c   :  { %v10182_v22 = vpop.f32.mrb[144].mxu1  ;;  %11199 = vmatprep.subr.bf16.mxu1 %v15783_v33 }
 0x88d   :  { %v10390_v63 = vsel %vm7545_vm7, %v10355_v25, -inf  ;;  %v10285_v9 = vadd.f32 %v10182_v22, %v20282_v57  ;;  %v10184_v41 = vpop.f32.mrb[145].mxu1  ;;  %v10444_v57 = vld [vmem:[#allocation6] ss:$2 sm:$0xf] }
 0x88e   :  { %v10391_v61 = vmax.f32 %v10389_v5, %v10390_v63  ;;  %v10185_v51 = vpop.f32.mrb[146].mxu1  ;;  %v10507_v31 = vmax.f32 %v10444_v57, %v10476_v15  ;;  %v15789_v15 = vld [vmem:[%s21517_s7 + $0x2a4] ss:$16 sps:$4 sm:$0xff]  }
 0x88f   :  { %v10324_v52 = vadd.f32 %v20357_v50, %v10285_v9  ;;  %v10286_v37 = vadd.f32 %v10185_v51, %v20285_v56  ;;  %v10187_v14 = vpop.f32.mrb[147].mxu1  ;;  %v10448_v47 = vld [vmem:[#allocation6 + $0x10] ss:$2 sm:$0xf] }
 0x890   :  { %10431 = vst.msk [vmem:[#allocation6 + $0x18] sm:$0xff] %vm7545_vm7, %v10391_v61  ;;  %v10480_v32 = vld [vmem:[#allocation6 + $0x11] ss:$2 sm:$0xf] }
 0x891   :  { %v10356_v16 = vmax.f32 %v10324_v52, 0.0  ;;  %v10325_v39 = vadd.f32 %v20357_v50, %v10286_v37  ;;  %v10509_v5 = vmax.f32 %v10448_v47, %v10480_v32  ;;  %v15786_v9 = vld [vmem:[%s21517_s7 + $0x284] ss:$16 sps:$4 sm:$0xff]   ;;  %v10539_v52 = vcombine.low %v10507_v31, %v10508_v44 }
 0x893   :  { %v10357_v18 = vmax.f32 %v10325_v39, 0.0  ;;  %v10392_v49 = vsel %vm7545_vm7, %v10356_v16, -inf }
 0x894   :  { %v10190_v42 = vpop.f32.mrb[148].mxu1 }
 0x895   :  { %v10393_v56 = vsel %vm7545_vm7, %v10357_v18, -inf  ;;  %v10287_v23 = vadd.f32 %v10190_v42, %v20289_v10  ;;  %v10192_v38 = vpop.f32.mrb[149].mxu1  ;;  %v20414_v10 = vshrl.u32 %v10571_v53, 7  ;;  %v15784_v18 = vld [vmem:[%s21517_s7 + $0x280] ss:$16 sps:$4 sm:$0xff]  }
 0x896   :  { %v10394_v55 = vmax.f32 %v10392_v49, %v10393_v56  ;;  %v10193_v21 = vpop.f32.mrb[150].mxu1 }
 0x897   :  { %v10326_v59 = vadd.f32 %v20357_v50, %v10287_v23  ;;  %v10288_v7 = vadd.f32 %v10193_v21, %v20292_v36  ;;  %v10195_v24 = vpop.f32.mrb[151].mxu1  ;;  %v10450_v28 = vld [vmem:[#allocation6 + $0x18] ss:$2 sm:$0xf]  ;;  %v15781_v36 = vld [vmem:[%s21517_s7 + $0x260] ss:$16 sps:$4 sm:$0xff]   ;;  %v20428_v51 = vsub.s32 %v10570_v13, %v20414_v10 }
 0x898   :  { %10432 = vst.msk [vmem:[#allocation6 + $0x20] sm:$0xff] %vm7545_vm7, %v10394_v55  ;;  %v10482_v3 = vld [vmem:[#allocation6 + $0x19] ss:$2 sm:$0xf]  ;;  %11200 = vmatpush1.bf16.msra.mxu1 %v15781_v36 }
 0x899   :  { %v10358_v25 = vmax.f32 %v10326_v59, 0.0  ;;  %v10327_v22 = vadd.f32 %v20357_v50, %v10288_v7  ;;  %v10510_v63 = vmax.f32 %v10450_v28, %v10482_v3  ;;  %11201 = vmatprep.subr.bf16.mxu1 %v15786_v9 }
 0x89b   :  { %v10359_v41 = vmax.f32 %v10327_v22, 0.0  ;;  %v10540_v61 = vcombine.low %v10509_v5, %v10510_v63  ;;  %v10395_v37 = vsel %vm7545_vm7, %v10358_v25, -inf }
 0x89c   :  { %v10198_v14 = vpop.f32.mrb[152].mxu1  ;;  %11202 = vmatpush1.bf16.msra.mxu1 %v15784_v18 }
 0x89d   :  { %v10396_v16 = vsel %vm7545_vm7, %v10359_v41, -inf  ;;  %v10289_v39 = vadd.f32 %v10198_v14, %v20295_v6  ;;  %v10200_v34 = vpop.f32.mrb[153].mxu1  ;;  %v13893_v45 = vpack.c.bf16 %v10540_v61, %v10540_v61  ;;  %v10555_v11 = vpack.c.bf16 %v10540_v61, %v10539_v52  ;;  %11203 = vmatprep.subr.bf16.mxu1 %v15789_v15 }
 0x89e   :  { %v10397_v53 = vmax.f32 %v10395_v37, %v10396_v16  ;;  %v10201_v57 = vpop.f32.mrb[154].mxu1 }
 0x89f   :  { %v10328_v27 = vadd.f32 %v20357_v50, %v10289_v39  ;;  %v10290_v42 = vadd.f32 %v10201_v57, %v20298_v48  ;;  %v10203_v6 = vpop.f32.mrb[155].mxu1  ;;  %v10624_v47 = vrot.slane %v13893_v45, %v20428_v51  ;;  %v10574_v49 = vrot.slane %v10555_v11, %v20428_v51  ;;  %10560 = vst.msk [vmem:[#allocation7] sm:$0x3] %vm10559_vm12, %v10555_v11  ;;  %v15787_v48 = vld [vmem:[%s21517_s7 + $0x2a0] ss:$16 sps:$4 sm:$0xff]  }
 0x8a0   :  { %10433 = vst.msk [vmem:[#allocation6 + $0x28] sm:$0xff] %vm7545_vm7, %v10397_v53  ;;  %11204 = vmatpush1.bf16.msra.mxu1 %v15787_v48  ;;  %v10452_v34 = vld [vmem:[#allocation6 + $0x20] ss:$2 sm:$0xf] }
 0x8a1   :  { %v10360_v56 = vmax.f32 %v10328_v27, 0.0  ;;  %v10329_v23 = vadd.f32 %v20357_v50, %v10290_v42  ;;  %v10657_v38 = vcombine.high %v10624_v47, %v10624_v47  ;;  %v10575_v32 = vcombine.high %v10574_v49, %v10574_v49  ;;  %10653 = vst.msk [vmem:[#allocation7 + $0x2] sm:$0x3] %vm10559_vm12, %v10624_v47  ;;  %v10484_v45 = vld [vmem:[#allocation6 + $0x21] ss:$2 sm:$0xf] }
 0x8a2   :  { %v15790_v47 = vld [vmem:[%s21517_s7 + $0x2c0] ss:$16 sps:$4 sm:$0xff]   ;;  %v15792_v49 = vld [vmem:[%s21517_s7 + $0x2c4] ss:$16 sps:$4 sm:$0xff]  }
 0x8a3   :  { %v10361_v55 = vmax.f32 %v10329_v23, 0.0  ;;  %10661 = vrot.lane.b32.xlu1 %v10657_v38, %s16233_s22  ;;  %10600 = vrot.lane.b32.xlu0 %v10575_v32, %s16233_s22  ;;  %v10398_v13 = vsel %vm7545_vm7, %v10360_v56, -inf }
 0x8a4   :  { %v10206_v21 = vpop.f32.mrb[156].mxu1  ;;  %11205 = vmatprep.subr.bf16.mxu1 %v15792_v49 }
 0x8a5   :  { %v10399_v12 = vsel %vm7545_vm7, %v10361_v55, -inf  ;;  %v10291_v40 = vadd.f32 %v10206_v21, %v20301_v60  ;;  %v10208_v59 = vpop.f32.mrb[157].mxu1  ;;  %v10511_v21 = vmax.f32 %v10452_v34, %v10484_v45  ;;  %11206 = vmatpush1.bf16.msra.mxu1 %v15790_v47 }
 0x8a6   :  { %v10400_v7 = vmax.f32 %v10398_v13, %v10399_v12  ;;  %v10209_v24 = vpop.f32.mrb[158].mxu1  ;;  %v15795_v13 = vld [vmem:[%s21517_s7 + $0x2e4] ss:$16 sps:$4 sm:$0xff]  }
 0x8a7   :  { %v10330_v28 = vadd.f32 %v20357_v50, %v10291_v40  ;;  %v10292_v44 = vadd.f32 %v10209_v24, %v20304_v46  ;;  %v10211_v3 = vpop.f32.mrb[159].mxu1  ;;  %v10454_v16 = vld [vmem:[#allocation6 + $0x28] ss:$2 sm:$0xf]  ;;  %v15798_v24 = vld [vmem:[%s21517_s7 + $0x604] ss:$16 sps:$4 sm:$0xff]   ;;  %11207 = vmatprep.subr.bf16.mxu1 %v15795_v13 }
 0x8a8   :  { %10434 = vst.msk [vmem:[#allocation6 + $0x30] sm:$0xff] %vm7545_vm7, %v10400_v7  ;;  %v10486_v11 = vld [vmem:[#allocation6 + $0x29] ss:$2 sm:$0xf]  ;;  %v15796_v7 = vld [vmem:[%s21517_s7 + $0x600] ss:$16 sps:$4 sm:$0xff]   ;;  %12677 = vmatprep.subr.bf16.mxu0 %v15798_v24 }
 0x8a9   :  { %v10362_v31 = vmax.f32 %v10330_v28, 0.0  ;;  %v10331_v33 = vadd.f32 %v20357_v50, %v10292_v44  ;;  %v10512_v48 = vmax.f32 %v10454_v16, %v10486_v11  ;;  %v15801_v28 = vld [vmem:[%s21517_s7 + $0x304] ss:$16 sps:$4 sm:$0xff]   ;;  %12678 = vmatpush1.bf16.msra.mxu0 %v15796_v7  ;;  %v15805_v11 = vld [vmem:[%s21517_s7 + $0x640] ss:$16 sps:$4 sm:$0xff]  }
 0x8ab   :  { %v10363_v25 = vmax.f32 %v10331_v33, 0.0  ;;  %v10401_v5 = vsel %vm7545_vm7, %v10362_v31, -inf  ;;  %v10541_v3 = vcombine.low %v10511_v21, %v10512_v48  ;;  %v15804_v33 = vld [vmem:[%s21517_s7 + $0x624] ss:$16 sps:$4 sm:$0xff]  }
 0x8ac   :  { %v10214_v22 = vpop.f32.mrb[160].mxu1  ;;  %12679 = vmatprep.subr.bf16.mxu0 %v15804_v33 }
 0x8ad   :  { %v10402_v60 = vsel %vm7545_vm7, %v10363_v25, -inf  ;;  %v10293_v63 = vadd.f32 %v10214_v22, %v20307_v20  ;;  %v10216_v36 = vpop.f32.mrb[161].mxu1 }
 0x8ae   :  { %v10403_v9 = vmax.f32 %v10401_v5, %v10402_v60  ;;  %v10217_v41 = vpop.f32.mrb[162].mxu1  ;;  %v15802_v5 = vld [vmem:[%s21517_s7 + $0x620] ss:$16 sps:$4 sm:$0xff]  }
 0x8af   :  { %v10332_v61 = vadd.f32 %v20357_v50, %v10293_v63  ;;  %v10294_v46 = vadd.f32 %v10217_v41, %v20310_v35  ;;  %v10219_v52 = vpop.f32.mrb[163].mxu1  ;;  %v10456_v20 = vld [vmem:[#allocation6 + $0x30] ss:$2 sm:$0xf]  ;;  %12680 = vmatpush1.bf16.msra.mxu0 %v15802_v5 }
 0x8b0   :  { %10435 = vst.msk [vmem:[#allocation6 + $0x38] sm:$0xff] %vm7545_vm7, %v10403_v9  ;;  %v10488_v27 = vld [vmem:[#allocation6 + $0x31] ss:$2 sm:$0xf] }
 0x8b1   :  { %v10364_v37 = vmax.f32 %v10332_v61, 0.0  ;;  %v10333_v14 = vadd.f32 %v20357_v50, %v10294_v46  ;;  %v15799_v61 = vld [vmem:[%s21517_s7 + $0x300] ss:$16 sps:$4 sm:$0xff]   ;;  %v15807_v46 = vld [vmem:[%s21517_s7 + $0x644] ss:$16 sps:$4 sm:$0xff]  }
 0x8b2   :  { %12681 = vmatprep.subr.bf16.mxu0 %v15807_v46  ;;  %v15813_v46 = vld [vmem:[%s21517_s7 + $0x664] ss:$16 sps:$4 sm:$0xff]  }
 0x8b3   :  { %v10365_v39 = vmax.f32 %v10333_v14, 0.0  ;;  %v10404_v53 = vsel %vm7545_vm7, %v10364_v37, -inf  ;;  %12682 = vmatpush1.bf16.msra.mxu0 %v15805_v11 }
 0x8b4   :  { %v10222_v18 = vpop.f32.mrb[164].mxu1  ;;  %12683 = vmatprep.subr.bf16.mxu0 %v15813_v46 }
 0x8b5   :  { %v10405_v57 = vsel %vm7545_vm7, %v10365_v39, -inf  ;;  %v10295_v15 = vadd.f32 %v10222_v18, %v20313_v19  ;;  %v10224_v35 = vpop.f32.mrb[165].mxu1  ;;  %v15793_v19 = vld [vmem:[%s21517_s7 + $0x2e0] ss:$16 sps:$4 sm:$0xff]  }
 0x8b6   :  { %v10406_v42 = vmax.f32 %v10404_v53, %v10405_v57  ;;  %v10225_v6 = vpop.f32.mrb[166].mxu1  ;;  %11208 = vmatpush1.bf16.msra.mxu1 %v15793_v19 }
 0x8b7   :  { %v10334_v56 = vadd.f32 %v20357_v50, %v10295_v15  ;;  %v10296_v23 = vadd.f32 %v10225_v6, %v20316_v2  ;;  %v10227_v38 = vpop.f32.mrb[167].mxu1  ;;  %v10458_v32 = vld [vmem:[#allocation6 + $0x38] ss:$2 sm:$0xf]  ;;  %v10513_v2 = vmax.f32 %v10456_v20, %v10488_v27  ;;  %11209 = vmatprep.subr.bf16.mxu1 %v15801_v28 }
 0x8b8   :  { %10436 = vst.msk [vmem:[#allocation6 + $0x40] sm:$0xff] %vm7545_vm7, %v10406_v42  ;;  %v10490_v55 = vld [vmem:[#allocation6 + $0x39] ss:$2 sm:$0xf] }
 0x8b9   :  { %v10366_v12 = vmax.f32 %v10334_v56, 0.0  ;;  %v10335_v40 = vadd.f32 %v20357_v50, %v10296_v23  ;;  %v10514_v59 = vmax.f32 %v10458_v32, %v10490_v55 }
 0x8ba   :  { %11210 = vmatpush1.bf16.msra.mxu1 %v15799_v61  ;;  %v15811_v61 = vld [vmem:[%s21517_s7 + $0x660] ss:$16 sps:$4 sm:$0xff]  }
 0x8bb   :  { %v10367_v44 = vmax.f32 %v10335_v40, 0.0  ;;  %v10542_v31 = vcombine.low %v10513_v2, %v10514_v59  ;;  %v10407_v25 = vsel %vm7545_vm7, %v10366_v12, -inf  ;;  %12684 = vmatpush1.bf16.msra.mxu0 %v15811_v61  ;;  %v15834_v61 = vld [vmem:[%s21517_s7 + $0x704] ss:$16 sps:$4 sm:$0xff]  }
 0x8bc   :  { %v10230_v22 = vpop.f32.mrb[168].mxu1 }
 0x8bd   :  { %v10408_v60 = vsel %vm7545_vm7, %v10367_v44, -inf  ;;  %v10297_v63 = vadd.f32 %v10230_v22, %v20319_v17  ;;  %v10232_v36 = vpop.f32.mrb[169].mxu1  ;;  %v10556_v9 = vpack.c.bf16 %v10542_v31, %v10541_v3  ;;  %v13894_v41 = vpack.c.bf16 %v10542_v31, %v10542_v31  ;;  %v15810_v17 = vld [vmem:[%s21517_s7 + $0x324] ss:$16 sps:$4 sm:$0xff]  }
 0x8be   :  { %v10409_v52 = vmax.f32 %v10407_v25, %v10408_v60  ;;  %v10233_v37 = vpop.f32.mrb[170].mxu1  ;;  %11211 = vmatprep.subr.bf16.mxu1 %v15810_v17 }
 0x8bf   :  { %v10336_v14 = vadd.f32 %v20357_v50, %v10297_v63  ;;  %v10298_v16 = vadd.f32 %v10233_v37, %v20322_v1  ;;  %v10235_v39 = vpop.f32.mrb[171].mxu1  ;;  %v10582_v34 = vrot.slane %v10556_v9, %v20428_v51  ;;  %v20516_v45 = vrot.slane %v13894_v41, %v20428_v51  ;;  %10561 = vst.msk [vmem:[#allocation7 + $0x4] sm:$0x3] %vm10559_vm12, %v10556_v9  ;;  %v15808_v1 = vld [vmem:[%s21517_s7 + $0x320] ss:$16 sps:$4 sm:$0xff]  }
 0x8c0   :  { %10437 = vst.msk [vmem:[#allocation6 + $0x48] sm:$0xff] %vm7545_vm7, %v10409_v52  ;;  %11212 = vmatpush1.bf16.msra.mxu1 %v15808_v1  ;;  %v10460_v31 = vld [vmem:[#allocation6 + $0x40] ss:$2 sm:$0xf] }
 0x8c1   :  { %v10368_v18 = vmax.f32 %v10336_v14, 0.0  ;;  %v10337_v20 = vadd.f32 %v20357_v50, %v10298_v16  ;;  %v10583_v53 = vcombine.high %v10582_v34, %v10582_v34  ;;  %10654 = vst.msk [vmem:[#allocation7 + $0x6] sm:$0x3] %vm10559_vm12, %v20516_v45  ;;  %v10492_v33 = vld [vmem:[#allocation6 + $0x41] ss:$2 sm:$0xf] }
 0x8c2   :  { %v10515_v39 = vmax.f32 %v10460_v31, %v10492_v33  ;;  %v15817_v1 = vld [vmem:[%s21517_s7 + $0x340] ss:$16 sps:$4 sm:$0xff]   ;;  %v15837_v31 = vld [vmem:[%s21517_s7 + $0x384] ss:$16 sps:$4 sm:$0xff]  }
 0x8c3   :  { %v10369_v57 = vmax.f32 %v10337_v20, 0.0  ;;  %10602 = vrot.lane.b32.xlu0 %v10583_v53, %s16233_s22  ;;  %v10410_v35 = vsel %vm7545_vm7, %v10368_v18, -inf  ;;  %v15814_v53 = vld [vmem:[%s21517_s7 + $0x680] ss:$16 sps:$4 sm:$0xff]  }
 0x8c4   :  { %v10238_v15 = vpop.f32.mrb[172].mxu1 }
 0x8c5   :  { %v10411_v27 = vsel %vm7545_vm7, %v10369_v57, -inf  ;;  %v10299_v42 = vadd.f32 %v10238_v15, %v20325_v30  ;;  %v10240_v6 = vpop.f32.mrb[173].mxu1 }
 0x8c6   :  { %v10412_v47 = vmax.f32 %v10410_v35, %v10411_v27  ;;  %v10241_v49 = vpop.f32.mrb[174].mxu1  ;;  %v15819_v27 = vld [vmem:[%s21517_s7 + $0x344] ss:$16 sps:$4 sm:$0xff]  }
 0x8c7   :  { %v10338_v56 = vadd.f32 %v20357_v50, %v10299_v42  ;;  %v10300_v23 = vadd.f32 %v10241_v49, %v20328_v43  ;;  %v10243_v38 = vpop.f32.mrb[175].mxu1  ;;  %v10462_v44 = vld [vmem:[#allocation6 + $0x48] ss:$2 sm:$0xf]  ;;  %11213 = vmatprep.subr.bf16.mxu1 %v15819_v27  ;;  %v15849_v27 = vld [vmem:[%s21517_s7 + $0x764] ss:$16 sps:$4 sm:$0xff]  }
 0x8c8   :  { %10438 = vst.msk [vmem:[#allocation6 + $0x50] sm:$0xff] %vm7545_vm7, %v10412_v47  ;;  %v10494_v25 = vld [vmem:[#allocation6 + $0x49] ss:$2 sm:$0xf]  ;;  %v15822_v47 = vld [vmem:[%s21517_s7 + $0x6a4] ss:$16 sps:$4 sm:$0xff]   ;;  %11214 = vmatpush1.bf16.msra.mxu1 %v15817_v1 }
 0x8c9   :  { %v10370_v32 = vmax.f32 %v10338_v56, 0.0  ;;  %v10339_v48 = vadd.f32 %v20357_v50, %v10300_v23  ;;  %v10516_v16 = vmax.f32 %v10462_v44, %v10494_v25  ;;  %v15831_v44 = vld [vmem:[%s21517_s7 + $0x6e4] ss:$16 sps:$4 sm:$0xff]  }
 0x8cb   :  { %v10371_v19 = vmax.f32 %v10339_v48, 0.0  ;;  %v10413_v21 = vsel %vm7545_vm7, %v10370_v32, -inf  ;;  %v10543_v35 = vcombine.low %v10515_v39, %v10516_v16  ;;  %v15820_v48 = vld [vmem:[%s21517_s7 + $0x6a0] ss:$16 sps:$4 sm:$0xff]   ;;  %v15840_v16 = vld [vmem:[%s21517_s7 + $0x724] ss:$16 sps:$4 sm:$0xff]  }
 0x8cc   :  { %v10246_v55 = vpop.f32.mrb[176].mxu1 }
 0x8cd   :  { %v10414_v30 = vsel %vm7545_vm7, %v10371_v19, -inf  ;;  %v10301_v13 = vadd.f32 %v10246_v55, %v20331_v26  ;;  %v10248_v12 = vpop.f32.mrb[177].mxu1  ;;  %v15825_v19 = vld [vmem:[%s21517_s7 + $0x6c4] ss:$16 sps:$4 sm:$0xff]  }
 0x8ce   :  { %v10415_v40 = vmax.f32 %v10413_v21, %v10414_v30  ;;  %v10249_v2 = vpop.f32.mrb[178].mxu1  ;;  %v15828_v30 = vld [vmem:[%s21517_s7 + $0x364] ss:$16 sps:$4 sm:$0xff]  }
 0x8cf   :  { %v10340_v59 = vadd.f32 %v20357_v50, %v10301_v13  ;;  %v10302_v43 = vadd.f32 %v10249_v2, %v20334_v0  ;;  %v10251_v7 = vpop.f32.mrb[179].mxu1  ;;  %v10464_v26 = vld [vmem:[#allocation6 + $0x50] ss:$2 sm:$0xf]  ;;  %11215 = vmatprep.subr.bf16.mxu1 %v15828_v30 }
 0x8d0   :  { %10439 = vst.msk [vmem:[#allocation6 + $0x58] sm:$0xff] %vm7545_vm7, %v10415_v40  ;;  %v10496_v36 = vld [vmem:[#allocation6 + $0x51] ss:$2 sm:$0xf] }
 0x8d1   :  { %v10372_v24 = vmax.f32 %v10340_v59, 0.0  ;;  %v10341_v28 = vadd.f32 %v20357_v50, %v10302_v43  ;;  %v10517_v18 = vmax.f32 %v10464_v26, %v10496_v36  ;;  %v15829_v36 = vld [vmem:[%s21517_s7 + $0x6e0] ss:$16 sps:$4 sm:$0xff]  }
 0x8d3   :  { %v10373_v3 = vmax.f32 %v10341_v28, 0.0  ;;  %v10416_v5 = vsel %vm7545_vm7, %v10372_v24, -inf }
 0x8d4   :  { %v10254_v22 = vpop.f32.mrb[180].mxu1 }
 0x8d5   :  { %v10417_v60 = vsel %vm7545_vm7, %v10373_v3, -inf  ;;  %v10303_v63 = vadd.f32 %v10254_v22, %v20337_v62  ;;  %v10256_v0 = vpop.f32.mrb[181].mxu1  ;;  %v15835_v3 = vld [vmem:[%s21517_s7 + $0x380] ss:$16 sps:$4 sm:$0xff]   ;;  %v15846_v22 = vld [vmem:[%s21517_s7 + $0x3a4] ss:$16 sps:$4 sm:$0xff]  }
 0x8d6   :  { %v10418_v9 = vmax.f32 %v10416_v5, %v10417_v60  ;;  %v10257_v41 = vpop.f32.mrb[182].mxu1  ;;  %v10658_v0 = vcombine.high %v20516_v45, %v20516_v45 }
 0x8d7   :  { %v10342_v52 = vadd.f32 %v20357_v50, %v10303_v63  ;;  %v10304_v37 = vadd.f32 %v10257_v41, %v20340_v4  ;;  %v10259_v17 = vpop.f32.mrb[183].mxu1  ;;  %v10466_v14 = vld [vmem:[#allocation6 + $0x58] ss:$2 sm:$0xf]  ;;  %v15816_v4 = vld [vmem:[%s21517_s7 + $0x684] ss:$16 sps:$4 sm:$0xff]  }
 0x8d8   :  { %10440 = vst.msk [vmem:[#allocation6 + $0x60] sm:$0xff] %vm7545_vm7, %v10418_v9  ;;  %v10498_v62 = vld [vmem:[#allocation6 + $0x59] ss:$2 sm:$0xf]  ;;  %12685 = vmatprep.subr.bf16.mxu0 %v15816_v4 }
 0x8d9   :  { %v10374_v34 = vmax.f32 %v10342_v52, 0.0  ;;  %v10343_v11 = vadd.f32 %v20357_v50, %v10304_v37  ;;  %v10518_v20 = vmax.f32 %v10466_v14, %v10498_v62  ;;  %12686 = vmatpush1.bf16.msra.mxu0 %v15814_v53  ;;  %v15832_v14 = vld [vmem:[%s21517_s7 + $0x700] ss:$16 sps:$4 sm:$0xff]  }
 0x8da   :  { %12687 = vmatprep.subr.bf16.mxu0 %v15822_v47 }
 0x8db   :  { %v10375_v57 = vmax.f32 %v10343_v11, 0.0  ;;  %v10544_v15 = vcombine.low %v10517_v18, %v10518_v20  ;;  %v10419_v42 = vsel %vm7545_vm7, %v10374_v34, -inf  ;;  %v15843_v11 = vld [vmem:[%s21517_s7 + $0x744] ss:$16 sps:$4 sm:$0xff]   ;;  %v15841_v18 = vld [vmem:[%s21517_s7 + $0x740] ss:$16 sps:$4 sm:$0xff]  }
 0x8dc   :  { %v10262_v6 = vpop.f32.mrb[184].mxu1 }
 0x8dd   :  { %v10420_v49 = vsel %vm7545_vm7, %v10375_v57, -inf  ;;  %v10305_v56 = vadd.f32 %v10262_v6, %v20343_v8  ;;  %v10264_v23 = vpop.f32.mrb[185].mxu1  ;;  %v13895_v38 = vpack.c.bf16 %v10544_v15, %v10544_v15  ;;  %v10557_v32 = vpack.c.bf16 %v10544_v15, %v10543_v35  ;;  %v15826_v8 = vld [vmem:[%s21517_s7 + $0x360] ss:$16 sps:$4 sm:$0xff]   ;;  %12688 = vmatpush1.bf16.msra.mxu0 %v15820_v48 }
 0x8de   :  { %v10421_v55 = vmax.f32 %v10419_v42, %v10420_v49  ;;  %v10265_v21 = vpop.f32.mrb[186].mxu1  ;;  %12689 = vmatprep.subr.bf16.mxu0 %v15825_v19  ;;  %11216 = vmatpush1.bf16.msra.mxu1 %v15826_v8  ;;  %v15847_v35 = vld [vmem:[%s21517_s7 + $0x760] ss:$16 sps:$4 sm:$0xff]   ;;  %v15858_v8 = vld [vmem:[%s21517_s7 + $0x7a4] ss:$16 sps:$4 sm:$0xff]  }
 0x8df   :  { %v10344_v13 = vadd.f32 %v20357_v50, %v10305_v56  ;;  %v10306_v12 = vadd.f32 %v10265_v21, %v20346_v58  ;;  %v10267_v40 = vpop.f32.mrb[187].mxu1  ;;  %v10640_v2 = vrot.slane %v13895_v38, %v20428_v51  ;;  %v10590_v59 = vrot.slane %v10557_v32, %v20428_v51  ;;  %10562 = vst.msk [vmem:[#allocation7 + $0x8] sm:$0x3] %vm10559_vm12, %v10557_v32  ;;  %v15823_v58 = vld [vmem:[%s21517_s7 + $0x6c0] ss:$16 sps:$4 sm:$0xff]  }
 0x8e0   :  { %10441 = vst.msk [vmem:[#allocation6 + $0x68] sm:$0xff] %vm7545_vm7, %v10421_v55  ;;  %11217 = vmatprep.subr.bf16.mxu1 %v15837_v31  ;;  %v10468_v20 = vld [vmem:[#allocation6 + $0x60] ss:$2 sm:$0xf] }
 0x8e1   :  { %v10376_v43 = vmax.f32 %v10344_v13, 0.0  ;;  %v10345_v7 = vadd.f32 %v20357_v50, %v10306_v12  ;;  %v10659_v24 = vcombine.high %v10640_v2, %v10640_v2  ;;  %v10591_v28 = vcombine.high %v10590_v59, %v10590_v59  ;;  %10655 = vst.msk [vmem:[#allocation7 + $0xa] sm:$0x3] %vm10559_vm12, %v10640_v2  ;;  %12690 = vmatpush1.bf16.msra.mxu0 %v15823_v58  ;;  %v10500_v4 = vld [vmem:[#allocation6 + $0x61] ss:$2 sm:$0xf] }
 0x8e2   :  { %12691 = vmatprep.subr.bf16.mxu0 %v15831_v44  ;;  %11218 = vmatpush1.bf16.msra.mxu1 %v15835_v3  ;;  %v10519_v49 = vmax.f32 %v10468_v20, %v10500_v4  ;;  %v15850_v38 = vld [vmem:[%s21517_s7 + $0x780] ss:$16 sps:$4 sm:$0xff]   ;;  %v15852_v32 = vld [vmem:[%s21517_s7 + $0x784] ss:$16 sps:$4 sm:$0xff]   ;;  %v15870_v3 = vld [vmem:[%s21517_s7 + $0x20c] ss:$16 sps:$4 sm:$0xff]  }
 0x8e3   :  { %v10377_v33 = vmax.f32 %v10345_v7, 0.0  ;;  %10665 = vrot.lane.b32.xlu1 %v10659_v24, %s16233_s22  ;;  %10604 = vrot.lane.b32.xlu0 %v10591_v28, %s16233_s22  ;;  %v10422_v26 = vsel %vm7545_vm7, %v10376_v43, -inf  ;;  %v15853_v48 = vld [vmem:[%s21517_s7 + $0x3c0] ss:$16 sps:$4 sm:$0xff]   ;;  %v15855_v21 = vld [vmem:[%s21517_s7 + $0x3c4] ss:$16 sps:$4 sm:$0xff]  }
 0x8e4   :  { %v10270_v25 = vpop.f32.mrb[188].mxu1  ;;  %11219 = vmatprep.subr.bf16.mxu1 %v15846_v22  ;;  %v15864_v12 = vld [vmem:[%s21517_s7 + $0x3e4] ss:$16 sps:$4 sm:$0xff]   ;;  %v15856_v40 = vld [vmem:[%s21517_s7 + $0x7a0] ss:$16 sps:$4 sm:$0xff]  }
 0x8e5   :  { %v10423_v5 = vsel %vm7545_vm7, %v10377_v33, -inf  ;;  %v10307_v60 = vadd.f32 %v10270_v25, %v20349_v54  ;;  %v10272_v63 = vpop.f32.mrb[189].mxu1  ;;  %v15844_v54 = vld [vmem:[%s21517_s7 + $0x3a0] ss:$16 sps:$4 sm:$0xff]   ;;  %12692 = vmatpush1.bf16.msra.mxu0 %v15829_v36  ;;  %v15861_v7 = vld [vmem:[%s21517_s7 + $0x7c4] ss:$16 sps:$4 sm:$0xff]  }
 0x8e6   :  { %v10424_v9 = vmax.f32 %v10422_v26, %v10423_v5  ;;  %v10273_v41 = vpop.f32.mrb[190].mxu1  ;;  %12693 = vmatprep.subr.bf16.mxu0 %v15834_v61  ;;  %11220 = vmatpush1.bf16.msra.mxu1 %v15844_v54  ;;  %v15862_v2 = vld [vmem:[%s21517_s7 + $0x3e0] ss:$16 sps:$4 sm:$0xff]  }
 0x8e7   :  { %v10346_v46 = vadd.f32 %v20357_v50, %v10307_v60  ;;  %v10308_v45 = vadd.f32 %v10273_v41, %v20352_v29  ;;  %10663 = vrot.lane.b32.xlu0 %v10658_v0, %s16233_s22  ;;  %v10275_v52 = vpop.f32.mrb[191].mxu1  ;;  %v10470_v53 = vld [vmem:[#allocation6 + $0x68] ss:$2 sm:$0xf]  ;;  %11221 = vmatprep.subr.bf16.mxu1 %v15855_v21  ;;  %v15859_v28 = vld [vmem:[%s21517_s7 + $0x7c0] ss:$16 sps:$4 sm:$0xff]  }
 0x8e8   :  { %10442 = vst.msk [vmem:[#allocation6 + $0x70] sm:$0xff] %vm7545_vm7, %v10424_v9  ;;  %v10502_v1 = vld [vmem:[#allocation6 + $0x69] ss:$2 sm:$0xf]  ;;  %v15865_v44 = vld [vmem:[%s21517_s7 + $0x7e0] ss:$16 sps:$4 sm:$0xff]  }
 0x8e9   :  { %v10378_v37 = vmax.f32 %v10346_v46, 0.0  ;;  %v10347_v17 = vadd.f32 %v20357_v50, %v10308_v45  ;;  %12694 = vmatpush1.bf16.msra.mxu0 %v15832_v14  ;;  %v15838_v50 = vld [vmem:[%s21517_s7 + $0x720] ss:$16 sps:$4 sm:$0xff]   ;;  %v10520_v42 = vmax.f32 %v10470_v53, %v10502_v1 }
 0x8ea   :  { %12695 = vmatprep.subr.bf16.mxu0 %v15840_v16  ;;  %11222 = vmatpush1.bf16.msra.mxu1 %v15853_v48 }
 0x8eb   :  { %v10379_v29 = vmax.f32 %v10347_v17, 0.0  ;;  %v10425_v62 = vsel %vm7545_vm7, %v10378_v37, -inf  ;;  %v10545_v19 = vcombine.low %v10519_v49, %v10520_v42  ;;  %11223 = vmatprep.subr.bf16.mxu1 %v15864_v12 }
 0x8ed   :  { %v10426_v39 = vsel %vm7545_vm7, %v10379_v29, -inf  ;;  %12696 = vmatpush1.bf16.msra.mxu0 %v15838_v50 }
 0x8ee   :  { %v10427_v34 = vmax.f32 %v10425_v62, %v10426_v39  ;;  %12697 = vmatprep.subr.bf16.mxu0 %v15843_v11  ;;  %11224 = vmatpush1.bf16.msra.mxu1 %v15862_v2 }
 0x8ef   :  { %v10472_v57 = vld [vmem:[#allocation6 + $0x70] ss:$2 sm:$0xf]  ;;  %v10504_v15 = vld [vmem:[#allocation6 + $0x71] ss:$2 sm:$0xf]  ;;  %11234 = vmatprep.subr.bf16.mxu1 %v15870_v3 }
 0x8f0   :  { %10443 = vst.msk [vmem:[#allocation6 + $0x78] sm:$0xff] %vm7545_vm7, %v10427_v34  ;;  %v10521_v56 = vmax.f32 %v10472_v57, %v10504_v15 }
 0x8f1   :  { %12698 = vmatpush1.bf16.msra.mxu0 %v15841_v18 }
 0x8f2   :  { %12699 = vmatprep.subr.bf16.mxu0 %v15849_v27 }
 0x8f5   :  { %12700 = vmatpush1.bf16.msra.mxu0 %v15847_v35 }
 0x8f6   :  { %12701 = vmatprep.subr.bf16.mxu0 %v15852_v32 }
 0x8f7   :  { %v10474_v6 = vld [vmem:[#allocation6 + $0x78] ss:$2 sm:$0xf]  ;;  %v10506_v47 = vld [vmem:[#allocation6 + $0x79] ss:$2 sm:$0xf] }
 0x8f8   :  { %v10522_v23 = vmax.f32 %v10474_v6, %v10506_v47 }
 0x8f9   :  { %12702 = vmatpush1.bf16.msra.mxu0 %v15850_v38 }
 0x8fa   :  { %v10546_v55 = vcombine.low %v10521_v56, %v10522_v23  ;;  %12703 = vmatprep.subr.bf16.mxu0 %v15858_v8 }
 0x8fc   :  { %v10558_v30 = vpack.c.bf16 %v10546_v55, %v10545_v19  ;;  %v13896_v13 = vpack.c.bf16 %v10546_v55, %v10546_v55 }
 0x8fd   :  { %12704 = vmatpush1.bf16.msra.mxu0 %v15856_v40 }
 0x8fe   :  { %v10598_v59 = vrot.slane %v10558_v30, %v20428_v51  ;;  %v10648_v43 = vrot.slane %v13896_v13, %v20428_v51  ;;  %10563 = vst.msk [vmem:[#allocation7 + $0xc] sm:$0x3] %vm10559_vm12, %v10558_v30  ;;  %12705 = vmatprep.subr.bf16.mxu0 %v15861_v7  ;;  %v15867_v51 = vld [vmem:[%s21517_s7 + $0x7e4] ss:$16 sps:$4 sm:$0xff]  }
 0x900   :  { %v10599_v24 = vcombine.high %v10598_v59, %v10598_v59  ;;  %10656 = vst.msk [vmem:[#allocation7 + $0xe] sm:$0x3] %vm10559_vm12, %v10648_v43  ;;  %v10660_v58 = vcombine.high %v10648_v43, %v10648_v43 }
 0x901   :  { %12706 = vmatpush1.bf16.msra.mxu0 %v15859_v28 }
 0x902   :  { %10606 = vrot.lane.b32.xlu1 %v10599_v24, %s16233_s22  ;;  %12707 = vmatprep.subr.bf16.mxu0 %v15867_v51 }
 0x905   :  { %12708 = vmatpush1.bf16.msra.mxu0 %v15865_v44 }
 0x906   :  { %10667 = vrot.lane.b32.xlu1 %v10660_v58, %s16233_s22 }
 0x915   :  { %v10662_v31 = vpop.permute.xlu1 %10661  ;;  %v10601_v33 = vpop.permute.xlu0 %10600 }
 0x916   :  { %10673 = vst.msk [vmem:[#allocation7 + $0x2] sm:$0x3] %vm10612_vm13, %v10662_v31  ;;  %10613 = vst.msk [vmem:[#allocation7] sm:$0x3] %vm10612_vm13, %v10601_v33 }
 0x91d   :  { %v14289_v60 = vld.sshfl [vmem:[#allocation7] sm:$0x22 pattern:$0x76325410] }
 0x91e   :  { %v12308_v63 = vcombine.high %v14289_v60, %v14289_v60  ;;  %v13961_v36 = vld.sshfl [vmem:[#allocation7] sm:$0x11 pattern:$0x76325410]  ;;  %v12333_v54 = vunpack.c.l.b16 %v14289_v60 }
 0x91f   :  { %v10821_v16 = vcombine.high %v13961_v36, %v13961_v36  ;;  %v10846_v34 = vunpack.c.l.b16 %v13961_v36 }
 0x920   :  { %v12334_v45 = vunpack.c.l.b16 %v12308_v63  ;;  %v11806_v57 = vrot.slane %v12333_v54, 2  ;;  %v12341_v13 = vrot.slane %v12333_v54, 3 }
 0x921   :  { %v10847_v35 = vunpack.c.l.b16 %v10821_v16  ;;  %v10854_v2 = vrot.slane %v10846_v34, 1 }
 0x922   :  { %v11812_v4 = vrot.slane %v12334_v45, 2  ;;  %v12347_v12 = vrot.slane %v12334_v45, 3 }
 0x923   :  { %v10863_v59 = vrot.slane %v10847_v35, 1 }
 0x935   :  { %v10603_v25 = vpop.permute.xlu0 %10602 }
 0x936   :  { %10614 = vst.msk [vmem:[#allocation7 + $0x4] sm:$0x3] %vm10612_vm13, %v10603_v25 }
 0x955   :  { %v10666_v22 = vpop.permute.xlu1 %10665  ;;  %v10605_v26 = vpop.permute.xlu0 %10604 }
 0x956   :  { %10675 = vst.msk [vmem:[#allocation7 + $0xa] sm:$0x3] %vm10612_vm13, %v10666_v22  ;;  %10615 = vst.msk [vmem:[#allocation7 + $0x8] sm:$0x3] %vm10612_vm13, %v10605_v26 }
 0x959   :  { %v10664_v5 = vpop.permute.xlu0 %10663 }
 0x95a   :  { %10674 = vst.msk [vmem:[#allocation7 + $0x6] sm:$0x3] %vm10612_vm13, %v10664_v5 }
 0x95d   :  { %v13963_v0 = vld.sshfl [vmem:[#allocation7 + $0x8] sm:$0x11 pattern:$0x76325410] }
 0x95e   :  { %v14291_v9 = vld.sshfl [vmem:[#allocation7 + $0x8] sm:$0x22 pattern:$0x76325410]  ;;  %v10837_v41 = vcombine.high %v13963_v0, %v13963_v0  ;;  %v10850_v17 = vunpack.c.l.b16 %v13963_v0 }
 0x95f   :  { %v12324_v14 = vcombine.high %v14291_v9, %v14291_v9  ;;  %v12337_v6 = vunpack.c.l.b16 %v14291_v9 }
 0x960   :  { %v10851_v50 = vunpack.c.l.b16 %v10837_v41  ;;  %v11277_v53 = vrot.slane %v10850_v17, 6  ;;  %v10857_v28 = vrot.slane %v10850_v17, 7 }
 0x961   :  { %v14290_v61 = vld.sshfl [vmem:[#allocation7 + $0x4] sm:$0x22 pattern:$0x76325410]  ;;  %v12338_v15 = vunpack.c.l.b16 %v12324_v14  ;;  %v12344_v7 = vrot.slane %v12337_v6, 1 }
 0x962   :  { %v12316_v46 = vcombine.high %v14290_v61, %v14290_v61  ;;  %v12335_v52 = vunpack.c.l.b16 %v14290_v61  ;;  %v13962_v37 = vld.sshfl [vmem:[#allocation7 + $0x4] sm:$0x11 pattern:$0x76325410]  ;;  %v11283_v47 = vrot.slane %v10851_v50, 6  ;;  %v10865_v31 = vrot.slane %v10851_v50, 7 }
 0x963   :  { %v10829_v29 = vcombine.high %v13962_v37, %v13962_v37  ;;  %v10848_v62 = vunpack.c.l.b16 %v13962_v37  ;;  %v12350_v44 = vrot.slane %v12338_v15, 1 }
 0x964   :  { %v12336_v39 = vunpack.c.l.b16 %v12316_v46  ;;  %v11807_v20 = vrot.slane %v12335_v52, 1  ;;  %v12342_v8 = vrot.slane %v12335_v52, 2 }
 0x965   :  { %v10849_v11 = vunpack.c.l.b16 %v10829_v29  ;;  %v11275_v18 = vrot.slane %v10848_v62, 7  ;;  %v10856_v26 = vsel %vm10855_vm14, %v10848_v62, %v10854_v2  ;;  %v15904_v2 = vld [vmem:[%s21517_s7 + $0x388] ss:$16 sps:$4 sm:$0xff]  }
 0x966   :  { %v11813_v1 = vrot.slane %v12336_v39, 1  ;;  %v11808_v32 = vsel %vm10855_vm14, %v11807_v20, %v11806_v57  ;;  %v12348_v30 = vrot.slane %v12336_v39, 2  ;;  %v12343_v40 = vsel %vm10855_vm14, %v12342_v8, %v12341_v13  ;;  %v15868_v20 = vld [vmem:[%s21517_s7 + $0x208] ss:$16 sps:$4 sm:$0xff]   ;;  %v15876_v57 = vld [vmem:[%s21517_s7 + $0x24c] ss:$16 sps:$4 sm:$0xff]  }
 0x967   :  { %v11281_v27 = vrot.slane %v10849_v11, 7  ;;  %v11276_v42 = vsel %vm10855_vm14, %v11275_v18, %v10846_v34  ;;  %v11809_v19 = vsel %vm10858_vm15, %v12337_v6, %v11808_v32  ;;  %v12345_v33 = vsel %vm10858_vm15, %v12344_v7, %v12343_v40  ;;  %v15880_v6 = vld [vmem:[%s21517_s7 + $0x288] ss:$16 sps:$4 sm:$0xff]   ;;  %v15900_v8 = vld [vmem:[%s21517_s7 + $0x34c] ss:$16 sps:$4 sm:$0xff]  }
 0x968   :  { %v11278_v49 = vsel %vm10858_vm15, %v11277_v53, %v11276_v42  ;;  %v11814_v56 = vsel %vm10855_vm14, %v11813_v1, %v11812_v4  ;;  %v12349_v24 = vsel %vm10855_vm14, %v12348_v30, %v12347_v12  ;;  %v10864_v63 = vsel %vm10855_vm14, %v10849_v11, %v10863_v59  ;;  %v15873_v4 = vld [vmem:[%s21517_s7 + $0x22c] ss:$16 sps:$4 sm:$0xff]   ;;  %v15871_v1 = vld [vmem:[%s21517_s7 + $0x228] ss:$16 sps:$4 sm:$0xff]  }
 0x969   :  { %v11282_v23 = vsel %vm10855_vm14, %v11281_v27, %v10847_v35  ;;  %v11815_v38 = vsel %vm10858_vm15, %v12338_v15, %v11814_v56  ;;  %v12351_v60 = vsel %vm10858_vm15, %v12350_v44, %v12349_v24  ;;  %v10859_v46 = vsel %vm10858_vm15, %v10857_v28, %v10856_v26  ;;  %v15874_v15 = vld [vmem:[%s21517_s7 + $0x248] ss:$16 sps:$4 sm:$0xff]   ;;  %v15879_v35 = vld [vmem:[%s21517_s7 + $0x26c] ss:$16 sps:$4 sm:$0xff]   ;;  %v15916_v44 = vld [vmem:[%s21517_s7] ss:$16 sps:$4 sm:$0xff]  }
 0x96a   :  { %v11284_v48 = vsel %vm10858_vm15, %v11283_v47, %v11282_v23  ;;  %v10866_v17 = vsel %vm10858_vm15, %v10865_v31, %v10864_v63  ;;  %v15877_v27 = vld [vmem:[%s21517_s7 + $0x268] ss:$16 sps:$4 sm:$0xff]   ;;  %v15882_v42 = vld [vmem:[%s21517_s7 + $0x28c] ss:$16 sps:$4 sm:$0xff]   ;;  %v15927_v26 = vld [vmem:[%s21517_s7 + $0x64] ss:$16 sps:$4 sm:$0xff]  }
 0x96b   :  { %v15885_v47 = vld [vmem:[%s21517_s7 + $0x2ac] ss:$16 sps:$4 sm:$0xff]   ;;  %v15886_v23 = vld [vmem:[%s21517_s7 + $0x2c8] ss:$16 sps:$4 sm:$0xff]   ;;  %v15928_v63 = vld [vmem:[%s21517_s7 + $0x80] ss:$16 sps:$4 sm:$0xff]  }
 0x96c   :  { %v15888_v56 = vld [vmem:[%s21517_s7 + $0x2cc] ss:$16 sps:$4 sm:$0xff]   ;;  %v15889_v32 = vld [vmem:[%s21517_s7 + $0x2e8] ss:$16 sps:$4 sm:$0xff]  }
 0x96d   :  { %v15898_v30 = vld [vmem:[%s21517_s7 + $0x348] ss:$16 sps:$4 sm:$0xff]   ;;  %v15903_v13 = vld [vmem:[%s21517_s7 + $0x36c] ss:$16 sps:$4 sm:$0xff]  }
 0x96e   :  { %v15901_v12 = vld [vmem:[%s21517_s7 + $0x368] ss:$16 sps:$4 sm:$0xff]   ;;  %v15906_v40 = vld [vmem:[%s21517_s7 + $0x38c] ss:$16 sps:$4 sm:$0xff]  }
 0x96f   :  { %v15909_v59 = vld [vmem:[%s21517_s7 + $0x3ac] ss:$16 sps:$4 sm:$0xff]   ;;  %v15910_v24 = vld [vmem:[%s21517_s7 + $0x3c8] ss:$16 sps:$4 sm:$0xff]  }
 0x970   :  { %v15912_v7 = vld [vmem:[%s21517_s7 + $0x3cc] ss:$16 sps:$4 sm:$0xff]  }
 0x971   :  { %v15915_v28 = vld [vmem:[%s21517_s7 + $0x3ec] ss:$16 sps:$4 sm:$0xff]  }
 0x974   :  { %v10607_v55 = vpop.permute.xlu1 %10606 }
 0x975   :  { %10616 = vst.msk [vmem:[#allocation7 + $0xc] sm:$0x3] %vm10612_vm13, %v10607_v55  ;;  %v15897_v55 = vld [vmem:[%s21517_s7 + $0x32c] ss:$16 sps:$4 sm:$0xff]  }
 0x978   :  { %v10668_v21 = vpop.permute.xlu1 %10667 }
 0x979   :  { %10676 = vst.msk [vmem:[#allocation7 + $0xe] sm:$0x3] %vm10612_vm13, %v10668_v21  ;;  %v15895_v21 = vld [vmem:[%s21517_s7 + $0x328] ss:$16 sps:$4 sm:$0xff]  }
 0x980   :  { %v14292_v43 = vld.sshfl [vmem:[#allocation7 + $0xc] sm:$0x22 pattern:$0x76325410] }
 0x981   :  { %v12332_v51 = vcombine.high %v14292_v43, %v14292_v43  ;;  %v12339_v58 = vunpack.c.l.b16 %v14292_v43  ;;  %v13964_v3 = vld.sshfl [vmem:[#allocation7 + $0xc] sm:$0x11 pattern:$0x76325410]  ;;  %v15907_v43 = vld [vmem:[%s21517_s7 + $0x3a8] ss:$16 sps:$4 sm:$0xff]  }
 0x982   :  { %v10845_v25 = vcombine.high %v13964_v3, %v13964_v3  ;;  %v10852_v22 = vunpack.c.l.b16 %v13964_v3  ;;  %v15921_v3 = vld [vmem:[%s21517_s7 + $0x24] ss:$16 sps:$4 sm:$0xff]  }
 0x983   :  { %v12340_v5 = vunpack.c.l.b16 %v12332_v51  ;;  %v11810_v0 = vrot.slane %v12339_v58, 7  ;;  %v12346_v36 = vsel %vm10861_vm1, %v12339_v58, %v12345_v33  ;;  %v15913_v51 = vld [vmem:[%s21517_s7 + $0x3e8] ss:$16 sps:$4 sm:$0xff]   ;;  %v15918_v58 = vld [vmem:[%s21517_s7 + $0x4] ss:$16 sps:$4 sm:$0xff]  }
 0x984   :  { %v10853_v9 = vunpack.c.l.b16 %v10845_v25  ;;  %v10860_v41 = vrot.slane %v10852_v22, 6  ;;  %v11279_v61 = vrot.slane %v10852_v22, 5  ;;  %v20731_v29 = vpack.c.b16 %v12346_v36, %v12346_v36  ;;  %v15919_v33 = vld [vmem:[%s21517_s7 + $0x20] ss:$16 sps:$4 sm:$0xff]   ;;  %v15924_v25 = vld [vmem:[%s21517_s7 + $0x44] ss:$16 sps:$4 sm:$0xff]  }
 0x985   :  { %v12352_v54 = vsel %vm10861_vm1, %v12340_v5, %v12351_v60  ;;  %v11816_v45 = vrot.slane %v12340_v5, 7  ;;  %v20726_v52 = vsel %vm10861_vm1, %v11810_v0, %v11809_v19  ;;  %v15892_v19 = vld [vmem:[%s21517_s7 + $0x308] ss:$16 sps:$4 sm:$0xff]   ;;  %v15922_v22 = vld [vmem:[%s21517_s7 + $0x40] ss:$16 sps:$4 sm:$0xff]  }
 0x986   :  { %v20728_v37 = vpack.c.b16 %v12352_v54, %v12352_v54  ;;  %v10867_v14 = vrot.slane %v10853_v9, 6  ;;  %v11285_v16 = vrot.slane %v10853_v9, 5  ;;  %v10862_v62 = vsel %vm10861_vm1, %v10860_v41, %v10859_v46  ;;  %v15925_v5 = vld [vmem:[%s21517_s7 + $0x60] ss:$16 sps:$4 sm:$0xff]   ;;  %v15930_v60 = vld [vmem:[%s21517_s7 + $0x84] ss:$16 sps:$4 sm:$0xff]  }
 0x987   :  { %v20735_v39 = vsel %vm10861_vm1, %v11279_v61, %v11278_v49  ;;  %v20738_v50 = vsel %vm10861_vm1, %v11816_v45, %v11815_v38  ;;  %v20749_v53 = vpack.c.b16 %v10862_v62, %v10862_v62  ;;  %v15883_v49 = vld [vmem:[%s21517_s7 + $0x2a8] ss:$16 sps:$4 sm:$0xff]   ;;  %v15891_v38 = vld [vmem:[%s21517_s7 + $0x2ec] ss:$16 sps:$4 sm:$0xff]   ;;  %v15933_v0 = vld [vmem:[%s21517_s7 + $0xa4] ss:$16 sps:$4 sm:$0xff]  }
 0x988   :  { %12709 = vmatprep.mubr.bf16.mxu0 %v20728_v37  ;;  %v10868_v34 = vsel %vm10861_vm1, %v10867_v14, %v10866_v17  ;;  %v20743_v11 = vsel %vm10861_vm1, %v11285_v16, %v11284_v48  ;;  %v15894_v48 = vld [vmem:[%s21517_s7 + $0x30c] ss:$16 sps:$4 sm:$0xff]   ;;  %v15931_v36 = vld [vmem:[%s21517_s7 + $0xa0] ss:$16 sps:$4 sm:$0xff]   ;;  %v15936_v9 = vld [vmem:[%s21517_s7 + $0xc4] ss:$16 sps:$4 sm:$0xff]  }
 0x989   :  { %12710 = vmatmul.mubr.bf16.vlgmr.msra.gmra.mrb[128].mxu0 %v20731_v29  ;;  %v10870_v18 = vpack.c.b16 %v10868_v34, %v10868_v34  ;;  %v20853_v31 = vpack.c.b16 %v20743_v11, %v20743_v11  ;;  %v15934_v41 = vld [vmem:[%s21517_s7 + $0xc0] ss:$16 sps:$4 sm:$0xff]   ;;  %v15939_v61 = vld [vmem:[%s21517_s7 + $0xe4] ss:$16 sps:$4 sm:$0xff]  }
 0x98a   :  { %v15937_v54 = vld [vmem:[%s21517_s7 + $0xe0] ss:$16 sps:$4 sm:$0xff]   ;;  %v15942_v46 = vld [vmem:[%s21517_s7 + $0x104] ss:$16 sps:$4 sm:$0xff]  }
 0x98b   :  { %11225 = vmatprep.mubr.bf16.mxu1 %v10870_v18  ;;  %v15940_v45 = vld [vmem:[%s21517_s7 + $0x100] ss:$16 sps:$4 sm:$0xff]   ;;  %v15945_v17 = vld [vmem:[%s21517_s7 + $0x124] ss:$16 sps:$4 sm:$0xff]  }
 0x98c   :  { %11226 = vmatmul.mubr.bf16.vlgmr.msra.gmra.mrb[192].mxu1 %v20749_v53  ;;  %v15943_v14 = vld [vmem:[%s21517_s7 + $0x120] ss:$16 sps:$4 sm:$0xff]   ;;  %v15948_v16 = vld [vmem:[%s21517_s7 + $0x144] ss:$16 sps:$4 sm:$0xff]  }
 0x98d   :  { %11235 = vmatpush1.bf16.msra.mxu1 %v15868_v20  ;;  %11266 = vmatprep.mubr.bf16.mxu1 %v10870_v18  ;;  %v15946_v62 = vld [vmem:[%s21517_s7 + $0x140] ss:$16 sps:$4 sm:$0xff]   ;;  %v15951_v34 = vld [vmem:[%s21517_s7 + $0x164] ss:$16 sps:$4 sm:$0xff]  }
 0x98e   :  { %11236 = vmatprep.subr.bf16.mxu1 %v15873_v4  ;;  %v15949_v11 = vld [vmem:[%s21517_s7 + $0x160] ss:$16 sps:$4 sm:$0xff]   ;;  %v15954_v18 = vld [vmem:[%s21517_s7 + $0x184] ss:$16 sps:$4 sm:$0xff]  }
 0x98f   :  { %v15952_v20 = vld [vmem:[%s21517_s7 + $0x180] ss:$16 sps:$4 sm:$0xff]  }
 0x990   :  { %v15955_v4 = vld [vmem:[%s21517_s7 + $0x1a0] ss:$16 sps:$4 sm:$0xff]  }
 0x991   :  { %11237 = vmatpush1.bf16.msra.mxu1 %v15871_v1  ;;  %v15960_v1 = vld [vmem:[%s21517_s7 + $0x1c4] ss:$16 sps:$4 sm:$0xff]  }
 0x992   :  { %11238 = vmatprep.subr.bf16.mxu1 %v15876_v57  ;;  %v15958_v57 = vld [vmem:[%s21517_s7 + $0x1c0] ss:$16 sps:$4 sm:$0xff]  }
 0x995   :  { %11239 = vmatpush1.bf16.msra.mxu1 %v15874_v15  ;;  %v15963_v15 = vld [vmem:[%s21517_s7 + $0x1e4] ss:$16 sps:$4 sm:$0xff]  }
 0x996   :  { %11240 = vmatprep.subr.bf16.mxu1 %v15879_v35  ;;  %v15961_v35 = vld [vmem:[%s21517_s7 + $0x1e0] ss:$16 sps:$4 sm:$0xff]  }
 0x999   :  { %11241 = vmatpush1.bf16.msra.mxu1 %v15877_v27  ;;  %v15966_v27 = vld [vmem:[%s21517_s7 + $0xc] ss:$16 sps:$4 sm:$0xff]  }
 0x99a   :  { %11242 = vmatprep.subr.bf16.mxu1 %v15882_v42  ;;  %v15964_v42 = vld [vmem:[%s21517_s7 + $0x8] ss:$16 sps:$4 sm:$0xff]  }
 0x99d   :  { %11243 = vmatpush1.bf16.msra.mxu1 %v15880_v6  ;;  %v20952_v6 = vpack.c.b16 %v20735_v39, %v20735_v39  ;;  %v15972_v39 = vld [vmem:[%s21517_s7 + $0x4c] ss:$16 sps:$4 sm:$0xff]  }
 0x99e   :  { %11244 = vmatprep.subr.bf16.mxu1 %v15885_v47  ;;  %v15969_v47 = vld [vmem:[%s21517_s7 + $0x2c] ss:$16 sps:$4 sm:$0xff]  }
 0x9a1   :  { %11245 = vmatpush1.bf16.msra.mxu1 %v15883_v49  ;;  %v15967_v49 = vld [vmem:[%s21517_s7 + $0x28] ss:$16 sps:$4 sm:$0xff]  }
 0x9a2   :  { %11246 = vmatprep.subr.bf16.mxu1 %v15888_v56  ;;  %v15970_v56 = vld [vmem:[%s21517_s7 + $0x48] ss:$16 sps:$4 sm:$0xff]  }
 0x9a5   :  { %11247 = vmatpush1.bf16.msra.mxu1 %v15886_v23  ;;  %v15975_v23 = vld [vmem:[%s21517_s7 + $0x6c] ss:$16 sps:$4 sm:$0xff]  }
 0x9a6   :  { %11248 = vmatprep.subr.bf16.mxu1 %v15891_v38  ;;  %v15973_v38 = vld [vmem:[%s21517_s7 + $0x68] ss:$16 sps:$4 sm:$0xff]  }
 0x9a9   :  { %11249 = vmatpush1.bf16.msra.mxu1 %v15889_v32  ;;  %v15978_v32 = vld [vmem:[%s21517_s7 + $0x8c] ss:$16 sps:$4 sm:$0xff]  }
 0x9aa   :  { %11250 = vmatprep.subr.bf16.mxu1 %v15894_v48  ;;  %v15976_v48 = vld [vmem:[%s21517_s7 + $0x88] ss:$16 sps:$4 sm:$0xff]  }
 0x9ad   :  { %11251 = vmatpush1.bf16.msra.mxu1 %v15892_v19  ;;  %v15981_v19 = vld [vmem:[%s21517_s7 + $0xac] ss:$16 sps:$4 sm:$0xff]  }
 0x9ae   :  { %11252 = vmatprep.subr.bf16.mxu1 %v15897_v55  ;;  %v15979_v55 = vld [vmem:[%s21517_s7 + $0xa8] ss:$16 sps:$4 sm:$0xff]  }
 0x9b1   :  { %11253 = vmatpush1.bf16.msra.mxu1 %v15895_v21  ;;  %v15984_v21 = vld [vmem:[%s21517_s7 + $0xcc] ss:$16 sps:$4 sm:$0xff]  }
 0x9b2   :  { %11254 = vmatprep.subr.bf16.mxu1 %v15900_v8  ;;  %v15982_v8 = vld [vmem:[%s21517_s7 + $0xc8] ss:$16 sps:$4 sm:$0xff]  }
 0x9b5   :  { %11255 = vmatpush1.bf16.msra.mxu1 %v15898_v30  ;;  %v15987_v30 = vld [vmem:[%s21517_s7 + $0xec] ss:$16 sps:$4 sm:$0xff]  }
 0x9b6   :  { %11256 = vmatprep.subr.bf16.mxu1 %v15903_v13  ;;  %v15985_v13 = vld [vmem:[%s21517_s7 + $0xe8] ss:$16 sps:$4 sm:$0xff]  }
 0x9b9   :  { %11257 = vmatpush1.bf16.msra.mxu1 %v15901_v12  ;;  %v15990_v12 = vld [vmem:[%s21517_s7 + $0x10c] ss:$16 sps:$4 sm:$0xff]  }
 0x9ba   :  { %11258 = vmatprep.subr.bf16.mxu1 %v15906_v40  ;;  %v15988_v40 = vld [vmem:[%s21517_s7 + $0x108] ss:$16 sps:$4 sm:$0xff]  }
 0x9bd   :  { %11259 = vmatpush1.bf16.msra.mxu1 %v15904_v2  ;;  %v15993_v2 = vld [vmem:[%s21517_s7 + $0x12c] ss:$16 sps:$4 sm:$0xff]  }
 0x9be   :  { %11260 = vmatprep.subr.bf16.mxu1 %v15909_v59  ;;  %v15991_v59 = vld [vmem:[%s21517_s7 + $0x128] ss:$16 sps:$4 sm:$0xff]  }
 0x9c1   :  { %11261 = vmatpush1.bf16.msra.mxu1 %v15907_v43  ;;  %v15996_v43 = vld [vmem:[%s21517_s7 + $0x14c] ss:$16 sps:$4 sm:$0xff]  }
 0x9c2   :  { %11262 = vmatprep.subr.bf16.mxu1 %v15912_v7  ;;  %v15994_v7 = vld [vmem:[%s21517_s7 + $0x148] ss:$16 sps:$4 sm:$0xff]  }
 0x9c5   :  { %11263 = vmatpush1.bf16.msra.mxu1 %v15910_v24  ;;  %v15999_v24 = vld [vmem:[%s21517_s7 + $0x16c] ss:$16 sps:$4 sm:$0xff]  }
 0x9c6   :  { %11264 = vmatprep.subr.bf16.mxu1 %v15915_v28  ;;  %v15997_v28 = vld [vmem:[%s21517_s7 + $0x168] ss:$16 sps:$4 sm:$0xff]  }
 0x9c9   :  { %11265 = vmatpush1.bf16.msra.mxu1 %v15913_v51  ;;  %v16002_v51 = vld [vmem:[%s21517_s7 + $0x18c] ss:$16 sps:$4 sm:$0xff]  }
 0x9ca   :  { %11611 = vmatprep.subr.bf16.mxu1 %v15918_v58  ;;  %v16000_v58 = vld [vmem:[%s21517_s7 + $0x188] ss:$16 sps:$4 sm:$0xff]  }
 0x9cc   :  { %11267 = vmatmul.mubr.bf16.vlgmr.msra.gmra.mrb[196].mxu1 %v20749_v53  ;;  %v15957_v53 = vld [vmem:[%s21517_s7 + $0x1a4] ss:$16 sps:$4 sm:$0xff]  }
 0x9cd   :  { %11612 = vmatpush1.bf16.msra.mxu1 %v15916_v44  ;;  %11643 = vmatprep.mubr.bf16.mxu1 %v20853_v31  ;;  %v16005_v44 = vld [vmem:[%s21517_s7 + $0x1ac] ss:$16 sps:$4 sm:$0xff]  }
 0x9ce   :  { %11613 = vmatprep.subr.bf16.mxu1 %v15921_v3  ;;  %v16003_v3 = vld [vmem:[%s21517_s7 + $0x1a8] ss:$16 sps:$4 sm:$0xff]  }
 0x9d1   :  { %11614 = vmatpush1.bf16.msra.mxu1 %v15919_v33  ;;  %v16006_v33 = vld [vmem:[%s21517_s7 + $0x1c8] ss:$16 sps:$4 sm:$0xff]  }
 0x9d2   :  { %11615 = vmatprep.subr.bf16.mxu1 %v15924_v25  ;;  %v16011_v25 = vld [vmem:[%s21517_s7 + $0x1ec] ss:$16 sps:$4 sm:$0xff]  }
 0x9d5   :  { %11616 = vmatpush1.bf16.msra.mxu1 %v15922_v22  ;;  %v16009_v22 = vld [vmem:[%s21517_s7 + $0x1e8] ss:$16 sps:$4 sm:$0xff]  }
 0x9d6   :  { %11617 = vmatprep.subr.bf16.mxu1 %v15927_v26  ;;  %v16014_v26 = vld [vmem:[%s21517_s7 + $0x404] ss:$16 sps:$4 sm:$0xff]  }
 0x9d9   :  { %11618 = vmatpush1.bf16.msra.mxu1 %v15925_v5  ;;  %v16012_v5 = vld [vmem:[%s21517_s7 + $0x400] ss:$16 sps:$4 sm:$0xff]  }
 0x9da   :  { %11619 = vmatprep.subr.bf16.mxu1 %v15930_v60  ;;  %v16017_v60 = vld [vmem:[%s21517_s7 + $0x424] ss:$16 sps:$4 sm:$0xff]  }
 0x9dd   :  { %11620 = vmatpush1.bf16.msra.mxu1 %v15928_v63  ;;  %v21057_v63 = vpack.c.b16 %v20738_v50, %v20738_v50  ;;  %v16018_v50 = vld [vmem:[%s21517_s7 + $0x440] ss:$16 sps:$4 sm:$0xff]  }
 0x9de   :  { %11621 = vmatprep.subr.bf16.mxu1 %v15933_v0  ;;  %v16015_v0 = vld [vmem:[%s21517_s7 + $0x420] ss:$16 sps:$4 sm:$0xff]  }
 0x9e1   :  { %11622 = vmatpush1.bf16.msra.mxu1 %v15931_v36  ;;  %v16020_v36 = vld [vmem:[%s21517_s7 + $0x444] ss:$16 sps:$4 sm:$0xff]  }
 0x9e2   :  { %11623 = vmatprep.subr.bf16.mxu1 %v15936_v9  ;;  %v16023_v9 = vld [vmem:[%s21517_s7 + $0x464] ss:$16 sps:$4 sm:$0xff]  }
 0x9e5   :  { %11624 = vmatpush1.bf16.msra.mxu1 %v15934_v41  ;;  %v16021_v41 = vld [vmem:[%s21517_s7 + $0x460] ss:$16 sps:$4 sm:$0xff]  }
 0x9e6   :  { %11625 = vmatprep.subr.bf16.mxu1 %v15939_v61  ;;  %v16026_v61 = vld [vmem:[%s21517_s7 + $0x484] ss:$16 sps:$4 sm:$0xff]  }
 0x9e9   :  { %11626 = vmatpush1.bf16.msra.mxu1 %v15937_v54  ;;  %v16024_v54 = vld [vmem:[%s21517_s7 + $0x480] ss:$16 sps:$4 sm:$0xff]  }
 0x9ea   :  { %11627 = vmatprep.subr.bf16.mxu1 %v15942_v46  ;;  %v16029_v46 = vld [vmem:[%s21517_s7 + $0x4a4] ss:$16 sps:$4 sm:$0xff]  }
 0x9ed   :  { %11628 = vmatpush1.bf16.msra.mxu1 %v15940_v45 }
 0x9ee   :  { %11629 = vmatprep.subr.bf16.mxu1 %v15945_v17 }
 0x9f1   :  { %11630 = vmatpush1.bf16.msra.mxu1 %v15943_v14  ;;  %v16027_v14 = vld [vmem:[%s21517_s7 + $0x4a0] ss:$16 sps:$4 sm:$0xff]  }
 0x9f2   :  { %11631 = vmatprep.subr.bf16.mxu1 %v15948_v16 }
 0x9f5   :  { %11632 = vmatpush1.bf16.msra.mxu1 %v15946_v62  ;;  %v16032_v62 = vld [vmem:[%s21517_s7 + $0x4c4] ss:$16 sps:$4 sm:$0xff]  }
 0x9f6   :  { %11633 = vmatprep.subr.bf16.mxu1 %v15951_v34 }
 0x9f9   :  { %11634 = vmatpush1.bf16.msra.mxu1 %v15949_v11 }
 0x9fa   :  { %11635 = vmatprep.subr.bf16.mxu1 %v15954_v18 }
 0x9fd   :  { %11636 = vmatpush1.bf16.msra.mxu1 %v15952_v20 }
 0x9fe   :  { %11637 = vmatprep.subr.bf16.mxu1 %v15957_v53  ;;  %v16030_v53 = vld [vmem:[%s21517_s7 + $0x4c0] ss:$16 sps:$4 sm:$0xff]  }
 0xa01   :  { %11638 = vmatpush1.bf16.msra.mxu1 %v15955_v4 }
 0xa02   :  { %11639 = vmatprep.subr.bf16.mxu1 %v15960_v1  ;;  %v16035_v1 = vld [vmem:[%s21517_s7 + $0x4e4] ss:$16 sps:$4 sm:$0xff]  }
 0xa05   :  { %11640 = vmatpush1.bf16.msra.mxu1 %v15958_v57  ;;  %v16033_v57 = vld [vmem:[%s21517_s7 + $0x4e0] ss:$16 sps:$4 sm:$0xff]  }
 0xa06   :  { %11641 = vmatprep.subr.bf16.mxu1 %v15963_v15  ;;  %v16038_v15 = vld [vmem:[%s21517_s7 + $0x504] ss:$16 sps:$4 sm:$0xff]  }
 0xa09   :  { %11642 = vmatpush1.bf16.msra.mxu1 %v15961_v35  ;;  %v16036_v35 = vld [vmem:[%s21517_s7 + $0x500] ss:$16 sps:$4 sm:$0xff]  }
 0xa0a   :  { %11652 = vmatprep.subr.bf16.mxu1 %v15966_v27  ;;  %v16041_v27 = vld [vmem:[%s21517_s7 + $0x524] ss:$16 sps:$4 sm:$0xff]  }
 0xa0c   :  { %11644 = vmatmul.mubr.bf16.vlgmr.msra.gmra.mrb[200].mxu1 %v20952_v6 }
 0xa0d   :  { %11653 = vmatpush1.bf16.msra.mxu1 %v15964_v42  ;;  %11684 = vmatprep.mubr.bf16.mxu1 %v20853_v31  ;;  %v16008_v31 = vld [vmem:[%s21517_s7 + $0x1cc] ss:$16 sps:$4 sm:$0xff]   ;;  %v16039_v42 = vld [vmem:[%s21517_s7 + $0x520] ss:$16 sps:$4 sm:$0xff]  }
 0xa0e   :  { %11654 = vmatprep.subr.bf16.mxu1 %v15969_v47  ;;  %v16042_v47 = vld [vmem:[%s21517_s7 + $0x540] ss:$16 sps:$4 sm:$0xff]  }
 0xa11   :  { %11655 = vmatpush1.bf16.msra.mxu1 %v15967_v49  ;;  %v16047_v49 = vld [vmem:[%s21517_s7 + $0x564] ss:$16 sps:$4 sm:$0xff]  }
 0xa12   :  { %11656 = vmatprep.subr.bf16.mxu1 %v15972_v39  ;;  %v16045_v39 = vld [vmem:[%s21517_s7 + $0x560] ss:$16 sps:$4 sm:$0xff]  }
 0xa15   :  { %11657 = vmatpush1.bf16.msra.mxu1 %v15970_v56  ;;  %v16050_v56 = vld [vmem:[%s21517_s7 + $0x584] ss:$16 sps:$4 sm:$0xff]  }
 0xa16   :  { %11658 = vmatprep.subr.bf16.mxu1 %v15975_v23  ;;  %v16048_v23 = vld [vmem:[%s21517_s7 + $0x580] ss:$16 sps:$4 sm:$0xff]  }
 0xa19   :  { %11659 = vmatpush1.bf16.msra.mxu1 %v15973_v38  ;;  %v16053_v38 = vld [vmem:[%s21517_s7 + $0x5a4] ss:$16 sps:$4 sm:$0xff]  }
 0xa1a   :  { %11660 = vmatprep.subr.bf16.mxu1 %v15978_v32  ;;  %v16051_v32 = vld [vmem:[%s21517_s7 + $0x5a0] ss:$16 sps:$4 sm:$0xff]  }
 0xa1d   :  { %11661 = vmatpush1.bf16.msra.mxu1 %v15976_v48  ;;  %v16056_v48 = vld [vmem:[%s21517_s7 + $0x5c4] ss:$16 sps:$4 sm:$0xff]  }
 0xa1e   :  { %11662 = vmatprep.subr.bf16.mxu1 %v15981_v19  ;;  %v16054_v19 = vld [vmem:[%s21517_s7 + $0x5c0] ss:$16 sps:$4 sm:$0xff]  }
 0xa21   :  { %11663 = vmatpush1.bf16.msra.mxu1 %v15979_v55  ;;  %v16059_v55 = vld [vmem:[%s21517_s7 + $0x5e4] ss:$16 sps:$4 sm:$0xff]  }
 0xa22   :  { %11664 = vmatprep.subr.bf16.mxu1 %v15984_v21  ;;  %v16057_v21 = vld [vmem:[%s21517_s7 + $0x5e0] ss:$16 sps:$4 sm:$0xff]  }
 0xa25   :  { %11665 = vmatpush1.bf16.msra.mxu1 %v15982_v8  ;;  %v16062_v8 = vld [vmem:[%s21517_s7 + $0x40c] ss:$16 sps:$4 sm:$0xff]  }
 0xa26   :  { %11666 = vmatprep.subr.bf16.mxu1 %v15987_v30  ;;  %v16060_v30 = vld [vmem:[%s21517_s7 + $0x408] ss:$16 sps:$4 sm:$0xff]  }
 0xa29   :  { %11667 = vmatpush1.bf16.msra.mxu1 %v15985_v13  ;;  %v21164_v13 = vpack.c.b16 %v20726_v52, %v20726_v52  ;;  %v16068_v52 = vld [vmem:[%s21517_s7 + $0x44c] ss:$16 sps:$4 sm:$0xff]  }
 0xa2a   :  { %11668 = vmatprep.subr.bf16.mxu1 %v15990_v12  ;;  %v16065_v12 = vld [vmem:[%s21517_s7 + $0x42c] ss:$16 sps:$4 sm:$0xff]  }
 0xa2d   :  { %11669 = vmatpush1.bf16.msra.mxu1 %v15988_v40  ;;  %v16063_v40 = vld [vmem:[%s21517_s7 + $0x428] ss:$16 sps:$4 sm:$0xff]  }
 0xa2e   :  { %11670 = vmatprep.subr.bf16.mxu1 %v15993_v2  ;;  %v16066_v2 = vld [vmem:[%s21517_s7 + $0x448] ss:$16 sps:$4 sm:$0xff]  }
 0xa31   :  { %11671 = vmatpush1.bf16.msra.mxu1 %v15991_v59  ;;  %v16071_v59 = vld [vmem:[%s21517_s7 + $0x46c] ss:$16 sps:$4 sm:$0xff]  }
 0xa32   :  { %11672 = vmatprep.subr.bf16.mxu1 %v15996_v43  ;;  %v16069_v43 = vld [vmem:[%s21517_s7 + $0x468] ss:$16 sps:$4 sm:$0xff]  }
 0xa35   :  { %11673 = vmatpush1.bf16.msra.mxu1 %v15994_v7  ;;  %v16074_v7 = vld [vmem:[%s21517_s7 + $0x48c] ss:$16 sps:$4 sm:$0xff]  }
 0xa36   :  { %11674 = vmatprep.subr.bf16.mxu1 %v15999_v24  ;;  %v16072_v24 = vld [vmem:[%s21517_s7 + $0x488] ss:$16 sps:$4 sm:$0xff]  }
 0xa39   :  { %11675 = vmatpush1.bf16.msra.mxu1 %v15997_v28  ;;  %v16077_v28 = vld [vmem:[%s21517_s7 + $0x4ac] ss:$16 sps:$4 sm:$0xff]  }
 0xa3a   :  { %11676 = vmatprep.subr.bf16.mxu1 %v16002_v51  ;;  %v16075_v51 = vld [vmem:[%s21517_s7 + $0x4a8] ss:$16 sps:$4 sm:$0xff]  }
 0xa3d   :  { %11677 = vmatpush1.bf16.msra.mxu1 %v16000_v58  ;;  %v16080_v58 = vld [vmem:[%s21517_s7 + $0x4cc] ss:$16 sps:$4 sm:$0xff]  }
 0xa3e   :  { %11678 = vmatprep.subr.bf16.mxu1 %v16005_v44 }
 0xa41   :  { %11679 = vmatpush1.bf16.msra.mxu1 %v16003_v3 }
 0xa42   :  { %11680 = vmatprep.subr.bf16.mxu1 %v16008_v31 }
 0xa45   :  { %11681 = vmatpush1.bf16.msra.mxu1 %v16006_v33  ;;  %v16078_v33 = vld [vmem:[%s21517_s7 + $0x4c8] ss:$16 sps:$4 sm:$0xff]  }
 0xa46   :  { %11682 = vmatprep.subr.bf16.mxu1 %v16011_v25  ;;  %v16083_v25 = vld [vmem:[%s21517_s7 + $0x4ec] ss:$16 sps:$4 sm:$0xff]  }
 0xa49   :  { %11683 = vmatpush1.bf16.msra.mxu1 %v16009_v22 }
 0xa4a   :  { %12142 = vmatprep.subr.bf16.mxu1 %v16014_v26  ;;  %v16156_v26 = vld [vmem:[%s21519_s9 + $0x40] sm:$0xff]  }
 0xa4b   :  { %14707 = vmatprep.subr.bf16.mxu0 %v16156_v26  ;;  %v16135_v26 = vld [vmem:[%s21517_s7 + $0x728] ss:$16 sps:$4 sm:$0xff]  }
 0xa4c   :  { %11685 = vmatmul.mubr.bf16.vlgmr.msra.gmra.mrb[204].mxu1 %v20952_v6  ;;  %v16044_v6 = vld [vmem:[%s21517_s7 + $0x544] ss:$16 sps:$4 sm:$0xff]  }
 0xa4d   :  { %12143 = vmatpush1.bf16.msra.mxu1 %v16012_v5  ;;  %12174 = vmatprep.mubr.bf16.mxu1 %v21057_v63  ;;  %v16157_v5 = vld [vmem:[%s21519_s9] sm:$0xff]  }
 0xa4e   :  { %12144 = vmatprep.subr.bf16.mxu1 %v16017_v60  ;;  %v16158_v60 = vld [vmem:[%s21519_s9 + $0x48] sm:$0xff]   ;;  %14708 = vmatpush3.bf16.msra.mxu0 %v16157_v5 }
 0xa4f   :  { %14709 = vmatprep.subr.bf16.mxu0 %v16158_v60  ;;  %v16140_v5 = vld [vmem:[%s21517_s7 + $0x74c] ss:$16 sps:$4 sm:$0xff]   ;;  %v16138_v60 = vld [vmem:[%s21517_s7 + $0x748] ss:$16 sps:$4 sm:$0xff]  }
 0xa51   :  { %12145 = vmatpush1.bf16.msra.mxu1 %v16015_v0  ;;  %v16159_v0 = vld [vmem:[%s21519_s9 + $0x8] sm:$0xff]  }
 0xa52   :  { %12146 = vmatprep.subr.bf16.mxu1 %v16020_v36  ;;  %v16086_v36 = vld [vmem:[%s21517_s7 + $0x50c] ss:$16 sps:$4 sm:$0xff]   ;;  %14710 = vmatpush3.bf16.msra.mxu0 %v16159_v0  ;;  %v16141_v0 = vld [vmem:[%s21517_s7 + $0x768] ss:$16 sps:$4 sm:$0xff]  }
 0xa55   :  { %12147 = vmatpush1.bf16.msra.mxu1 %v16018_v50  ;;  %v16160_v50 = vld [vmem:[%s21519_s9 + $0x50] sm:$0xff]  }
 0xa56   :  { %12148 = vmatprep.subr.bf16.mxu1 %v16023_v9  ;;  %v16084_v9 = vld [vmem:[%s21517_s7 + $0x508] ss:$16 sps:$4 sm:$0xff]   ;;  %14711 = vmatprep.subr.bf16.mxu0 %v16160_v50 }
 0xa57   :  { %v16144_v50 = vld [vmem:[%s21517_s7 + $0x788] ss:$16 sps:$4 sm:$0xff]  }
 0xa59   :  { %12149 = vmatpush1.bf16.msra.mxu1 %v16021_v41  ;;  %v16161_v41 = vld [vmem:[%s21519_s9 + $0x10] sm:$0xff]  }
 0xa5a   :  { %12150 = vmatprep.subr.bf16.mxu1 %v16026_v61  ;;  %v16089_v61 = vld [vmem:[%s21517_s7 + $0x52c] ss:$16 sps:$4 sm:$0xff]   ;;  %14712 = vmatpush3.bf16.msra.mxu0 %v16161_v41  ;;  %v16147_v41 = vld [vmem:[%s21517_s7 + $0x7a8] ss:$16 sps:$4 sm:$0xff]  }
 0xa5c   :  { %v21085_v45 = vpop.f32.mrb[128].mxu0 }
 0xa5d   :  { %12151 = vmatpush1.bf16.msra.mxu1 %v16024_v54  ;;  %v21087_v17 = vpop.f32.mrb[129].mxu0  ;;  %v16162_v54 = vld [vmem:[%s21519_s9 + $0x58] sm:$0xff]  }
 0xa5e   :  { %12152 = vmatprep.subr.bf16.mxu1 %v16029_v46  ;;  %v12715_v16 = vpop.f32.mrb[130].mxu0  ;;  %v16087_v46 = vld [vmem:[%s21517_s7 + $0x528] ss:$16 sps:$4 sm:$0xff]   ;;  %14713 = vmatprep.subr.bf16.mxu0 %v16162_v54 }
 0xa5f   :  { %v21095_v34 = vpop.f32.mrb[192].mxu1  ;;  %v12716_v11 = vpop.f32.mrb[131].mxu0  ;;  %v16092_v16 = vld [vmem:[%s21517_s7 + $0x54c] ss:$16 sps:$4 sm:$0xff]   ;;  %v16150_v54 = vld [vmem:[%s21517_s7 + $0x7c8] ss:$16 sps:$4 sm:$0xff]  }
 0xa60   :  { %v21097_v18 = vpop.f32.mrb[193].mxu1  ;;  %v16090_v11 = vld [vmem:[%s21517_s7 + $0x548] ss:$16 sps:$4 sm:$0xff]  }
 0xa61   :  { %12153 = vmatpush1.bf16.msra.mxu1 %v16027_v14  ;;  %v11231_v20 = vpop.f32.mrb[194].mxu1  ;;  %v16163_v14 = vld [vmem:[%s21519_s9 + $0x18] sm:$0xff]  }
 0xa62   :  { %v11232_v4 = vpop.f32.mrb[195].mxu1  ;;  %12154 = vmatprep.subr.bf16.mxu1 %v16032_v62  ;;  %v16164_v62 = vld [vmem:[%s21519_s9 + $0x60] sm:$0xff]   ;;  %14714 = vmatpush3.bf16.msra.mxu0 %v16163_v14  ;;  %v16153_v14 = vld [vmem:[%s21517_s7 + $0x7e8] ss:$16 sps:$4 sm:$0xff]  }
 0xa63   :  { %v16165_v20 = vld [vmem:[%s21519_s9 + $0x20] sm:$0xff]   ;;  %14715 = vmatprep.subr.bf16.mxu0 %v16164_v62  ;;  %v16093_v4 = vld [vmem:[%s21517_s7 + $0x568] ss:$16 sps:$4 sm:$0xff]  }
 0xa65   :  { %12155 = vmatpush1.bf16.msra.mxu1 %v16030_v53  ;;  %v16095_v53 = vld [vmem:[%s21517_s7 + $0x56c] ss:$16 sps:$4 sm:$0xff]  }
 0xa66   :  { %12156 = vmatprep.subr.bf16.mxu1 %v16035_v1  ;;  %14716 = vmatpush3.bf16.msra.mxu0 %v16165_v20  ;;  %v16098_v1 = vld [vmem:[%s21517_s7 + $0x58c] ss:$16 sps:$4 sm:$0xff]  }
 0xa69   :  { %12157 = vmatpush1.bf16.msra.mxu1 %v16033_v57  ;;  %v16096_v57 = vld [vmem:[%s21517_s7 + $0x588] ss:$16 sps:$4 sm:$0xff]  }
 0xa6a   :  { %12158 = vmatprep.subr.bf16.mxu1 %v16038_v15  ;;  %v16101_v15 = vld [vmem:[%s21517_s7 + $0x5ac] ss:$16 sps:$4 sm:$0xff]  }
 0xa6d   :  { %12159 = vmatpush1.bf16.msra.mxu1 %v16036_v35  ;;  %v16099_v35 = vld [vmem:[%s21517_s7 + $0x5a8] ss:$16 sps:$4 sm:$0xff]  }
 0xa6e   :  { %12160 = vmatprep.subr.bf16.mxu1 %v16041_v27  ;;  %v16104_v27 = vld [vmem:[%s21517_s7 + $0x5cc] ss:$16 sps:$4 sm:$0xff]  }
 0xa71   :  { %12161 = vmatpush1.bf16.msra.mxu1 %v16039_v42  ;;  %v16102_v42 = vld [vmem:[%s21517_s7 + $0x5c8] ss:$16 sps:$4 sm:$0xff]  }
 0xa72   :  { %12162 = vmatprep.subr.bf16.mxu1 %v16044_v6  ;;  %v16107_v6 = vld [vmem:[%s21517_s7 + $0x5ec] ss:$16 sps:$4 sm:$0xff]  }
 0xa75   :  { %12163 = vmatpush1.bf16.msra.mxu1 %v16042_v47  ;;  %v16105_v47 = vld [vmem:[%s21517_s7 + $0x5e8] ss:$16 sps:$4 sm:$0xff]  }
 0xa76   :  { %12164 = vmatprep.subr.bf16.mxu1 %v16047_v49  ;;  %v16110_v49 = vld [vmem:[%s21517_s7 + $0x60c] ss:$16 sps:$4 sm:$0xff]  }
 0xa79   :  { %12165 = vmatpush1.bf16.msra.mxu1 %v16045_v39  ;;  %v16108_v39 = vld [vmem:[%s21517_s7 + $0x608] ss:$16 sps:$4 sm:$0xff]  }
 0xa7a   :  { %12166 = vmatprep.subr.bf16.mxu1 %v16050_v56  ;;  %v16113_v56 = vld [vmem:[%s21517_s7 + $0x62c] ss:$16 sps:$4 sm:$0xff]  }
 0xa7d   :  { %12167 = vmatpush1.bf16.msra.mxu1 %v16048_v23  ;;  %v16111_v23 = vld [vmem:[%s21517_s7 + $0x628] ss:$16 sps:$4 sm:$0xff]  }
 0xa7e   :  { %12168 = vmatprep.subr.bf16.mxu1 %v16053_v38  ;;  %v16116_v38 = vld [vmem:[%s21517_s7 + $0x64c] ss:$16 sps:$4 sm:$0xff]  }
 0xa81   :  { %12169 = vmatpush1.bf16.msra.mxu1 %v16051_v32  ;;  %v16114_v32 = vld [vmem:[%s21517_s7 + $0x648] ss:$16 sps:$4 sm:$0xff]  }
 0xa82   :  { %12170 = vmatprep.subr.bf16.mxu1 %v16056_v48  ;;  %v16119_v48 = vld [vmem:[%s21517_s7 + $0x66c] ss:$16 sps:$4 sm:$0xff]  }
 0xa85   :  { %12171 = vmatpush1.bf16.msra.mxu1 %v16054_v19  ;;  %v16122_v19 = vld [vmem:[%s21517_s7 + $0x68c] ss:$16 sps:$4 sm:$0xff]  }
 0xa86   :  { %12172 = vmatprep.subr.bf16.mxu1 %v16059_v55  ;;  %v16120_v55 = vld [vmem:[%s21517_s7 + $0x688] ss:$16 sps:$4 sm:$0xff]  }
 0xa89   :  { %12173 = vmatpush1.bf16.msra.mxu1 %v16057_v21  ;;  %v16125_v21 = vld [vmem:[%s21517_s7 + $0x6ac] ss:$16 sps:$4 sm:$0xff]  }
 0xa8a   :  { %12183 = vmatprep.subr.bf16.mxu1 %v16062_v8  ;;  %v16123_v8 = vld [vmem:[%s21517_s7 + $0x6a8] ss:$16 sps:$4 sm:$0xff]  }
 0xa8c   :  { %12175 = vmatmul.mubr.bf16.vlgmr.msra.gmra.mrb[208].mxu1 %v21164_v13 }
 0xa8d   :  { %12184 = vmatpush1.bf16.msra.mxu1 %v16060_v30  ;;  %12215 = vmatprep.mubr.bf16.mxu1 %v21057_v63  ;;  %v16081_v63 = vld [vmem:[%s21517_s7 + $0x4e8] ss:$16 sps:$4 sm:$0xff]   ;;  %v16128_v30 = vld [vmem:[%s21517_s7 + $0x6cc] ss:$16 sps:$4 sm:$0xff]  }
 0xa8e   :  { %12185 = vmatprep.subr.bf16.mxu1 %v16065_v12 }
 0xa91   :  { %12186 = vmatpush1.bf16.msra.mxu1 %v16063_v40 }
 0xa92   :  { %12187 = vmatprep.subr.bf16.mxu1 %v16068_v52  ;;  %v16166_v52 = vld [vmem:[%s21519_s9 + $0x68] sm:$0xff]  }
 0xa93   :  { %14717 = vmatprep.subr.bf16.mxu0 %v16166_v52 }
 0xa95   :  { %12188 = vmatpush1.bf16.msra.mxu1 %v16066_v2 }
 0xa96   :  { %12189 = vmatprep.subr.bf16.mxu1 %v16071_v59 }
 0xa99   :  { %12190 = vmatpush1.bf16.msra.mxu1 %v16069_v43  ;;  %v16126_v43 = vld [vmem:[%s21517_s7 + $0x6c8] ss:$16 sps:$4 sm:$0xff]  }
 0xa9a   :  { %12191 = vmatprep.subr.bf16.mxu1 %v16074_v7  ;;  %v16167_v7 = vld [vmem:[%s21519_s9 + $0x28] sm:$0xff]  }
 0xa9b   :  { %14718 = vmatpush3.bf16.msra.mxu0 %v16167_v7  ;;  %v16187_v7 = vld [vmem:[%s21519_s9 + $0xb8] sm:$0xff]  }
 0xa9d   :  { %12192 = vmatpush1.bf16.msra.mxu1 %v16072_v24  ;;  %v16131_v24 = vld [vmem:[%s21517_s7 + $0x6ec] ss:$16 sps:$4 sm:$0xff]  }
 0xa9e   :  { %12193 = vmatprep.subr.bf16.mxu1 %v16077_v28  ;;  %v16129_v28 = vld [vmem:[%s21517_s7 + $0x6e8] ss:$16 sps:$4 sm:$0xff]  }
 0xa9f   :  { %v21201_v44 = vpop.f32.mrb[196].mxu1 }
 0xaa0   :  { %v21203_v3 = vpop.f32.mrb[197].mxu1 }
 0xaa1   :  { %v11272_v31 = vpop.f32.mrb[198].mxu1  ;;  %12194 = vmatpush1.bf16.msra.mxu1 %v16075_v51  ;;  %v16169_v51 = vld [vmem:[%s21519_s9 + $0x30] sm:$0xff]  }
 0xaa2   :  { %v11273_v22 = vpop.f32.mrb[199].mxu1  ;;  %12195 = vmatprep.subr.bf16.mxu1 %v16080_v58  ;;  %v16134_v58 = vld [vmem:[%s21517_s7 + $0x70c] ss:$16 sps:$4 sm:$0xff]  }
 0xaa3   :  { %v16170_v31 = vld [vmem:[%s21519_s9 + $0x78] sm:$0xff]  }
 0xaa4   :  { %v16137_v22 = vld [vmem:[%s21517_s7 + $0x72c] ss:$16 sps:$4 sm:$0xff]  }
 0xaa5   :  { %12196 = vmatpush1.bf16.msra.mxu1 %v16078_v33  ;;  %v16171_v33 = vld [vmem:[%s21519_s9 + $0x38] sm:$0xff]  }
 0xaa6   :  { %12197 = vmatprep.subr.bf16.mxu1 %v16083_v25  ;;  %v16132_v25 = vld [vmem:[%s21517_s7 + $0x708] ss:$16 sps:$4 sm:$0xff]  }
 0xaa9   :  { %12198 = vmatpush1.bf16.msra.mxu1 %v16081_v63  ;;  %v16143_v63 = vld [vmem:[%s21517_s7 + $0x76c] ss:$16 sps:$4 sm:$0xff]  }
 0xaaa   :  { %12199 = vmatprep.subr.bf16.mxu1 %v16086_v36  ;;  %v16146_v36 = vld [vmem:[%s21517_s7 + $0x78c] ss:$16 sps:$4 sm:$0xff]  }
 0xaad   :  { %12200 = vmatpush1.bf16.msra.mxu1 %v16084_v9  ;;  %v16149_v9 = vld [vmem:[%s21517_s7 + $0x7ac] ss:$16 sps:$4 sm:$0xff]  }
 0xaae   :  { %12201 = vmatprep.subr.bf16.mxu1 %v16089_v61  ;;  %v16152_v61 = vld [vmem:[%s21517_s7 + $0x7cc] ss:$16 sps:$4 sm:$0xff]  }
 0xab1   :  { %12202 = vmatpush1.bf16.msra.mxu1 %v16087_v46  ;;  %v16155_v46 = vld [vmem:[%s21517_s7 + $0x7ec] ss:$16 sps:$4 sm:$0xff]  }
 0xab2   :  { %12203 = vmatprep.subr.bf16.mxu1 %v16092_v16 }
 0xab5   :  { %12204 = vmatpush1.bf16.msra.mxu1 %v16090_v11 }
 0xab6   :  { %12205 = vmatprep.subr.bf16.mxu1 %v16095_v53 }
 0xab9   :  { %12206 = vmatpush1.bf16.msra.mxu1 %v16093_v4 }
 0xaba   :  { %12207 = vmatprep.subr.bf16.mxu1 %v16098_v1  ;;  %v16172_v1 = vld [vmem:[%s21519_s9 + $0xc0] sm:$0xff]  }
 0xabd   :  { %12208 = vmatpush1.bf16.msra.mxu1 %v16096_v57  ;;  %v16173_v57 = vld [vmem:[%s21519_s9 + $0x80] sm:$0xff]  }
 0xabe   :  { %12209 = vmatprep.subr.bf16.mxu1 %v16101_v15  ;;  %v16177_v15 = vld [vmem:[%s21519_s9 + $0x90] sm:$0xff]  }
 0xac1   :  { %12210 = vmatpush1.bf16.msra.mxu1 %v16099_v35  ;;  %v16178_v35 = vld [vmem:[%s21519_s9 + $0xd8] sm:$0xff]  }
 0xac2   :  { %12211 = vmatprep.subr.bf16.mxu1 %v16104_v27  ;;  %v16179_v27 = vld [vmem:[%s21519_s9 + $0x98] sm:$0xff]  }
 0xac5   :  { %12212 = vmatpush1.bf16.msra.mxu1 %v16102_v42  ;;  %v16180_v42 = vld [vmem:[%s21519_s9 + $0xe0] sm:$0xff]  }
 0xac6   :  { %12213 = vmatprep.subr.bf16.mxu1 %v16107_v6  ;;  %v16181_v6 = vld [vmem:[%s21519_s9 + $0xa0] sm:$0xff]  }
 0xac9   :  { %12214 = vmatpush1.bf16.msra.mxu1 %v16105_v47  ;;  %v16182_v47 = vld [vmem:[%s21519_s9 + $0xe8] sm:$0xff]  }
 0xaca   :  { %12718 = vmatprep.subr.bf16.mxu1 %v16110_v49  ;;  %v12767_v49 = vsub.s32 0, %v20414_v10 }
 0xacc   :  { %12216 = vmatmul.mubr.bf16.vlgmr.msra.gmra.mrb[212].mxu1 %v21164_v13 }
 0xacd   :  { %12719 = vmatpush1.bf16.msra.mxu1 %v16108_v39  ;;  %12750 = vmatprep.mubr.bf16.mxu1 %v20728_v37  ;;  %v16117_v37 = vld [vmem:[%s21517_s7 + $0x668] ss:$16 sps:$4 sm:$0xff]   ;;  %v12763_v39 = vld [vmem:[%s21518_s8] sm:$0xf] }
 0xace   :  { %12720 = vmatprep.subr.bf16.mxu1 %v16113_v56  ;;  %v12771_v56 = vsub.s32 1, %v20414_v10 }
 0xad1   :  { %12721 = vmatpush1.bf16.msra.mxu1 %v16111_v23 }
 0xad2   :  { %12722 = vmatprep.subr.bf16.mxu1 %v16116_v38  ;;  %v16183_v38 = vld [vmem:[%s21519_s9 + $0xa8] sm:$0xff]  }
 0xad5   :  { %12723 = vmatpush1.bf16.msra.mxu1 %v16114_v32 }
 0xad6   :  { %12724 = vmatprep.subr.bf16.mxu1 %v16119_v48  ;;  %v12768_v48 = vrot.slane %v12763_v39, %v12767_v49 }
 0xad9   :  { %12725 = vmatpush1.bf16.msra.mxu1 %v16117_v37 }
 0xada   :  { %12726 = vmatprep.subr.bf16.mxu1 %v16122_v19 }
 0xadd   :  { %12727 = vmatpush1.bf16.msra.mxu1 %v16120_v55  ;;  %v12772_v55 = vrot.slane %v12763_v39, %v12771_v56  ;;  %v14390_v56 = vld [vmem:[%s21522_s12] ss:$0 sm:$0xff] }
 0xade   :  { %12728 = vmatprep.subr.bf16.mxu1 %v16125_v21 }
 0xadf   :  { %v11645_v13 = vpop.f32.mrb[200].mxu1 }
 0xae0   :  { %v21334_v12 = vadd.f32 %v11645_v13, %v21095_v34  ;;  %v11647_v40 = vpop.f32.mrb[201].mxu1  ;;  %v16184_v13 = vld [vmem:[%s21519_s9 + $0xf0] sm:$0xff]  }
 0xae1   :  { %v21340_v2 = vadd.f32 %v11647_v40, %v21097_v18  ;;  %v11649_v59 = vpop.f32.mrb[202].mxu1  ;;  %12729 = vmatpush1.bf16.msra.mxu1 %v16123_v8  ;;  %v16168_v18 = vld [vmem:[%s21519_s9 + $0x70] sm:$0xff]  }
 0xae2   :  { %v11650_v34 = vpop.f32.mrb[203].mxu1  ;;  %12730 = vmatprep.subr.bf16.mxu1 %v16128_v30  ;;  %14719 = vmatprep.subr.bf16.mxu0 %v16168_v18 }
 0xae3   :  { %14720 = vmatpush3.bf16.msra.mxu0 %v16169_v51 }
 0xae4   :  { %14721 = vmatprep.subr.bf16.mxu0 %v16170_v31 }
 0xae5   :  { %12731 = vmatpush1.bf16.msra.mxu1 %v16126_v43 }
 0xae6   :  { %12732 = vmatprep.subr.bf16.mxu1 %v16131_v24 }
 0xae7   :  { %14722 = vmatpush3.bf16.msra.mxu0 %v16171_v33  ;;  %v16188_v33 = vld [vmem:[%s21521_s11] sm:$0xff]  }
 0xae9   :  { %12733 = vmatpush1.bf16.msra.mxu1 %v16129_v28 }
 0xaea   :  { %12734 = vmatprep.subr.bf16.mxu1 %v16134_v58 }
 0xaed   :  { %12735 = vmatpush1.bf16.msra.mxu1 %v16132_v25  ;;  %v16235_v25 = vmov 0.0  }
 0xaee   :  { %12736 = vmatprep.subr.bf16.mxu1 %v16137_v22  ;;  %15308 = vmatprep.subr.bf16.mxu0 %v16235_v25  ;;  %v16189_v22 = vld [vmem:[%s21521_s11 + $0x8] sm:$0xff]  }
 0xaf1   :  { %12737 = vmatpush1.bf16.msra.mxu1 %v16135_v26  ;;  %v12775_v26 = vsub.s32 2, %v20414_v10 }
 0xaf2   :  { %12738 = vmatprep.subr.bf16.mxu1 %v16140_v5  ;;  %v12779_v5 = vsub.s32 3, %v20414_v10  ;;  %v16190_v10 = vld [vmem:[%s21521_s11 + $0x10] sm:$0xff]  }
 0xaf5   :  { %12739 = vmatpush1.bf16.msra.mxu1 %v16138_v60  ;;  %v12776_v60 = vrot.slane %v12763_v39, %v12775_v26 }
 0xaf6   :  { %12740 = vmatprep.subr.bf16.mxu1 %v16143_v63 }
 0xaf9   :  { %12741 = vmatpush1.bf16.msra.mxu1 %v16141_v0  ;;  %v12780_v0 = vrot.slane %v12763_v39, %v12779_v5 }
 0xafa   :  { %12742 = vmatprep.subr.bf16.mxu1 %v16146_v36 }
 0xafd   :  { %12743 = vmatpush1.bf16.msra.mxu1 %v16144_v50 }
 0xafe   :  { %12744 = vmatprep.subr.bf16.mxu1 %v16149_v9 }
 0xb01   :  { %12745 = vmatpush1.bf16.msra.mxu1 %v16147_v41 }
 0xb02   :  { %12746 = vmatprep.subr.bf16.mxu1 %v16152_v61 }
 0xb05   :  { %12747 = vmatpush1.bf16.msra.mxu1 %v16150_v54 }
 0xb06   :  { %12748 = vmatprep.subr.bf16.mxu1 %v16155_v46 }
 0xb09   :  { %12749 = vmatpush1.bf16.msra.mxu1 %v16153_v14 }
 0xb0a   :  { %14729 = vmatprep.subr.bf16.mxu1 %v16172_v1 }
 0xb0c   :  { %12751 = vmatmul.mubr.bf16.vlgmr.msra.gmra.mrb[216].mxu1 %v20731_v29  ;;  %v16174_v29 = vld [vmem:[%s21519_s9 + $0xc8] sm:$0xff]  }
 0xb0d   :  { %14730 = vmatpush3.bf16.msra.mxu1 %v16173_v57 }
 0xb0e   :  { %14731 = vmatprep.subr.bf16.mxu1 %v16174_v29  ;;  %v16191_v29 = vld [vmem:[%s21521_s11 + $0x18] sm:$0xff]  }
 0xb1f   :  { %v11686_v16 = vpop.f32.mrb[204].mxu1 }
 0xb20   :  { %v11687_v62 = vadd.f32 %v11686_v16, %v21201_v44  ;;  %v11688_v11 = vpop.f32.mrb[205].mxu1  ;;  %v16175_v44 = vld [vmem:[%s21519_s9 + $0x88] sm:$0xff]  }
 0xb21   :  { %v11689_v20 = vadd.f32 %v11688_v11, %v21203_v3  ;;  %v11690_v53 = vpop.f32.mrb[206].mxu1  ;;  %v16176_v3 = vld [vmem:[%s21519_s9 + $0xd0] sm:$0xff]   ;;  %14732 = vmatpush3.bf16.msra.mxu1 %v16175_v44  ;;  %v14357_v44 = vld [vmem:[%s21520_s10] ss:$0 sm:$0xff]  ;;  %s16237_s10 = smov [#allocation8]  }
 0xb22   :  { %v11691_v4 = vpop.f32.mrb[207].mxu1  ;;  %14733 = vmatprep.subr.bf16.mxu1 %v16176_v3  ;;  %s13244_s12 = sshll.u32 %s16237_s10, 4  ;;  %s13245_s12 = int_to_ptr.vmem [resolvable:$true] %s13244_s12 }
 0xb23   :  { %s16199_s30 = scalar_lea.vmem %s13245_s12, 64  ;;  %p16204_p2 = scmp.lt.s32.totalorder %s13245_s12, %s13245_s12 }
 0xb24   :  { %p16200_p1 = scmp.ne.s32.totalorder %s13245_s12, %s16199_s30  ;;  %p16205_p3 = scmp.lt.s32.totalorder %s16199_s30, %s16199_s30 }
 0xb25   :  { %14734 = vmatpush3.bf16.msra.mxu1 %v16177_v15 }
 0xb26   :  { %14735 = vmatprep.subr.bf16.mxu1 %v16178_v35  ;;  %p16206_p4 = por %p16205_p3, %p16204_p2 }
 0xb28   :  { %p16207_p5 = pnand %p16206_p4, %p16200_p1 }
 0xb29   :  { %14736 = vmatpush3.bf16.msra.mxu1 %v16179_v27 }
 0xb2a   :  { %14737 = vmatprep.subr.bf16.mxu1 %v16180_v42 }
 0xb2d   :  { %14738 = vmatpush3.bf16.msra.mxu1 %v16181_v6 }
 0xb2e   :  { %14739 = vmatprep.subr.bf16.mxu1 %v16182_v47 }
 0xb31   :  { %14740 = vmatpush3.bf16.msra.mxu1 %v16183_v38 }
 0xb32   :  { %14741 = vmatprep.subr.bf16.mxu1 %v16184_v13 }
 0xb5f   :  { %v12176_v23 = vpop.f32.mrb[208].mxu1 }
 0xb60   :  { %v12224_v32 = vadd.f32 %v12176_v23, %v21334_v12  ;;  %v12178_v37 = vpop.f32.mrb[209].mxu1  ;;  %v16185_v12 = vld [vmem:[%s21519_s9 + $0xb0] sm:$0xff]  }
 0xb61   :  { %v12225_v19 = vadd.f32 %v12178_v37, %v21340_v2  ;;  %v12180_v21 = vpop.f32.mrb[210].mxu1  ;;  %14742 = vmatpush3.bf16.msra.mxu1 %v16185_v12 }
 0xb62   :  { %v12759_v8 = vadd.f32 %v21085_v45, %v12224_v32  ;;  %v12181_v30 = vpop.f32.mrb[211].mxu1  ;;  %v16186_v45 = vld [vmem:[%s21519_s9 + $0xf8] sm:$0xff]  }
 0xb63   :  { %v12760_v40 = vadd.f32 %v21087_v17, %v12225_v19  ;;  %14743 = vmatprep.subr.bf16.mxu1 %v16186_v45 }
 0xb64   :  { %v12785_v52 = vadd.f32 %v12768_v48, %v12759_v8 }
 0xb65   :  { %v12786_v59 = vadd.f32 %v12772_v55, %v12760_v40  ;;  %14744 = vmatpush3.bf16.msra.mxu1 %v16187_v7 }
 0xb66   :  { %v12789_v2 = vmax.f32 %v12785_v52, 0.0 }
 0xb67   :  { %v12790_v43 = vmax.f32 %v12786_v59, 0.0 }
 0xb68   :  { %v12793_v34 = vpack.c.bf16 %v12789_v2, %v12789_v2 }
 0xb69   :  { %v12794_v17 = vpack.c.bf16 %v12790_v43, %v12790_v43 }
 0xb6b   :  { %13092 = vmatprep.mubr.bf16.mxu0 %v12794_v17 }
 0xb6c   :  { %13093 = vmatmul.mubr.bf16.vlgmr.msra.gmra.mrb[132].mxu0 %v12793_v34 }
 0xb6d   :  { %15309 = vmatpush3.bf16.msra.mxu0 %v16188_v33  ;;  %15316 = vmatprep.mubr.msk.bf16.mxu0 %vm16236_vm2, %v16235_v25 }
 0xb6e   :  { %15310 = vmatprep.subr.bf16.mxu0 %v16235_v25 }
 0xb71   :  { %15311 = vmatpush3.bf16.msra.mxu0 %v16189_v22 }
 0xb72   :  { %15312 = vmatprep.subr.bf16.mxu0 %v16235_v25 }
 0xb75   :  { %15313 = vmatpush3.bf16.msra.mxu0 %v16190_v10 }
 0xb76   :  { %15314 = vmatprep.subr.bf16.mxu0 %v16235_v25 }
 0xb79   :  { %15315 = vmatpush3.bf16.msra.mxu0 %v16191_v29 }
 0xb9f   :  { %v12217_v24 = vpop.f32.mrb[212].mxu1 }
 0xba0   :  { %v12226_v18 = vadd.f32 %v12217_v24, %v11687_v62  ;;  %v12219_v28 = vpop.f32.mrb[213].mxu1 }
 0xba1   :  { %v12227_v51 = vadd.f32 %v12219_v28, %v11689_v20  ;;  %v12221_v58 = vpop.f32.mrb[214].mxu1 }
 0xba2   :  { %v12222_v31 = vpop.f32.mrb[215].mxu1 }
 0xbdf   :  { %v12752_v63 = vpop.f32.mrb[216].mxu1 }
 0xbe0   :  { %v12761_v36 = vadd.f32 %v12752_v63, %v12226_v18  ;;  %v12754_v50 = vpop.f32.mrb[217].mxu1 }
 0xbe1   :  { %v12762_v9 = vadd.f32 %v12754_v50, %v12227_v51  ;;  %v12756_v41 = vpop.f32.mrb[218].mxu1 }
 0xbe2   :  { %v12787_v61 = vadd.f32 %v12776_v60, %v12761_v36  ;;  %v12757_v54 = vpop.f32.mrb[219].mxu1 }
 0xbe3   :  { %v12788_v46 = vadd.f32 %v12780_v0, %v12762_v9 }
 0xbe4   :  { %v12791_v14 = vmax.f32 %v12787_v61, 0.0 }
 0xbe5   :  { %v12792_v16 = vmax.f32 %v12788_v46, 0.0 }
 0xbe6   :  { %v12795_v11 = vpack.c.bf16 %v12791_v14, %v12791_v14 }
 0xbe7   :  { %v12796_v62 = vpack.c.bf16 %v12792_v16, %v12792_v16 }
 0xbe9   :  { %13132 = vmatprep.mubr.bf16.mxu1 %v12796_v62 }
 0xbea   :  { %13133 = vmatmul.mubr.bf16.vlgmr.msra.gmra.mrb[220].mxu1 %v12795_v11 }
 0xc3f   :  { %v14723_v20 = vpop.f32.mrb[132].mxu0 }
 0xc40   :  { %v14724_v53 = vpop.f32.mrb[133].mxu0 }
 0xc41   :  { %v14725_v4 = vadd.f32 %v14724_v53, %v14723_v20  ;;  %v14726_v1 = vpop.f32.mrb[134].mxu0 }
 0xc42   :  { %v14727_v57 = vpop.f32.mrb[135].mxu0 }
 0xc43   :  { %v13095_v35 = vadd.f32 %v14725_v4, %v14357_v44 }
 0xcbd   :  { %v14745_v3 = vpop.f32.mrb[220].mxu1 }
 0xcbe   :  { %v14746_v15 = vpop.f32.mrb[221].mxu1 }
 0xcbf   :  { %v14747_v27 = vadd.f32 %v14746_v15, %v14745_v3  ;;  %v14748_v42 = vpop.f32.mrb[222].mxu1 }
 0xcc0   :  { %v14749_v6 = vpop.f32.mrb[223].mxu1 }
 0xcc1   :  { %v13135_v47 = vadd.f32 %v14747_v27, %v13095_v35 }
 0xcc3   :  { %v13140_v49 = vmax.f32 %v13135_v47, 0.0 }
 0xcc5   :  { %v13141_v39 = vpack.c.bf16 %v13140_v49, %v13140_v49 }
 0xcc7   :  { %15317 = vmatmul.mubr.msk.bf16.vlgmr.msra.gmra.mrb[136].mxu0 %vm7545_vm7, %v13141_v39 }
 0xd9a   :  { %v13218_v23 = vpop.f32.mrb[136].mxu0 }
 0xd9b   :  { %v13219_v38 = vadd.f32 %v14390_v56, %v13218_v23  ;;  %v15318_v32 = vpop.f32.mrb[137].mxu0 }
 0xd9c   :  { %v13221_v48 = vpop.f32.mrb[138].mxu0 }
 0xd9d   :  { %v15319_v37 = vpop.f32.mrb[139].mxu0  ;;  %v13225_v19 = vsel %vm13224_vm3, %v13219_v38, -inf }
 0xd9e   :  { %13226 = vmax.xlane.f32.xlu0 %v13225_v19 }
 0xe2b   :  { %v13227_v55 = vpop.xlane.xlu0 %13226 }
 0xe2c   :  { %v13228_v21 = vsub.f32 %v13219_v38, %v13227_v55 }
 0xe2e   :  { %v13229_v8 = vmul.f32 1.442695, %v13228_v21 }
 0xe30   :  { %16192 = vpow2.f32 %v13229_v8 }
 0xe3a   :  { %v16193_v30 = vpop.eup %16192 }
 0xe3b   :  { %v13231_v13 = vsel %vm13224_vm3, %v16193_v30, 0.0 }
 0xe3c   :  { %13232 = vadd.xlane.f32.xlu1 %v13231_v13 }
 0xec9   :  { %v13233_v40 = vpop.xlane.xlu1 %13232 }
 0xeca   :  { %16194 = vlog2.f32 %v13233_v40 }
 0xed4   :  { %v16195_v12 = vpop.eup %16194 }
 0xed5   :  { %v13235_v52 = vmul.f32 0.6931472, %v16195_v12 }
 0xed7   :  { %v13236_v59 = vsub.f32 %v13228_v21, %v13235_v52 }
 0xed9   :  { %13237 = vst.msk [vmem:[#allocation8] sm:$0xf] %vm13224_vm3, %v13236_v59 }
 0xeda   :  { %16210 = shalt.err (!%p16207_p5)
}
 0xedb   :  { %s16211_s14 = scalar_lea.hbm %s21523_s13, 64 }
 0xedc   :  { %p16212_p6 = scmp.ne.s32.totalorder %s21523_s13, %s16211_s14  ;;  %p16215_p7 = scmp.lt.u32.totalorder %s16211_s14, %s21523_s13 }
 0xede   :  { %p16217_p8 = pnand %p16215_p7, %p16212_p6 }
 0xee0   :  { %16220 = shalt.err (!%p16217_p8)
}
 0xee1   :  { %13247 = dma.vmem_to_hbm [thread:$0]  %s13245_s12, 64, %s21523_s13, [#allocation9]  }
 0xee2   :  { %16225 = dma.done.wait [#allocation9], 64  }
 0xee3   :  { %16226 = vsyncadd [#allocation9], 4294967232 }
 0xee4   :  { %13251 = vsyncpa [#allocation9], 1 }

</bundles_post_ra>
